<compile_context>
chip_gen: v7x
topology: tpu7x:2x2x1
jax: 0.10.0
libtpu: 0.0.40
codegen_flags: <defaults>
</compile_context>

<pallas_src>
import jax
import jax.numpy as jnp
from jax import lax
from jax.experimental import pallas as pl
from jax.experimental.pallas import tpu as pltpu


def _round_up(n, m):
    return (n + m - 1) // m * m


_VMEM_LIMIT = 48 * 1024 * 1024
_POOL_OFFSETS = ((0, 0), (0, 1), (1, 0), (1, 1))
_TAPS = tuple((dy, dx) for dy in range(3) for dx in range(3))


# ----------------------------- Pallas kernels -----------------------------

def conv1_pool_kernel(p_ref, w_ref, b_ref, o_ref):
    """conv1 (im2col matmul) + bias + ReLU + 2x2 maxpool.

    p_ref : (4, TR, 9)  im2col patches; leading axis = pool offset
    w_ref : (9, 32), b_ref : (1, 32), o_ref : (TR, 32)
    """
    nt = p_ref.shape[1]
    c = w_ref.shape[1]
    # one matmul for all 4 pool offsets (offsets merged into M; TR is a multiple of 8,
    # so this reshape is a pure vreg renumbering)
    lhs = p_ref[...].reshape(4 * nt, p_ref.shape[2])
    z = jnp.dot(lhs, w_ref[...], preferred_element_type=jnp.float32)
    z = jnp.max(z.reshape(4, nt, c), axis=0)
    # bias hoisted out of the offset "loop"; relu(max)+b == relu(max+b) since b is offset-invariant
    o_ref[...] = jnp.maximum(z + b_ref[...], 0.0)


def conv2_pool_kernel(ph_ref, w_ref, b_ref, o_ref):
    """Fused conv2 + bias + ReLU + 2x2 maxpool with in-kernel patch construction.

    ph_ref : (NB, 32, 9, 32)  phase-split, zero-padded conv1 activations.
             dim1 = phase(p, q)*8 + i, where phase(p,q)[n,i,j,ci] = h1pad[n, 2i+p, 2j+q, ci]
             and h1pad is the (16, 18)-padded 14x14x32 conv1 output.
    w_ref  : (9, 32, 64)      conv2 weights, tap-major (dy, dx) x ci x co
    b_ref  : (1, 64)
    o_ref  : (NB*56, 64)      rows = (n, u, v) with v in 0..7; v == 7 is a finite pad column
                              that is zeroed by the fc1 weight layout downstream.
    """
    nb = ph_ref.shape[0]
    co = w_ref.shape[2]
    m = 4 * nb * 56

    acc = jnp.zeros((m, co), jnp.float32)
    for t, (dy, dx) in enumerate(_TAPS):
        # gather the 4 pool-offset slabs for this tap; every slice is contiguous and the
        # sublane extent (8) is tile-aligned, so the merge-reshape below is free.
        slabs = []
        for (a, b) in _POOL_OFFSETS:
            r = a + dy
            c = b + dx
            k = (r % 2) * 2 + (c % 2)      # which phase
            u0 = r // 2
            v0 = c // 2
            slabs.append(ph_ref[:, k * 8 + u0:k * 8 + u0 + 7, v0:v0 + 8, :])
        lhs = jnp.concatenate(slabs, axis=0).reshape(m, 32)      # (4*NB*56, 32)
        acc = acc + jnp.dot(lhs, w_ref[t], preferred_element_type=jnp.float32)

    z = jnp.max(acc.reshape(4, nb * 56, co), axis=0)             # max over pool offsets
    o_ref[...] = jnp.maximum(z + b_ref[...], 0.0)                # bias + ReLU once


def fc_kernel(x_ref, w1_ref, b1_ref, w2_ref, b2_ref, o_ref):
    """fc1 + ReLU + fc2 (fc2 padded to 128 output lanes for dense stores)."""
    h = jnp.dot(x_ref[...], w1_ref[...], preferred_element_type=jnp.float32) + b1_ref[...]
    h = jnp.maximum(h, 0.0)
    o_ref[...] = jnp.dot(h, w2_ref[...], preferred_element_type=jnp.float32) + b2_ref[...]


# ----------------------------- wrappers -----------------------------------

def _conv1_pool(patches, w, b, *, max_rows=2048):
    """patches: (4, R, 9) -> (R, 32)."""
    _, R, K = patches.shape
    C = w.shape[1]
    R8 = _round_up(R, 8)
    TR = min(max_rows, R8)
    R_pad = _round_up(R8, TR)
    if R_pad != R:
        patches = jnp.pad(patches, ((0, 0), (0, R_pad - R), (0, 0)))

    out = pl.pallas_call(
        conv1_pool_kernel,
        out_shape=jax.ShapeDtypeStruct((R_pad, C), jnp.float32),
        grid=(R_pad // TR,),
        in_specs=[
            pl.BlockSpec((4, TR, K), lambda i: (0, i, 0)),   # streamed patch rows
            pl.BlockSpec((K, C), lambda i: (0, 0)),          # weights resident
            pl.BlockSpec((1, C), lambda i: (0, 0)),          # bias resident
        ],
        out_specs=pl.BlockSpec((TR, C), lambda i: (i, 0)),
        compiler_params=pltpu.CompilerParams(
            dimension_semantics=("parallel",),
            vmem_limit_bytes=_VMEM_LIMIT),
    )(patches, w, b)
    return out[:R]


def _conv2_pool(ph, w2, b2, *, max_batch=32):
    """ph: (B, 32, 9, 32) phase-split conv1 activations -> h2 rows (B*56, 64)."""
    B = ph.shape[0]
    NB = min(max_batch, B)
    B_pad = _round_up(B, NB)
    if B_pad != B:
        ph = jnp.pad(ph, ((0, B_pad - B), (0, 0), (0, 0), (0, 0)))

    out = pl.pallas_call(
        conv2_pool_kernel,
        out_shape=jax.ShapeDtypeStruct((B_pad * 56, 64), jnp.float32),
        grid=(B_pad // NB,),
        in_specs=[
            pl.BlockSpec((NB, 32, 9, 32), lambda i: (i, 0, 0, 0)),   # streamed batch tile
            pl.BlockSpec((9, 32, 64), lambda i: (0, 0, 0)),          # conv2 weights resident
            pl.BlockSpec((1, 64), lambda i: (0, 0)),
        ],
        out_specs=pl.BlockSpec((NB * 56, 64), lambda i: (i, 0)),
        compiler_params=pltpu.CompilerParams(
            dimension_semantics=("parallel",),
            vmem_limit_bytes=_VMEM_LIMIT),
    )(ph, w2, b2)
    return out[:B * 56]


def _fc_forward(x, wf1, bf1, wf2p, bf2p, *, max_tile=1024):
    """x: (B, 3584) -> (B, 128) lane-padded logits."""
    B, D = x.shape
    B8 = _round_up(B, 8)
    TB = min(max_tile, B8)
    B_pad = _round_up(B8, TB)
    if B_pad != B:
        x = jnp.pad(x, ((0, B_pad - B), (0, 0)))

    out = pl.pallas_call(
        fc_kernel,
        out_shape=jax.ShapeDtypeStruct((B_pad, 128), jnp.float32),
        grid=(B_pad // TB,),
        in_specs=[
            pl.BlockSpec((TB, D), lambda i: (i, 0)),         # streamed batch rows
            pl.BlockSpec((D, 128), lambda i: (0, 0)),        # fc1 W resident
            pl.BlockSpec((1, 128), lambda i: (0, 0)),
            pl.BlockSpec((128, 128), lambda i: (0, 0)),      # fc2 W (lane padded) resident
            pl.BlockSpec((1, 128), lambda i: (0, 0)),
        ],
        out_specs=pl.BlockSpec((TB, 128), lambda i: (i, 0)),
        compiler_params=pltpu.CompilerParams(
            dimension_semantics=("parallel",),
            vmem_limit_bytes=_VMEM_LIMIT),
    )(x, wf1, bf1, wf2p, bf2p)
    return out[:B]


def _im2col_pooled(x_nhwc, out_hw):
    """XLA layout plumbing for conv1 only: 3x3 patches at the stride-2-subsampled positions.

    x_nhwc : (B, 2*out_hw + 2, 2*out_hw + 2, Cin), zero-padded by 1 pixel.
    returns: (4, B*out_hw*out_hw, 9*Cin); leading axis = 2x2 maxpool offset (a, b).
    """
    B = x_nhwc.shape[0]
    cin = x_nhwc.shape[-1]
    P = out_hw
    slots = []
    for a in range(2):
        for b in range(2):
            taps = []
            for dy in range(3):
                for dx in range(3):
                    r0 = a + dy
                    c0 = b + dx
                    taps.append(x_nhwc[:, r0:r0 + 2 * P - 1:2, c0:c0 + 2 * P - 1:2, :])
            slots.append(jnp.concatenate(taps, axis=-1).reshape(B * P * P, 9 * cin))
    return jnp.stack(slots, axis=0)


def mnist_cnn_forward(x_nchw, params):
    """x_nchw: (B, 1, 28, 28) float32 -> logits (B, 10) float32."""
    w1, b1, w2, b2, wf1, bf1, wf2p, bf2p = params
    B = x_nchw.shape[0]

    # stage 1: conv1 (1->32, 3x3, pad 1) + ReLU + maxpool 2x2
    x = jnp.transpose(x_nchw, (0, 2, 3, 1))                  # NHWC
    x = jnp.pad(x, ((0, 0), (1, 1), (1, 1), (0, 0)))         # (B, 30, 30, 1)
    p1 = _im2col_pooled(x, 14)                                # (4, B*196, 9)
    h1 = _conv1_pool(p1, w1, b1)                              # (B*196, 32)

    # compact layout prep (XLA) for the fused conv2 kernel: pad + phase-split h1.
    # ~37 KB/image instead of the old ~226 KB/image expanded im2col.
    h1 = h1.reshape(B, 14, 14, 32)
    h1p = jnp.pad(h1, ((0, 0), (1, 1), (1, 3), (0, 0)))       # (B, 16, 18, 32)
    ph = jnp.stack([h1p[:, p::2, q::2, :] for p in (0, 1) for q in (0, 1)], axis=1)
    ph = ph.reshape(B, 32, 9, 32)                             # (B, 4 phases * 8, 9, 32)

    # stage 2: conv2 (32->64) + ReLU + maxpool, taps built in-kernel
    h2 = _conv2_pool(ph, w2, b2)                              # (B*56, 64)

    # flatten is a free reshape (fc1 weights were permuted/padded to this order at init)
    h2 = h2.reshape(B, 56 * 64)                               # (B, 3584)

    logits128 = _fc_forward(h2, wf1, bf1, wf2p, bf2p)         # (B, 128)
    return logits128[:, :10]


# ----------------------------- parameters & reference ---------------------

def init_params(key):
    """PyTorch-default-style init. Returns (kernel_layout_params, torch_layout_params)."""
    def uinit(k, shape, fan_in):
        bound = 1.0 / jnp.sqrt(jnp.float32(fan_in))
        return jax.random.uniform(k, shape, jnp.float32, -bound, bound)

    ks = jax.random.split(key, 8)
    w1_t = uinit(ks[0], (32, 1, 3, 3), 1 * 9)
    b1_t = uinit(ks[1], (32,), 1 * 9)
    w2_t = uinit(ks[2], (64, 32, 3, 3), 32 * 9)
    b2_t = uinit(ks[3], (64,), 32 * 9)
    wf1_t = uinit(ks[4], (128, 7 * 7 * 64), 7 * 7 * 64)
    bf1_t = uinit(ks[5], (128,), 7 * 7 * 64)
    wf2_t = uinit(ks[6], (10, 128), 128)
    bf2_t = uinit(ks[7], (10,), 128)
    torch_params = (w1_t, b1_t, w2_t, b2_t, wf1_t, bf1_t, wf2_t, bf2_t)

    # kernel layout
    w1 = jnp.transpose(w1_t, (2, 3, 1, 0)).reshape(9 * 1, 32)        # (dy,dx,ci) x co
    b1 = b1_t.reshape(1, 32)
    w2 = jnp.transpose(w2_t, (2, 3, 1, 0)).reshape(9, 32, 64)        # tap x ci x co
    b2 = b2_t.reshape(1, 64)
    # fc1: permute from PyTorch (c, u, v) flatten order to the kernel's (u, v<8, c) order,
    # with zero rows at the v==7 pad column -> forward needs no transpose, only a reshape.
    wf1 = wf1_t.reshape(128, 64, 7, 7).transpose(0, 2, 3, 1)          # (128, u, v, c)
    wf1 = jnp.pad(wf1, ((0, 0), (0, 0), (0, 1), (0, 0)))              # (128, 7, 8, 64)
    wf1 = wf1.reshape(128, 7 * 8 * 64).T                              # (3584, 128)
    bf1 = bf1_t.reshape(1, 128)
    wf2p = jnp.zeros((128, 128), jnp.float32).at[:, :10].set(wf2_t.T)
    bf2p = jnp.zeros((1, 128), jnp.float32).at[:, :10].set(bf2_t.reshape(1, 10))
    kernel_params = (w1, b1, w2, b2, wf1, bf1, wf2p, bf2p)
    return kernel_params, torch_params


def ref_forward(x_nchw, torch_params):
    """Plain-JAX reference (HIGHEST precision) — same math as the PyTorch module."""
    w1, b1, w2, b2, wf1, bf1, wf2, bf2 = torch_params
    hp = lax.Precision.HIGHEST
    y = lax.conv_general_dilated(x_nchw, w1, (1, 1), ((1, 1), (1, 1)),
                                 dimension_numbers=("NCHW", "OIHW", "NCHW"), precision=hp)
    y = jnp.maximum(y + b1.reshape(1, -1, 1, 1), 0.0)
    y = lax.reduce_window(y, -jnp.inf, lax.max, (1, 1, 2, 2), (1, 1, 2, 2), "VALID")
    y = lax.conv_general_dilated(y, w2, (1, 1), ((1, 1), (1, 1)),
                                 dimension_numbers=("NCHW", "OIHW", "NCHW"), precision=hp)
    y = jnp.maximum(y + b2.reshape(1, -1, 1, 1), 0.0)
    y = lax.reduce_window(y, -jnp.inf, lax.max, (1, 1, 2, 2), (1, 1, 2, 2), "VALID")
    y = y.reshape(y.shape[0], -1)                                     # PyTorch .view order
    y = jnp.maximum(jnp.dot(y, wf1.T, precision="highest") + bf1, 0.0)
    return jnp.dot(y, wf2.T, precision="highest") + bf2


if __name__ == "__main__":
    key = jax.random.PRNGKey(0)
    key, kx = jax.random.split(key)

    B = 2
    x = jax.random.normal(kx, (B, 1, 28, 28), dtype=jnp.float32)
    kernel_params, torch_params = init_params(key)

    fwd = jax.jit(mnist_cnn_forward)
    logits = fwd(x, kernel_params)
    jax.block_until_ready(logits)

    ref = ref_forward(x, torch_params)
    assert logits.shape == (B, 10)
    err = float(jnp.max(jnp.abs(logits - ref)))
    assert jnp.allclose(logits, ref, atol=1e-3, rtol=1e-3), f"max abs err {err}"

    print("KERNEL_OK")
</pallas_src>

<mosaic_0001>
module attributes {stable_mosaic.version = 11 : i64} {
  func.func @conv1_pool_kernel(%arg0: i32, %arg1: memref<4x392x9xf32, #tpu.memory_space<vmem>>, %arg2: memref<9x32xf32, #tpu.memory_space<vmem>>, %arg3: memref<1x32xf32, #tpu.memory_space<vmem>>, %arg4: memref<392x32xf32, #tpu.memory_space<vmem>>) attributes {dimension_semantics = [#tpu.dimension_semantics<parallel>], iteration_bounds = array<i64: 1>, scalar_prefetch = 0 : i64, scratch_operands = 0 : i64, tpu.core_type = #tpu.core_type<tc>, window_params = [{transform_indices = @transform_0, window_bounds = array<i64: 4, 392, 9>}, {pipeline_mode = #tpu.pipeline_mode<synchronous>, transform_indices = @transform_1, window_bounds = array<i64: 9, 32>}, {pipeline_mode = #tpu.pipeline_mode<synchronous>, transform_indices = @transform_2, window_bounds = array<i64: 1, 32>}, {transform_indices = @transform_3, window_bounds = array<i64: 392, 32>}]} {
    %c0 = arith.constant 0 : index
    %c0_0 = arith.constant 0 : index
    %c0_1 = arith.constant 0 : index
    %0 = vector.load %arg1[%c0, %c0_0, %c0_1] : memref<4x392x9xf32, #tpu.memory_space<vmem>>, vector<4x392x9xf32>
    %1 = vector.shape_cast %0 : vector<4x392x9xf32> to vector<1568x9xf32>
    %c0_2 = arith.constant 0 : index
    %c0_3 = arith.constant 0 : index
    %2 = vector.load %arg2[%c0_2, %c0_3] : memref<9x32xf32, #tpu.memory_space<vmem>>, vector<9x32xf32>
    %cst = arith.constant dense<0.000000e+00> : vector<1568x32xf32>
    %3 = tpu.matmul %1, %2, %cst {dimension_numbers = #tpu.dot_dimension_numbers<[1], [0], [0], [1], [0, 0, 1, 1], [], []>} : vector<1568x9xf32>, vector<9x32xf32>, vector<1568x32xf32> -> vector<1568x32xf32>
    %4 = vector.shape_cast %3 : vector<1568x32xf32> to vector<4x392x32xf32>
    %cst_4 = arith.constant dense<0xFF800000> : vector<392x32xf32>
    %5 = vector.multi_reduction <maximumf>, %4, %cst_4 [0] : vector<4x392x32xf32> to vector<392x32xf32>
    %c0_5 = arith.constant 0 : index
    %c0_6 = arith.constant 0 : index
    %6 = vector.load %arg3[%c0_5, %c0_6] : memref<1x32xf32, #tpu.memory_space<vmem>>, vector<1x32xf32>
    %7 = vector.broadcast %6 : vector<1x32xf32> to vector<392x32xf32>
    %8 = arith.addf %5, %7 : vector<392x32xf32>
    %cst_7 = arith.constant 0.000000e+00 : f32
    %9 = vector.broadcast %cst_7 : f32 to vector<392x32xf32>
    %10 = arith.maximumf %8, %9 : vector<392x32xf32>
    %c0_8 = arith.constant 0 : index
    %c0_9 = arith.constant 0 : index
    %11 = vector.load %arg4[%c0_8, %c0_9] : memref<392x32xf32, #tpu.memory_space<vmem>>, vector<392x32xf32>
    tpu.vector_store %arg4[%c0_8, %c0_9], %10 {strides = array<i32>} : memref<392x32xf32, #tpu.memory_space<vmem>>, vector<392x32xf32>,
    return
  }
  func.func @transform_0(%arg0: i32) -> (i32, i32, i32) {
    %c0_i32 = arith.constant 0 : i32
    %c0_i32_0 = arith.constant 0 : i32
    %c0_i32_1 = arith.constant 0 : i32
    return %c0_i32, %arg0, %c0_i32_0 : i32, i32, i32
  }
  func.func @transform_1(%arg0: i32) -> (i32, i32) {
    %c0_i32 = arith.constant 0 : i32
    %c0_i32_0 = arith.constant 0 : i32
    %c0_i32_1 = arith.constant 0 : i32
    return %c0_i32, %c0_i32_0 : i32, i32
  }
  func.func @transform_2(%arg0: i32) -> (i32, i32) {
    %c0_i32 = arith.constant 0 : i32
    %c0_i32_0 = arith.constant 0 : i32
    %c0_i32_1 = arith.constant 0 : i32
    return %c0_i32, %c0_i32_0 : i32, i32
  }
  func.func @transform_3(%arg0: i32) -> (i32, i32) {
    %c0_i32 = arith.constant 0 : i32
    %c0_i32_0 = arith.constant 0 : i32
    return %arg0, %c0_i32 : i32, i32
  }
}

module attributes {stable_mosaic.version = 11 : i64} {
  func.func @conv2_pool_kernel(%arg0: i32, %arg1: memref<2x32x9x32xf32, #tpu.memory_space<vmem>>, %arg2: memref<9x32x64xf32, #tpu.memory_space<vmem>>, %arg3: memref<1x64xf32, #tpu.memory_space<vmem>>, %arg4: memref<112x64xf32, #tpu.memory_space<vmem>>) attributes {dimension_semantics = [#tpu.dimension_semantics<parallel>], iteration_bounds = array<i64: 1>, scalar_prefetch = 0 : i64, scratch_operands = 0 : i64, tpu.core_type = #tpu.core_type<tc>, window_params = [{transform_indices = @transform_0, window_bounds = array<i64: 2, 32, 9, 32>}, {pipeline_mode = #tpu.pipeline_mode<synchronous>, transform_indices = @transform_1, window_bounds = array<i64: 9, 32, 64>}, {pipeline_mode = #tpu.pipeline_mode<synchronous>, transform_indices = @transform_2, window_bounds = array<i64: 1, 64>}, {transform_indices = @transform_3, window_bounds = array<i64: 112, 64>}]} {
    %cst = arith.constant 0.000000e+00 : f32
    %0 = vector.broadcast %cst : f32 to vector<448x64xf32>
    %c0 = arith.constant 0 : index
    %c0_0 = arith.constant 0 : index
    %c0_1 = arith.constant 0 : index
    %c0_2 = arith.constant 0 : index
    %1 = vector.load %arg1[%c0, %c0_0, %c0_1, %c0_2] : memref<2x32x9x32xf32, #tpu.memory_space<vmem>>, vector<2x7x8x32xf32>
    %c0_3 = arith.constant 0 : index
    %c8 = arith.constant 8 : index
    %c0_4 = arith.constant 0 : index
    %c0_5 = arith.constant 0 : index
    %2 = vector.load %arg1[%c0_3, %c8, %c0_4, %c0_5] : memref<2x32x9x32xf32, #tpu.memory_space<vmem>>, vector<2x7x8x32xf32>
    %c0_6 = arith.constant 0 : index
    %c16 = arith.constant 16 : index
    %c0_7 = arith.constant 0 : index
    %c0_8 = arith.constant 0 : index
    %3 = vector.load %arg1[%c0_6, %c16, %c0_7, %c0_8] : memref<2x32x9x32xf32, #tpu.memory_space<vmem>>, vector<2x7x8x32xf32>
    %c0_9 = arith.constant 0 : index
    %c24 = arith.constant 24 : index
    %c0_10 = arith.constant 0 : index
    %c0_11 = arith.constant 0 : index
    %4 = vector.load %arg1[%c0_9, %c24, %c0_10, %c0_11] : memref<2x32x9x32xf32, #tpu.memory_space<vmem>>, vector<2x7x8x32xf32>
    %5 = tpu.concatenate %1, %2, %3, %4 in 0 : vector<2x7x8x32xf32>, vector<2x7x8x32xf32>, vector<2x7x8x32xf32>, vector<2x7x8x32xf32> -> vector<8x7x8x32xf32>
    %6 = vector.shape_cast %5 : vector<8x7x8x32xf32> to vector<448x32xf32>
    %c0_12 = arith.constant 0 : index
    %c0_13 = arith.constant 0 : index
    %c0_14 = arith.constant 0 : index
    %7 = vector.load %arg2[%c0_12, %c0_13, %c0_14] : memref<9x32x64xf32, #tpu.memory_space<vmem>>, vector<1x32x64xf32>
    %8 = vector.shape_cast %7 : vector<1x32x64xf32> to vector<32x64xf32>
    %cst_15 = arith.constant dense<0.000000e+00> : vector<448x64xf32>
    %9 = tpu.matmul %6, %8, %cst_15 {dimension_numbers = #tpu.dot_dimension_numbers<[1], [0], [0], [1], [0, 0, 1, 1], [], []>} : vector<448x32xf32>, vector<32x64xf32>, vector<448x64xf32> -> vector<448x64xf32>
    %10 = arith.addf %0, %9 : vector<448x64xf32>
    %c0_16 = arith.constant 0 : index
    %c8_17 = arith.constant 8 : index
    %c0_18 = arith.constant 0 : index
    %c0_19 = arith.constant 0 : index
    %11 = vector.load %arg1[%c0_16, %c8_17, %c0_18, %c0_19] : memref<2x32x9x32xf32, #tpu.memory_space<vmem>>, vector<2x7x8x32xf32>
    %c0_20 = arith.constant 0 : index
    %c0_21 = arith.constant 0 : index
    %c1 = arith.constant 1 : index
    %c0_22 = arith.constant 0 : index
    %12 = vector.load %arg1[%c0_20, %c0_21, %c1, %c0_22] : memref<2x32x9x32xf32, #tpu.memory_space<vmem>>, vector<2x7x8x32xf32>
    %c0_23 = arith.constant 0 : index
    %c24_24 = arith.constant 24 : index
    %c0_25 = arith.constant 0 : index
    %c0_26 = arith.constant 0 : index
    %13 = vector.load %arg1[%c0_23, %c24_24, %c0_25, %c0_26] : memref<2x32x9x32xf32, #tpu.memory_space<vmem>>, vector<2x7x8x32xf32>
    %c0_27 = arith.constant 0 : index
    %c16_28 = arith.constant 16 : index
    %c1_29 = arith.constant 1 : index
    %c0_30 = arith.constant 0 : index
    %14 = vector.load %arg1[%c0_27, %c16_28, %c1_29, %c0_30] : memref<2x32x9x32xf32, #tpu.memory_space<vmem>>, vector<2x7x8x32xf32>
    %15 = tpu.concatenate %11, %12, %13, %14 in 0 : vector<2x7x8x32xf32>, vector<2x7x8x32xf32>, vector<2x7x8x32xf32>, vector<2x7x8x32xf32> -> vector<8x7x8x32xf32>
    %16 = vector.shape_cast %15 : vector<8x7x8x32xf32> to vector<448x32xf32>
    %c1_31 = arith.constant 1 : index
    %c0_32 = arith.constant 0 : index
    %c0_33 = arith.constant 0 : index
    %17 = vector.load %arg2[%c1_31, %c0_32, %c0_33] : memref<9x32x64xf32, #tpu.memory_space<vmem>>, vector<1x32x64xf32>
    %18 = vector.shape_cast %17 : vector<1x32x64xf32> to vector<32x64xf32>
    %cst_34 = arith.constant dense<0.000000e+00> : vector<448x64xf32>
    %19 = tpu.matmul %16, %18, %cst_34 {dimension_numbers = #tpu.dot_dimension_numbers<[1], [0], [0], [1], [0, 0, 1, 1], [], []>} : vector<448x32xf32>, vector<32x64xf32>, vector<448x64xf32> -> vector<448x64xf32>
    %20 = arith.addf %10, %19 : vector<448x64xf32>
    %c0_35 = arith.constant 0 : index
    %c0_36 = arith.constant 0 : index
    %c1_37 = arith.constant 1 : index
    %c0_38 = arith.constant 0 : index
    %21 = vector.load %arg1[%c0_35, %c0_36, %c1_37, %c0_38] : memref<2x32x9x32xf32, #tpu.memory_space<vmem>>, vector<2x7x8x32xf32>
    %c0_39 = arith.constant 0 : index
    %c8_40 = arith.constant 8 : index
    %c1_41 = arith.constant 1 : index
    %c0_42 = arith.constant 0 : index
    %22 = vector.load %arg1[%c0_39, %c8_40, %c1_41, %c0_42] : memref<2x32x9x32xf32, #tpu.memory_space<vmem>>, vector<2x7x8x32xf32>
    %c0_43 = arith.constant 0 : index
    %c16_44 = arith.constant 16 : index
    %c1_45 = arith.constant 1 : index
    %c0_46 = arith.constant 0 : index
    %23 = vector.load %arg1[%c0_43, %c16_44, %c1_45, %c0_46] : memref<2x32x9x32xf32, #tpu.memory_space<vmem>>, vector<2x7x8x32xf32>
    %c0_47 = arith.constant 0 : index
    %c24_48 = arith.constant 24 : index
    %c1_49 = arith.constant 1 : index
    %c0_50 = arith.constant 0 : index
    %24 = vector.load %arg1[%c0_47, %c24_48, %c1_49, %c0_50] : memref<2x32x9x32xf32, #tpu.memory_space<vmem>>, vector<2x7x8x32xf32>
    %25 = tpu.concatenate %21, %22, %23, %24 in 0 : vector<2x7x8x32xf32>, vector<2x7x8x32xf32>, vector<2x7x8x32xf32>, vector<2x7x8x32xf32> -> vector<8x7x8x32xf32>
    %26 = vector.shape_cast %25 : vector<8x7x8x32xf32> to vector<448x32xf32>
    %c2 = arith.constant 2 : index
    %c0_51 = arith.constant 0 : index
    %c0_52 = arith.constant 0 : index
    %27 = vector.load %arg2[%c2, %c0_51, %c0_52] : memref<9x32x64xf32, #tpu.memory_space<vmem>>, vector<1x32x64xf32>
    %28 = vector.shape_cast %27 : vector<1x32x64xf32> to vector<32x64xf32>
    %cst_53 = arith.constant dense<0.000000e+00> : vector<448x64xf32>
    %29 = tpu.matmul %26, %28, %cst_53 {dimension_numbers = #tpu.dot_dimension_numbers<[1], [0], [0], [1], [0, 0, 1, 1], [], []>} : vector<448x32xf32>, vector<32x64xf32>, vector<448x64xf32> -> vector<448x64xf32>
    %30 = arith.addf %20, %29 : vector<448x64xf32>
    %c0_54 = arith.constant 0 : index
    %c16_55 = arith.constant 16 : index
    %c0_56 = arith.constant 0 : index
    %c0_57 = arith.constant 0 : index
    %31 = vector.load %arg1[%c0_54, %c16_55, %c0_56, %c0_57] : memref<2x32x9x32xf32, #tpu.memory_space<vmem>>, vector<2x7x8x32xf32>
    %c0_58 = arith.constant 0 : index
    %c24_59 = arith.constant 24 : index
    %c0_60 = arith.constant 0 : index
    %c0_61 = arith.constant 0 : index
    %32 = vector.load %arg1[%c0_58, %c24_59, %c0_60, %c0_61] : memref<2x32x9x32xf32, #tpu.memory_space<vmem>>, vector<2x7x8x32xf32>
    %c0_62 = arith.constant 0 : index
    %c1_63 = arith.constant 1 : index
    %c0_64 = arith.constant 0 : index
    %c0_65 = arith.constant 0 : index
    %33 = vector.load %arg1[%c0_62, %c1_63, %c0_64, %c0_65] : memref<2x32x9x32xf32, #tpu.memory_space<vmem>>, vector<2x7x8x32xf32>
    %c0_66 = arith.constant 0 : index
    %c9 = arith.constant 9 : index
    %c0_67 = arith.constant 0 : index
    %c0_68 = arith.constant 0 : index
    %34 = vector.load %arg1[%c0_66, %c9, %c0_67, %c0_68] : memref<2x32x9x32xf32, #tpu.memory_space<vmem>>, vector<2x7x8x32xf32>
    %35 = tpu.concatenate %31, %32, %33, %34 in 0 : vector<2x7x8x32xf32>, vector<2x7x8x32xf32>, vector<2x7x8x32xf32>, vector<2x7x8x32xf32> -> vector<8x7x8x32xf32>
    %36 = vector.shape_cast %35 : vector<8x7x8x32xf32> to vector<448x32xf32>
    %c3 = arith.constant 3 : index
    %c0_69 = arith.constant 0 : index
    %c0_70 = arith.constant 0 : index
    %37 = vector.load %arg2[%c3, %c0_69, %c0_70] : memref<9x32x64xf32, #tpu.memory_space<vmem>>, vector<1x32x64xf32>
    %38 = vector.shape_cast %37 : vector<1x32x64xf32> to vector<32x64xf32>
    %cst_71 = arith.constant dense<0.000000e+00> : vector<448x64xf32>
    %39 = tpu.matmul %36, %38, %cst_71 {dimension_numbers = #tpu.dot_dimension_numbers<[1], [0], [0], [1], [0, 0, 1, 1], [], []>} : vector<448x32xf32>, vector<32x64xf32>, vector<448x64xf32> -> vector<448x64xf32>
    %40 = arith.addf %30, %39 : vector<448x64xf32>
    %c0_72 = arith.constant 0 : index
    %c24_73 = arith.constant 24 : index
    %c0_74 = arith.constant 0 : index
    %c0_75 = arith.constant 0 : index
    %41 = vector.load %arg1[%c0_72, %c24_73, %c0_74, %c0_75] : memref<2x32x9x32xf32, #tpu.memory_space<vmem>>, vector<2x7x8x32xf32>
    %c0_76 = arith.constant 0 : index
    %c16_77 = arith.constant 16 : index
    %c1_78 = arith.constant 1 : index
    %c0_79 = arith.constant 0 : index
    %42 = vector.load %arg1[%c0_76, %c16_77, %c1_78, %c0_79] : memref<2x32x9x32xf32, #tpu.memory_space<vmem>>, vector<2x7x8x32xf32>
    %c0_80 = arith.constant 0 : index
    %c9_81 = arith.constant 9 : index
    %c0_82 = arith.constant 0 : index
    %c0_83 = arith.constant 0 : index
    %43 = vector.load %arg1[%c0_80, %c9_81, %c0_82, %c0_83] : memref<2x32x9x32xf32, #tpu.memory_space<vmem>>, vector<2x7x8x32xf32>
    %c0_84 = arith.constant 0 : index
    %c1_85 = arith.constant 1 : index
    %c1_86 = arith.constant 1 : index
    %c0_87 = arith.constant 0 : index
    %44 = vector.load %arg1[%c0_84, %c1_85, %c1_86, %c0_87] : memref<2x32x9x32xf32, #tpu.memory_space<vmem>>, vector<2x7x8x32xf32>
    %45 = tpu.concatenate %41, %42, %43, %44 in 0 : vector<2x7x8x32xf32>, vector<2x7x8x32xf32>, vector<2x7x8x32xf32>, vector<2x7x8x32xf32> -> vector<8x7x8x32xf32>
    %46 = vector.shape_cast %45 : vector<8x7x8x32xf32> to vector<448x32xf32>
    %c4 = arith.constant 4 : index
    %c0_88 = arith.constant 0 : index
    %c0_89 = arith.constant 0 : index
    %47 = vector.load %arg2[%c4, %c0_88, %c0_89] : memref<9x32x64xf32, #tpu.memory_space<vmem>>, vector<1x32x64xf32>
    %48 = vector.shape_cast %47 : vector<1x32x64xf32> to vector<32x64xf32>
    %cst_90 = arith.constant dense<0.000000e+00> : vector<448x64xf32>
    %49 = tpu.matmul %46, %48, %cst_90 {dimension_numbers = #tpu.dot_dimension_numbers<[1], [0], [0], [1], [0, 0, 1, 1], [], []>} : vector<448x32xf32>, vector<32x64xf32>, vector<448x64xf32> -> vector<448x64xf32>
    %50 = arith.addf %40, %49 : vector<448x64xf32>
    %c0_91 = arith.constant 0 : index
    %c16_92 = arith.constant 16 : index
    %c1_93 = arith.constant 1 : index
    %c0_94 = arith.constant 0 : index
    %51 = vector.load %arg1[%c0_91, %c16_92, %c1_93, %c0_94] : memref<2x32x9x32xf32, #tpu.memory_space<vmem>>, vector<2x7x8x32xf32>
    %c0_95 = arith.constant 0 : index
    %c24_96 = arith.constant 24 : index
    %c1_97 = arith.constant 1 : index
    %c0_98 = arith.constant 0 : index
    %52 = vector.load %arg1[%c0_95, %c24_96, %c1_97, %c0_98] : memref<2x32x9x32xf32, #tpu.memory_space<vmem>>, vector<2x7x8x32xf32>
    %c0_99 = arith.constant 0 : index
    %c1_100 = arith.constant 1 : index
    %c1_101 = arith.constant 1 : index
    %c0_102 = arith.constant 0 : index
    %53 = vector.load %arg1[%c0_99, %c1_100, %c1_101, %c0_102] : memref<2x32x9x32xf32, #tpu.memory_space<vmem>>, vector<2x7x8x32xf32>
    %c0_103 = arith.constant 0 : index
    %c9_104 = arith.constant 9 : index
    %c1_105 = arith.constant 1 : index
    %c0_106 = arith.constant 0 : index
    %54 = vector.load %arg1[%c0_103, %c9_104, %c1_105, %c0_106] : memref<2x32x9x32xf32, #tpu.memory_space<vmem>>, vector<2x7x8x32xf32>
    %55 = tpu.concatenate %51, %52, %53, %54 in 0 : vector<2x7x8x32xf32>, vector<2x7x8x32xf32>, vector<2x7x8x32xf32>, vector<2x7x8x32xf32> -> vector<8x7x8x32xf32>
    %56 = vector.shape_cast %55 : vector<8x7x8x32xf32> to vector<448x32xf32>
    %c5 = arith.constant 5 : index
    %c0_107 = arith.constant 0 : index
    %c0_108 = arith.constant 0 : index
    %57 = vector.load %arg2[%c5, %c0_107, %c0_108] : memref<9x32x64xf32, #tpu.memory_space<vmem>>, vector<1x32x64xf32>
    %58 = vector.shape_cast %57 : vector<1x32x64xf32> to vector<32x64xf32>
    %cst_109 = arith.constant dense<0.000000e+00> : vector<448x64xf32>
    %59 = tpu.matmul %56, %58, %cst_109 {dimension_numbers = #tpu.dot_dimension_numbers<[1], [0], [0], [1], [0, 0, 1, 1], [], []>} : vector<448x32xf32>, vector<32x64xf32>, vector<448x64xf32> -> vector<448x64xf32>
    %60 = arith.addf %50, %59 : vector<448x64xf32>
    %c0_110 = arith.constant 0 : index
    %c1_111 = arith.constant 1 : index
    %c0_112 = arith.constant 0 : index
    %c0_113 = arith.constant 0 : index
    %61 = vector.load %arg1[%c0_110, %c1_111, %c0_112, %c0_113] : memref<2x32x9x32xf32, #tpu.memory_space<vmem>>, vector<2x7x8x32xf32>
    %c0_114 = arith.constant 0 : index
    %c9_115 = arith.constant 9 : index
    %c0_116 = arith.constant 0 : index
    %c0_117 = arith.constant 0 : index
    %62 = vector.load %arg1[%c0_114, %c9_115, %c0_116, %c0_117] : memref<2x32x9x32xf32, #tpu.memory_space<vmem>>, vector<2x7x8x32xf32>
    %c0_118 = arith.constant 0 : index
    %c17 = arith.constant 17 : index
    %c0_119 = arith.constant 0 : index
    %c0_120 = arith.constant 0 : index
    %63 = vector.load %arg1[%c0_118, %c17, %c0_119, %c0_120] : memref<2x32x9x32xf32, #tpu.memory_space<vmem>>, vector<2x7x8x32xf32>
    %c0_121 = arith.constant 0 : index
    %c25 = arith.constant 25 : index
    %c0_122 = arith.constant 0 : index
    %c0_123 = arith.constant 0 : index
    %64 = vector.load %arg1[%c0_121, %c25, %c0_122, %c0_123] : memref<2x32x9x32xf32, #tpu.memory_space<vmem>>, vector<2x7x8x32xf32>
    %65 = tpu.concatenate %61, %62, %63, %64 in 0 : vector<2x7x8x32xf32>, vector<2x7x8x32xf32>, vector<2x7x8x32xf32>, vector<2x7x8x32xf32> -> vector<8x7x8x32xf32>
    %66 = vector.shape_cast %65 : vector<8x7x8x32xf32> to vector<448x32xf32>
    %c6 = arith.constant 6 : index
    %c0_124 = arith.constant 0 : index
    %c0_125 = arith.constant 0 : index
    %67 = vector.load %arg2[%c6, %c0_124, %c0_125] : memref<9x32x64xf32, #tpu.memory_space<vmem>>, vector<1x32x64xf32>
    %68 = vector.shape_cast %67 : vector<1x32x64xf32> to vector<32x64xf32>
    %cst_126 = arith.constant dense<0.000000e+00> : vector<448x64xf32>
    %69 = tpu.matmul %66, %68, %cst_126 {dimension_numbers = #tpu.dot_dimension_numbers<[1], [0], [0], [1], [0, 0, 1, 1], [], []>} : vector<448x32xf32>, vector<32x64xf32>, vector<448x64xf32> -> vector<448x64xf32>
    %70 = arith.addf %60, %69 : vector<448x64xf32>
    %c0_127 = arith.constant 0 : index
    %c9_128 = arith.constant 9 : index
    %c0_129 = arith.constant 0 : index
    %c0_130 = arith.constant 0 : index
    %71 = vector.load %arg1[%c0_127, %c9_128, %c0_129, %c0_130] : memref<2x32x9x32xf32, #tpu.memory_space<vmem>>, vector<2x7x8x32xf32>
    %c0_131 = arith.constant 0 : index
    %c1_132 = arith.constant 1 : index
    %c1_133 = arith.constant 1 : index
    %c0_134 = arith.constant 0 : index
    %72 = vector.load %arg1[%c0_131, %c1_132, %c1_133, %c0_134] : memref<2x32x9x32xf32, #tpu.memory_space<vmem>>, vector<2x7x8x32xf32>
    %c0_135 = arith.constant 0 : index
    %c25_136 = arith.constant 25 : index
    %c0_137 = arith.constant 0 : index
    %c0_138 = arith.constant 0 : index
    %73 = vector.load %arg1[%c0_135, %c25_136, %c0_137, %c0_138] : memref<2x32x9x32xf32, #tpu.memory_space<vmem>>, vector<2x7x8x32xf32>
    %c0_139 = arith.constant 0 : index
    %c17_140 = arith.constant 17 : index
    %c1_141 = arith.constant 1 : index
    %c0_142 = arith.constant 0 : index
    %74 = vector.load %arg1[%c0_139, %c17_140, %c1_141, %c0_142] : memref<2x32x9x32xf32, #tpu.memory_space<vmem>>, vector<2x7x8x32xf32>
    %75 = tpu.concatenate %71, %72, %73, %74 in 0 : vector<2x7x8x32xf32>, vector<2x7x8x32xf32>, vector<2x7x8x32xf32>, vector<2x7x8x32xf32> -> vector<8x7x8x32xf32>
    %76 = vector.shape_cast %75 : vector<8x7x8x32xf32> to vector<448x32xf32>
    %c7 = arith.constant 7 : index
    %c0_143 = arith.constant 0 : index
    %c0_144 = arith.constant 0 : index
    %77 = vector.load %arg2[%c7, %c0_143, %c0_144] : memref<9x32x64xf32, #tpu.memory_space<vmem>>, vector<1x32x64xf32>
    %78 = vector.shape_cast %77 : vector<1x32x64xf32> to vector<32x64xf32>
    %cst_145 = arith.constant dense<0.000000e+00> : vector<448x64xf32>
    %79 = tpu.matmul %76, %78, %cst_145 {dimension_numbers = #tpu.dot_dimension_numbers<[1], [0], [0], [1], [0, 0, 1, 1], [], []>} : vector<448x32xf32>, vector<32x64xf32>, vector<448x64xf32> -> vector<448x64xf32>
    %80 = arith.addf %70, %79 : vector<448x64xf32>
    %c0_146 = arith.constant 0 : index
    %c1_147 = arith.constant 1 : index
    %c1_148 = arith.constant 1 : index
    %c0_149 = arith.constant 0 : index
    %81 = vector.load %arg1[%c0_146, %c1_147, %c1_148, %c0_149] : memref<2x32x9x32xf32, #tpu.memory_space<vmem>>, vector<2x7x8x32xf32>
    %c0_150 = arith.constant 0 : index
    %c9_151 = arith.constant 9 : index
    %c1_152 = arith.constant 1 : index
    %c0_153 = arith.constant 0 : index
    %82 = vector.load %arg1[%c0_150, %c9_151, %c1_152, %c0_153] : memref<2x32x9x32xf32, #tpu.memory_space<vmem>>, vector<2x7x8x32xf32>
    %c0_154 = arith.constant 0 : index
    %c17_155 = arith.constant 17 : index
    %c1_156 = arith.constant 1 : index
    %c0_157 = arith.constant 0 : index
    %83 = vector.load %arg1[%c0_154, %c17_155, %c1_156, %c0_157] : memref<2x32x9x32xf32, #tpu.memory_space<vmem>>, vector<2x7x8x32xf32>
    %c0_158 = arith.constant 0 : index
    %c25_159 = arith.constant 25 : index
    %c1_160 = arith.constant 1 : index
    %c0_161 = arith.constant 0 : index
    %84 = vector.load %arg1[%c0_158, %c25_159, %c1_160, %c0_161] : memref<2x32x9x32xf32, #tpu.memory_space<vmem>>, vector<2x7x8x32xf32>
    %85 = tpu.concatenate %81, %82, %83, %84 in 0 : vector<2x7x8x32xf32>, vector<2x7x8x32xf32>, vector<2x7x8x32xf32>, vector<2x7x8x32xf32> -> vector<8x7x8x32xf32>
    %86 = vector.shape_cast %85 : vector<8x7x8x32xf32> to vector<448x32xf32>
    %c8_162 = arith.constant 8 : index
    %c0_163 = arith.constant 0 : index
    %c0_164 = arith.constant 0 : index
    %87 = vector.load %arg2[%c8_162, %c0_163, %c0_164] : memref<9x32x64xf32, #tpu.memory_space<vmem>>, vector<1x32x64xf32>
    %88 = vector.shape_cast %87 : vector<1x32x64xf32> to vector<32x64xf32>
    %cst_165 = arith.constant dense<0.000000e+00> : vector<448x64xf32>
    %89 = tpu.matmul %86, %88, %cst_165 {dimension_numbers = #tpu.dot_dimension_numbers<[1], [0], [0], [1], [0, 0, 1, 1], [], []>} : vector<448x32xf32>, vector<32x64xf32>, vector<448x64xf32> -> vector<448x64xf32>
    %90 = arith.addf %80, %89 : vector<448x64xf32>
    %91 = vector.shape_cast %90 : vector<448x64xf32> to vector<4x112x64xf32>
    %cst_166 = arith.constant dense<0xFF800000> : vector<112x64xf32>
    %92 = vector.multi_reduction <maximumf>, %91, %cst_166 [0] : vector<4x112x64xf32> to vector<112x64xf32>
    %c0_167 = arith.constant 0 : index
    %c0_168 = arith.constant 0 : index
    %93 = vector.load %arg3[%c0_167, %c0_168] : memref<1x64xf32, #tpu.memory_space<vmem>>, vector<1x64xf32>
    %94 = vector.broadcast %93 : vector<1x64xf32> to vector<112x64xf32>
    %95 = arith.addf %92, %94 : vector<112x64xf32>
    %cst_169 = arith.constant 0.000000e+00 : f32
    %96 = vector.broadcast %cst_169 : f32 to vector<112x64xf32>
    %97 = arith.maximumf %95, %96 : vector<112x64xf32>
    %c0_170 = arith.constant 0 : index
    %c0_171 = arith.constant 0 : index
    %98 = vector.load %arg4[%c0_170, %c0_171] : memref<112x64xf32, #tpu.memory_space<vmem>>, vector<112x64xf32>
    tpu.vector_store %arg4[%c0_170, %c0_171], %97 {strides = array<i32>} : memref<112x64xf32, #tpu.memory_space<vmem>>, vector<112x64xf32>,
    return
  }
  func.func @transform_0(%arg0: i32) -> (i32, i32, i32, i32) {
    %c0_i32 = arith.constant 0 : i32
    %c0_i32_0 = arith.constant 0 : i32
    %c0_i32_1 = arith.constant 0 : i32
    %c0_i32_2 = arith.constant 0 : i32
    return %arg0, %c0_i32, %c0_i32_0, %c0_i32_1 : i32, i32, i32, i32
  }
  func.func @transform_1(%arg0: i32) -> (i32, i32, i32) {
    %c0_i32 = arith.constant 0 : i32
    %c0_i32_0 = arith.constant 0 : i32
    %c0_i32_1 = arith.constant 0 : i32
    %c0_i32_2 = arith.constant 0 : i32
    return %c0_i32, %c0_i32_0, %c0_i32_1 : i32, i32, i32
  }
  func.func @transform_2(%arg0: i32) -> (i32, i32) {
    %c0_i32 = arith.constant 0 : i32
    %c0_i32_0 = arith.constant 0 : i32
    %c0_i32_1 = arith.constant 0 : i32
    return %c0_i32, %c0_i32_0 : i32, i32
  }
  func.func @transform_3(%arg0: i32) -> (i32, i32) {
    %c0_i32 = arith.constant 0 : i32
    %c0_i32_0 = arith.constant 0 : i32
    return %arg0, %c0_i32 : i32, i32
  }
}

module attributes {stable_mosaic.version = 11 : i64} {
  func.func @fc_kernel(%arg0: i32, %arg1: memref<8x3584xf32, #tpu.memory_space<vmem>>, %arg2: memref<3584x128xf32, #tpu.memory_space<vmem>>, %arg3: memref<1x128xf32, #tpu.memory_space<vmem>>, %arg4: memref<128x128xf32, #tpu.memory_space<vmem>>, %arg5: memref<1x128xf32, #tpu.memory_space<vmem>>, %arg6: memref<8x128xf32, #tpu.memory_space<vmem>>) attributes {dimension_semantics = [#tpu.dimension_semantics<parallel>], iteration_bounds = array<i64: 1>, scalar_prefetch = 0 : i64, scratch_operands = 0 : i64, tpu.core_type = #tpu.core_type<tc>, window_params = [{transform_indices = @transform_0, window_bounds = array<i64: 8, 3584>}, {pipeline_mode = #tpu.pipeline_mode<synchronous>, transform_indices = @transform_1, window_bounds = array<i64: 3584, 128>}, {pipeline_mode = #tpu.pipeline_mode<synchronous>, transform_indices = @transform_2, window_bounds = array<i64: 1, 128>}, {pipeline_mode = #tpu.pipeline_mode<synchronous>, transform_indices = @transform_3, window_bounds = array<i64: 128, 128>}, {pipeline_mode = #tpu.pipeline_mode<synchronous>, transform_indices = @transform_4, window_bounds = array<i64: 1, 128>}, {transform_indices = @transform_5, window_bounds = array<i64: 8, 128>}]} {
    %c0 = arith.constant 0 : index
    %c0_0 = arith.constant 0 : index
    %0 = vector.load %arg1[%c0, %c0_0] : memref<8x3584xf32, #tpu.memory_space<vmem>>, vector<8x3584xf32>
    %c0_1 = arith.constant 0 : index
    %c0_2 = arith.constant 0 : index
    %1 = vector.load %arg2[%c0_1, %c0_2] : memref<3584x128xf32, #tpu.memory_space<vmem>>, vector<3584x128xf32>
    %cst = arith.constant dense<0.000000e+00> : vector<8x128xf32>
    %2 = tpu.matmul %0, %1, %cst {dimension_numbers = #tpu.dot_dimension_numbers<[1], [0], [0], [1], [0, 0, 1, 1], [], []>} : vector<8x3584xf32>, vector<3584x128xf32>, vector<8x128xf32> -> vector<8x128xf32>
    %c0_3 = arith.constant 0 : index
    %c0_4 = arith.constant 0 : index
    %3 = vector.load %arg3[%c0_3, %c0_4] : memref<1x128xf32, #tpu.memory_space<vmem>>, vector<1x128xf32>
    %4 = vector.broadcast %3 : vector<1x128xf32> to vector<8x128xf32>
    %5 = arith.addf %2, %4 : vector<8x128xf32>
    %cst_5 = arith.constant 0.000000e+00 : f32
    %6 = vector.broadcast %cst_5 : f32 to vector<8x128xf32>
    %7 = arith.maximumf %5, %6 : vector<8x128xf32>
    %c0_6 = arith.constant 0 : index
    %c0_7 = arith.constant 0 : index
    %8 = vector.load %arg4[%c0_6, %c0_7] : memref<128x128xf32, #tpu.memory_space<vmem>>, vector<128x128xf32>
    %cst_8 = arith.constant dense<0.000000e+00> : vector<8x128xf32>
    %9 = tpu.matmul %7, %8, %cst_8 {dimension_numbers = #tpu.dot_dimension_numbers<[1], [0], [0], [1], [0, 0, 1, 1], [], []>} : vector<8x128xf32>, vector<128x128xf32>, vector<8x128xf32> -> vector<8x128xf32>
    %c0_9 = arith.constant 0 : index
    %c0_10 = arith.constant 0 : index
    %10 = vector.load %arg5[%c0_9, %c0_10] : memref<1x128xf32, #tpu.memory_space<vmem>>, vector<1x128xf32>
    %11 = vector.broadcast %10 : vector<1x128xf32> to vector<8x128xf32>
    %12 = arith.addf %9, %11 : vector<8x128xf32>
    %c0_11 = arith.constant 0 : index
    %c0_12 = arith.constant 0 : index
    %13 = vector.load %arg6[%c0_11, %c0_12] : memref<8x128xf32, #tpu.memory_space<vmem>>, vector<8x128xf32>
    tpu.vector_store %arg6[%c0_11, %c0_12], %12 {strides = array<i32>} : memref<8x128xf32, #tpu.memory_space<vmem>>, vector<8x128xf32>,
    return
  }
  func.func @transform_0(%arg0: i32) -> (i32, i32) {
    %c0_i32 = arith.constant 0 : i32
    %c0_i32_0 = arith.constant 0 : i32
    return %arg0, %c0_i32 : i32, i32
  }
  func.func @transform_1(%arg0: i32) -> (i32, i32) {
    %c0_i32 = arith.constant 0 : i32
    %c0_i32_0 = arith.constant 0 : i32
    %c0_i32_1 = arith.constant 0 : i32
    return %c0_i32, %c0_i32_0 : i32, i32
  }
  func.func @transform_2(%arg0: i32) -> (i32, i32) {
    %c0_i32 = arith.constant 0 : i32
    %c0_i32_0 = arith.constant 0 : i32
    %c0_i32_1 = arith.constant 0 : i32
    return %c0_i32, %c0_i32_0 : i32, i32
  }
  func.func @transform_3(%arg0: i32) -> (i32, i32) {
    %c0_i32 = arith.constant 0 : i32
    %c0_i32_0 = arith.constant 0 : i32
    %c0_i32_1 = arith.constant 0 : i32
    return %c0_i32, %c0_i32_0 : i32, i32
  }
  func.func @transform_4(%arg0: i32) -> (i32, i32) {
    %c0_i32 = arith.constant 0 : i32
    %c0_i32_0 = arith.constant 0 : i32
    %c0_i32_1 = arith.constant 0 : i32
    return %c0_i32, %c0_i32_0 : i32, i32
  }
  func.func @transform_5(%arg0: i32) -> (i32, i32) {
    %c0_i32 = arith.constant 0 : i32
    %c0_i32_0 = arith.constant 0 : i32
    return %arg0, %c0_i32 : i32, i32
  }
}

</mosaic_0001>

<bundles_post_ra>
// kernel: mnist_cnn_forward.3
= control target key start
LH: loop header
LB: loop body
LE: loop exit
PB: predicated region body
PF: predicated region fallthrough
CT: control target
= control target key end

     0   :  { %vm801_vm0 = vcmask 1040384   ;;  %vm212_vm1 = vcmask 72704   ;;  %vm3056_vm2 = vmmov 1   ;;  %vm1850_vm4 = vcmask 261120   ;;  %s4869_s1 = inlined_call_operand.vmem [shape: f32[9,32], index: 1, kind: input, shape index: {}]   ;;  %s4870_s0 = inlined_call_operand.vmem [shape: f32[4,392,9], index: 0, kind: input, shape index: {}]   ;;  %s4871_s2 = inlined_call_operand.vmem [shape: f32[1,32], index: 2, kind: input, shape index: {}]   ;;  %s4872_s3 = inlined_call_operand.vmem [shape: f32[392,32], index: 3, kind: output, shape index: {}]  }
   0x1   :  { %v210_v0 = vld [vmem:[%s4869_s1] sm:$0xff]  ;;  %v211_v1 = vld [vmem:[%s4869_s1 + $0x8] sm:$0x1]  ;;  %vm3047_vm3 = vmpackc.low %vm801_vm0, %vm3056_vm2 }
   0x2   :  { %v3046_v2 = vpack.c.bf16 %v211_v1, %v210_v0  ;;  %v14_v3 = vld [vmem:[%s4870_s0] sm:$0xff]  ;;  %v112_v4 = vld [vmem:[%s4870_s0 + $0x310] sm:$0xff]  ;;  %v15_v5 = vld [vmem:[%s4870_s0 + $0x8] sm:$0xff] }
   0x3   :  { %2752 = vmatprep.mubr.msk.f32.mxu0 %vm212_vm1, %v14_v3  ;;  %2899 = vmatprep.mubr.msk.f32.mxu1 %vm212_vm1, %v112_v4  ;;  %v113_v6 = vld [vmem:[%s4870_s0 + $0x318] sm:$0xff]  ;;  %v16_v7 = vld [vmem:[%s4870_s0 + $0x10] sm:$0xff]  ;;  %v114_v8 = vld [vmem:[%s4870_s0 + $0x320] sm:$0xff] }
   0x4   :  { %3048 = vmatprep.subr.msk.bf16.mxu0 %vm3047_vm3, %v3046_v2  ;;  %3052 = vmatprep.subr.msk.bf16.mxu1 %vm3047_vm3, %v3046_v2  ;;  %v17_v9 = vld [vmem:[%s4870_s0 + $0x18] sm:$0xff]  ;;  %v115_v10 = vld [vmem:[%s4870_s0 + $0x328] sm:$0xff]  ;;  %v18_v11 = vld [vmem:[%s4870_s0 + $0x20] sm:$0xff] }
   0x5   :  { %3051 = vmatpush3.bf16.msk.msra.mxu0 %vm3047_vm3, %v3046_v2  ;;  %3053 = vmatpush3.bf16.msk.msra.mxu1 %vm3047_vm3, %v3046_v2  ;;  %v116_v12 = vld [vmem:[%s4870_s0 + $0x330] sm:$0xff]  ;;  %v19_v13 = vld [vmem:[%s4870_s0 + $0x28] sm:$0xff]  ;;  %v117_v14 = vld [vmem:[%s4870_s0 + $0x338] sm:$0xff] }
   0x6   :  { %v20_v15 = vld [vmem:[%s4870_s0 + $0x30] sm:$0xff]  ;;  %v118_v16 = vld [vmem:[%s4870_s0 + $0x340] sm:$0xff]  ;;  %v21_v17 = vld [vmem:[%s4870_s0 + $0x38] sm:$0xff] }
   0x7   :  { %v119_v18 = vld [vmem:[%s4870_s0 + $0x348] sm:$0xff]  ;;  %v22_v19 = vld [vmem:[%s4870_s0 + $0x40] sm:$0xff]  ;;  %v120_v20 = vld [vmem:[%s4870_s0 + $0x350] sm:$0xff] }
   0x8   :  { %2753 = vmatmul.mubr.msk.f32.vlgmr.msra.gmra.mrb[0].mxu0 %vm212_vm1, %v15_v5  ;;  %2900 = vmatmul.mubr.msk.f32.vlgmr.msra.gmra.mrb[0].mxu1 %vm212_vm1, %v113_v6  ;;  %v23_v21 = vld [vmem:[%s4870_s0 + $0x48] sm:$0xff]  ;;  %v121_v22 = vld [vmem:[%s4870_s0 + $0x358] sm:$0xff]  ;;  %v24_v23 = vld [vmem:[%s4870_s0 + $0x50] sm:$0xff] }
   0x9   :  { %2755 = vmatprep.mubr.msk.f32.mxu0 %vm212_vm1, %v16_v7  ;;  %2902 = vmatprep.mubr.msk.f32.mxu1 %vm212_vm1, %v114_v8  ;;  %v122_v24 = vld [vmem:[%s4870_s0 + $0x360] sm:$0xff]  ;;  %v25_v25 = vld [vmem:[%s4870_s0 + $0x58] sm:$0xff]  ;;  %v123_v26 = vld [vmem:[%s4870_s0 + $0x368] sm:$0xff] }
   0xa   :  { %v26_v27 = vld [vmem:[%s4870_s0 + $0x60] sm:$0xff]  ;;  %v124_v28 = vld [vmem:[%s4870_s0 + $0x370] sm:$0xff]  ;;  %v27_v29 = vld [vmem:[%s4870_s0 + $0x68] sm:$0xff] }
   0xb   :  { %v125_v30 = vld [vmem:[%s4870_s0 + $0x378] sm:$0xff]  ;;  %v28_v31 = vld [vmem:[%s4870_s0 + $0x70] sm:$0xff]  ;;  %v126_v32 = vld [vmem:[%s4870_s0 + $0x380] sm:$0xff] }
   0xc   :  { %2756 = vmatmul.mubr.msk.f32.gmra.mrb[2].mxu0 %vm212_vm1, %v17_v9  ;;  %2903 = vmatmul.mubr.msk.f32.gmra.mrb[2].mxu1 %vm212_vm1, %v115_v10  ;;  %v29_v33 = vld [vmem:[%s4870_s0 + $0x78] sm:$0xff]  ;;  %v127_v34 = vld [vmem:[%s4870_s0 + $0x388] sm:$0xff]  ;;  %v30_v35 = vld [vmem:[%s4870_s0 + $0x80] sm:$0xff] }
   0xd   :  { %2758 = vmatprep.mubr.msk.f32.mxu0 %vm212_vm1, %v18_v11  ;;  %2905 = vmatprep.mubr.msk.f32.mxu1 %vm212_vm1, %v116_v12  ;;  %v128_v36 = vld [vmem:[%s4870_s0 + $0x390] sm:$0xff]  ;;  %v31_v37 = vld [vmem:[%s4870_s0 + $0x88] sm:$0xff]  ;;  %v129_v38 = vld [vmem:[%s4870_s0 + $0x398] sm:$0xff] }
   0xe   :  { %v32_v39 = vld [vmem:[%s4870_s0 + $0x90] sm:$0xff]  ;;  %v130_v40 = vld [vmem:[%s4870_s0 + $0x3a0] sm:$0xff]  ;;  %v33_v41 = vld [vmem:[%s4870_s0 + $0x98] sm:$0xff] }
   0xf   :  { %v131_v42 = vld [vmem:[%s4870_s0 + $0x3a8] sm:$0xff]  ;;  %v34_v43 = vld [vmem:[%s4870_s0 + $0xa0] sm:$0xff]  ;;  %v132_v44 = vld [vmem:[%s4870_s0 + $0x3b0] sm:$0xff] }
  0x10   :  { %2759 = vmatmul.mubr.msk.f32.gmra.mrb[4].mxu0 %vm212_vm1, %v19_v13  ;;  %2906 = vmatmul.mubr.msk.f32.gmra.mrb[4].mxu1 %vm212_vm1, %v117_v14  ;;  %v35_v45 = vld [vmem:[%s4870_s0 + $0xa8] sm:$0xff]  ;;  %v133_v46 = vld [vmem:[%s4870_s0 + $0x3b8] sm:$0xff]  ;;  %v36_v47 = vld [vmem:[%s4870_s0 + $0xb0] sm:$0xff] }
  0x11   :  { %2761 = vmatprep.mubr.msk.f32.mxu0 %vm212_vm1, %v20_v15  ;;  %2908 = vmatprep.mubr.msk.f32.mxu1 %vm212_vm1, %v118_v16  ;;  %v134_v48 = vld [vmem:[%s4870_s0 + $0x3c0] sm:$0xff]  ;;  %v37_v49 = vld [vmem:[%s4870_s0 + $0xb8] sm:$0xff]  ;;  %v135_v50 = vld [vmem:[%s4870_s0 + $0x3c8] sm:$0xff] }
  0x12   :  { %v38_v51 = vld [vmem:[%s4870_s0 + $0xc0] sm:$0xff]  ;;  %v136_v52 = vld [vmem:[%s4870_s0 + $0x3d0] sm:$0xff]  ;;  %v39_v53 = vld [vmem:[%s4870_s0 + $0xc8] sm:$0xff] }
  0x13   :  { %v137_v54 = vld [vmem:[%s4870_s0 + $0x3d8] sm:$0xff]  ;;  %v40_v55 = vld [vmem:[%s4870_s0 + $0xd0] sm:$0xff]  ;;  %v138_v56 = vld [vmem:[%s4870_s0 + $0x3e0] sm:$0xff] }
  0x14   :  { %2762 = vmatmul.mubr.msk.f32.gmra.mrb[6].mxu0 %vm212_vm1, %v21_v17  ;;  %2909 = vmatmul.mubr.msk.f32.gmra.mrb[6].mxu1 %vm212_vm1, %v119_v18  ;;  %v41_v57 = vld [vmem:[%s4870_s0 + $0xd8] sm:$0xff]  ;;  %v139_v58 = vld [vmem:[%s4870_s0 + $0x3e8] sm:$0xff]  ;;  %v42_v59 = vld [vmem:[%s4870_s0 + $0xe0] sm:$0xff] }
  0x15   :  { %2764 = vmatprep.mubr.msk.f32.mxu0 %vm212_vm1, %v22_v19  ;;  %2911 = vmatprep.mubr.msk.f32.mxu1 %vm212_vm1, %v120_v20  ;;  %v140_v60 = vld [vmem:[%s4870_s0 + $0x3f0] sm:$0xff]  ;;  %v43_v61 = vld [vmem:[%s4870_s0 + $0xe8] sm:$0xff]  ;;  %v141_v62 = vld [vmem:[%s4870_s0 + $0x3f8] sm:$0xff] }
  0x16   :  { %v44_v63 = vld [vmem:[%s4870_s0 + $0xf0] sm:$0xff]  ;;  %v142_v0 = vld [vmem:[%s4870_s0 + $0x400] sm:$0xff]  ;;  %v45_v1 = vld [vmem:[%s4870_s0 + $0xf8] sm:$0xff] }
  0x17   :  { %v143_v2 = vld [vmem:[%s4870_s0 + $0x408] sm:$0xff]  ;;  %v46_v3 = vld [vmem:[%s4870_s0 + $0x100] sm:$0xff]  ;;  %v144_v4 = vld [vmem:[%s4870_s0 + $0x410] sm:$0xff] }
  0x18   :  { %2765 = vmatmul.mubr.msk.f32.gmra.mrb[8].mxu0 %vm212_vm1, %v23_v21  ;;  %2912 = vmatmul.mubr.msk.f32.gmra.mrb[8].mxu1 %vm212_vm1, %v121_v22  ;;  %v47_v5 = vld [vmem:[%s4870_s0 + $0x108] sm:$0xff]  ;;  %v145_v6 = vld [vmem:[%s4870_s0 + $0x418] sm:$0xff]  ;;  %v48_v7 = vld [vmem:[%s4870_s0 + $0x110] sm:$0xff] }
  0x19   :  { %2767 = vmatprep.mubr.msk.f32.mxu0 %vm212_vm1, %v24_v23  ;;  %2914 = vmatprep.mubr.msk.f32.mxu1 %vm212_vm1, %v122_v24  ;;  %v146_v8 = vld [vmem:[%s4870_s0 + $0x420] sm:$0xff]  ;;  %v49_v9 = vld [vmem:[%s4870_s0 + $0x118] sm:$0xff]  ;;  %v147_v10 = vld [vmem:[%s4870_s0 + $0x428] sm:$0xff] }
  0x1a   :  { %v50_v11 = vld [vmem:[%s4870_s0 + $0x120] sm:$0xff]  ;;  %v148_v12 = vld [vmem:[%s4870_s0 + $0x430] sm:$0xff]  ;;  %v51_v13 = vld [vmem:[%s4870_s0 + $0x128] sm:$0xff] }
  0x1b   :  { %v149_v14 = vld [vmem:[%s4870_s0 + $0x438] sm:$0xff]  ;;  %v52_v15 = vld [vmem:[%s4870_s0 + $0x130] sm:$0xff]  ;;  %v150_v16 = vld [vmem:[%s4870_s0 + $0x440] sm:$0xff] }
  0x1c   :  { %2768 = vmatmul.mubr.msk.f32.gmra.mrb[10].mxu0 %vm212_vm1, %v25_v25  ;;  %2915 = vmatmul.mubr.msk.f32.gmra.mrb[10].mxu1 %vm212_vm1, %v123_v26  ;;  %v53_v17 = vld [vmem:[%s4870_s0 + $0x138] sm:$0xff]  ;;  %v151_v18 = vld [vmem:[%s4870_s0 + $0x448] sm:$0xff]  ;;  %v54_v19 = vld [vmem:[%s4870_s0 + $0x140] sm:$0xff] }
  0x1d   :  { %2770 = vmatprep.mubr.msk.f32.mxu0 %vm212_vm1, %v26_v27  ;;  %2917 = vmatprep.mubr.msk.f32.mxu1 %vm212_vm1, %v124_v28  ;;  %v152_v20 = vld [vmem:[%s4870_s0 + $0x450] sm:$0xff]  ;;  %v55_v21 = vld [vmem:[%s4870_s0 + $0x148] sm:$0xff]  ;;  %v153_v22 = vld [vmem:[%s4870_s0 + $0x458] sm:$0xff] }
  0x1e   :  { %v56_v23 = vld [vmem:[%s4870_s0 + $0x150] sm:$0xff]  ;;  %v154_v24 = vld [vmem:[%s4870_s0 + $0x460] sm:$0xff]  ;;  %v57_v25 = vld [vmem:[%s4870_s0 + $0x158] sm:$0xff] }
  0x1f   :  { %v155_v26 = vld [vmem:[%s4870_s0 + $0x468] sm:$0xff]  ;;  %v58_v27 = vld [vmem:[%s4870_s0 + $0x160] sm:$0xff]  ;;  %v156_v28 = vld [vmem:[%s4870_s0 + $0x470] sm:$0xff] }
  0x20   :  { %2771 = vmatmul.mubr.msk.f32.gmra.mrb[12].mxu0 %vm212_vm1, %v27_v29  ;;  %2918 = vmatmul.mubr.msk.f32.gmra.mrb[12].mxu1 %vm212_vm1, %v125_v30  ;;  %v59_v29 = vld [vmem:[%s4870_s0 + $0x168] sm:$0xff]  ;;  %v157_v30 = vld [vmem:[%s4870_s0 + $0x478] sm:$0xff] }
  0x21   :  { %2773 = vmatprep.mubr.msk.f32.mxu0 %vm212_vm1, %v28_v31  ;;  %2920 = vmatprep.mubr.msk.f32.mxu1 %vm212_vm1, %v126_v32  ;;  %v60_v31 = vld [vmem:[%s4870_s0 + $0x170] sm:$0xff]  ;;  %v158_v32 = vld [vmem:[%s4870_s0 + $0x480] sm:$0xff] }
  0x24   :  { %2774 = vmatmul.mubr.msk.f32.gmra.mrb[14].mxu0 %vm212_vm1, %v29_v33  ;;  %2921 = vmatmul.mubr.msk.f32.gmra.mrb[14].mxu1 %vm212_vm1, %v127_v34  ;;  %v61_v33 = vld [vmem:[%s4870_s0 + $0x178] sm:$0xff]  ;;  %v159_v34 = vld [vmem:[%s4870_s0 + $0x488] sm:$0xff] }
  0x25   :  { %2776 = vmatprep.mubr.msk.f32.mxu0 %vm212_vm1, %v30_v35  ;;  %2923 = vmatprep.mubr.msk.f32.mxu1 %vm212_vm1, %v128_v36  ;;  %v62_v35 = vld [vmem:[%s4870_s0 + $0x180] sm:$0xff]  ;;  %v160_v36 = vld [vmem:[%s4870_s0 + $0x490] sm:$0xff] }
  0x28   :  { %2777 = vmatmul.mubr.msk.f32.gmra.mrb[16].mxu0 %vm212_vm1, %v31_v37  ;;  %2924 = vmatmul.mubr.msk.f32.gmra.mrb[16].mxu1 %vm212_vm1, %v129_v38  ;;  %v63_v37 = vld [vmem:[%s4870_s0 + $0x188] sm:$0xff]  ;;  %v161_v38 = vld [vmem:[%s4870_s0 + $0x498] sm:$0xff] }
  0x29   :  { %2779 = vmatprep.mubr.msk.f32.mxu0 %vm212_vm1, %v32_v39  ;;  %2926 = vmatprep.mubr.msk.f32.mxu1 %vm212_vm1, %v130_v40  ;;  %v64_v39 = vld [vmem:[%s4870_s0 + $0x190] sm:$0xff]  ;;  %v162_v40 = vld [vmem:[%s4870_s0 + $0x4a0] sm:$0xff] }
  0x2c   :  { %2780 = vmatmul.mubr.msk.f32.gmra.mrb[18].mxu0 %vm212_vm1, %v33_v41  ;;  %2927 = vmatmul.mubr.msk.f32.gmra.mrb[18].mxu1 %vm212_vm1, %v131_v42  ;;  %v65_v41 = vld [vmem:[%s4870_s0 + $0x198] sm:$0xff]  ;;  %v163_v42 = vld [vmem:[%s4870_s0 + $0x4a8] sm:$0xff] }
  0x2d   :  { %2782 = vmatprep.mubr.msk.f32.mxu0 %vm212_vm1, %v34_v43  ;;  %2929 = vmatprep.mubr.msk.f32.mxu1 %vm212_vm1, %v132_v44  ;;  %v66_v43 = vld [vmem:[%s4870_s0 + $0x1a0] sm:$0xff]  ;;  %v164_v44 = vld [vmem:[%s4870_s0 + $0x4b0] sm:$0xff] }
  0x30   :  { %2783 = vmatmul.mubr.msk.f32.gmra.mrb[20].mxu0 %vm212_vm1, %v35_v45  ;;  %2930 = vmatmul.mubr.msk.f32.gmra.mrb[20].mxu1 %vm212_vm1, %v133_v46  ;;  %v67_v45 = vld [vmem:[%s4870_s0 + $0x1a8] sm:$0xff]  ;;  %v165_v46 = vld [vmem:[%s4870_s0 + $0x4b8] sm:$0xff] }
  0x31   :  { %2785 = vmatprep.mubr.msk.f32.mxu0 %vm212_vm1, %v36_v47  ;;  %2932 = vmatprep.mubr.msk.f32.mxu1 %vm212_vm1, %v134_v48  ;;  %v68_v47 = vld [vmem:[%s4870_s0 + $0x1b0] sm:$0xff]  ;;  %v166_v48 = vld [vmem:[%s4870_s0 + $0x4c0] sm:$0xff] }
  0x34   :  { %2786 = vmatmul.mubr.msk.f32.gmra.mrb[22].mxu0 %vm212_vm1, %v37_v49  ;;  %2933 = vmatmul.mubr.msk.f32.gmra.mrb[22].mxu1 %vm212_vm1, %v135_v50  ;;  %v69_v49 = vld [vmem:[%s4870_s0 + $0x1b8] sm:$0xff]  ;;  %v167_v50 = vld [vmem:[%s4870_s0 + $0x4c8] sm:$0xff] }
  0x35   :  { %2788 = vmatprep.mubr.msk.f32.mxu0 %vm212_vm1, %v38_v51  ;;  %2935 = vmatprep.mubr.msk.f32.mxu1 %vm212_vm1, %v136_v52  ;;  %v70_v51 = vld [vmem:[%s4870_s0 + $0x1c0] sm:$0xff]  ;;  %v168_v52 = vld [vmem:[%s4870_s0 + $0x4d0] sm:$0xff] }
  0x38   :  { %2789 = vmatmul.mubr.msk.f32.gmra.mrb[24].mxu0 %vm212_vm1, %v39_v53  ;;  %2936 = vmatmul.mubr.msk.f32.gmra.mrb[24].mxu1 %vm212_vm1, %v137_v54  ;;  %v71_v53 = vld [vmem:[%s4870_s0 + $0x1c8] sm:$0xff]  ;;  %v169_v54 = vld [vmem:[%s4870_s0 + $0x4d8] sm:$0xff] }
  0x39   :  { %2791 = vmatprep.mubr.msk.f32.mxu0 %vm212_vm1, %v40_v55  ;;  %2938 = vmatprep.mubr.msk.f32.mxu1 %vm212_vm1, %v138_v56  ;;  %v72_v55 = vld [vmem:[%s4870_s0 + $0x1d0] sm:$0xff]  ;;  %v170_v56 = vld [vmem:[%s4870_s0 + $0x4e0] sm:$0xff] }
  0x3c   :  { %2792 = vmatmul.mubr.msk.f32.gmra.mrb[26].mxu0 %vm212_vm1, %v41_v57  ;;  %2939 = vmatmul.mubr.msk.f32.gmra.mrb[26].mxu1 %vm212_vm1, %v139_v58  ;;  %v73_v57 = vld [vmem:[%s4870_s0 + $0x1d8] sm:$0xff]  ;;  %v171_v58 = vld [vmem:[%s4870_s0 + $0x4e8] sm:$0xff] }
  0x3d   :  { %2794 = vmatprep.mubr.msk.f32.mxu0 %vm212_vm1, %v42_v59  ;;  %2941 = vmatprep.mubr.msk.f32.mxu1 %vm212_vm1, %v140_v60  ;;  %v74_v59 = vld [vmem:[%s4870_s0 + $0x1e0] sm:$0xff]  ;;  %v172_v60 = vld [vmem:[%s4870_s0 + $0x4f0] sm:$0xff] }
  0x40   :  { %2795 = vmatmul.mubr.msk.f32.gmra.mrb[28].mxu0 %vm212_vm1, %v43_v61  ;;  %2942 = vmatmul.mubr.msk.f32.gmra.mrb[28].mxu1 %vm212_vm1, %v141_v62  ;;  %v75_v61 = vld [vmem:[%s4870_s0 + $0x1e8] sm:$0xff]  ;;  %v173_v62 = vld [vmem:[%s4870_s0 + $0x4f8] sm:$0xff] }
  0x41   :  { %2797 = vmatprep.mubr.msk.f32.mxu0 %vm212_vm1, %v44_v63  ;;  %2944 = vmatprep.mubr.msk.f32.mxu1 %vm212_vm1, %v142_v0  ;;  %v76_v63 = vld [vmem:[%s4870_s0 + $0x1f0] sm:$0xff]  ;;  %v174_v0 = vld [vmem:[%s4870_s0 + $0x500] sm:$0xff] }
  0x44   :  { %2798 = vmatmul.mubr.msk.f32.gmra.mrb[30].mxu0 %vm212_vm1, %v45_v1  ;;  %2945 = vmatmul.mubr.msk.f32.gmra.mrb[30].mxu1 %vm212_vm1, %v143_v2  ;;  %v77_v1 = vld [vmem:[%s4870_s0 + $0x1f8] sm:$0xff]  ;;  %v175_v2 = vld [vmem:[%s4870_s0 + $0x508] sm:$0xff] }
  0x45   :  { %2800 = vmatprep.mubr.msk.f32.mxu0 %vm212_vm1, %v46_v3  ;;  %2947 = vmatprep.mubr.msk.f32.mxu1 %vm212_vm1, %v144_v4  ;;  %v78_v3 = vld [vmem:[%s4870_s0 + $0x200] sm:$0xff]  ;;  %v176_v4 = vld [vmem:[%s4870_s0 + $0x510] sm:$0xff] }
  0x48   :  { %2801 = vmatmul.mubr.msk.f32.gmra.mrb[32].mxu0 %vm212_vm1, %v47_v5  ;;  %2948 = vmatmul.mubr.msk.f32.gmra.mrb[32].mxu1 %vm212_vm1, %v145_v6  ;;  %v79_v5 = vld [vmem:[%s4870_s0 + $0x208] sm:$0xff]  ;;  %v177_v6 = vld [vmem:[%s4870_s0 + $0x518] sm:$0xff] }
  0x49   :  { %2803 = vmatprep.mubr.msk.f32.mxu0 %vm212_vm1, %v48_v7  ;;  %2950 = vmatprep.mubr.msk.f32.mxu1 %vm212_vm1, %v146_v8  ;;  %v80_v7 = vld [vmem:[%s4870_s0 + $0x210] sm:$0xff]  ;;  %v178_v8 = vld [vmem:[%s4870_s0 + $0x520] sm:$0xff] }
  0x4c   :  { %2804 = vmatmul.mubr.msk.f32.gmra.mrb[34].mxu0 %vm212_vm1, %v49_v9  ;;  %2951 = vmatmul.mubr.msk.f32.gmra.mrb[34].mxu1 %vm212_vm1, %v147_v10  ;;  %v81_v9 = vld [vmem:[%s4870_s0 + $0x218] sm:$0xff]  ;;  %v179_v10 = vld [vmem:[%s4870_s0 + $0x528] sm:$0xff] }
  0x4d   :  { %2806 = vmatprep.mubr.msk.f32.mxu0 %vm212_vm1, %v50_v11  ;;  %2953 = vmatprep.mubr.msk.f32.mxu1 %vm212_vm1, %v148_v12  ;;  %v82_v11 = vld [vmem:[%s4870_s0 + $0x220] sm:$0xff]  ;;  %v180_v12 = vld [vmem:[%s4870_s0 + $0x530] sm:$0xff] }
  0x50   :  { %2807 = vmatmul.mubr.msk.f32.gmra.mrb[36].mxu0 %vm212_vm1, %v51_v13  ;;  %2954 = vmatmul.mubr.msk.f32.gmra.mrb[36].mxu1 %vm212_vm1, %v149_v14  ;;  %v83_v13 = vld [vmem:[%s4870_s0 + $0x228] sm:$0xff]  ;;  %v181_v14 = vld [vmem:[%s4870_s0 + $0x538] sm:$0xff] }
  0x51   :  { %2809 = vmatprep.mubr.msk.f32.mxu0 %vm212_vm1, %v52_v15  ;;  %2956 = vmatprep.mubr.msk.f32.mxu1 %vm212_vm1, %v150_v16  ;;  %v84_v15 = vld [vmem:[%s4870_s0 + $0x230] sm:$0xff]  ;;  %v182_v16 = vld [vmem:[%s4870_s0 + $0x540] sm:$0xff] }
  0x54   :  { %2810 = vmatmul.mubr.msk.f32.gmra.mrb[38].mxu0 %vm212_vm1, %v53_v17  ;;  %2957 = vmatmul.mubr.msk.f32.gmra.mrb[38].mxu1 %vm212_vm1, %v151_v18  ;;  %v85_v17 = vld [vmem:[%s4870_s0 + $0x238] sm:$0xff]  ;;  %v183_v18 = vld [vmem:[%s4870_s0 + $0x548] sm:$0xff] }
  0x55   :  { %2812 = vmatprep.mubr.msk.f32.mxu0 %vm212_vm1, %v54_v19  ;;  %2959 = vmatprep.mubr.msk.f32.mxu1 %vm212_vm1, %v152_v20  ;;  %v86_v19 = vld [vmem:[%s4870_s0 + $0x240] sm:$0xff]  ;;  %v184_v20 = vld [vmem:[%s4870_s0 + $0x550] sm:$0xff] }
  0x58   :  { %2813 = vmatmul.mubr.msk.f32.gmra.mrb[40].mxu0 %vm212_vm1, %v55_v21  ;;  %2960 = vmatmul.mubr.msk.f32.gmra.mrb[40].mxu1 %vm212_vm1, %v153_v22  ;;  %v87_v21 = vld [vmem:[%s4870_s0 + $0x248] sm:$0xff]  ;;  %v185_v22 = vld [vmem:[%s4870_s0 + $0x558] sm:$0xff] }
  0x59   :  { %2815 = vmatprep.mubr.msk.f32.mxu0 %vm212_vm1, %v56_v23  ;;  %2962 = vmatprep.mubr.msk.f32.mxu1 %vm212_vm1, %v154_v24  ;;  %v88_v23 = vld [vmem:[%s4870_s0 + $0x250] sm:$0xff]  ;;  %v186_v24 = vld [vmem:[%s4870_s0 + $0x560] sm:$0xff] }
  0x5c   :  { %2816 = vmatmul.mubr.msk.f32.gmra.mrb[42].mxu0 %vm212_vm1, %v57_v25  ;;  %2963 = vmatmul.mubr.msk.f32.gmra.mrb[42].mxu1 %vm212_vm1, %v155_v26  ;;  %v89_v25 = vld [vmem:[%s4870_s0 + $0x258] sm:$0xff]  ;;  %v187_v26 = vld [vmem:[%s4870_s0 + $0x568] sm:$0xff] }
  0x5d   :  { %2818 = vmatprep.mubr.msk.f32.mxu0 %vm212_vm1, %v58_v27  ;;  %2965 = vmatprep.mubr.msk.f32.mxu1 %vm212_vm1, %v156_v28  ;;  %v90_v27 = vld [vmem:[%s4870_s0 + $0x260] sm:$0xff]  ;;  %v188_v28 = vld [vmem:[%s4870_s0 + $0x570] sm:$0xff] }
  0x60   :  { %2819 = vmatmul.mubr.msk.f32.gmra.mrb[44].mxu0 %vm212_vm1, %v59_v29  ;;  %2966 = vmatmul.mubr.msk.f32.gmra.mrb[44].mxu1 %vm212_vm1, %v157_v30  ;;  %v91_v29 = vld [vmem:[%s4870_s0 + $0x268] sm:$0xff]  ;;  %v189_v30 = vld [vmem:[%s4870_s0 + $0x578] sm:$0xff] }
  0x61   :  { %2821 = vmatprep.mubr.msk.f32.mxu0 %vm212_vm1, %v60_v31  ;;  %2968 = vmatprep.mubr.msk.f32.mxu1 %vm212_vm1, %v158_v32  ;;  %v92_v31 = vld [vmem:[%s4870_s0 + $0x270] sm:$0xff]  ;;  %v190_v32 = vld [vmem:[%s4870_s0 + $0x580] sm:$0xff] }
  0x64   :  { %2822 = vmatmul.mubr.msk.f32.gmra.mrb[46].mxu0 %vm212_vm1, %v61_v33  ;;  %2969 = vmatmul.mubr.msk.f32.gmra.mrb[46].mxu1 %vm212_vm1, %v159_v34  ;;  %v93_v33 = vld [vmem:[%s4870_s0 + $0x278] sm:$0xff]  ;;  %v191_v34 = vld [vmem:[%s4870_s0 + $0x588] sm:$0xff] }
  0x65   :  { %2824 = vmatprep.mubr.msk.f32.mxu0 %vm212_vm1, %v62_v35  ;;  %2971 = vmatprep.mubr.msk.f32.mxu1 %vm212_vm1, %v160_v36  ;;  %v94_v35 = vld [vmem:[%s4870_s0 + $0x280] sm:$0xff]  ;;  %v192_v36 = vld [vmem:[%s4870_s0 + $0x590] sm:$0xff] }
  0x68   :  { %2825 = vmatmul.mubr.msk.f32.gmra.mrb[48].mxu0 %vm212_vm1, %v63_v37  ;;  %2972 = vmatmul.mubr.msk.f32.gmra.mrb[48].mxu1 %vm212_vm1, %v161_v38  ;;  %v95_v37 = vld [vmem:[%s4870_s0 + $0x288] sm:$0xff]  ;;  %v193_v38 = vld [vmem:[%s4870_s0 + $0x598] sm:$0xff] }
  0x69   :  { %2827 = vmatprep.mubr.msk.f32.mxu0 %vm212_vm1, %v64_v39  ;;  %2974 = vmatprep.mubr.msk.f32.mxu1 %vm212_vm1, %v162_v40  ;;  %v96_v39 = vld [vmem:[%s4870_s0 + $0x290] sm:$0xff]  ;;  %v194_v40 = vld [vmem:[%s4870_s0 + $0x5a0] sm:$0xff] }
  0x6c   :  { %2828 = vmatmul.mubr.msk.f32.gmra.mrb[50].mxu0 %vm212_vm1, %v65_v41  ;;  %2975 = vmatmul.mubr.msk.f32.gmra.mrb[50].mxu1 %vm212_vm1, %v163_v42  ;;  %v97_v41 = vld [vmem:[%s4870_s0 + $0x298] sm:$0xff]  ;;  %v195_v42 = vld [vmem:[%s4870_s0 + $0x5a8] sm:$0xff] }
  0x6d   :  { %2830 = vmatprep.mubr.msk.f32.mxu0 %vm212_vm1, %v66_v43  ;;  %2977 = vmatprep.mubr.msk.f32.mxu1 %vm212_vm1, %v164_v44  ;;  %v98_v43 = vld [vmem:[%s4870_s0 + $0x2a0] sm:$0xff]  ;;  %v196_v44 = vld [vmem:[%s4870_s0 + $0x5b0] sm:$0xff] }
  0x70   :  { %2831 = vmatmul.mubr.msk.f32.gmra.mrb[52].mxu0 %vm212_vm1, %v67_v45  ;;  %2978 = vmatmul.mubr.msk.f32.gmra.mrb[52].mxu1 %vm212_vm1, %v165_v46  ;;  %v99_v45 = vld [vmem:[%s4870_s0 + $0x2a8] sm:$0xff]  ;;  %v197_v46 = vld [vmem:[%s4870_s0 + $0x5b8] sm:$0xff] }
  0x71   :  { %2833 = vmatprep.mubr.msk.f32.mxu0 %vm212_vm1, %v68_v47  ;;  %2980 = vmatprep.mubr.msk.f32.mxu1 %vm212_vm1, %v166_v48  ;;  %v100_v47 = vld [vmem:[%s4870_s0 + $0x2b0] sm:$0xff]  ;;  %v198_v48 = vld [vmem:[%s4870_s0 + $0x5c0] sm:$0xff] }
  0x74   :  { %2834 = vmatmul.mubr.msk.f32.gmra.mrb[54].mxu0 %vm212_vm1, %v69_v49  ;;  %2981 = vmatmul.mubr.msk.f32.gmra.mrb[54].mxu1 %vm212_vm1, %v167_v50  ;;  %v101_v49 = vld [vmem:[%s4870_s0 + $0x2b8] sm:$0xff]  ;;  %v199_v50 = vld [vmem:[%s4870_s0 + $0x5c8] sm:$0xff] }
  0x75   :  { %2836 = vmatprep.mubr.msk.f32.mxu0 %vm212_vm1, %v70_v51  ;;  %2983 = vmatprep.mubr.msk.f32.mxu1 %vm212_vm1, %v168_v52  ;;  %v102_v51 = vld [vmem:[%s4870_s0 + $0x2c0] sm:$0xff]  ;;  %v200_v52 = vld [vmem:[%s4870_s0 + $0x5d0] sm:$0xff] }
  0x78   :  { %2837 = vmatmul.mubr.msk.f32.gmra.mrb[56].mxu0 %vm212_vm1, %v71_v53  ;;  %2984 = vmatmul.mubr.msk.f32.gmra.mrb[56].mxu1 %vm212_vm1, %v169_v54  ;;  %v103_v53 = vld [vmem:[%s4870_s0 + $0x2c8] sm:$0xff]  ;;  %v201_v54 = vld [vmem:[%s4870_s0 + $0x5d8] sm:$0xff] }
  0x79   :  { %2839 = vmatprep.mubr.msk.f32.mxu0 %vm212_vm1, %v72_v55  ;;  %2986 = vmatprep.mubr.msk.f32.mxu1 %vm212_vm1, %v170_v56  ;;  %v104_v55 = vld [vmem:[%s4870_s0 + $0x2d0] sm:$0xff]  ;;  %v202_v56 = vld [vmem:[%s4870_s0 + $0x5e0] sm:$0xff] }
  0x7c   :  { %2840 = vmatmul.mubr.msk.f32.gmra.mrb[58].mxu0 %vm212_vm1, %v73_v57  ;;  %2987 = vmatmul.mubr.msk.f32.gmra.mrb[58].mxu1 %vm212_vm1, %v171_v58  ;;  %v105_v57 = vld [vmem:[%s4870_s0 + $0x2d8] sm:$0xff]  ;;  %v203_v58 = vld [vmem:[%s4870_s0 + $0x5e8] sm:$0xff] }
  0x7d   :  { %2842 = vmatprep.mubr.msk.f32.mxu0 %vm212_vm1, %v74_v59  ;;  %2989 = vmatprep.mubr.msk.f32.mxu1 %vm212_vm1, %v172_v60  ;;  %v106_v59 = vld [vmem:[%s4870_s0 + $0x2e0] sm:$0xff]  ;;  %v204_v60 = vld [vmem:[%s4870_s0 + $0x5f0] sm:$0xff] }
  0x80   :  { %2843 = vmatmul.mubr.msk.f32.gmra.mrb[60].mxu0 %vm212_vm1, %v75_v61  ;;  %2990 = vmatmul.mubr.msk.f32.gmra.mrb[60].mxu1 %vm212_vm1, %v173_v62  ;;  %v107_v61 = vld [vmem:[%s4870_s0 + $0x2e8] sm:$0xff]  ;;  %v205_v62 = vld [vmem:[%s4870_s0 + $0x5f8] sm:$0xff] }
  0x81   :  { %2845 = vmatprep.mubr.msk.f32.mxu0 %vm212_vm1, %v76_v63  ;;  %2992 = vmatprep.mubr.msk.f32.mxu1 %vm212_vm1, %v174_v0  ;;  %v108_v63 = vld [vmem:[%s4870_s0 + $0x2f0] sm:$0xff]  ;;  %v206_v0 = vld [vmem:[%s4870_s0 + $0x600] sm:$0xff] }
  0x84   :  { %2846 = vmatmul.mubr.msk.f32.gmra.mrb[62].mxu0 %vm212_vm1, %v77_v1  ;;  %2993 = vmatmul.mubr.msk.f32.gmra.mrb[62].mxu1 %vm212_vm1, %v175_v2  ;;  %v109_v1 = vld [vmem:[%s4870_s0 + $0x2f8] sm:$0xff]  ;;  %v207_v2 = vld [vmem:[%s4870_s0 + $0x608] sm:$0xff] }
  0x85   :  { %2848 = vmatprep.mubr.msk.f32.mxu0 %vm212_vm1, %v78_v3  ;;  %2995 = vmatprep.mubr.msk.f32.mxu1 %vm212_vm1, %v176_v4  ;;  %v110_v3 = vld [vmem:[%s4870_s0 + $0x300] sm:$0xff]  ;;  %v208_v4 = vld [vmem:[%s4870_s0 + $0x610] sm:$0xff] }
  0x88   :  { %2849 = vmatmul.mubr.msk.f32.gmra.mrb[64].mxu0 %vm212_vm1, %v79_v5  ;;  %2996 = vmatmul.mubr.msk.f32.gmra.mrb[64].mxu1 %vm212_vm1, %v177_v6  ;;  %v111_v5 = vld [vmem:[%s4870_s0 + $0x308] sm:$0xff]  ;;  %v209_v6 = vld [vmem:[%s4870_s0 + $0x618] sm:$0xff] }
  0x89   :  { %2851 = vmatprep.mubr.msk.f32.mxu0 %vm212_vm1, %v80_v7  ;;  %2998 = vmatprep.mubr.msk.f32.mxu1 %vm212_vm1, %v178_v8 }
  0x8c   :  { %2852 = vmatmul.mubr.msk.f32.gmra.mrb[66].mxu0 %vm212_vm1, %v81_v9  ;;  %2999 = vmatmul.mubr.msk.f32.gmra.mrb[66].mxu1 %vm212_vm1, %v179_v10 }
  0x8d   :  { %2854 = vmatprep.mubr.msk.f32.mxu0 %vm212_vm1, %v82_v11  ;;  %3001 = vmatprep.mubr.msk.f32.mxu1 %vm212_vm1, %v180_v12 }
  0x90   :  { %2855 = vmatmul.mubr.msk.f32.gmra.mrb[68].mxu0 %vm212_vm1, %v83_v13  ;;  %3002 = vmatmul.mubr.msk.f32.gmra.mrb[68].mxu1 %vm212_vm1, %v181_v14 }
  0x91   :  { %2857 = vmatprep.mubr.msk.f32.mxu0 %vm212_vm1, %v84_v15  ;;  %3004 = vmatprep.mubr.msk.f32.mxu1 %vm212_vm1, %v182_v16 }
  0x94   :  { %2858 = vmatmul.mubr.msk.f32.gmra.mrb[70].mxu0 %vm212_vm1, %v85_v17  ;;  %3005 = vmatmul.mubr.msk.f32.gmra.mrb[70].mxu1 %vm212_vm1, %v183_v18 }
  0x95   :  { %2860 = vmatprep.mubr.msk.f32.mxu0 %vm212_vm1, %v86_v19  ;;  %3007 = vmatprep.mubr.msk.f32.mxu1 %vm212_vm1, %v184_v20 }
  0x98   :  { %2861 = vmatmul.mubr.msk.f32.gmra.mrb[72].mxu0 %vm212_vm1, %v87_v21  ;;  %3008 = vmatmul.mubr.msk.f32.gmra.mrb[72].mxu1 %vm212_vm1, %v185_v22 }
  0x99   :  { %2863 = vmatprep.mubr.msk.f32.mxu0 %vm212_vm1, %v88_v23  ;;  %3010 = vmatprep.mubr.msk.f32.mxu1 %vm212_vm1, %v186_v24 }
  0x9c   :  { %2864 = vmatmul.mubr.msk.f32.gmra.mrb[74].mxu0 %vm212_vm1, %v89_v25  ;;  %3011 = vmatmul.mubr.msk.f32.gmra.mrb[74].mxu1 %vm212_vm1, %v187_v26 }
  0x9d   :  { %2866 = vmatprep.mubr.msk.f32.mxu0 %vm212_vm1, %v90_v27  ;;  %3013 = vmatprep.mubr.msk.f32.mxu1 %vm212_vm1, %v188_v28 }
  0xa0   :  { %2867 = vmatmul.mubr.msk.f32.gmra.mrb[76].mxu0 %vm212_vm1, %v91_v29  ;;  %3014 = vmatmul.mubr.msk.f32.gmra.mrb[76].mxu1 %vm212_vm1, %v189_v30 }
  0xa1   :  { %2869 = vmatprep.mubr.msk.f32.mxu0 %vm212_vm1, %v92_v31  ;;  %3016 = vmatprep.mubr.msk.f32.mxu1 %vm212_vm1, %v190_v32 }
  0xa4   :  { %2870 = vmatmul.mubr.msk.f32.gmra.mrb[78].mxu0 %vm212_vm1, %v93_v33  ;;  %3017 = vmatmul.mubr.msk.f32.gmra.mrb[78].mxu1 %vm212_vm1, %v191_v34 }
  0xa5   :  { %2872 = vmatprep.mubr.msk.f32.mxu0 %vm212_vm1, %v94_v35  ;;  %3019 = vmatprep.mubr.msk.f32.mxu1 %vm212_vm1, %v192_v36 }
  0xa8   :  { %2873 = vmatmul.mubr.msk.f32.gmra.mrb[80].mxu0 %vm212_vm1, %v95_v37  ;;  %3020 = vmatmul.mubr.msk.f32.gmra.mrb[80].mxu1 %vm212_vm1, %v193_v38 }
  0xa9   :  { %2875 = vmatprep.mubr.msk.f32.mxu0 %vm212_vm1, %v96_v39  ;;  %3022 = vmatprep.mubr.msk.f32.mxu1 %vm212_vm1, %v194_v40 }
  0xac   :  { %2876 = vmatmul.mubr.msk.f32.gmra.mrb[82].mxu0 %vm212_vm1, %v97_v41  ;;  %3023 = vmatmul.mubr.msk.f32.gmra.mrb[82].mxu1 %vm212_vm1, %v195_v42 }
  0xad   :  { %2878 = vmatprep.mubr.msk.f32.mxu0 %vm212_vm1, %v98_v43  ;;  %3025 = vmatprep.mubr.msk.f32.mxu1 %vm212_vm1, %v196_v44 }
  0xb0   :  { %2879 = vmatmul.mubr.msk.f32.gmra.mrb[84].mxu0 %vm212_vm1, %v99_v45  ;;  %3026 = vmatmul.mubr.msk.f32.gmra.mrb[84].mxu1 %vm212_vm1, %v197_v46 }
  0xb1   :  { %2881 = vmatprep.mubr.msk.f32.mxu0 %vm212_vm1, %v100_v47  ;;  %3028 = vmatprep.mubr.msk.f32.mxu1 %vm212_vm1, %v198_v48 }
  0xb4   :  { %2882 = vmatmul.mubr.msk.f32.gmra.mrb[86].mxu0 %vm212_vm1, %v101_v49  ;;  %3029 = vmatmul.mubr.msk.f32.gmra.mrb[86].mxu1 %vm212_vm1, %v199_v50 }
  0xb5   :  { %2884 = vmatprep.mubr.msk.f32.mxu0 %vm212_vm1, %v102_v51  ;;  %3031 = vmatprep.mubr.msk.f32.mxu1 %vm212_vm1, %v200_v52 }
  0xb8   :  { %2885 = vmatmul.mubr.msk.f32.gmra.mrb[88].mxu0 %vm212_vm1, %v103_v53  ;;  %3032 = vmatmul.mubr.msk.f32.gmra.mrb[88].mxu1 %vm212_vm1, %v201_v54 }
  0xb9   :  { %2887 = vmatprep.mubr.msk.f32.mxu0 %vm212_vm1, %v104_v55  ;;  %3034 = vmatprep.mubr.msk.f32.mxu1 %vm212_vm1, %v202_v56 }
  0xbc   :  { %2888 = vmatmul.mubr.msk.f32.gmra.mrb[90].mxu0 %vm212_vm1, %v105_v57  ;;  %3035 = vmatmul.mubr.msk.f32.gmra.mrb[90].mxu1 %vm212_vm1, %v203_v58 }
  0xbd   :  { %2890 = vmatprep.mubr.msk.f32.mxu0 %vm212_vm1, %v106_v59  ;;  %3037 = vmatprep.mubr.msk.f32.mxu1 %vm212_vm1, %v204_v60 }
  0xc0   :  { %2891 = vmatmul.mubr.msk.f32.gmra.mrb[92].mxu0 %vm212_vm1, %v107_v61  ;;  %3038 = vmatmul.mubr.msk.f32.gmra.mrb[92].mxu1 %vm212_vm1, %v205_v62 }
  0xc1   :  { %2893 = vmatprep.mubr.msk.f32.mxu0 %vm212_vm1, %v108_v63  ;;  %3040 = vmatprep.mubr.msk.f32.mxu1 %vm212_vm1, %v206_v0 }
  0xc4   :  { %2894 = vmatmul.mubr.msk.f32.gmra.mrb[94].mxu0 %vm212_vm1, %v109_v1  ;;  %3041 = vmatmul.mubr.msk.f32.gmra.mrb[94].mxu1 %vm212_vm1, %v207_v2 }
  0xc5   :  { %2896 = vmatprep.mubr.msk.f32.mxu0 %vm212_vm1, %v110_v3  ;;  %3043 = vmatprep.mubr.msk.f32.mxu1 %vm212_vm1, %v208_v4 }
  0xc8   :  { %2897 = vmatmul.mubr.msk.f32.gmra.mrb[96].mxu0 %vm212_vm1, %v111_v5  ;;  %3044 = vmatmul.mubr.msk.f32.gmra.mrb[96].mxu1 %vm212_vm1, %v209_v6 }
  0xdb   :  { %v3867_v7 = vpop.f32.mrb[0].mxu0  ;;  %v3869_v8 = vpop.f32.mrb[0].mxu1 }
  0xdc   :  { %v3871_v9 = vpop.f32.mrb[1].mxu0  ;;  %v3873_v10 = vpop.f32.mrb[1].mxu1 }
  0xdf   :  { %v3875_v11 = vpop.f32.mrb[2].mxu0  ;;  %v3877_v12 = vpop.f32.mrb[2].mxu1 }
  0xe0   :  { %v3879_v13 = vpop.f32.mrb[3].mxu0  ;;  %v3881_v14 = vpop.f32.mrb[3].mxu1 }
  0xe3   :  { %v3883_v15 = vpop.f32.mrb[4].mxu0  ;;  %v3885_v16 = vpop.f32.mrb[4].mxu1 }
  0xe4   :  { %v3887_v17 = vpop.f32.mrb[5].mxu0  ;;  %v3889_v18 = vpop.f32.mrb[5].mxu1 }
  0xe7   :  { %v3891_v19 = vpop.f32.mrb[6].mxu0  ;;  %v3893_v20 = vpop.f32.mrb[6].mxu1 }
  0xe8   :  { %v3895_v21 = vpop.f32.mrb[7].mxu0  ;;  %v3897_v22 = vpop.f32.mrb[7].mxu1 }
  0xeb   :  { %v3899_v23 = vpop.f32.mrb[8].mxu0  ;;  %v3901_v24 = vpop.f32.mrb[8].mxu1 }
  0xec   :  { %v3903_v25 = vpop.f32.mrb[9].mxu0  ;;  %v3905_v26 = vpop.f32.mrb[9].mxu1 }
  0xef   :  { %v3907_v27 = vpop.f32.mrb[10].mxu0  ;;  %v3909_v28 = vpop.f32.mrb[10].mxu1 }
  0xf0   :  { %v3911_v29 = vpop.f32.mrb[11].mxu0  ;;  %v3913_v30 = vpop.f32.mrb[11].mxu1 }
  0xf3   :  { %v3915_v31 = vpop.f32.mrb[12].mxu0  ;;  %v3917_v32 = vpop.f32.mrb[12].mxu1 }
  0xf4   :  { %v3919_v33 = vpop.f32.mrb[13].mxu0  ;;  %v3921_v34 = vpop.f32.mrb[13].mxu1 }
  0xf7   :  { %v3923_v35 = vpop.f32.mrb[14].mxu0  ;;  %v3925_v36 = vpop.f32.mrb[14].mxu1 }
  0xf8   :  { %v3927_v37 = vpop.f32.mrb[15].mxu0  ;;  %v3929_v38 = vpop.f32.mrb[15].mxu1 }
  0xfb   :  { %v3931_v39 = vpop.f32.mrb[16].mxu0  ;;  %v3933_v40 = vpop.f32.mrb[16].mxu1 }
  0xfc   :  { %v3935_v41 = vpop.f32.mrb[17].mxu0  ;;  %v3937_v42 = vpop.f32.mrb[17].mxu1 }
  0xff   :  { %v3939_v43 = vpop.f32.mrb[18].mxu0  ;;  %v3941_v44 = vpop.f32.mrb[18].mxu1 }
 0x100   :  { %v3943_v45 = vpop.f32.mrb[19].mxu0  ;;  %v3945_v46 = vpop.f32.mrb[19].mxu1 }
 0x103   :  { %v3947_v47 = vpop.f32.mrb[20].mxu0  ;;  %v3949_v48 = vpop.f32.mrb[20].mxu1 }
 0x104   :  { %v3951_v49 = vpop.f32.mrb[21].mxu0  ;;  %v3953_v50 = vpop.f32.mrb[21].mxu1 }
 0x107   :  { %v3955_v51 = vpop.f32.mrb[22].mxu0  ;;  %v3957_v52 = vpop.f32.mrb[22].mxu1 }
 0x108   :  { %v3959_v53 = vpop.f32.mrb[23].mxu0  ;;  %v3961_v54 = vpop.f32.mrb[23].mxu1 }
 0x10b   :  { %v3963_v55 = vpop.f32.mrb[24].mxu0  ;;  %v3965_v56 = vpop.f32.mrb[24].mxu1 }
 0x10c   :  { %v3967_v57 = vpop.f32.mrb[25].mxu0  ;;  %v3969_v58 = vpop.f32.mrb[25].mxu1 }
 0x10f   :  { %v3971_v59 = vpop.f32.mrb[26].mxu0  ;;  %v3973_v60 = vpop.f32.mrb[26].mxu1 }
 0x110   :  { %4873 = vst [vmem:[#allocation2_spill] sm:$0xff] %v3973_v60  ;;  %v3975_v61 = vpop.f32.mrb[27].mxu0  ;;  %v3977_v62 = vpop.f32.mrb[27].mxu1 }
 0x111   :  { %4874 = vst [vmem:[#allocation3_spill] sm:$0xff] %v3975_v61  ;;  %4875 = vst [vmem:[#allocation4_spill] sm:$0xff] %v3977_v62 }
 0x113   :  { %v3979_v63 = vpop.f32.mrb[28].mxu0  ;;  %v3981_v0 = vpop.f32.mrb[28].mxu1 }
 0x114   :  { %4876 = vst [vmem:[#allocation5_spill] sm:$0xff] %v3979_v63  ;;  %4877 = vst [vmem:[#allocation6_spill] sm:$0xff] %v3981_v0  ;;  %v3983_v1 = vpop.f32.mrb[29].mxu0  ;;  %v3985_v2 = vpop.f32.mrb[29].mxu1 }
 0x115   :  { %4878 = vst [vmem:[#allocation7_spill] sm:$0xff] %v3983_v1  ;;  %4879 = vst [vmem:[#allocation8_spill] sm:$0xff] %v3985_v2 }
 0x117   :  { %v3987_v3 = vpop.f32.mrb[30].mxu0  ;;  %v3989_v4 = vpop.f32.mrb[30].mxu1 }
 0x118   :  { %4880 = vst [vmem:[#allocation9_spill] sm:$0xff] %v3987_v3  ;;  %4881 = vst [vmem:[#allocation10_spill] sm:$0xff] %v3989_v4  ;;  %v3991_v5 = vpop.f32.mrb[31].mxu0  ;;  %v3993_v6 = vpop.f32.mrb[31].mxu1 }
 0x119   :  { %4882 = vst [vmem:[#allocation11_spill] sm:$0xff] %v3991_v5  ;;  %4883 = vst [vmem:[#allocation12_spill] sm:$0xff] %v3993_v6 }
 0x11b   :  { %v3995_v60 = vpop.f32.mrb[32].mxu0  ;;  %v3997_v61 = vpop.f32.mrb[32].mxu1 }
 0x11c   :  { %4884 = vst [vmem:[#allocation13_spill] sm:$0xff] %v3995_v60  ;;  %4885 = vst [vmem:[#allocation14_spill] sm:$0xff] %v3997_v61  ;;  %v3999_v62 = vpop.f32.mrb[33].mxu0  ;;  %v4001_v63 = vpop.f32.mrb[33].mxu1 }
 0x11d   :  { %4886 = vst [vmem:[#allocation15_spill] sm:$0xff] %v3999_v62  ;;  %4887 = vst [vmem:[#allocation16_spill] sm:$0xff] %v4001_v63 }
 0x11f   :  { %v4003_v0 = vpop.f32.mrb[34].mxu0  ;;  %v4005_v1 = vpop.f32.mrb[34].mxu1 }
 0x120   :  { %4888 = vst [vmem:[#allocation17_spill] sm:$0xff] %v4003_v0  ;;  %4889 = vst [vmem:[#allocation18_spill] sm:$0xff] %v4005_v1  ;;  %v4007_v2 = vpop.f32.mrb[35].mxu0  ;;  %v4009_v3 = vpop.f32.mrb[35].mxu1 }
 0x121   :  { %4890 = vst [vmem:[#allocation19_spill] sm:$0xff] %v4007_v2  ;;  %4891 = vst [vmem:[#allocation20_spill] sm:$0xff] %v4009_v3 }
 0x123   :  { %v4011_v4 = vpop.f32.mrb[36].mxu0  ;;  %v4013_v5 = vpop.f32.mrb[36].mxu1 }
 0x124   :  { %4892 = vst [vmem:[#allocation21_spill] sm:$0xff] %v4011_v4  ;;  %4893 = vst [vmem:[#allocation22_spill] sm:$0xff] %v4013_v5  ;;  %v4015_v6 = vpop.f32.mrb[37].mxu0  ;;  %v4017_v60 = vpop.f32.mrb[37].mxu1 }
 0x125   :  { %4894 = vst [vmem:[#allocation23_spill] sm:$0xff] %v4015_v6  ;;  %4895 = vst [vmem:[#allocation24_spill] sm:$0xff] %v4017_v60 }
 0x127   :  { %v4019_v61 = vpop.f32.mrb[38].mxu0  ;;  %v4021_v62 = vpop.f32.mrb[38].mxu1 }
 0x128   :  { %4896 = vst [vmem:[#allocation25_spill] sm:$0xff] %v4019_v61  ;;  %4897 = vst [vmem:[#allocation26_spill] sm:$0xff] %v4021_v62  ;;  %v4023_v63 = vpop.f32.mrb[39].mxu0  ;;  %v4025_v0 = vpop.f32.mrb[39].mxu1 }
 0x129   :  { %4898 = vst [vmem:[#allocation27_spill] sm:$0xff] %v4023_v63  ;;  %4899 = vst [vmem:[#allocation28_spill] sm:$0xff] %v4025_v0 }
 0x12b   :  { %v4027_v1 = vpop.f32.mrb[40].mxu0  ;;  %v4029_v2 = vpop.f32.mrb[40].mxu1 }
 0x12c   :  { %4900 = vst [vmem:[#allocation29_spill] sm:$0xff] %v4027_v1  ;;  %4901 = vst [vmem:[#allocation30_spill] sm:$0xff] %v4029_v2  ;;  %v4031_v3 = vpop.f32.mrb[41].mxu0  ;;  %v4033_v4 = vpop.f32.mrb[41].mxu1  ;;  %v4049_v2 = vsel %vm1850_vm4, %v3867_v7, -inf  ;;  %v4069_v7 = vsel %vm1850_vm4, %v3879_v13, -inf }
 0x12d   :  { %4902 = vst [vmem:[#allocation31_spill] sm:$0xff] %v4031_v3  ;;  %4903 = vst [vmem:[#allocation32_spill] sm:$0xff] %v4033_v4  ;;  %v1851_v4 = vsel %vm1850_vm4, %v3871_v9, -inf  ;;  %v4073_v9 = vsel %vm1850_vm4, %v3877_v12, -inf  ;;  %v4093_v12 = vsel %vm1850_vm4, %v3891_v19, -inf  ;;  %v4097_v13 = vsel %vm1850_vm4, %v3889_v18, -inf }
 0x12e   :  { %v4113_v19 = vsel %vm1850_vm4, %v3899_v23, -inf  ;;  %v4117_v18 = vsel %vm1850_vm4, %v3897_v22, -inf  ;;  %v4133_v23 = vsel %vm1850_vm4, %v3907_v27, -inf  ;;  %v4137_v22 = vsel %vm1850_vm4, %v3905_v26, -inf }
 0x12f   :  { %v4035_v5 = vpop.f32.mrb[42].mxu0  ;;  %v4037_v6 = vpop.f32.mrb[42].mxu1  ;;  %v4153_v27 = vsel %vm1850_vm4, %v3913_v30, -inf  ;;  %v4157_v26 = vsel %vm1850_vm4, %v3919_v33, -inf  ;;  %v4173_v30 = vsel %vm1850_vm4, %v3927_v37, -inf  ;;  %v4177_v33 = vsel %vm1850_vm4, %v3925_v36, -inf }
 0x130   :  { %4904 = vst [vmem:[#allocation33_spill] sm:$0xff] %v4035_v5  ;;  %4905 = vst [vmem:[#allocation34_spill] sm:$0xff] %v4037_v6  ;;  %v4039_v60 = vpop.f32.mrb[43].mxu0  ;;  %v4041_v61 = vpop.f32.mrb[43].mxu1  ;;  %v4055_v5 = vsel %vm1850_vm4, %v3869_v8, -inf  ;;  %v4077_v8 = vsel %vm1850_vm4, %v3883_v15, -inf }
 0x131   :  { %4906 = vst [vmem:[#allocation35_spill] sm:$0xff] %v4039_v60  ;;  %4907 = vst [vmem:[#allocation36_spill] sm:$0xff] %v4041_v61  ;;  %v4105_v15 = vsel %vm1850_vm4, %v3893_v20, -inf  ;;  %v4125_v20 = vsel %vm1850_vm4, %v3901_v24, -inf  ;;  %v4145_v24 = vsel %vm1850_vm4, %v3909_v28, -inf  ;;  %v4165_v28 = vsel %vm1850_vm4, %v3923_v35, -inf }
 0x132   :  { %v4185_v35 = vsel %vm1850_vm4, %v3929_v38, -inf  ;;  %v4198_v3 = vsel %vm1850_vm4, %v3935_v41, -inf  ;;  %v4206_v38 = vsel %vm1850_vm4, %v3937_v42, -inf  ;;  %v4218_v41 = vsel %vm1850_vm4, %v3945_v46, -inf  ;;  %v4224_v42 = vld [vmem:[%s4871_s2] ss:$0 sm:$0xff] }
 0x133   :  { %v4043_v63 = vpop.f32.mrb[44].mxu0  ;;  %v4045_v0 = vpop.f32.mrb[44].mxu1  ;;  %v4244_v1 = vsel %vm1850_vm4, %v3953_v50, -inf  ;;  %v4259_v50 = vsel %vm1850_vm4, %v3963_v55, -inf }
 0x134   :  { %4908 = vst [vmem:[#allocation37_spill] sm:$0xff] %v4043_v63  ;;  %4909 = vst [vmem:[#allocation38_spill] sm:$0xff] %v4045_v0  ;;  %v4057_v6 = vpop.f32.mrb[45].mxu0  ;;  %v4059_v60 = vpop.f32.mrb[45].mxu1  ;;  %v4063_v63 = vsel %vm1850_vm4, %v3875_v11, -inf  ;;  %v1854_v0 = vsel %vm1850_vm4, %v3873_v10, -inf }
 0x135   :  { %4910 = vst [vmem:[#allocation39_spill] sm:$0xff] %v4057_v6  ;;  %4911 = vst [vmem:[#allocation40_spill] sm:$0xff] %v4059_v60  ;;  %v4081_v60 = vsel %vm1850_vm4, %v3881_v14, -inf  ;;  %v4085_v11 = vsel %vm1850_vm4, %v3887_v17, -inf  ;;  %v4089_v10 = vsel %vm1850_vm4, %v3885_v16, -inf  ;;  %v4101_v14 = vsel %vm1850_vm4, %v3895_v21, -inf }
 0x136   :  { %v4121_v21 = vsel %vm1850_vm4, %v3903_v25, -inf  ;;  %v4141_v25 = vsel %vm1850_vm4, %v3911_v29, -inf  ;;  %v4161_v29 = vsel %vm1850_vm4, %v3917_v32, -inf  ;;  %v4181_v32 = vsel %vm1850_vm4, %v3931_v39, -inf  ;;  %4920 = vst [vmem:[#allocation49_spill] sm:$0xff] %v4259_v50 }
 0x137   :  { %v4107_v17 = vpop.f32.mrb[46].mxu0  ;;  %v4109_v16 = vpop.f32.mrb[46].mxu1  ;;  %v4202_v39 = vsel %vm1850_vm4, %v3939_v43, -inf }
 0x138   :  { %4912 = vst [vmem:[#allocation41_spill] sm:$0xff] %v4107_v17  ;;  %4913 = vst [vmem:[#allocation42_spill] sm:$0xff] %v4109_v16  ;;  %v4127_v6 = vpop.f32.mrb[47].mxu0  ;;  %v4129_v17 = vpop.f32.mrb[47].mxu1  ;;  %v4149_v16 = vsel %vm1850_vm4, %v3915_v31, -inf  ;;  %v4169_v31 = vsel %vm1850_vm4, %v3921_v34, -inf }
 0x139   :  { %4914 = vst [vmem:[#allocation43_spill] sm:$0xff] %v4127_v6  ;;  %4915 = vst [vmem:[#allocation44_spill] sm:$0xff] %v4129_v17  ;;  %v4189_v34 = vsel %vm1850_vm4, %v3933_v40, -inf }
 0x13b   :  { %v2826_v17 = vpop.f32.mrb[48].mxu0  ;;  %v2973_v6 = vpop.f32.mrb[48].mxu1 }
 0x13c   :  { %v1852_v37 = vsel %vm1850_vm4, %v2826_v17, -inf  ;;  %v4192_v61 = vpop.f32.mrb[49].mxu0  ;;  %v4194_v36 = vpop.f32.mrb[49].mxu1  ;;  %v4210_v17 = vsel %vm1850_vm4, %v3943_v45, -inf  ;;  %v1856_v43 = vsel %vm1850_vm4, %v2973_v6, -inf  ;;  %v4232_v45 = vsel %vm1850_vm4, %v3951_v49, -inf }
 0x13d   :  { %4916 = vst [vmem:[#allocation45_spill] sm:$0xff] %v4192_v61  ;;  %4917 = vst [vmem:[#allocation46_spill] sm:$0xff] %v4194_v36  ;;  %v1853_v40 = vmax.f32 %v1851_v4, %v1852_v37  ;;  %v4214_v36 = vsel %vm1850_vm4, %v3941_v44, -inf  ;;  %v4228_v4 = vsel %vm1850_vm4, %v3947_v47, -inf  ;;  %v4236_v44 = vsel %vm1850_vm4, %v3949_v48, -inf }
 0x13e   :  { %v4240_v61 = vsel %vm1850_vm4, %v3955_v51, -inf  ;;  %v4248_v47 = vsel %vm1850_vm4, %v3957_v52, -inf  ;;  %v4263_v52 = vsel %vm1850_vm4, %v3961_v54, -inf  ;;  %v4276_v54 = vsel %vm1850_vm4, %v3967_v57, -inf }
 0x13f   :  { %v1855_v46 = vmax.f32 %v1853_v40, %v1854_v0  ;;  %v2829_v37 = vpop.f32.mrb[50].mxu0  ;;  %v2976_v6 = vpop.f32.mrb[50].mxu1  ;;  %4918 = vst [vmem:[#allocation47_spill] sm:$0xff] %v4240_v61  ;;  %4919 = vst [vmem:[#allocation48_spill] sm:$0xff] %v4248_v47  ;;  %v4253_v0 = vsel %vm1850_vm4, %v3959_v53, -inf  ;;  %v4269_v53 = vsel %vm1850_vm4, %v3965_v56, -inf }
 0x140   :  { %v1866_v49 = vsel %vm1850_vm4, %v2829_v37, -inf  ;;  %v1121_v62 = vpop.f32.mrb[51].mxu0  ;;  %v1611_v48 = vpop.f32.mrb[51].mxu1  ;;  %v1870_v47 = vsel %vm1850_vm4, %v2976_v6, -inf  ;;  %4921 = vst [vmem:[#allocation50_spill] sm:$0xff] %v4269_v53  ;;  %v4288_v57 = vsel %vm1850_vm4, %v3971_v59, -inf }
 0x141   :  { %v1857_v40 = vmax.f32 %v1855_v46, %v1856_v43  ;;  %v1867_v51 = vmax.f32 %v4069_v7, %v1866_v49  ;;  %v1859_v61 = vsel %vm1850_vm4, %v1121_v62, -inf  ;;  %v1863_v55 = vsel %vm1850_vm4, %v1611_v48, -inf }
 0x142   :  { %v1860_v37 = vmax.f32 %v4049_v2, %v1859_v61  ;;  %v4280_v61 = vsel %vm1850_vm4, %v3969_v58, -inf }
 0x143   :  { %v2201_v7 = vadd.f32 %v4224_v42, %v1857_v40  ;;  %v1869_v62 = vmax.f32 %v1867_v51, %v4081_v60  ;;  %v2832_v43 = vpop.f32.mrb[52].mxu0  ;;  %v2979_v46 = vpop.f32.mrb[52].mxu1 }
 0x144   :  { %v1880_v2 = vsel %vm1850_vm4, %v2832_v43, -inf  ;;  %v1862_v56 = vmax.f32 %v1860_v37, %v4055_v5  ;;  %v1131_v6 = vpop.f32.mrb[53].mxu0  ;;  %v1621_v49 = vpop.f32.mrb[53].mxu1  ;;  %v1884_v50 = vsel %vm1850_vm4, %v2979_v46, -inf  ;;  %v4922_v43 = vld [vmem:[#allocation2_spill] sm:$0xff] }
 0x145   :  { %v2250_v40 = vmax.f32 %v2201_v7, 0.0  ;;  %v1871_v60 = vmax.f32 %v1869_v62, %v1870_v47  ;;  %v1881_v51 = vmax.f32 %v4085_v11, %v1880_v2  ;;  %v1873_v48 = vsel %vm1850_vm4, %v1131_v6, -inf }
 0x146   :  { %v1864_v53 = vmax.f32 %v1862_v56, %v1863_v55  ;;  %v1874_v58 = vmax.f32 %v4063_v63, %v1873_v48  ;;  %v4294_v5 = vsel %vm1850_vm4, %v4922_v43, -inf  ;;  %v1877_v37 = vsel %vm1850_vm4, %v1621_v49, -inf  ;;  %v4924_v63 = vld [vmem:[#allocation3_spill] sm:$0xff] }
 0x147   :  { %4923 = vst [vmem:[#allocation2_spill] sm:$0xff] %v4294_v5  ;;  %2299 = vst.msk [vmem:[%s4872_s3] sm:$0xff] %vm1850_vm4, %v2250_v40  ;;  %v2203_v11 = vadd.f32 %v4224_v42, %v1871_v60  ;;  %v1883_v47 = vmax.f32 %v1881_v51, %v4097_v13  ;;  %v2835_v59 = vpop.f32.mrb[54].mxu0  ;;  %v2982_v7 = vpop.f32.mrb[54].mxu1  ;;  %v4305_v62 = vsel %vm1850_vm4, %v4924_v63, -inf  ;;  %v4925_v5 = vld [vmem:[#allocation4_spill] sm:$0xff] }
 0x148   :  { %v2202_v55 = vadd.f32 %v4224_v42, %v1864_v53  ;;  %v1894_v46 = vsel %vm1850_vm4, %v2835_v59, -inf  ;;  %v1876_v2 = vmax.f32 %v1874_v58, %v4073_v9  ;;  %v1141_v56 = vpop.f32.mrb[55].mxu0  ;;  %v1631_v6 = vpop.f32.mrb[55].mxu1  ;;  %v1898_v63 = vsel %vm1850_vm4, %v2982_v7, -inf }
 0x149   :  { %v2252_v40 = vmax.f32 %v2203_v11, 0.0  ;;  %v1885_v60 = vmax.f32 %v1883_v47, %v1884_v50  ;;  %v1895_v13 = vmax.f32 %v4101_v14, %v1894_v46  ;;  %v1887_v51 = vsel %vm1850_vm4, %v1141_v56, -inf }
 0x14a   :  { %v2251_v49 = vmax.f32 %v2202_v55, 0.0  ;;  %v1878_v48 = vmax.f32 %v1876_v2, %v1877_v37  ;;  %v1888_v43 = vmax.f32 %v4077_v8, %v1887_v51  ;;  %v4316_v53 = vsel %vm1850_vm4, %v4925_v5, -inf  ;;  %v4926_v8 = vld [vmem:[#allocation5_spill] sm:$0xff]  ;;  %v4927_v51 = vld [vmem:[#allocation6_spill] sm:$0xff] }
 0x14b   :  { %2301 = vst.msk [vmem:[%s4872_s3 + $0x10] sm:$0xff] %vm1850_vm4, %v2252_v40  ;;  %v2205_v9 = vadd.f32 %v4224_v42, %v1885_v60  ;;  %v1897_v14 = vmax.f32 %v1895_v13, %v4117_v18  ;;  %v2838_v50 = vpop.f32.mrb[56].mxu0  ;;  %v1891_v58 = vsel %vm1850_vm4, %v1631_v6, -inf  ;;  %v2985_v11 = vpop.f32.mrb[56].mxu1  ;;  %v4327_v47 = vsel %vm1850_vm4, %v4926_v8, -inf }
 0x14c   :  { %2300 = vst.msk [vmem:[%s4872_s3 + $0x8] sm:$0xff] %vm1850_vm4, %v2251_v49  ;;  %v2204_v5 = vadd.f32 %v4224_v42, %v1878_v48  ;;  %v1908_v59 = vsel %vm1850_vm4, %v2838_v50, -inf  ;;  %v1890_v37 = vmax.f32 %v1888_v43, %v4089_v10  ;;  %v1151_v18 = vpop.f32.mrb[57].mxu0  ;;  %v1641_v7 = vpop.f32.mrb[57].mxu1  ;;  %v1912_v13 = vsel %vm1850_vm4, %v2985_v11, -inf }
 0x14d   :  { %v2254_v55 = vmax.f32 %v2205_v9, 0.0  ;;  %v1899_v46 = vmax.f32 %v1897_v14, %v1898_v63  ;;  %v1909_v2 = vmax.f32 %v4121_v21, %v1908_v59  ;;  %v1901_v56 = vsel %vm1850_vm4, %v1151_v18, -inf }
 0x14e   :  { %v2253_v6 = vmax.f32 %v2204_v5, 0.0  ;;  %v1892_v40 = vmax.f32 %v1890_v37, %v1891_v58  ;;  %v1902_v60 = vmax.f32 %v4093_v12, %v1901_v56  ;;  %v4342_v49 = vsel %vm1850_vm4, %v4927_v51, -inf  ;;  %v4928_v12 = vld [vmem:[#allocation7_spill] sm:$0xff] }
 0x14f   :  { %2303 = vst.msk [vmem:[%s4872_s3 + $0x20] sm:$0xff] %vm1850_vm4, %v2254_v55  ;;  %v2207_v10 = vadd.f32 %v4224_v42, %v1899_v46  ;;  %v1911_v21 = vmax.f32 %v1909_v2, %v4137_v22  ;;  %v2841_v48 = vpop.f32.mrb[58].mxu0  ;;  %v1905_v43 = vsel %vm1850_vm4, %v1641_v7, -inf  ;;  %v2988_v63 = vpop.f32.mrb[58].mxu1  ;;  %v4353_v9 = vsel %vm1850_vm4, %v4928_v12, -inf  ;;  %v4929_v2 = vld [vmem:[#allocation8_spill] sm:$0xff] }
 0x150   :  { %2302 = vst.msk [vmem:[%s4872_s3 + $0x18] sm:$0xff] %vm1850_vm4, %v2253_v6  ;;  %v2206_v14 = vadd.f32 %v4224_v42, %v1892_v40  ;;  %v1922_v50 = vsel %vm1850_vm4, %v2841_v48, -inf  ;;  %v1904_v58 = vmax.f32 %v1902_v60, %v4105_v15  ;;  %v1161_v22 = vpop.f32.mrb[59].mxu0  ;;  %v1651_v11 = vpop.f32.mrb[59].mxu1  ;;  %v1926_v46 = vsel %vm1850_vm4, %v2988_v63, -inf }
 0x151   :  { %v2256_v8 = vmax.f32 %v2207_v10, 0.0  ;;  %v1913_v5 = vmax.f32 %v1911_v21, %v1912_v13  ;;  %v1923_v59 = vmax.f32 %v4141_v25, %v1922_v50  ;;  %v1915_v37 = vsel %vm1850_vm4, %v1161_v22, -inf }
 0x152   :  { %v2255_v18 = vmax.f32 %v2206_v14, 0.0  ;;  %v1906_v7 = vmax.f32 %v1904_v58, %v1905_v43  ;;  %v1916_v55 = vmax.f32 %v4113_v19, %v1915_v37  ;;  %v4368_v56 = vsel %vm1850_vm4, %v4929_v2, -inf  ;;  %v4930_v19 = vld [vmem:[#allocation9_spill] sm:$0xff] }
 0x153   :  { %2305 = vst.msk [vmem:[%s4872_s3 + $0x30] sm:$0xff] %vm1850_vm4, %v2256_v8  ;;  %v2209_v15 = vadd.f32 %v4224_v42, %v1913_v5  ;;  %v1925_v25 = vmax.f32 %v1923_v59, %v4153_v27  ;;  %v2844_v6 = vpop.f32.mrb[60].mxu0  ;;  %v1919_v40 = vsel %vm1850_vm4, %v1651_v11, -inf  ;;  %v2991_v60 = vpop.f32.mrb[60].mxu1  ;;  %v4379_v13 = vsel %vm1850_vm4, %v4930_v19, -inf  ;;  %v4931_v8 = vld [vmem:[#allocation10_spill] sm:$0xff] }
 0x154   :  { %2304 = vst.msk [vmem:[%s4872_s3 + $0x28] sm:$0xff] %vm1850_vm4, %v2255_v18  ;;  %v2208_v51 = vadd.f32 %v4224_v42, %v1906_v7  ;;  %v1936_v10 = vsel %vm1850_vm4, %v2844_v6, -inf  ;;  %v1918_v21 = vmax.f32 %v1916_v55, %v4125_v20  ;;  %v1171_v27 = vpop.f32.mrb[61].mxu0  ;;  %v1661_v48 = vpop.f32.mrb[61].mxu1  ;;  %v1940_v11 = vsel %vm1850_vm4, %v2991_v60, -inf }
 0x155   :  { %v2258_v43 = vmax.f32 %v2209_v15, 0.0  ;;  %v1927_v63 = vmax.f32 %v1925_v25, %v1926_v46  ;;  %v1937_v12 = vmax.f32 %v4157_v26, %v1936_v10  ;;  %v1929_v14 = vsel %vm1850_vm4, %v1171_v27, -inf  ;;  %v4933_v27 = vld [vmem:[#allocation12_spill] sm:$0xff] }
 0x156   :  { %v2257_v50 = vmax.f32 %v2208_v51, 0.0  ;;  %v1920_v58 = vmax.f32 %v1918_v21, %v1919_v40  ;;  %v1930_v22 = vmax.f32 %v4133_v23, %v1929_v14  ;;  %v4394_v5 = vsel %vm1850_vm4, %v4931_v8, -inf  ;;  %v4932_v23 = vld [vmem:[#allocation11_spill] sm:$0xff] }
 0x157   :  { %2307 = vst.msk [vmem:[%s4872_s3 + $0x40] sm:$0xff] %vm1850_vm4, %v2258_v43  ;;  %v2211_v20 = vadd.f32 %v4224_v42, %v1927_v63  ;;  %v1939_v26 = vmax.f32 %v1937_v12, %v4169_v31  ;;  %v2847_v59 = vpop.f32.mrb[62].mxu0  ;;  %v1933_v37 = vsel %vm1850_vm4, %v1661_v48, -inf  ;;  %v2994_v18 = vpop.f32.mrb[62].mxu1  ;;  %v4405_v7 = vsel %vm1850_vm4, %v4932_v23, -inf }
 0x158   :  { %2306 = vst.msk [vmem:[%s4872_s3 + $0x38] sm:$0xff] %vm1850_vm4, %v2257_v50  ;;  %v2210_v55 = vadd.f32 %v4224_v42, %v1920_v58  ;;  %v1950_v46 = vsel %vm1850_vm4, %v2847_v59, -inf  ;;  %v1932_v2 = vmax.f32 %v1930_v22, %v4145_v24  ;;  %v1181_v31 = vpop.f32.mrb[63].mxu0  ;;  %v1671_v15 = vpop.f32.mrb[63].mxu1  ;;  %v1954_v21 = vsel %vm1850_vm4, %v2994_v18, -inf }
 0x159   :  { %v2260_v25 = vmax.f32 %v2211_v20, 0.0  ;;  %v1941_v6 = vmax.f32 %v1939_v26, %v1940_v11  ;;  %v1951_v40 = vmax.f32 %v4173_v30, %v1950_v46  ;;  %v1943_v60 = vsel %vm1850_vm4, %v1181_v31, -inf  ;;  %v4935_v46 = vld [vmem:[#allocation14_spill] sm:$0xff] }
 0x15a   :  { %v2259_v19 = vmax.f32 %v2210_v55, 0.0  ;;  %v1934_v51 = vmax.f32 %v1932_v2, %v1933_v37  ;;  %v1944_v10 = vmax.f32 %v4149_v16, %v1943_v60  ;;  %v4420_v48 = vsel %vm1850_vm4, %v4933_v27, -inf  ;;  %v4934_v16 = vld [vmem:[#allocation13_spill] sm:$0xff] }
 0x15b   :  { %2309 = vst.msk [vmem:[%s4872_s3 + $0x50] sm:$0xff] %vm1850_vm4, %v2260_v25  ;;  %v2213_v24 = vadd.f32 %v4224_v42, %v1941_v6  ;;  %v1953_v30 = vmax.f32 %v1951_v40, %v4185_v35  ;;  %v2850_v43 = vpop.f32.mrb[64].mxu0  ;;  %v1947_v63 = vsel %vm1850_vm4, %v1671_v15, -inf  ;;  %v2997_v12 = vpop.f32.mrb[64].mxu1  ;;  %v4431_v14 = vsel %vm1850_vm4, %v4934_v16, -inf  ;;  %v4937_v16 = vld [vmem:[#allocation16_spill] sm:$0xff] }
 0x15c   :  { %2308 = vst.msk [vmem:[%s4872_s3 + $0x48] sm:$0xff] %vm1850_vm4, %v2259_v19  ;;  %v2212_v50 = vadd.f32 %v4224_v42, %v1934_v51  ;;  %v1964_v58 = vsel %vm1850_vm4, %v2850_v43, -inf  ;;  %v1946_v22 = vmax.f32 %v1944_v10, %v4161_v29  ;;  %v1191_v35 = vpop.f32.mrb[65].mxu0  ;;  %v1681_v11 = vpop.f32.mrb[65].mxu1  ;;  %v1968_v55 = vsel %vm1850_vm4, %v2997_v12, -inf }
 0x15d   :  { %v2262_v8 = vmax.f32 %v2213_v24, 0.0  ;;  %v1955_v20 = vmax.f32 %v1953_v30, %v1954_v21  ;;  %v1965_v26 = vmax.f32 %v4198_v3, %v1964_v58  ;;  %v1957_v59 = vsel %vm1850_vm4, %v1191_v35, -inf }
 0x15e   :  { %v2261_v37 = vmax.f32 %v2212_v50, 0.0  ;;  %v1948_v18 = vmax.f32 %v1946_v22, %v1947_v63  ;;  %v1958_v23 = vmax.f32 %v4165_v28, %v1957_v59  ;;  %v4446_v2 = vsel %vm1850_vm4, %v4935_v46, -inf  ;;  %v4936_v28 = vld [vmem:[#allocation15_spill] sm:$0xff] }
 0x15f   :  { %2311 = vst.msk [vmem:[%s4872_s3 + $0x60] sm:$0xff] %vm1850_vm4, %v2262_v8  ;;  %v2215_v29 = vadd.f32 %v4224_v42, %v1955_v20  ;;  %v1967_v3 = vmax.f32 %v1965_v26, %v4206_v38  ;;  %v2853_v31 = vpop.f32.mrb[66].mxu0  ;;  %v1961_v15 = vsel %vm1850_vm4, %v1681_v11, -inf  ;;  %v3000_v25 = vpop.f32.mrb[66].mxu1  ;;  %v4457_v6 = vsel %vm1850_vm4, %v4936_v28, -inf }
 0x160   :  { %2310 = vst.msk [vmem:[%s4872_s3 + $0x58] sm:$0xff] %vm1850_vm4, %v2261_v37  ;;  %v2214_v40 = vadd.f32 %v4224_v42, %v1948_v18  ;;  %v1978_v60 = vsel %vm1850_vm4, %v2853_v31, -inf  ;;  %v1960_v19 = vmax.f32 %v1958_v23, %v4177_v33  ;;  %v1201_v38 = vpop.f32.mrb[67].mxu0  ;;  %v1691_v51 = vpop.f32.mrb[67].mxu1  ;;  %v1982_v12 = vsel %vm1850_vm4, %v3000_v25, -inf }
 0x161   :  { %v2264_v10 = vmax.f32 %v2215_v29, 0.0  ;;  %v1969_v21 = vmax.f32 %v1967_v3, %v1968_v55  ;;  %v1979_v27 = vmax.f32 %v4210_v17, %v1978_v60  ;;  %v1971_v24 = vsel %vm1850_vm4, %v1201_v38, -inf }
 0x162   :  { %v2263_v30 = vmax.f32 %v2214_v40, 0.0  ;;  %v1962_v43 = vmax.f32 %v1960_v19, %v1961_v15  ;;  %v1972_v63 = vmax.f32 %v4181_v32, %v1971_v24  ;;  %v4472_v50 = vsel %vm1850_vm4, %v4937_v16, -inf  ;;  %v4938_v32 = vld [vmem:[#allocation17_spill] sm:$0xff]  ;;  %v4939_v15 = vld [vmem:[#allocation18_spill] sm:$0xff] }
 0x163   :  { %2313 = vst.msk [vmem:[%s4872_s3 + $0x70] sm:$0xff] %vm1850_vm4, %v2264_v10  ;;  %v2217_v33 = vadd.f32 %v4224_v42, %v1969_v21  ;;  %v1981_v17 = vmax.f32 %v1979_v27, %v4218_v41  ;;  %v2856_v58 = vpop.f32.mrb[68].mxu0  ;;  %v1975_v22 = vsel %vm1850_vm4, %v1691_v51, -inf  ;;  %v3003_v35 = vpop.f32.mrb[68].mxu1  ;;  %v4483_v11 = vsel %vm1850_vm4, %v4938_v32, -inf }
 0x164   :  { %2312 = vst.msk [vmem:[%s4872_s3 + $0x68] sm:$0xff] %vm1850_vm4, %v2263_v30  ;;  %v2216_v8 = vadd.f32 %v4224_v42, %v1962_v43  ;;  %v1992_v20 = vsel %vm1850_vm4, %v2856_v58, -inf  ;;  %v1974_v26 = vmax.f32 %v1972_v63, %v4189_v34  ;;  %v1211_v41 = vpop.f32.mrb[69].mxu0  ;;  %v1701_v59 = vpop.f32.mrb[69].mxu1  ;;  %v1996_v31 = vsel %vm1850_vm4, %v3003_v35, -inf }
 0x165   :  { %v2266_v37 = vmax.f32 %v2217_v33, 0.0  ;;  %v1983_v18 = vmax.f32 %v1981_v17, %v1982_v12  ;;  %v1993_v23 = vmax.f32 %v4232_v45, %v1992_v20  ;;  %v1985_v55 = vsel %vm1850_vm4, %v1211_v41, -inf  ;;  %v4941_v17 = vld [vmem:[#allocation20_spill] sm:$0xff] }
 0x166   :  { %v2265_v46 = vmax.f32 %v2216_v8, 0.0  ;;  %v1976_v29 = vmax.f32 %v1974_v26, %v1975_v22  ;;  %v1986_v3 = vmax.f32 %v4202_v39, %v1985_v55  ;;  %v4498_v25 = vsel %vm1850_vm4, %v4939_v15, -inf  ;;  %v4940_v39 = vld [vmem:[#allocation19_spill] sm:$0xff] }
 0x167   :  { %2315 = vst.msk [vmem:[%s4872_s3 + $0x80] sm:$0xff] %vm1850_vm4, %v2266_v37  ;;  %v2219_v34 = vadd.f32 %v4224_v42, %v1983_v18  ;;  %v1995_v45 = vmax.f32 %v1993_v23, %v4244_v1  ;;  %v2859_v28 = vpop.f32.mrb[70].mxu0  ;;  %v1989_v40 = vsel %vm1850_vm4, %v1701_v59, -inf  ;;  %v3006_v60 = vpop.f32.mrb[70].mxu1  ;;  %v4509_v19 = vsel %vm1850_vm4, %v4940_v39, -inf  ;;  %v4945_v39 = vld [vmem:[#allocation23_spill] sm:$0xff] }
 0x168   :  { %2314 = vst.msk [vmem:[%s4872_s3 + $0x78] sm:$0xff] %vm1850_vm4, %v2265_v46  ;;  %v2218_v38 = vadd.f32 %v4224_v42, %v1976_v29  ;;  %v2006_v51 = vsel %vm1850_vm4, %v2859_v28, -inf  ;;  %v1988_v10 = vmax.f32 %v1986_v3, %v4214_v36  ;;  %v1221_v1 = vpop.f32.mrb[71].mxu0  ;;  %v1711_v21 = vpop.f32.mrb[71].mxu1  ;;  %v2010_v33 = vsel %vm1850_vm4, %v3006_v60, -inf  ;;  %v4943_v3 = vld [vmem:[#allocation47_spill] sm:$0xff] }
 0x169   :  { %v2268_v27 = vmax.f32 %v2219_v34, 0.0  ;;  %v1997_v24 = vmax.f32 %v1995_v45, %v1996_v31  ;;  %v2007_v30 = vmax.f32 %v4253_v0, %v2006_v51  ;;  %v1999_v43 = vsel %vm1850_vm4, %v1221_v1, -inf  ;;  %v4944_v34 = vld [vmem:[#allocation22_spill] sm:$0xff]  ;;  %v4946_v1 = vld [vmem:[#allocation48_spill] sm:$0xff] }
 0x16a   :  { %v2267_v63 = vmax.f32 %v2218_v38, 0.0  ;;  %v1990_v12 = vmax.f32 %v1988_v10, %v1989_v40  ;;  %v2000_v16 = vmax.f32 %v4228_v4, %v1999_v43  ;;  %v4524_v58 = vsel %vm1850_vm4, %v4941_v17, -inf  ;;  %v4942_v4 = vld [vmem:[#allocation21_spill] sm:$0xff] }
 0x16b   :  { %2317 = vst.msk [vmem:[%s4872_s3 + $0x90] sm:$0xff] %vm1850_vm4, %v2268_v27  ;;  %v2221_v36 = vadd.f32 %v4224_v42, %v1997_v24  ;;  %v2009_v0 = vmax.f32 %v2007_v30, %v4263_v52  ;;  %v2862_v22 = vpop.f32.mrb[72].mxu0  ;;  %v2003_v35 = vsel %vm1850_vm4, %v1711_v21, -inf  ;;  %v3009_v32 = vpop.f32.mrb[72].mxu1  ;;  %v4535_v8 = vsel %vm1850_vm4, %v4942_v4, -inf }
 0x16c   :  { %2316 = vst.msk [vmem:[%s4872_s3 + $0x88] sm:$0xff] %vm1850_vm4, %v2267_v63  ;;  %v2220_v20 = vadd.f32 %v4224_v42, %v1990_v12  ;;  %v2020_v26 = vsel %vm1850_vm4, %v2862_v22, -inf  ;;  %v2002_v41 = vmax.f32 %v2000_v16, %v4236_v44  ;;  %v1231_v52 = vpop.f32.mrb[73].mxu0  ;;  %v1721_v59 = vpop.f32.mrb[73].mxu1  ;;  %v2024_v15 = vsel %vm1850_vm4, %v3009_v32, -inf }
 0x16d   :  { %v2270_v37 = vmax.f32 %v2221_v36, 0.0  ;;  %v2011_v18 = vmax.f32 %v2009_v0, %v2010_v33  ;;  %v2021_v23 = vmax.f32 %v4276_v54, %v2020_v26  ;;  %v2013_v55 = vsel %vm1850_vm4, %v1231_v52, -inf  ;;  %v4947_v33 = vld [vmem:[#allocation49_spill] sm:$0xff]  ;;  %v4948_v0 = vld [vmem:[#allocation24_spill] sm:$0xff] }
 0x16e   :  { %v2269_v46 = vmax.f32 %v2220_v20, 0.0  ;;  %v2004_v29 = vmax.f32 %v2002_v41, %v2003_v35  ;;  %v2014_v31 = vmax.f32 %v4943_v3, %v2013_v55  ;;  %v4550_v45 = vsel %vm1850_vm4, %v4944_v34, -inf  ;;  %v4949_v26 = vld [vmem:[#allocation25_spill] sm:$0xff] }
 0x16f   :  { %2319 = vst.msk [vmem:[%s4872_s3 + $0xa0] sm:$0xff] %vm1850_vm4, %v2270_v37  ;;  %v2223_v44 = vadd.f32 %v4224_v42, %v2011_v18  ;;  %v2023_v54 = vmax.f32 %v2021_v23, %v4280_v61  ;;  %v2865_v28 = vpop.f32.mrb[74].mxu0  ;;  %v2017_v40 = vsel %vm1850_vm4, %v1721_v59, -inf  ;;  %v3012_v60 = vpop.f32.mrb[74].mxu1  ;;  %v4561_v38 = vsel %vm1850_vm4, %v4945_v39, -inf  ;;  %v4950_v37 = vld [vmem:[#allocation50_spill] sm:$0xff] }
 0x170   :  { %2318 = vst.msk [vmem:[%s4872_s3 + $0x98] sm:$0xff] %vm1850_vm4, %v2269_v46  ;;  %v2222_v51 = vadd.f32 %v4224_v42, %v2004_v29  ;;  %v2034_v10 = vsel %vm1850_vm4, %v2865_v28, -inf  ;;  %v2016_v21 = vmax.f32 %v2014_v31, %v4946_v1  ;;  %v1241_v61 = vpop.f32.mrb[75].mxu0  ;;  %v1731_v27 = vpop.f32.mrb[75].mxu1  ;;  %v2038_v36 = vsel %vm1850_vm4, %v3012_v60, -inf }
 0x171   :  { %v2272_v24 = vmax.f32 %v2223_v44, 0.0  ;;  %v2025_v30 = vmax.f32 %v2023_v54, %v2024_v15  ;;  %v2035_v43 = vmax.f32 %v4305_v62, %v2034_v10  ;;  %v2027_v63 = vsel %vm1850_vm4, %v1241_v61, -inf  ;;  %v4951_v54 = vld [vmem:[#allocation26_spill] sm:$0xff] }
 0x172   :  { %v2271_v12 = vmax.f32 %v2222_v51, 0.0  ;;  %v2018_v16 = vmax.f32 %v2016_v21, %v2017_v40  ;;  %v2028_v17 = vmax.f32 %v4947_v33, %v2027_v63  ;;  %v4576_v22 = vsel %vm1850_vm4, %v4948_v0, -inf  ;;  %v4953_v61 = vld [vmem:[#allocation2_spill] sm:$0xff]  ;;  %v4954_v0 = vld [vmem:[#allocation28_spill] sm:$0xff] }
 0x173   :  { %2321 = vst.msk [vmem:[%s4872_s3 + $0xb0] sm:$0xff] %vm1850_vm4, %v2272_v24  ;;  %v2225_v35 = vadd.f32 %v4224_v42, %v2025_v30  ;;  %v2037_v62 = vmax.f32 %v2035_v43, %v4316_v53  ;;  %v2868_v32 = vpop.f32.mrb[76].mxu0  ;;  %v2031_v4 = vsel %vm1850_vm4, %v1731_v27, -inf  ;;  %v3015_v20 = vpop.f32.mrb[76].mxu1  ;;  %v4587_v41 = vsel %vm1850_vm4, %v4949_v26, -inf }
 0x174   :  { %2320 = vst.msk [vmem:[%s4872_s3 + $0xa8] sm:$0xff] %vm1850_vm4, %v2271_v12  ;;  %v2224_v52 = vadd.f32 %v4224_v42, %v2018_v16  ;;  %v2048_v59 = vsel %vm1850_vm4, %v2868_v32, -inf  ;;  %v2030_v18 = vmax.f32 %v2028_v17, %v4950_v37  ;;  %v1251_v53 = vpop.f32.mrb[77].mxu0  ;;  %v1741_v23 = vpop.f32.mrb[77].mxu1  ;;  %v2052_v44 = vsel %vm1850_vm4, %v3015_v20, -inf }
 0x175   :  { %v2274_v55 = vmax.f32 %v2225_v35, 0.0  ;;  %v2039_v46 = vmax.f32 %v2037_v62, %v2038_v36  ;;  %v2049_v29 = vmax.f32 %v4353_v9, %v2048_v59  ;;  %v2041_v3 = vsel %vm1850_vm4, %v1251_v53, -inf }
 0x176   :  { %v2273_v31 = vmax.f32 %v2224_v52, 0.0  ;;  %v2032_v15 = vmax.f32 %v2030_v18, %v2031_v4  ;;  %v2042_v34 = vmax.f32 %v4288_v57, %v2041_v3  ;;  %v4602_v28 = vsel %vm1850_vm4, %v4951_v54, -inf  ;;  %v4952_v57 = vld [vmem:[#allocation27_spill] sm:$0xff] }
 0x177   :  { %2323 = vst.msk [vmem:[%s4872_s3 + $0xc0] sm:$0xff] %vm1850_vm4, %v2274_v55  ;;  %v2227_v40 = vadd.f32 %v4224_v42, %v2039_v46  ;;  %v2051_v9 = vmax.f32 %v2049_v29, %v4368_v56  ;;  %v2871_v60 = vpop.f32.mrb[78].mxu0  ;;  %v2045_v39 = vsel %vm1850_vm4, %v1741_v23, -inf  ;;  %v3018_v51 = vpop.f32.mrb[78].mxu1  ;;  %v4613_v10 = vsel %vm1850_vm4, %v4952_v57, -inf }
 0x178   :  { %2322 = vst.msk [vmem:[%s4872_s3 + $0xb8] sm:$0xff] %vm1850_vm4, %v2273_v31  ;;  %v2226_v1 = vadd.f32 %v4224_v42, %v2032_v15  ;;  %v2062_v21 = vsel %vm1850_vm4, %v2871_v60, -inf  ;;  %v2044_v27 = vmax.f32 %v2042_v34, %v4953_v61  ;;  %v1261_v56 = vpop.f32.mrb[79].mxu0  ;;  %v1751_v24 = vpop.f32.mrb[79].mxu1  ;;  %v2066_v36 = vsel %vm1850_vm4, %v3018_v51, -inf  ;;  %v4956_v34 = vld [vmem:[#allocation30_spill] sm:$0xff] }
 0x179   :  { %v2276_v30 = vmax.f32 %v2227_v40, 0.0  ;;  %v2053_v43 = vmax.f32 %v2051_v9, %v2052_v44  ;;  %v2063_v63 = vmax.f32 %v4405_v7, %v2062_v21  ;;  %v2055_v12 = vsel %vm1850_vm4, %v1261_v56, -inf }
 0x17a   :  { %v2275_v16 = vmax.f32 %v2226_v1, 0.0  ;;  %v2046_v33 = vmax.f32 %v2044_v27, %v2045_v39  ;;  %v2056_v17 = vmax.f32 %v4327_v47, %v2055_v12  ;;  %v4628_v35 = vsel %vm1850_vm4, %v4954_v0, -inf  ;;  %v4955_v47 = vld [vmem:[#allocation29_spill] sm:$0xff]  ;;  %v4958_v12 = vld [vmem:[#allocation32_spill] sm:$0xff] }
 0x17b   :  { %2325 = vst.msk [vmem:[%s4872_s3 + $0xd0] sm:$0xff] %vm1850_vm4, %v2276_v30  ;;  %v2229_v62 = vadd.f32 %v4224_v42, %v2053_v43  ;;  %v2065_v7 = vmax.f32 %v2063_v63, %v4420_v48  ;;  %v2874_v32 = vpop.f32.mrb[80].mxu0  ;;  %v2059_v4 = vsel %vm1850_vm4, %v1751_v24, -inf  ;;  %v3021_v20 = vpop.f32.mrb[80].mxu1  ;;  %v4639_v26 = vsel %vm1850_vm4, %v4955_v47, -inf }
 0x17c   :  { %2324 = vst.msk [vmem:[%s4872_s3 + $0xc8] sm:$0xff] %vm1850_vm4, %v2275_v16  ;;  %v2228_v52 = vadd.f32 %v4224_v42, %v2046_v33  ;;  %v2076_v59 = vsel %vm1850_vm4, %v2874_v32, -inf  ;;  %v2058_v37 = vmax.f32 %v2056_v17, %v4342_v49  ;;  %v1271_v48 = vpop.f32.mrb[81].mxu0  ;;  %v1761_v18 = vpop.f32.mrb[81].mxu1  ;;  %v2080_v15 = vsel %vm1850_vm4, %v3021_v20, -inf }
 0x17d   :  { %v2278_v53 = vmax.f32 %v2229_v62, 0.0  ;;  %v2067_v23 = vmax.f32 %v2065_v7, %v2066_v36  ;;  %v2077_v55 = vmax.f32 %v4457_v6, %v2076_v59  ;;  %v2069_v46 = vsel %vm1850_vm4, %v1271_v48, -inf }
 0x17e   :  { %v2277_v29 = vmax.f32 %v2228_v52, 0.0  ;;  %v2060_v3 = vmax.f32 %v2058_v37, %v2059_v4  ;;  %v2070_v31 = vmax.f32 %v4379_v13, %v2069_v46  ;;  %v4654_v44 = vsel %vm1850_vm4, %v4956_v34, -inf  ;;  %v4957_v13 = vld [vmem:[#allocation31_spill] sm:$0xff] }
 0x17f   :  { %2327 = vst.msk [vmem:[%s4872_s3 + $0xe0] sm:$0xff] %vm1850_vm4, %v2278_v53  ;;  %v2231_v49 = vadd.f32 %v4224_v42, %v2067_v23  ;;  %v2079_v6 = vmax.f32 %v2077_v55, %v4472_v50  ;;  %v2877_v54 = vpop.f32.mrb[82].mxu0  ;;  %v2073_v40 = vsel %vm1850_vm4, %v1761_v18, -inf  ;;  %v3024_v9 = vpop.f32.mrb[82].mxu1  ;;  %v4665_v60 = vsel %vm1850_vm4, %v4957_v13, -inf  ;;  %v4960_v23 = vld [vmem:[#allocation34_spill] sm:$0xff] }
 0x180   :  { %2326 = vst.msk [vmem:[%s4872_s3 + $0xd8] sm:$0xff] %vm1850_vm4, %v2277_v29  ;;  %v2230_v39 = vadd.f32 %v4224_v42, %v2060_v3  ;;  %v2090_v51 = vsel %vm1850_vm4, %v2877_v54, -inf  ;;  %v2072_v57 = vmax.f32 %v2070_v31, %v4394_v5  ;;  %v1281_v50 = vpop.f32.mrb[83].mxu0  ;;  %v1771_v1 = vpop.f32.mrb[83].mxu1  ;;  %v2094_v63 = vsel %vm1850_vm4, %v3024_v9, -inf }
 0x181   :  { %v2280_v21 = vmax.f32 %v2231_v49, 0.0  ;;  %v2081_v61 = vmax.f32 %v2079_v6, %v2080_v15  ;;  %v2091_v27 = vmax.f32 %v4509_v19, %v2090_v51  ;;  %v2083_v56 = vsel %vm1850_vm4, %v1281_v50, -inf }
 0x182   :  { %v2279_v24 = vmax.f32 %v2230_v39, 0.0  ;;  %v2074_v30 = vmax.f32 %v2072_v57, %v2073_v40  ;;  %v2084_v43 = vmax.f32 %v4431_v14, %v2083_v56  ;;  %v4680_v16 = vsel %vm1850_vm4, %v4958_v12, -inf  ;;  %v4959_v14 = vld [vmem:[#allocation33_spill] sm:$0xff] }
 0x183   :  { %2329 = vst.msk [vmem:[%s4872_s3 + $0xf0] sm:$0xff] %vm1850_vm4, %v2280_v21  ;;  %v2233_v5 = vadd.f32 %v4224_v42, %v2081_v61  ;;  %v2093_v19 = vmax.f32 %v2091_v27, %v4524_v58  ;;  %v2880_v33 = vpop.f32.mrb[84].mxu0  ;;  %v2087_v17 = vsel %vm1850_vm4, %v1771_v1, -inf  ;;  %v3027_v36 = vpop.f32.mrb[84].mxu1  ;;  %v4691_v0 = vsel %vm1850_vm4, %v4959_v14, -inf  ;;  %v4962_v1 = vld [vmem:[#allocation36_spill] sm:$0xff] }
 0x184   :  { %2328 = vst.msk [vmem:[%s4872_s3 + $0xe8] sm:$0xff] %vm1850_vm4, %v2279_v24  ;;  %v2232_v62 = vadd.f32 %v4224_v42, %v2074_v30  ;;  %v2104_v7 = vsel %vm1850_vm4, %v2880_v33, -inf  ;;  %v2086_v32 = vmax.f32 %v2084_v43, %v4446_v2  ;;  %v1291_v58 = vpop.f32.mrb[85].mxu0  ;;  %v1781_v4 = vpop.f32.mrb[85].mxu1  ;;  %v2108_v53 = vsel %vm1850_vm4, %v3027_v36, -inf  ;;  %v4963_v24 = vld [vmem:[#allocation37_spill] sm:$0xff] }
 0x185   :  { %v2282_v20 = vmax.f32 %v2233_v5, 0.0  ;;  %v2095_v47 = vmax.f32 %v2093_v19, %v2094_v63  ;;  %v2105_v52 = vmax.f32 %v4561_v38, %v2104_v7  ;;  %v2097_v59 = vsel %vm1850_vm4, %v1291_v58, -inf }
 0x186   :  { %v2281_v37 = vmax.f32 %v2232_v62, 0.0  ;;  %v2088_v48 = vmax.f32 %v2086_v32, %v2087_v17  ;;  %v2098_v18 = vmax.f32 %v4483_v11, %v2097_v59  ;;  %v4706_v55 = vsel %vm1850_vm4, %v4960_v23, -inf  ;;  %v4961_v11 = vld [vmem:[#allocation35_spill] sm:$0xff]  ;;  %v4964_v32 = vld [vmem:[#allocation38_spill] sm:$0xff] }
 0x187   :  { %2331 = vst.msk [vmem:[%s4872_s3 + $0x100] sm:$0xff] %vm1850_vm4, %v2282_v20  ;;  %v2235_v2 = vadd.f32 %v4224_v42, %v2095_v47  ;;  %v2107_v38 = vmax.f32 %v2105_v52, %v4576_v22  ;;  %v2883_v46 = vpop.f32.mrb[86].mxu0  ;;  %v2101_v29 = vsel %vm1850_vm4, %v1781_v4, -inf  ;;  %v3030_v3 = vpop.f32.mrb[86].mxu1  ;;  %v4717_v31 = vsel %vm1850_vm4, %v4961_v11, -inf }
 0x188   :  { %2330 = vst.msk [vmem:[%s4872_s3 + $0xf8] sm:$0xff] %vm1850_vm4, %v2281_v37  ;;  %v2234_v15 = vadd.f32 %v4224_v42, %v2088_v48  ;;  %v2118_v34 = vsel %vm1850_vm4, %v2883_v46, -inf  ;;  %v2100_v49 = vmax.f32 %v2098_v18, %v4498_v25  ;;  %v1301_v22 = vpop.f32.mrb[87].mxu0  ;;  %v1791_v6 = vpop.f32.mrb[87].mxu1  ;;  %v2122_v50 = vsel %vm1850_vm4, %v3030_v3, -inf }
 0x189   :  { %v2284_v54 = vmax.f32 %v2235_v2, 0.0  ;;  %v2109_v40 = vmax.f32 %v2107_v38, %v2108_v53  ;;  %v2119_v9 = vmax.f32 %v4613_v10, %v2118_v34  ;;  %v2111_v13 = vsel %vm1850_vm4, %v1301_v22, -inf }
 0x18a   :  { %v2283_v39 = vmax.f32 %v2234_v15, 0.0  ;;  %v2102_v51 = vmax.f32 %v2100_v49, %v2101_v29  ;;  %v2112_v57 = vmax.f32 %v4535_v8, %v2111_v13  ;;  %v2148_v21 = vsel %vm1850_vm4, %v4962_v1, -inf  ;;  %v4966_v15 = vld [vmem:[#allocation40_spill] sm:$0xff] }
 0x18b   :  { %2333 = vst.msk [vmem:[%s4872_s3 + $0x110] sm:$0xff] %vm1850_vm4, %v2284_v54  ;;  %v2237_v25 = vadd.f32 %v4224_v42, %v2109_v40  ;;  %v2121_v10 = vmax.f32 %v2119_v9, %v4628_v35  ;;  %v2886_v61 = vpop.f32.mrb[88].mxu0  ;;  %v2115_v27 = vsel %vm1850_vm4, %v1791_v6, -inf  ;;  %v3033_v56 = vpop.f32.mrb[88].mxu1  ;;  %v4741_v8 = vsel %vm1850_vm4, %v4963_v24, -inf  ;;  %v4967_v54 = vld [vmem:[#allocation41_spill] sm:$0xff] }
 0x18c   :  { %2332 = vst.msk [vmem:[%s4872_s3 + $0x108] sm:$0xff] %vm1850_vm4, %v2283_v39  ;;  %v2236_v30 = vadd.f32 %v4224_v42, %v2102_v51  ;;  %v2132_v43 = vsel %vm1850_vm4, %v2886_v61, -inf  ;;  %v2114_v63 = vmax.f32 %v2112_v57, %v4550_v45  ;;  %v1311_v35 = vpop.f32.mrb[89].mxu0  ;;  %v1801_v12 = vpop.f32.mrb[89].mxu1  ;;  %v2136_v7 = vsel %vm1850_vm4, %v3033_v56, -inf  ;;  %v4968_v56 = vld [vmem:[#allocation43_spill] sm:$0xff] }
 0x18d   :  { %v2286_v5 = vmax.f32 %v2237_v25, 0.0  ;;  %v2123_v19 = vmax.f32 %v2121_v10, %v2122_v50  ;;  %v2133_v33 = vmax.f32 %v4665_v60, %v2132_v43  ;;  %v2125_v17 = vsel %vm1850_vm4, %v1311_v35, -inf }
 0x18e   :  { %v2285_v36 = vmax.f32 %v2236_v30, 0.0  ;;  %v2116_v14 = vmax.f32 %v2114_v63, %v2115_v27  ;;  %v2126_v62 = vmax.f32 %v4587_v41, %v2125_v17  ;;  %v4756_v58 = vsel %vm1850_vm4, %v4964_v32, -inf  ;;  %v4965_v41 = vld [vmem:[#allocation39_spill] sm:$0xff] }
 0x18f   :  { %2335 = vst.msk [vmem:[%s4872_s3 + $0x120] sm:$0xff] %vm1850_vm4, %v2286_v5  ;;  %v2239_v45 = vadd.f32 %v4224_v42, %v2123_v19  ;;  %v2135_v60 = vmax.f32 %v2133_v33, %v4680_v16  ;;  %v2889_v4 = vpop.f32.mrb[90].mxu0  ;;  %v2129_v20 = vsel %vm1850_vm4, %v1801_v12, -inf  ;;  %v3036_v47 = vpop.f32.mrb[90].mxu1  ;;  %v2159_v52 = vsel %vm1850_vm4, %v4965_v41, -inf  ;;  %v4969_v12 = vld [vmem:[#allocation44_spill] sm:$0xff] }
 0x190   :  { %2334 = vst.msk [vmem:[%s4872_s3 + $0x118] sm:$0xff] %vm1850_vm4, %v2285_v36  ;;  %v2238_v59 = vadd.f32 %v4224_v42, %v2116_v14  ;;  %v2146_v37 = vsel %vm1850_vm4, %v2889_v4, -inf  ;;  %v2128_v48 = vmax.f32 %v2126_v62, %v4602_v28  ;;  %v1321_v18 = vpop.f32.mrb[91].mxu0  ;;  %v1811_v16 = vpop.f32.mrb[91].mxu1  ;;  %v2150_v11 = vsel %vm1850_vm4, %v3036_v47, -inf  ;;  %v4970_v47 = vld [vmem:[#allocation45_spill] sm:$0xff] }
 0x191   :  { %v2288_v53 = vmax.f32 %v2239_v45, 0.0  ;;  %v2137_v23 = vmax.f32 %v2135_v60, %v2136_v7  ;;  %v2147_v2 = vmax.f32 %v4717_v31, %v2146_v37  ;;  %v2139_v38 = vsel %vm1850_vm4, %v1321_v18, -inf  ;;  %v4971_v18 = vld [vmem:[#allocation46_spill] sm:$0xff] }
 0x192   :  { %v2287_v46 = vmax.f32 %v2238_v59, 0.0  ;;  %v2130_v29 = vmax.f32 %v2128_v48, %v2129_v20  ;;  %v2140_v3 = vmax.f32 %v4639_v26, %v2139_v38  ;;  %v2162_v34 = vsel %vm1850_vm4, %v4966_v15, -inf }
 0x193   :  { %2337 = vst.msk [vmem:[%s4872_s3 + $0x130] sm:$0xff] %vm1850_vm4, %v2288_v53  ;;  %v2241_v28 = vadd.f32 %v4224_v42, %v2137_v23  ;;  %v2149_v49 = vmax.f32 %v2147_v2, %v2148_v21  ;;  %v2892_v31 = vpop.f32.mrb[92].mxu0  ;;  %v2143_v22 = vsel %vm1850_vm4, %v1811_v16, -inf  ;;  %v3039_v6 = vpop.f32.mrb[92].mxu1  ;;  %v4788_v26 = vsel %vm1850_vm4, %v4967_v54, -inf }
 0x194   :  { %2336 = vst.msk [vmem:[%s4872_s3 + $0x128] sm:$0xff] %vm1850_vm4, %v2287_v46  ;;  %v2240_v40 = vadd.f32 %v4224_v42, %v2130_v29  ;;  %v2160_v9 = vsel %vm1850_vm4, %v2892_v31, -inf  ;;  %v2142_v13 = vmax.f32 %v2140_v3, %v4654_v44  ;;  %v1331_v39 = vpop.f32.mrb[93].mxu0  ;;  %v1821_v51 = vpop.f32.mrb[93].mxu1  ;;  %v2164_v27 = vsel %vm1850_vm4, %v3039_v6, -inf  ;;  %v4972_v31 = vld [vmem:[#allocation42_spill] sm:$0xff] }
 0x195   :  { %v2290_v57 = vmax.f32 %v2241_v28, 0.0  ;;  %v2151_v50 = vmax.f32 %v2149_v49, %v2150_v11  ;;  %v2161_v1 = vmax.f32 %v2159_v52, %v2160_v9  ;;  %v2153_v21 = vsel %vm1850_vm4, %v1331_v39, -inf  ;;  %v3055_v16 = vld [vmem:[%s4871_s2] ss:$0 sm:$0xff] }
 0x196   :  { %v2289_v25 = vmax.f32 %v2240_v40, 0.0  ;;  %v2144_v10 = vmax.f32 %v2142_v13, %v2143_v22  ;;  %v2154_v61 = vmax.f32 %v4691_v0, %v2153_v21  ;;  %v2173_v24 = vsel %vm1850_vm4, %v4968_v56, -inf }
 0x197   :  { %2339 = vst.msk [vmem:[%s4872_s3 + $0x140] sm:$0xff] %vm1850_vm4, %v2290_v57  ;;  %v2243_v44 = vadd.f32 %v4224_v42, %v2151_v50  ;;  %v2163_v30 = vmax.f32 %v2161_v1, %v2162_v34  ;;  %v2895_v43 = vpop.f32.mrb[94].mxu0  ;;  %v2157_v63 = vsel %vm1850_vm4, %v1821_v51, -inf  ;;  %v3042_v35 = vpop.f32.mrb[94].mxu1  ;;  %v2176_v0 = vsel %vm1850_vm4, %v4969_v12, -inf }
 0x198   :  { %2338 = vst.msk [vmem:[%s4872_s3 + $0x138] sm:$0xff] %vm1850_vm4, %v2289_v25  ;;  %v2242_v5 = vadd.f32 %v4224_v42, %v2144_v10  ;;  %v2174_v19 = vsel %vm1850_vm4, %v2895_v43, -inf  ;;  %v2156_v33 = vmax.f32 %v2154_v61, %v4706_v55  ;;  %v1341_v17 = vpop.f32.mrb[95].mxu0  ;;  %v1831_v36 = vpop.f32.mrb[95].mxu1  ;;  %v2178_v20 = vsel %vm1850_vm4, %v3042_v35, -inf }
 0x199   :  { %v2292_v14 = vmax.f32 %v2243_v44, 0.0  ;;  %v2165_v62 = vmax.f32 %v2163_v30, %v2164_v27  ;;  %v2175_v7 = vmax.f32 %v2173_v24, %v2174_v19  ;;  %v2167_v32 = vsel %vm1850_vm4, %v1341_v17, -inf }
 0x19a   :  { %v2291_v45 = vmax.f32 %v2242_v5, 0.0  ;;  %v2158_v60 = vmax.f32 %v2156_v33, %v2157_v63  ;;  %v2168_v4 = vmax.f32 %v4741_v8, %v2167_v32  ;;  %v2187_v41 = vsel %vm1850_vm4, %v4970_v47, -inf }
 0x19b   :  { %2341 = vst.msk [vmem:[%s4872_s3 + $0x150] sm:$0xff] %vm1850_vm4, %v2292_v14  ;;  %v2245_v55 = vadd.f32 %v4224_v42, %v2165_v62  ;;  %v2177_v52 = vmax.f32 %v2175_v7, %v2176_v0  ;;  %v2898_v59 = vpop.f32.mrb[96].mxu0  ;;  %v2171_v37 = vsel %vm1850_vm4, %v1831_v36, -inf  ;;  %v3045_v48 = vpop.f32.mrb[96].mxu1  ;;  %v2190_v8 = vsel %vm1850_vm4, %v4971_v18, -inf }
 0x19c   :  { %2340 = vst.msk [vmem:[%s4872_s3 + $0x148] sm:$0xff] %vm1850_vm4, %v2291_v45  ;;  %v2244_v53 = vadd.f32 %v3055_v16, %v2158_v60  ;;  %v2188_v42 = vsel %vm1850_vm4, %v2898_v59, -inf  ;;  %v2170_v23 = vmax.f32 %v2168_v4, %v4756_v58  ;;  %v1351_v2 = vpop.f32.mrb[97].mxu0  ;;  %v1841_v38 = vpop.f32.mrb[97].mxu1  ;;  %v2192_v49 = vsel %vm1850_vm4, %v3045_v48, -inf }
 0x19d   :  { %v2294_v46 = vmax.f32 %v2245_v55, 0.0  ;;  %v2179_v29 = vmax.f32 %v2177_v52, %v2178_v20  ;;  %v2189_v3 = vmax.f32 %v2187_v41, %v2188_v42  ;;  %v2181_v11 = vsel %vm1850_vm4, %v1351_v2, -inf }
 0x19e   :  { %v2293_v15 = vmax.f32 %v2244_v53, 0.0  ;;  %v2172_v34 = vmax.f32 %v2170_v23, %v2171_v37  ;;  %v2182_v28 = vmax.f32 %v4788_v26, %v2181_v11  ;;  %v2183_v22 = vsel %vm1850_vm4, %v4972_v31, -inf }
 0x19f   :  { %2343 = vst.msk [vmem:[%s4872_s3 + $0x160] sm:$0xff] %vm1850_vm4, %v2294_v46  ;;  %v2247_v58 = vadd.f32 %v3055_v16, %v2179_v29  ;;  %v2191_v6 = vmax.f32 %v2189_v3, %v2190_v8  ;;  %v2185_v54 = vsel %vm1850_vm4, %v1841_v38, -inf }
 0x1a0   :  { %2342 = vst.msk [vmem:[%s4872_s3 + $0x158] sm:$0xff] %vm1850_vm4, %v2293_v15  ;;  %v2246_v26 = vadd.f32 %v3055_v16, %v2172_v34  ;;  %v2184_v40 = vmax.f32 %v2182_v28, %v2183_v22 }
 0x1a1   :  { %v2296_v9 = vmax.f32 %v2247_v58, 0.0  ;;  %v2193_v13 = vmax.f32 %v2191_v6, %v2192_v49 }
 0x1a2   :  { %v2295_v39 = vmax.f32 %v2246_v26, 0.0  ;;  %v2186_v51 = vmax.f32 %v2184_v40, %v2185_v54 }
 0x1a3   :  { %2345 = vst.msk [vmem:[%s4872_s3 + $0x170] sm:$0xff] %vm1850_vm4, %v2296_v9  ;;  %v2249_v57 = vadd.f32 %v3055_v16, %v2193_v13 }
 0x1a4   :  { %2344 = vst.msk [vmem:[%s4872_s3 + $0x168] sm:$0xff] %vm1850_vm4, %v2295_v39  ;;  %v2248_v50 = vadd.f32 %v3055_v16, %v2186_v51 }
 0x1a5   :  { %v2298_v1 = vmax.f32 %v2249_v57, 0.0 }
 0x1a6   :  { %v2297_v21 = vmax.f32 %v2248_v50, 0.0 }
 0x1a7   :  { %2347 = vst.msk [vmem:[%s4872_s3 + $0x180] sm:$0xff] %vm1850_vm4, %v2298_v1 }
 0x1a8   :  { %2346 = vst.msk [vmem:[%s4872_s3 + $0x178] sm:$0xff] %vm1850_vm4, %v2297_v21 }

// kernel: mnist_cnn_forward.5
= control target key start
LH: loop header
LB: loop body
LE: loop exit
PB: predicated region body
PF: predicated region fallthrough
CT: control target
= control target key end

     0   :  { %vm2602_vm0 = vmmov 0   ;;  %s4119_s1 = inlined_call_operand.vmem [shape: f32[3584,128], index: 1, kind: input, shape index: {}]   ;;  %s4120_s0 = inlined_call_operand.vmem [shape: f32[8,3584], index: 0, kind: input, shape index: {}]   ;;  %s4121_s2 = inlined_call_operand.vmem [shape: f32[1,128], index: 2, kind: input, shape index: {}]   ;;  %s4122_s3 = inlined_call_operand.vmem [shape: f32[128,128], index: 3, kind: input, shape index: {}]   ;;  %s4123_s4 = inlined_call_operand.vmem [shape: f32[1,128], index: 4, kind: input, shape index: {}]   ;;  %s4124_s5 = inlined_call_operand.vmem [shape: f32[8,128], index: 5, kind: output, shape index: {}]  }
   0x1   :  { %v64_v0 = vld [vmem:[%s4119_s1 + $0x80] sm:$0xff]  ;;  %v65_v1 = vld [vmem:[%s4119_s1 + $0x88] sm:$0xff]  ;;  %v66_v11 = vld [vmem:[%s4119_s1 + $0x90] sm:$0xff] }
   0x2   :  { %v48_v2 = vld [vmem:[%s4119_s1] sm:$0xff]  ;;  %v2126_v3 = vpack.c.bf16 %v65_v1, %v64_v0  ;;  %v49_v4 = vld [vmem:[%s4119_s1 + $0x8] sm:$0xff]  ;;  %v67_v13 = vld [vmem:[%s4119_s1 + $0x98] sm:$0xff] }
   0x3   :  { %v96_v5 = vld [vmem:[%s4119_s1 + $0x180] sm:$0xff]  ;;  %v97_v6 = vld [vmem:[%s4119_s1 + $0x188] sm:$0xff]  ;;  %v2128_v7 = vpack.c.bf16 %v49_v4, %v48_v2  ;;  %v50_v14 = vld [vmem:[%s4119_s1 + $0x10] sm:$0xff]  ;;  %v2130_v16 = vpack.c.bf16 %v67_v13, %v66_v11 }
   0x4   :  { %v2158_v8 = vpack.c.bf16 %v97_v6, %v96_v5  ;;  %v80_v9 = vld [vmem:[%s4119_s1 + $0x100] sm:$0xff]  ;;  %v81_v10 = vld [vmem:[%s4119_s1 + $0x108] sm:$0xff]  ;;  %2127 = vmatprep.subr.bf16.mxu0 %v2126_v3  ;;  %v51_v15 = vld [vmem:[%s4119_s1 + $0x18] sm:$0xff] }
   0x5   :  { %v2160_v12 = vpack.c.bf16 %v81_v10, %v80_v9  ;;  %2129 = vmatpush3.bf16.msra.mxu0 %v2128_v7  ;;  %v2132_v17 = vpack.c.bf16 %v51_v15, %v50_v14  ;;  %v98_v18 = vld [vmem:[%s4119_s1 + $0x190] sm:$0xff]  ;;  %v99_v19 = vld [vmem:[%s4119_s1 + $0x198] sm:$0xff]  ;;  %v68_v23 = vld [vmem:[%s4119_s1 + $0xa0] sm:$0xff] }
   0x6   :  { %2159 = vmatprep.subr.bf16.mxu1 %v2158_v8  ;;  %v82_v20 = vld [vmem:[%s4119_s1 + $0x110] sm:$0xff]  ;;  %v2162_v21 = vpack.c.bf16 %v99_v19, %v98_v18  ;;  %v83_v22 = vld [vmem:[%s4119_s1 + $0x118] sm:$0xff]  ;;  %v69_v24 = vld [vmem:[%s4119_s1 + $0xa8] sm:$0xff]  ;;  %2131 = vmatprep.subr.bf16.mxu0 %v2130_v16 }
   0x7   :  { %2161 = vmatpush3.bf16.msra.mxu1 %v2160_v12  ;;  %v2164_v25 = vpack.c.bf16 %v83_v22, %v82_v20  ;;  %v2134_v26 = vpack.c.bf16 %v69_v24, %v68_v23  ;;  %v52_v27 = vld [vmem:[%s4119_s1 + $0x20] sm:$0xff]  ;;  %v53_v28 = vld [vmem:[%s4119_s1 + $0x28] sm:$0xff]  ;;  %v70_v35 = vld [vmem:[%s4119_s1 + $0xb0] sm:$0xff] }
   0x8   :  { %v100_v29 = vld [vmem:[%s4119_s1 + $0x1a0] sm:$0xff]  ;;  %2163 = vmatprep.subr.bf16.mxu1 %v2162_v21  ;;  %v101_v30 = vld [vmem:[%s4119_s1 + $0x1a8] sm:$0xff]  ;;  %v2136_v33 = vpack.c.bf16 %v53_v28, %v52_v27  ;;  %v71_v36 = vld [vmem:[%s4119_s1 + $0xb8] sm:$0xff] }
   0x9   :  { %v84_v31 = vld [vmem:[%s4119_s1 + $0x120] sm:$0xff]  ;;  %v85_v32 = vld [vmem:[%s4119_s1 + $0x128] sm:$0xff]  ;;  %2133 = vmatpush3.bf16.msra.mxu0 %v2132_v17  ;;  %v2166_v34 = vpack.c.bf16 %v101_v30, %v100_v29  ;;  %v54_v37 = vld [vmem:[%s4119_s1 + $0x30] sm:$0xff]  ;;  %v2138_v39 = vpack.c.bf16 %v71_v36, %v70_v35 }
   0xa   :  { %2135 = vmatprep.subr.bf16.mxu0 %v2134_v26  ;;  %v2168_v38 = vpack.c.bf16 %v85_v32, %v84_v31  ;;  %v55_v40 = vld [vmem:[%s4119_s1 + $0x38] sm:$0xff]  ;;  %v102_v41 = vld [vmem:[%s4119_s1 + $0x1b0] sm:$0xff]  ;;  %v72_v46 = vld [vmem:[%s4119_s1 + $0xc0] sm:$0xff] }
   0xb   :  { %2165 = vmatpush3.bf16.msra.mxu1 %v2164_v25  ;;  %v103_v42 = vld [vmem:[%s4119_s1 + $0x1b8] sm:$0xff]  ;;  %v86_v44 = vld [vmem:[%s4119_s1 + $0x130] sm:$0xff]  ;;  %v73_v47 = vld [vmem:[%s4119_s1 + $0xc8] sm:$0xff]  ;;  %v2140_v48 = vpack.c.bf16 %v55_v40, %v54_v37 }
   0xc   :  { %2167 = vmatprep.subr.bf16.mxu1 %v2166_v34  ;;  %v2170_v43 = vpack.c.bf16 %v103_v42, %v102_v41  ;;  %v87_v45 = vld [vmem:[%s4119_s1 + $0x138] sm:$0xff]  ;;  %v104_v49 = vld [vmem:[%s4119_s1 + $0x1c0] sm:$0xff]  ;;  %v105_v50 = vld [vmem:[%s4119_s1 + $0x1c8] sm:$0xff]  ;;  %v2142_v52 = vpack.c.bf16 %v73_v47, %v72_v46 }
   0xd   :  { %2137 = vmatpush3.bf16.msra.mxu0 %v2136_v33  ;;  %v2172_v51 = vpack.c.bf16 %v87_v45, %v86_v44  ;;  %v56_v53 = vld [vmem:[%s4119_s1 + $0x40] sm:$0xff]  ;;  %v57_v54 = vld [vmem:[%s4119_s1 + $0x48] sm:$0xff]  ;;  %v2174_v56 = vpack.c.bf16 %v105_v50, %v104_v49  ;;  %v74_v58 = vld [vmem:[%s4119_s1 + $0xd0] sm:$0xff] }
   0xe   :  { %2139 = vmatprep.subr.bf16.mxu0 %v2138_v39  ;;  %v88_v55 = vld [vmem:[%s4119_s1 + $0x140] sm:$0xff]  ;;  %v89_v57 = vld [vmem:[%s4119_s1 + $0x148] sm:$0xff]  ;;  %v75_v59 = vld [vmem:[%s4119_s1 + $0xd8] sm:$0xff]  ;;  %v2144_v62 = vpack.c.bf16 %v57_v54, %v56_v53 }
   0xf   :  { %2169 = vmatpush3.bf16.msra.mxu1 %v2168_v38  ;;  %v106_v60 = vld [vmem:[%s4119_s1 + $0x1d0] sm:$0xff]  ;;  %v107_v61 = vld [vmem:[%s4119_s1 + $0x1d8] sm:$0xff]  ;;  %v2176_v63 = vpack.c.bf16 %v89_v57, %v88_v55  ;;  %v2146_v0 = vpack.c.bf16 %v75_v59, %v74_v58  ;;  %v76_v6 = vld [vmem:[%s4119_s1 + $0xe0] sm:$0xff] }
  0x10   :  { %2171 = vmatprep.subr.bf16.mxu1 %v2170_v43  ;;  %v58_v1 = vld [vmem:[%s4119_s1 + $0x50] sm:$0xff]  ;;  %v59_v2 = vld [vmem:[%s4119_s1 + $0x58] sm:$0xff]  ;;  %v2178_v4 = vpack.c.bf16 %v107_v61, %v106_v60  ;;  %v77_v7 = vld [vmem:[%s4119_s1 + $0xe8] sm:$0xff] }
  0x11   :  { %2141 = vmatpush3.bf16.msra.mxu0 %v2140_v48  ;;  %v90_v3 = vld [vmem:[%s4119_s1 + $0x150] sm:$0xff]  ;;  %v91_v5 = vld [vmem:[%s4119_s1 + $0x158] sm:$0xff]  ;;  %v108_v8 = vld [vmem:[%s4119_s1 + $0x1e0] sm:$0xff]  ;;  %v2148_v10 = vpack.c.bf16 %v59_v2, %v58_v1  ;;  %v2150_v14 = vpack.c.bf16 %v77_v7, %v76_v6 }
  0x12   :  { %2143 = vmatprep.subr.bf16.mxu0 %v2142_v52  ;;  %v109_v9 = vld [vmem:[%s4119_s1 + $0x1e8] sm:$0xff]  ;;  %v60_v11 = vld [vmem:[%s4119_s1 + $0x60] sm:$0xff]  ;;  %v2180_v13 = vpack.c.bf16 %v91_v5, %v90_v3  ;;  %v78_v19 = vld [vmem:[%s4119_s1 + $0xf0] sm:$0xff] }
  0x13   :  { %2173 = vmatpush3.bf16.msra.mxu1 %v2172_v51  ;;  %v61_v12 = vld [vmem:[%s4119_s1 + $0x68] sm:$0xff]  ;;  %v92_v15 = vld [vmem:[%s4119_s1 + $0x160] sm:$0xff]  ;;  %v2182_v18 = vpack.c.bf16 %v109_v9, %v108_v8  ;;  %v79_v20 = vld [vmem:[%s4119_s1 + $0xf8] sm:$0xff] }
  0x14   :  { %2175 = vmatprep.subr.bf16.mxu1 %v2174_v56  ;;  %v93_v16 = vld [vmem:[%s4119_s1 + $0x168] sm:$0xff]  ;;  %v23_v21 = vld [vmem:[%s4120_s0 + $0x18] sm:$0xff]  ;;  %v110_v22 = vld [vmem:[%s4119_s1 + $0x1f0] sm:$0xff]  ;;  %v2152_v24 = vpack.c.bf16 %v61_v12, %v60_v11  ;;  %v2154_v26 = vpack.c.bf16 %v79_v20, %v78_v19 }
  0x15   :  { %2145 = vmatpush3.bf16.msra.mxu0 %v2144_v62  ;;  %v21_v17 = vld [vmem:[%s4120_s0 + $0x8] sm:$0xff]  ;;  %v111_v23 = vld [vmem:[%s4119_s1 + $0x1f8] sm:$0xff]  ;;  %637 = vmatprep.mubr.f32.mxu1 %v23_v21  ;;  %v2184_v25 = vpack.c.bf16 %v93_v16, %v92_v15  ;;  %v62_v27 = vld [vmem:[%s4119_s1 + $0x70] sm:$0xff] }
  0x16   :  { %2147 = vmatprep.subr.bf16.mxu0 %v2146_v0  ;;  %567 = vmatprep.mubr.f32.mxu0 %v21_v17  ;;  %v63_v28 = vld [vmem:[%s4119_s1 + $0x78] sm:$0xff]  ;;  %v94_v29 = vld [vmem:[%s4119_s1 + $0x170] sm:$0xff]  ;;  %v2186_v30 = vpack.c.bf16 %v111_v23, %v110_v22  ;;  %v128_v32 = vld [vmem:[%s4119_s1 + $0x280] sm:$0xff] }
  0x17   :  { %2177 = vmatpush3.bf16.msra.mxu1 %v2176_v63  ;;  %v95_v31 = vld [vmem:[%s4119_s1 + $0x178] sm:$0xff]  ;;  %v129_v33 = vld [vmem:[%s4119_s1 + $0x288] sm:$0xff]  ;;  %v160_v34 = vld [vmem:[%s4119_s1 + $0x380] sm:$0xff]  ;;  %v2156_v36 = vpack.c.bf16 %v63_v28, %v62_v27 }
  0x18   :  { %2179 = vmatprep.subr.bf16.mxu1 %v2178_v4  ;;  %v161_v35 = vld [vmem:[%s4119_s1 + $0x388] sm:$0xff]  ;;  %v2188_v37 = vpack.c.bf16 %v95_v31, %v94_v29  ;;  %v2190_v38 = vpack.c.bf16 %v129_v33, %v128_v32  ;;  %v112_v39 = vld [vmem:[%s4119_s1 + $0x200] sm:$0xff]  ;;  %v130_v44 = vld [vmem:[%s4119_s1 + $0x290] sm:$0xff] }
  0x19   :  { %2149 = vmatpush3.bf16.msra.mxu0 %v2148_v10  ;;  %v113_v40 = vld [vmem:[%s4119_s1 + $0x208] sm:$0xff]  ;;  %v144_v41 = vld [vmem:[%s4119_s1 + $0x300] sm:$0xff]  ;;  %v2222_v42 = vpack.c.bf16 %v161_v35, %v160_v34  ;;  %v131_v45 = vld [vmem:[%s4119_s1 + $0x298] sm:$0xff] }
  0x1a   :  { %2151 = vmatprep.subr.bf16.mxu0 %v2150_v14  ;;  %v145_v43 = vld [vmem:[%s4119_s1 + $0x308] sm:$0xff]  ;;  %v162_v46 = vld [vmem:[%s4119_s1 + $0x390] sm:$0xff]  ;;  %v163_v47 = vld [vmem:[%s4119_s1 + $0x398] sm:$0xff]  ;;  %v2192_v49 = vpack.c.bf16 %v113_v40, %v112_v39  ;;  %v2194_v52 = vpack.c.bf16 %v131_v45, %v130_v44 }
  0x1b   :  { %2181 = vmatpush3.bf16.msra.mxu1 %v2180_v13  ;;  %v20_v48 = vld [vmem:[%s4120_s0] sm:$0xff]  ;;  %v22_v50 = vld [vmem:[%s4120_s0 + $0x10] sm:$0xff]  ;;  %v2224_v51 = vpack.c.bf16 %v145_v43, %v144_v41  ;;  %v115_v54 = vld [vmem:[%s4119_s1 + $0x218] sm:$0xff]  ;;  %v2226_v56 = vpack.c.bf16 %v163_v47, %v162_v46 }
  0x1c   :  { %2183 = vmatprep.subr.bf16.mxu1 %v2182_v18  ;;  %v114_v53 = vld [vmem:[%s4119_s1 + $0x210] sm:$0xff]  ;;  %v147_v57 = vld [vmem:[%s4119_s1 + $0x318] sm:$0xff]  ;;  %v132_v58 = vld [vmem:[%s4119_s1 + $0x2a0] sm:$0xff] }
  0x1d   :  { %2153 = vmatpush3.bf16.msra.mxu0 %v2152_v24  ;;  %v146_v55 = vld [vmem:[%s4119_s1 + $0x310] sm:$0xff]  ;;  %v133_v59 = vld [vmem:[%s4119_s1 + $0x2a8] sm:$0xff]  ;;  %v164_v60 = vld [vmem:[%s4119_s1 + $0x3a0] sm:$0xff]  ;;  %v2196_v62 = vpack.c.bf16 %v115_v54, %v114_v53 }
  0x1e   :  { %2155 = vmatprep.subr.bf16.mxu0 %v2154_v26  ;;  %v165_v61 = vld [vmem:[%s4119_s1 + $0x3a8] sm:$0xff]  ;;  %v2228_v63 = vpack.c.bf16 %v147_v57, %v146_v55  ;;  %v2198_v0 = vpack.c.bf16 %v133_v59, %v132_v58  ;;  %v116_v1 = vld [vmem:[%s4119_s1 + $0x220] sm:$0xff]  ;;  %v134_v6 = vld [vmem:[%s4119_s1 + $0x2b0] sm:$0xff] }
  0x1f   :  { %2185 = vmatpush3.bf16.msra.mxu1 %v2184_v25  ;;  %v117_v2 = vld [vmem:[%s4119_s1 + $0x228] sm:$0xff]  ;;  %v148_v3 = vld [vmem:[%s4119_s1 + $0x320] sm:$0xff]  ;;  %v2230_v4 = vpack.c.bf16 %v165_v61, %v164_v60  ;;  %v135_v7 = vld [vmem:[%s4119_s1 + $0x2b8] sm:$0xff] }
  0x20   :  { %2187 = vmatprep.subr.bf16.mxu1 %v2186_v30  ;;  %v149_v5 = vld [vmem:[%s4119_s1 + $0x328] sm:$0xff]  ;;  %v166_v8 = vld [vmem:[%s4119_s1 + $0x3b0] sm:$0xff]  ;;  %v167_v9 = vld [vmem:[%s4119_s1 + $0x3b8] sm:$0xff]  ;;  %v2200_v10 = vpack.c.bf16 %v117_v2, %v116_v1  ;;  %v2202_v12 = vpack.c.bf16 %v135_v7, %v134_v6 }
  0x21   :  { %2157 = vmatpush3.bf16.msra.mxu0 %v2156_v36  ;;  %v2232_v11 = vpack.c.bf16 %v149_v5, %v148_v3  ;;  %v118_v13 = vld [vmem:[%s4119_s1 + $0x230] sm:$0xff]  ;;  %v119_v14 = vld [vmem:[%s4119_s1 + $0x238] sm:$0xff]  ;;  %v2234_v16 = vpack.c.bf16 %v167_v9, %v166_v8  ;;  %v136_v18 = vld [vmem:[%s4119_s1 + $0x2c0] sm:$0xff] }
  0x22   :  { %2191 = vmatprep.subr.bf16.mxu0 %v2190_v38  ;;  %v150_v15 = vld [vmem:[%s4119_s1 + $0x330] sm:$0xff]  ;;  %v151_v17 = vld [vmem:[%s4119_s1 + $0x338] sm:$0xff]  ;;  %v137_v19 = vld [vmem:[%s4119_s1 + $0x2c8] sm:$0xff]  ;;  %v2204_v22 = vpack.c.bf16 %v119_v14, %v118_v13 }
  0x23   :  { %2189 = vmatpush3.bf16.msra.mxu1 %v2188_v37  ;;  %v168_v20 = vld [vmem:[%s4119_s1 + $0x3c0] sm:$0xff]  ;;  %v169_v21 = vld [vmem:[%s4119_s1 + $0x3c8] sm:$0xff]  ;;  %v2236_v25 = vpack.c.bf16 %v151_v17, %v150_v15  ;;  %v2206_v26 = vpack.c.bf16 %v137_v19, %v136_v18  ;;  %v27_v29 = vld [vmem:[%s4120_s0 + $0x38] sm:$0xff] }
  0x24   :  { %2223 = vmatprep.subr.bf16.mxu1 %v2222_v42  ;;  %568 = vmatmul.mubr.f32.vlgmr.msra.gmra.mrb[0].mxu0 %v20_v48  ;;  %v120_v23 = vld [vmem:[%s4119_s1 + $0x240] sm:$0xff]  ;;  %v25_v24 = vld [vmem:[%s4120_s0 + $0x28] sm:$0xff]  ;;  %v2238_v30 = vpack.c.bf16 %v169_v21, %v168_v20  ;;  %v138_v32 = vld [vmem:[%s4119_s1 + $0x2d0] sm:$0xff] }
  0x25   :  { %2193 = vmatpush3.bf16.msra.mxu0 %v2192_v49  ;;  %v121_v27 = vld [vmem:[%s4119_s1 + $0x248] sm:$0xff]  ;;  %v152_v28 = vld [vmem:[%s4119_s1 + $0x340] sm:$0xff]  ;;  %v139_v33 = vld [vmem:[%s4119_s1 + $0x2d8] sm:$0xff]  ;;  %707 = vmatprep.mubr.f32.mxu0 %v25_v24 }
  0x26   :  { %638 = vmatmul.mubr.f32.vlgmr.msra.gmra.mrb[0].mxu1 %v22_v50  ;;  %2195 = vmatprep.subr.bf16.mxu0 %v2194_v52  ;;  %v153_v31 = vld [vmem:[%s4119_s1 + $0x348] sm:$0xff]  ;;  %v170_v34 = vld [vmem:[%s4119_s1 + $0x3d0] sm:$0xff]  ;;  %v171_v35 = vld [vmem:[%s4119_s1 + $0x3d8] sm:$0xff]  ;;  %v2208_v36 = vpack.c.bf16 %v121_v27, %v120_v23  ;;  %v2210_v38 = vpack.c.bf16 %v139_v33, %v138_v32 }
  0x27   :  { %2225 = vmatpush3.bf16.msra.mxu1 %v2224_v51  ;;  %777 = vmatprep.mubr.f32.mxu1 %v27_v29  ;;  %v2240_v37 = vpack.c.bf16 %v153_v31, %v152_v28  ;;  %v122_v39 = vld [vmem:[%s4119_s1 + $0x250] sm:$0xff]  ;;  %v123_v40 = vld [vmem:[%s4119_s1 + $0x258] sm:$0xff]  ;;  %v2242_v42 = vpack.c.bf16 %v171_v35, %v170_v34  ;;  %v140_v44 = vld [vmem:[%s4119_s1 + $0x2e0] sm:$0xff] }
  0x28   :  { %2227 = vmatprep.subr.bf16.mxu1 %v2226_v56  ;;  %v154_v41 = vld [vmem:[%s4119_s1 + $0x350] sm:$0xff]  ;;  %v155_v43 = vld [vmem:[%s4119_s1 + $0x358] sm:$0xff]  ;;  %v141_v45 = vld [vmem:[%s4119_s1 + $0x2e8] sm:$0xff]  ;;  %v2212_v48 = vpack.c.bf16 %v123_v40, %v122_v39 }
  0x29   :  { %2197 = vmatpush3.bf16.msra.mxu0 %v2196_v62  ;;  %v172_v46 = vld [vmem:[%s4119_s1 + $0x3e0] sm:$0xff]  ;;  %v173_v47 = vld [vmem:[%s4119_s1 + $0x3e8] sm:$0xff]  ;;  %v2244_v49 = vpack.c.bf16 %v155_v43, %v154_v41  ;;  %v2214_v50 = vpack.c.bf16 %v141_v45, %v140_v44  ;;  %v142_v56 = vld [vmem:[%s4119_s1 + $0x2f0] sm:$0xff] }
  0x2a   :  { %2199 = vmatprep.subr.bf16.mxu0 %v2198_v0  ;;  %v124_v51 = vld [vmem:[%s4119_s1 + $0x260] sm:$0xff]  ;;  %v125_v52 = vld [vmem:[%s4119_s1 + $0x268] sm:$0xff]  ;;  %v2246_v54 = vpack.c.bf16 %v173_v47, %v172_v46  ;;  %v143_v57 = vld [vmem:[%s4119_s1 + $0x2f8] sm:$0xff] }
  0x2b   :  { %2229 = vmatpush3.bf16.msra.mxu1 %v2228_v63  ;;  %v156_v53 = vld [vmem:[%s4119_s1 + $0x360] sm:$0xff]  ;;  %v157_v55 = vld [vmem:[%s4119_s1 + $0x368] sm:$0xff]  ;;  %v174_v58 = vld [vmem:[%s4119_s1 + $0x3f0] sm:$0xff]  ;;  %v2216_v60 = vpack.c.bf16 %v125_v52, %v124_v51  ;;  %v2218_v62 = vpack.c.bf16 %v143_v57, %v142_v56 }
  0x2c   :  { %2231 = vmatprep.subr.bf16.mxu1 %v2230_v4  ;;  %v175_v59 = vld [vmem:[%s4119_s1 + $0x3f8] sm:$0xff]  ;;  %v2248_v61 = vpack.c.bf16 %v157_v55, %v156_v53  ;;  %v126_v63 = vld [vmem:[%s4119_s1 + $0x270] sm:$0xff]  ;;  %v192_v4 = vld [vmem:[%s4119_s1 + $0x480] sm:$0xff] }
  0x2d   :  { %2201 = vmatpush3.bf16.msra.mxu0 %v2200_v10  ;;  %v127_v0 = vld [vmem:[%s4119_s1 + $0x278] sm:$0xff]  ;;  %v158_v1 = vld [vmem:[%s4119_s1 + $0x370] sm:$0xff]  ;;  %v2250_v2 = vpack.c.bf16 %v175_v59, %v174_v58  ;;  %v193_v5 = vld [vmem:[%s4119_s1 + $0x488] sm:$0xff] }
  0x2e   :  { %2203 = vmatprep.subr.bf16.mxu0 %v2202_v12  ;;  %v159_v3 = vld [vmem:[%s4119_s1 + $0x378] sm:$0xff]  ;;  %v224_v6 = vld [vmem:[%s4119_s1 + $0x580] sm:$0xff]  ;;  %v225_v7 = vld [vmem:[%s4119_s1 + $0x588] sm:$0xff]  ;;  %v2220_v8 = vpack.c.bf16 %v127_v0, %v126_v63  ;;  %v2254_v10 = vpack.c.bf16 %v193_v5, %v192_v4 }
  0x2f   :  { %2233 = vmatpush3.bf16.msra.mxu1 %v2232_v11  ;;  %v2252_v9 = vpack.c.bf16 %v159_v3, %v158_v1  ;;  %v176_v11 = vld [vmem:[%s4119_s1 + $0x400] sm:$0xff]  ;;  %v177_v12 = vld [vmem:[%s4119_s1 + $0x408] sm:$0xff]  ;;  %v2286_v14 = vpack.c.bf16 %v225_v7, %v224_v6  ;;  %v195_v17 = vld [vmem:[%s4119_s1 + $0x498] sm:$0xff] }
  0x30   :  { %2235 = vmatprep.subr.bf16.mxu1 %v2234_v16  ;;  %v208_v13 = vld [vmem:[%s4119_s1 + $0x500] sm:$0xff]  ;;  %v209_v15 = vld [vmem:[%s4119_s1 + $0x508] sm:$0xff]  ;;  %v194_v16 = vld [vmem:[%s4119_s1 + $0x490] sm:$0xff]  ;;  %v2256_v21 = vpack.c.bf16 %v177_v12, %v176_v11 }
  0x31   :  { %2205 = vmatpush3.bf16.msra.mxu0 %v2204_v22  ;;  %v226_v18 = vld [vmem:[%s4119_s1 + $0x590] sm:$0xff]  ;;  %v227_v19 = vld [vmem:[%s4119_s1 + $0x598] sm:$0xff]  ;;  %v24_v20 = vld [vmem:[%s4120_s0 + $0x20] sm:$0xff]  ;;  %v2288_v23 = vpack.c.bf16 %v209_v15, %v208_v13  ;;  %v2258_v24 = vpack.c.bf16 %v195_v17, %v194_v16 }
  0x32   :  { %2207 = vmatprep.subr.bf16.mxu0 %v2206_v26  ;;  %v26_v22 = vld [vmem:[%s4120_s0 + $0x30] sm:$0xff]  ;;  %v179_v26 = vld [vmem:[%s4119_s1 + $0x418] sm:$0xff]  ;;  %v2290_v28 = vpack.c.bf16 %v227_v19, %v226_v18  ;;  %v197_v31 = vld [vmem:[%s4119_s1 + $0x4a8] sm:$0xff] }
  0x33   :  { %2237 = vmatpush3.bf16.msra.mxu1 %v2236_v25  ;;  %v178_v25 = vld [vmem:[%s4119_s1 + $0x410] sm:$0xff]  ;;  %v211_v29 = vld [vmem:[%s4119_s1 + $0x518] sm:$0xff]  ;;  %v228_v32 = vld [vmem:[%s4119_s1 + $0x5a0] sm:$0xff] }
  0x34   :  { %2239 = vmatprep.subr.bf16.mxu1 %v2238_v30  ;;  %v210_v27 = vld [vmem:[%s4119_s1 + $0x510] sm:$0xff]  ;;  %v196_v30 = vld [vmem:[%s4119_s1 + $0x4a0] sm:$0xff]  ;;  %v229_v33 = vld [vmem:[%s4119_s1 + $0x5a8] sm:$0xff]  ;;  %v2260_v35 = vpack.c.bf16 %v179_v26, %v178_v25 }
  0x35   :  { %2209 = vmatpush3.bf16.msra.mxu0 %v2208_v36  ;;  %v29_v34 = vld [vmem:[%s4120_s0 + $0x48] sm:$0xff]  ;;  %v31_v36 = vld [vmem:[%s4120_s0 + $0x58] sm:$0xff]  ;;  %v180_v39 = vld [vmem:[%s4119_s1 + $0x420] sm:$0xff] }
  0x36   :  { %2211 = vmatprep.subr.bf16.mxu0 %v2210_v38  ;;  %v2262_v38 = vpack.c.bf16 %v197_v31, %v196_v30  ;;  %v181_v40 = vld [vmem:[%s4119_s1 + $0x428] sm:$0xff]  ;;  %v212_v41 = vld [vmem:[%s4119_s1 + $0x520] sm:$0xff]  ;;  %v198_v44 = vld [vmem:[%s4119_s1 + $0x4b0] sm:$0xff] }
  0x37   :  { %2241 = vmatpush3.bf16.msra.mxu1 %v2240_v37  ;;  %v2292_v37 = vpack.c.bf16 %v211_v29, %v210_v27  ;;  %v213_v43 = vld [vmem:[%s4119_s1 + $0x528] sm:$0xff]  ;;  %v199_v45 = vld [vmem:[%s4119_s1 + $0x4b8] sm:$0xff]  ;;  %v230_v46 = vld [vmem:[%s4119_s1 + $0x5b0] sm:$0xff] }
  0x38   :  { %2243 = vmatprep.subr.bf16.mxu1 %v2242_v42  ;;  %v2294_v42 = vpack.c.bf16 %v229_v33, %v228_v32  ;;  %v231_v47 = vld [vmem:[%s4119_s1 + $0x5b8] sm:$0xff]  ;;  %v182_v51 = vld [vmem:[%s4119_s1 + $0x430] sm:$0xff]  ;;  %v200_v56 = vld [vmem:[%s4119_s1 + $0x4c0] sm:$0xff] }
  0x39   :  { %2213 = vmatpush3.bf16.msra.mxu0 %v2212_v48  ;;  %v2264_v48 = vpack.c.bf16 %v181_v40, %v180_v39  ;;  %v183_v52 = vld [vmem:[%s4119_s1 + $0x438] sm:$0xff]  ;;  %v214_v53 = vld [vmem:[%s4119_s1 + $0x530] sm:$0xff]  ;;  %v201_v57 = vld [vmem:[%s4119_s1 + $0x4c8] sm:$0xff] }
  0x3a   :  { %2215 = vmatprep.subr.bf16.mxu0 %v2214_v50  ;;  %v2266_v50 = vpack.c.bf16 %v199_v45, %v198_v44  ;;  %v215_v55 = vld [vmem:[%s4119_s1 + $0x538] sm:$0xff]  ;;  %v232_v58 = vld [vmem:[%s4119_s1 + $0x5c0] sm:$0xff]  ;;  %v233_v59 = vld [vmem:[%s4119_s1 + $0x5c8] sm:$0xff] }
  0x3b   :  { %2245 = vmatpush3.bf16.msra.mxu1 %v2244_v49  ;;  %v2296_v49 = vpack.c.bf16 %v213_v43, %v212_v41  ;;  %v184_v63 = vld [vmem:[%s4119_s1 + $0x440] sm:$0xff]  ;;  %v185_v0 = vld [vmem:[%s4119_s1 + $0x448] sm:$0xff]  ;;  %v202_v4 = vld [vmem:[%s4119_s1 + $0x4d0] sm:$0xff] }
  0x3c   :  { %2247 = vmatprep.subr.bf16.mxu1 %v2246_v54  ;;  %v2298_v54 = vpack.c.bf16 %v231_v47, %v230_v46  ;;  %v216_v1 = vld [vmem:[%s4119_s1 + $0x540] sm:$0xff]  ;;  %v217_v3 = vld [vmem:[%s4119_s1 + $0x548] sm:$0xff]  ;;  %v203_v5 = vld [vmem:[%s4119_s1 + $0x4d8] sm:$0xff] }
  0x3d   :  { %2217 = vmatpush3.bf16.msra.mxu0 %v2216_v60  ;;  %v2268_v60 = vpack.c.bf16 %v183_v52, %v182_v51  ;;  %v234_v6 = vld [vmem:[%s4119_s1 + $0x5d0] sm:$0xff]  ;;  %v235_v7 = vld [vmem:[%s4119_s1 + $0x5d8] sm:$0xff]  ;;  %v204_v16 = vld [vmem:[%s4119_s1 + $0x4e0] sm:$0xff] }
  0x3e   :  { %2219 = vmatprep.subr.bf16.mxu0 %v2218_v62  ;;  %v2270_v62 = vpack.c.bf16 %v201_v57, %v200_v56  ;;  %v186_v11 = vld [vmem:[%s4119_s1 + $0x450] sm:$0xff]  ;;  %v187_v12 = vld [vmem:[%s4119_s1 + $0x458] sm:$0xff]  ;;  %v205_v17 = vld [vmem:[%s4119_s1 + $0x4e8] sm:$0xff] }
  0x3f   :  { %2249 = vmatpush3.bf16.msra.mxu1 %v2248_v61  ;;  %v2300_v61 = vpack.c.bf16 %v215_v55, %v214_v53  ;;  %v218_v13 = vld [vmem:[%s4119_s1 + $0x550] sm:$0xff]  ;;  %v219_v15 = vld [vmem:[%s4119_s1 + $0x558] sm:$0xff]  ;;  %v236_v18 = vld [vmem:[%s4119_s1 + $0x5e0] sm:$0xff] }
  0x40   :  { %2251 = vmatprep.subr.bf16.mxu1 %v2250_v2  ;;  %v2302_v2 = vpack.c.bf16 %v233_v59, %v232_v58  ;;  %v237_v19 = vld [vmem:[%s4119_s1 + $0x5e8] sm:$0xff]  ;;  %v220_v25 = vld [vmem:[%s4119_s1 + $0x560] sm:$0xff]  ;;  %v207_v29 = vld [vmem:[%s4119_s1 + $0x4f8] sm:$0xff] }
  0x41   :  { %2221 = vmatpush3.bf16.msra.mxu0 %v2220_v8  ;;  %v2272_v8 = vpack.c.bf16 %v185_v0, %v184_v63  ;;  %v2310_v26 = vpack.c.bf16 %v237_v19, %v236_v18  ;;  %v221_v27 = vld [vmem:[%s4119_s1 + $0x568] sm:$0xff]  ;;  %v238_v30 = vld [vmem:[%s4119_s1 + $0x5f0] sm:$0xff]  ;;  %v239_v31 = vld [vmem:[%s4119_s1 + $0x5f8] sm:$0xff] }
  0x42   :  { %2255 = vmatprep.subr.bf16.mxu0 %v2254_v10  ;;  %v2274_v10 = vpack.c.bf16 %v203_v5, %v202_v4  ;;  %v2312_v33 = vpack.c.bf16 %v221_v27, %v220_v25  ;;  %v223_v39 = vld [vmem:[%s4119_s1 + $0x578] sm:$0xff]  ;;  %v256_v40 = vld [vmem:[%s4119_s1 + $0x680] sm:$0xff]  ;;  %v257_v41 = vld [vmem:[%s4119_s1 + $0x688] sm:$0xff] }
  0x43   :  { %2253 = vmatpush3.bf16.msra.mxu1 %v2252_v9  ;;  %v2304_v9 = vpack.c.bf16 %v217_v3, %v216_v1  ;;  %v289_v43 = vld [vmem:[%s4119_s1 + $0x788] sm:$0xff]  ;;  %v2318_v46 = vpack.c.bf16 %v257_v41, %v256_v40  ;;  %v240_v47 = vld [vmem:[%s4119_s1 + $0x600] sm:$0xff]  ;;  %v258_v52 = vld [vmem:[%s4119_s1 + $0x690] sm:$0xff] }
  0x44   :  { %2287 = vmatprep.subr.bf16.mxu1 %v2286_v14  ;;  %708 = vmatmul.mubr.f32.vlgmr.msra.gmra.mrb[2].mxu0 %v24_v20  ;;  %v2306_v14 = vpack.c.bf16 %v235_v7, %v234_v6  ;;  %v2276_v20 = vpack.c.bf16 %v187_v12, %v186_v11  ;;  %v273_v51 = vld [vmem:[%s4119_s1 + $0x708] sm:$0xff]  ;;  %v259_v53 = vld [vmem:[%s4119_s1 + $0x698] sm:$0xff]  ;;  %v28_v56 = vld [vmem:[%s4120_s0 + $0x40] sm:$0xff] }
  0x45   :  { %2257 = vmatpush3.bf16.msra.mxu0 %v2256_v21  ;;  %847 = vmatprep.mubr.f32.mxu0 %v29_v34  ;;  %v2308_v21 = vpack.c.bf16 %v219_v15, %v218_v13  ;;  %v291_v55 = vld [vmem:[%s4119_s1 + $0x798] sm:$0xff]  ;;  %v30_v58 = vld [vmem:[%s4120_s0 + $0x50] sm:$0xff]  ;;  %v261_v3 = vld [vmem:[%s4119_s1 + $0x6a8] sm:$0xff] }
  0x46   :  { %778 = vmatmul.mubr.f32.vlgmr.msra.gmra.mrb[2].mxu1 %v26_v22  ;;  %2259 = vmatprep.subr.bf16.mxu0 %v2258_v24  ;;  %v2278_v22 = vpack.c.bf16 %v205_v17, %v204_v16  ;;  %v189_v24 = vld [vmem:[%s4119_s1 + $0x468] sm:$0xff]  ;;  %v274_v63 = vld [vmem:[%s4119_s1 + $0x710] sm:$0xff]  ;;  %v275_v1 = vld [vmem:[%s4119_s1 + $0x718] sm:$0xff] }
  0x47   :  { %2289 = vmatpush3.bf16.msra.mxu1 %v2288_v23  ;;  %917 = vmatprep.mubr.f32.mxu1 %v31_v36  ;;  %v188_v23 = vld [vmem:[%s4119_s1 + $0x460] sm:$0xff]  ;;  %v191_v36 = vld [vmem:[%s4119_s1 + $0x478] sm:$0xff]  ;;  %v293_v5 = vld [vmem:[%s4119_s1 + $0x7a8] sm:$0xff] }
  0x48   :  { %2291 = vmatprep.subr.bf16.mxu1 %v2290_v28  ;;  %v206_v28 = vld [vmem:[%s4119_s1 + $0x4f0] sm:$0xff]  ;;  %v2280_v32 = vpack.c.bf16 %v189_v24, %v188_v23  ;;  %v292_v4 = vld [vmem:[%s4119_s1 + $0x7a0] sm:$0xff]  ;;  %v33_v6 = vld [vmem:[%s4120_s0 + $0x68] sm:$0xff] }
  0x49   :  { %2261 = vmatpush3.bf16.msra.mxu0 %v2260_v35  ;;  %v2282_v34 = vpack.c.bf16 %v207_v29, %v206_v28  ;;  %v190_v35 = vld [vmem:[%s4119_s1 + $0x470] sm:$0xff]  ;;  %v244_v11 = vld [vmem:[%s4119_s1 + $0x620] sm:$0xff]  ;;  %v245_v12 = vld [vmem:[%s4119_s1 + $0x628] sm:$0xff] }
  0x4a   :  { %2263 = vmatprep.subr.bf16.mxu0 %v2262_v38  ;;  %v2314_v38 = vpack.c.bf16 %v239_v31, %v238_v30  ;;  %v2284_v44 = vpack.c.bf16 %v191_v36, %v190_v35  ;;  %v276_v13 = vld [vmem:[%s4119_s1 + $0x720] sm:$0xff]  ;;  %v277_v15 = vld [vmem:[%s4119_s1 + $0x728] sm:$0xff]  ;;  %v262_v16 = vld [vmem:[%s4119_s1 + $0x6b0] sm:$0xff] }
  0x4b   :  { %2293 = vmatpush3.bf16.msra.mxu1 %v2292_v37  ;;  %v222_v37 = vld [vmem:[%s4119_s1 + $0x570] sm:$0xff]  ;;  %v263_v17 = vld [vmem:[%s4119_s1 + $0x6b8] sm:$0xff]  ;;  %v264_v28 = vld [vmem:[%s4119_s1 + $0x6c0] sm:$0xff] }
  0x4c   :  { %2295 = vmatprep.subr.bf16.mxu1 %v2294_v42  ;;  %v288_v42 = vld [vmem:[%s4119_s1 + $0x780] sm:$0xff]  ;;  %v2316_v45 = vpack.c.bf16 %v223_v39, %v222_v37  ;;  %v294_v18 = vld [vmem:[%s4119_s1 + $0x7b0] sm:$0xff]  ;;  %v295_v19 = vld [vmem:[%s4119_s1 + $0x7b8] sm:$0xff] }
  0x4d   :  { %2265 = vmatpush3.bf16.msra.mxu0 %v2264_v48  ;;  %v241_v48 = vld [vmem:[%s4119_s1 + $0x608] sm:$0xff]  ;;  %v246_v23 = vld [vmem:[%s4119_s1 + $0x630] sm:$0xff]  ;;  %v247_v24 = vld [vmem:[%s4119_s1 + $0x638] sm:$0xff] }
  0x4e   :  { %2267 = vmatprep.subr.bf16.mxu0 %v2266_v50  ;;  %v2350_v50 = vpack.c.bf16 %v289_v43, %v288_v42  ;;  %v2320_v57 = vpack.c.bf16 %v241_v48, %v240_v47  ;;  %v278_v25 = vld [vmem:[%s4119_s1 + $0x730] sm:$0xff]  ;;  %v279_v27 = vld [vmem:[%s4119_s1 + $0x738] sm:$0xff]  ;;  %v265_v29 = vld [vmem:[%s4119_s1 + $0x6c8] sm:$0xff] }
  0x4f   :  { %2297 = vmatpush3.bf16.msra.mxu1 %v2296_v49  ;;  %v272_v49 = vld [vmem:[%s4119_s1 + $0x700] sm:$0xff]  ;;  %v297_v31 = vld [vmem:[%s4119_s1 + $0x7c8] sm:$0xff]  ;;  %v266_v40 = vld [vmem:[%s4119_s1 + $0x6d0] sm:$0xff] }
  0x50   :  { %2299 = vmatprep.subr.bf16.mxu1 %v2298_v54  ;;  %v290_v54 = vld [vmem:[%s4119_s1 + $0x790] sm:$0xff]  ;;  %v2352_v59 = vpack.c.bf16 %v273_v51, %v272_v49  ;;  %v296_v30 = vld [vmem:[%s4119_s1 + $0x7c0] sm:$0xff]  ;;  %v249_v36 = vld [vmem:[%s4119_s1 + $0x648] sm:$0xff] }
  0x51   :  { %2269 = vmatpush3.bf16.msra.mxu0 %v2268_v60  ;;  %v2322_v60 = vpack.c.bf16 %v259_v53, %v258_v52  ;;  %v2354_v0 = vpack.c.bf16 %v291_v55, %v290_v54  ;;  %v248_v35 = vld [vmem:[%s4119_s1 + $0x640] sm:$0xff]  ;;  %v281_v39 = vld [vmem:[%s4119_s1 + $0x748] sm:$0xff]  ;;  %v267_v41 = vld [vmem:[%s4119_s1 + $0x6d8] sm:$0xff] }
  0x52   :  { %2271 = vmatprep.subr.bf16.mxu0 %v2270_v62  ;;  %v243_v62 = vld [vmem:[%s4119_s1 + $0x618] sm:$0xff]  ;;  %v280_v37 = vld [vmem:[%s4119_s1 + $0x740] sm:$0xff]  ;;  %v298_v42 = vld [vmem:[%s4119_s1 + $0x7d0] sm:$0xff] }
  0x53   :  { %2301 = vmatpush3.bf16.msra.mxu1 %v2300_v61  ;;  %v242_v61 = vld [vmem:[%s4119_s1 + $0x610] sm:$0xff]  ;;  %v299_v43 = vld [vmem:[%s4119_s1 + $0x7d8] sm:$0xff]  ;;  %v268_v52 = vld [vmem:[%s4119_s1 + $0x6e0] sm:$0xff] }
  0x54   :  { %2303 = vmatprep.subr.bf16.mxu1 %v2302_v2  ;;  %v260_v2 = vld [vmem:[%s4119_s1 + $0x6a0] sm:$0xff]  ;;  %v2324_v7 = vpack.c.bf16 %v243_v62, %v242_v61  ;;  %v250_v47 = vld [vmem:[%s4119_s1 + $0x650] sm:$0xff]  ;;  %v251_v48 = vld [vmem:[%s4119_s1 + $0x658] sm:$0xff] }
  0x55   :  { %2273 = vmatpush3.bf16.msra.mxu0 %v2272_v8  ;;  %v35_v8 = vld [vmem:[%s4120_s0 + $0x78] sm:$0xff]  ;;  %v282_v49 = vld [vmem:[%s4119_s1 + $0x750] sm:$0xff]  ;;  %v269_v53 = vld [vmem:[%s4119_s1 + $0x6e8] sm:$0xff] }
  0x56   :  { %2275 = vmatprep.subr.bf16.mxu0 %v2274_v10  ;;  %v2326_v10 = vpack.c.bf16 %v261_v3, %v260_v2  ;;  %v283_v51 = vld [vmem:[%s4119_s1 + $0x758] sm:$0xff]  ;;  %v300_v54 = vld [vmem:[%s4119_s1 + $0x7e0] sm:$0xff]  ;;  %v301_v55 = vld [vmem:[%s4119_s1 + $0x7e8] sm:$0xff] }
  0x57   :  { %2305 = vmatpush3.bf16.msra.mxu1 %v2304_v9  ;;  %v2356_v9 = vpack.c.bf16 %v275_v1, %v274_v63  ;;  %v284_v61 = vld [vmem:[%s4119_s1 + $0x760] sm:$0xff]  ;;  %v2374_v62 = vpack.c.bf16 %v301_v55, %v300_v54  ;;  %v285_v63 = vld [vmem:[%s4119_s1 + $0x768] sm:$0xff]  ;;  %v271_v1 = vld [vmem:[%s4119_s1 + $0x6f8] sm:$0xff] }
  0x58   :  { %2307 = vmatprep.subr.bf16.mxu1 %v2306_v14  ;;  %v2358_v14 = vpack.c.bf16 %v293_v5, %v292_v4  ;;  %v302_v2 = vld [vmem:[%s4119_s1 + $0x7f0] sm:$0xff]  ;;  %v303_v3 = vld [vmem:[%s4119_s1 + $0x7f8] sm:$0xff]  ;;  %v2376_v5 = vpack.c.bf16 %v285_v63, %v284_v61 }
  0x59   :  { %2277 = vmatpush3.bf16.msra.mxu0 %v2276_v20  ;;  %v2328_v20 = vpack.c.bf16 %v245_v12, %v244_v11  ;;  %v287_v11 = vld [vmem:[%s4119_s1 + $0x778] sm:$0xff]  ;;  %v320_v12 = vld [vmem:[%s4119_s1 + $0x880] sm:$0xff]  ;;  %v358_v54 = vld [vmem:[%s4119_s1 + $0x9b0] sm:$0xff] }
  0x5a   :  { %2279 = vmatprep.subr.bf16.mxu0 %v2278_v22  ;;  %v2330_v22 = vpack.c.bf16 %v263_v17, %v262_v16  ;;  %v359_v55 = vld [vmem:[%s4119_s1 + $0x9b8] sm:$0xff]  ;;  %v342_v61 = vld [vmem:[%s4119_s1 + $0x930] sm:$0xff] }
  0x5b   :  { %2309 = vmatpush3.bf16.msra.mxu1 %v2308_v21  ;;  %v2360_v21 = vpack.c.bf16 %v277_v15, %v276_v13  ;;  %v321_v13 = vld [vmem:[%s4119_s1 + $0x888] sm:$0xff]  ;;  %v343_v63 = vld [vmem:[%s4119_s1 + $0x938] sm:$0xff] }
  0x5c   :  { %2311 = vmatprep.subr.bf16.mxu1 %v2310_v26  ;;  %v2362_v26 = vpack.c.bf16 %v295_v19, %v294_v18  ;;  %v353_v15 = vld [vmem:[%s4119_s1 + $0x988] sm:$0xff]  ;;  %v2382_v18 = vpack.c.bf16 %v321_v13, %v320_v12  ;;  %v304_v19 = vld [vmem:[%s4119_s1 + $0x800] sm:$0xff]  ;;  %v330_v12 = vld [vmem:[%s4119_s1 + $0x8d0] sm:$0xff] }
  0x5d   :  { %2281 = vmatpush3.bf16.msra.mxu0 %v2280_v32  ;;  %v2332_v32 = vpack.c.bf16 %v247_v24, %v246_v23  ;;  %v337_v23 = vld [vmem:[%s4119_s1 + $0x908] sm:$0xff]  ;;  %v322_v24 = vld [vmem:[%s4119_s1 + $0x890] sm:$0xff]  ;;  %v331_v13 = vld [vmem:[%s4119_s1 + $0x8d8] sm:$0xff] }
  0x5e   :  { %2283 = vmatprep.subr.bf16.mxu0 %v2282_v34  ;;  %v2334_v34 = vpack.c.bf16 %v265_v29, %v264_v28  ;;  %v32_v28 = vld [vmem:[%s4120_s0 + $0x60] sm:$0xff] }
  0x5f   :  { %2313 = vmatpush3.bf16.msra.mxu1 %v2312_v33  ;;  %v2364_v33 = vpack.c.bf16 %v279_v27, %v278_v25  ;;  %v323_v25 = vld [vmem:[%s4119_s1 + $0x898] sm:$0xff] }
  0x60   :  { %2315 = vmatprep.subr.bf16.mxu1 %v2314_v38  ;;  %v2366_v38 = vpack.c.bf16 %v297_v31, %v296_v30  ;;  %v355_v27 = vld [vmem:[%s4119_s1 + $0x998] sm:$0xff]  ;;  %v34_v30 = vld [vmem:[%s4120_s0 + $0x70] sm:$0xff] }
  0x61   :  { %2285 = vmatpush3.bf16.msra.mxu0 %v2284_v44  ;;  %v2336_v44 = vpack.c.bf16 %v249_v36, %v248_v35  ;;  %v338_v35 = vld [vmem:[%s4119_s1 + $0x910] sm:$0xff] }
  0x62   :  { %2319 = vmatprep.subr.bf16.mxu0 %v2318_v46  ;;  %v2338_v46 = vpack.c.bf16 %v267_v41, %v266_v40  ;;  %v356_v40 = vld [vmem:[%s4119_s1 + $0x9a0] sm:$0xff]  ;;  %v357_v41 = vld [vmem:[%s4119_s1 + $0x9a8] sm:$0xff] }
  0x63   :  { %2317 = vmatpush3.bf16.msra.mxu1 %v2316_v45  ;;  %v2368_v45 = vpack.c.bf16 %v281_v39, %v280_v37  ;;  %v339_v37 = vld [vmem:[%s4119_s1 + $0x918] sm:$0xff]  ;;  %v325_v39 = vld [vmem:[%s4119_s1 + $0x8a8] sm:$0xff] }
  0x64   :  { %2351 = vmatprep.subr.bf16.mxu1 %v2350_v50  ;;  %848 = vmatmul.mubr.f32.vlgmr.msra.gmra.mrb[4].mxu0 %v28_v56  ;;  %v2370_v50 = vpack.c.bf16 %v299_v43, %v298_v42  ;;  %v2340_v56 = vpack.c.bf16 %v251_v48, %v250_v47  ;;  %v37_v42 = vld [vmem:[%s4120_s0 + $0x88] sm:$0xff]  ;;  %v308_v47 = vld [vmem:[%s4119_s1 + $0x820] sm:$0xff] }
  0x65   :  { %2321 = vmatpush3.bf16.msra.mxu0 %v2320_v57  ;;  %987 = vmatprep.mubr.f32.mxu0 %v33_v6  ;;  %v2372_v57 = vpack.c.bf16 %v283_v51, %v282_v49  ;;  %v309_v48 = vld [vmem:[%s4119_s1 + $0x828] sm:$0xff]  ;;  %v340_v49 = vld [vmem:[%s4119_s1 + $0x920] sm:$0xff] }
  0x66   :  { %918 = vmatmul.mubr.f32.vlgmr.msra.gmra.mrb[4].mxu1 %v30_v58  ;;  %2323 = vmatprep.subr.bf16.mxu0 %v2322_v60  ;;  %v2342_v58 = vpack.c.bf16 %v269_v53, %v268_v52  ;;  %v253_v60 = vld [vmem:[%s4119_s1 + $0x668] sm:$0xff]  ;;  %v326_v52 = vld [vmem:[%s4119_s1 + $0x8b0] sm:$0xff]  ;;  %v327_v53 = vld [vmem:[%s4119_s1 + $0x8b8] sm:$0xff] }
  0x67   :  { %2353 = vmatpush3.bf16.msra.mxu1 %v2352_v59  ;;  %1057 = vmatprep.mubr.f32.mxu1 %v35_v8  ;;  %v252_v59 = vld [vmem:[%s4119_s1 + $0x660] sm:$0xff]  ;;  %v255_v8 = vld [vmem:[%s4119_s1 + $0x678] sm:$0xff]  ;;  %v341_v51 = vld [vmem:[%s4119_s1 + $0x928] sm:$0xff] }
  0x68   :  { %2355 = vmatprep.subr.bf16.mxu1 %v2354_v0  ;;  %v270_v0 = vld [vmem:[%s4119_s1 + $0x6f0] sm:$0xff]  ;;  %v2344_v4 = vpack.c.bf16 %v253_v60, %v252_v59  ;;  %v311_v60 = vld [vmem:[%s4119_s1 + $0x838] sm:$0xff] }
  0x69   :  { %2325 = vmatpush3.bf16.msra.mxu0 %v2324_v7  ;;  %v2346_v6 = vpack.c.bf16 %v271_v1, %v270_v0  ;;  %v254_v7 = vld [vmem:[%s4119_s1 + $0x670] sm:$0xff]  ;;  %v328_v0 = vld [vmem:[%s4119_s1 + $0x8c0] sm:$0xff]  ;;  %v329_v1 = vld [vmem:[%s4119_s1 + $0x8c8] sm:$0xff] }
  0x6a   :  { %2327 = vmatprep.subr.bf16.mxu0 %v2326_v10  ;;  %v2378_v10 = vpack.c.bf16 %v303_v3, %v302_v2  ;;  %v2348_v16 = vpack.c.bf16 %v255_v8, %v254_v7  ;;  %v310_v59 = vld [vmem:[%s4119_s1 + $0x830] sm:$0xff]  ;;  %v360_v2 = vld [vmem:[%s4119_s1 + $0x9c0] sm:$0xff]  ;;  %v361_v3 = vld [vmem:[%s4119_s1 + $0x9c8] sm:$0xff] }
  0x6b   :  { %2357 = vmatpush3.bf16.msra.mxu1 %v2356_v9  ;;  %v286_v9 = vld [vmem:[%s4119_s1 + $0x770] sm:$0xff]  ;;  %v312_v7 = vld [vmem:[%s4119_s1 + $0x840] sm:$0xff]  ;;  %v313_v8 = vld [vmem:[%s4119_s1 + $0x848] sm:$0xff] }
  0x6c   :  { %2359 = vmatprep.subr.bf16.mxu1 %v2358_v14  ;;  %v352_v14 = vld [vmem:[%s4119_s1 + $0x980] sm:$0xff]  ;;  %v2380_v17 = vpack.c.bf16 %v287_v11, %v286_v9  ;;  %v345_v11 = vld [vmem:[%s4119_s1 + $0x948] sm:$0xff] }
  0x6d   :  { %2329 = vmatpush3.bf16.msra.mxu0 %v2328_v20  ;;  %v305_v20 = vld [vmem:[%s4119_s1 + $0x808] sm:$0xff]  ;;  %v344_v9 = vld [vmem:[%s4119_s1 + $0x940] sm:$0xff] }
  0x6e   :  { %2331 = vmatprep.subr.bf16.mxu0 %v2330_v22  ;;  %v2414_v22 = vpack.c.bf16 %v353_v15, %v352_v14  ;;  %v2384_v29 = vpack.c.bf16 %v305_v20, %v304_v19  ;;  %v362_v14 = vld [vmem:[%s4119_s1 + $0x9d0] sm:$0xff]  ;;  %v363_v15 = vld [vmem:[%s4119_s1 + $0x9d8] sm:$0xff] }
  0x6f   :  { %2361 = vmatpush3.bf16.msra.mxu1 %v2360_v21  ;;  %v336_v21 = vld [vmem:[%s4119_s1 + $0x900] sm:$0xff]  ;;  %v314_v19 = vld [vmem:[%s4119_s1 + $0x850] sm:$0xff]  ;;  %v315_v20 = vld [vmem:[%s4119_s1 + $0x858] sm:$0xff] }
  0x70   :  { %2363 = vmatprep.subr.bf16.mxu1 %v2362_v26  ;;  %v354_v26 = vld [vmem:[%s4119_s1 + $0x990] sm:$0xff]  ;;  %v2416_v31 = vpack.c.bf16 %v337_v23, %v336_v21  ;;  %v347_v23 = vld [vmem:[%s4119_s1 + $0x958] sm:$0xff] }
  0x71   :  { %2333 = vmatpush3.bf16.msra.mxu0 %v2332_v32  ;;  %v2386_v32 = vpack.c.bf16 %v323_v25, %v322_v24  ;;  %v2418_v36 = vpack.c.bf16 %v355_v27, %v354_v26  ;;  %v346_v21 = vld [vmem:[%s4119_s1 + $0x950] sm:$0xff]  ;;  %v332_v24 = vld [vmem:[%s4119_s1 + $0x8e0] sm:$0xff]  ;;  %v333_v25 = vld [vmem:[%s4119_s1 + $0x8e8] sm:$0xff] }
  0x72   :  { %2335 = vmatprep.subr.bf16.mxu0 %v2334_v34  ;;  %v307_v34 = vld [vmem:[%s4119_s1 + $0x818] sm:$0xff]  ;;  %v364_v26 = vld [vmem:[%s4119_s1 + $0x9e0] sm:$0xff]  ;;  %v365_v27 = vld [vmem:[%s4119_s1 + $0x9e8] sm:$0xff] }
  0x73   :  { %2365 = vmatpush3.bf16.msra.mxu1 %v2364_v33  ;;  %v306_v33 = vld [vmem:[%s4119_s1 + $0x810] sm:$0xff] }
  0x74   :  { %2367 = vmatprep.subr.bf16.mxu1 %v2366_v38  ;;  %v324_v38 = vld [vmem:[%s4119_s1 + $0x8a0] sm:$0xff]  ;;  %v2388_v43 = vpack.c.bf16 %v307_v34, %v306_v33  ;;  %v2438_v34 = vpack.c.bf16 %v365_v27, %v364_v26  ;;  %v422_v26 = vld [vmem:[%s4119_s1 + $0xbb0] sm:$0xff]  ;;  %v423_v27 = vld [vmem:[%s4119_s1 + $0xbb8] sm:$0xff] }
  0x75   :  { %2337 = vmatpush3.bf16.msra.mxu0 %v2336_v44  ;;  %v39_v44 = vld [vmem:[%s4120_s0 + $0x98] sm:$0xff]  ;;  %v348_v33 = vld [vmem:[%s4119_s1 + $0x960] sm:$0xff] }
  0x76   :  { %2339 = vmatprep.subr.bf16.mxu0 %v2338_v46  ;;  %v2390_v46 = vpack.c.bf16 %v325_v39, %v324_v38  ;;  %v366_v38 = vld [vmem:[%s4119_s1 + $0x9f0] sm:$0xff]  ;;  %v367_v39 = vld [vmem:[%s4119_s1 + $0x9f8] sm:$0xff] }
  0x77   :  { %2369 = vmatpush3.bf16.msra.mxu1 %v2368_v45  ;;  %v2420_v45 = vpack.c.bf16 %v339_v37, %v338_v35  ;;  %v349_v35 = vld [vmem:[%s4119_s1 + $0x968] sm:$0xff]  ;;  %v335_v37 = vld [vmem:[%s4119_s1 + $0x8f8] sm:$0xff] }
  0x78   :  { %2371 = vmatprep.subr.bf16.mxu1 %v2370_v50  ;;  %v2422_v50 = vpack.c.bf16 %v357_v41, %v356_v40  ;;  %v2440_v41 = vpack.c.bf16 %v349_v35, %v348_v33  ;;  %v406_v33 = vld [vmem:[%s4119_s1 + $0xb30] sm:$0xff]  ;;  %v407_v35 = vld [vmem:[%s4119_s1 + $0xb38] sm:$0xff] }
  0x79   :  { %2341 = vmatpush3.bf16.msra.mxu0 %v2340_v56  ;;  %v2392_v56 = vpack.c.bf16 %v309_v48, %v308_v47  ;;  %v351_v47 = vld [vmem:[%s4119_s1 + $0x978] sm:$0xff]  ;;  %v384_v48 = vld [vmem:[%s4119_s1 + $0xa80] sm:$0xff] }
  0x7a   :  { %2343 = vmatprep.subr.bf16.mxu0 %v2342_v58  ;;  %v2394_v58 = vpack.c.bf16 %v327_v53, %v326_v52 }
  0x7b   :  { %2373 = vmatpush3.bf16.msra.mxu1 %v2372_v57  ;;  %v2424_v57 = vpack.c.bf16 %v341_v51, %v340_v49  ;;  %v385_v49 = vld [vmem:[%s4119_s1 + $0xa88] sm:$0xff] }
  0x7c   :  { %2375 = vmatprep.subr.bf16.mxu1 %v2374_v62  ;;  %v2426_v62 = vpack.c.bf16 %v359_v55, %v358_v54  ;;  %v417_v51 = vld [vmem:[%s4119_s1 + $0xb88] sm:$0xff]  ;;  %v2446_v54 = vpack.c.bf16 %v385_v49, %v384_v48  ;;  %v368_v55 = vld [vmem:[%s4119_s1 + $0xa00] sm:$0xff]  ;;  %v394_v48 = vld [vmem:[%s4119_s1 + $0xad0] sm:$0xff] }
  0x7d   :  { %2345 = vmatpush3.bf16.msra.mxu0 %v2344_v4  ;;  %v2396_v4 = vpack.c.bf16 %v311_v60, %v310_v59  ;;  %v401_v59 = vld [vmem:[%s4119_s1 + $0xb08] sm:$0xff]  ;;  %v386_v60 = vld [vmem:[%s4119_s1 + $0xa90] sm:$0xff]  ;;  %v395_v49 = vld [vmem:[%s4119_s1 + $0xad8] sm:$0xff] }
  0x7e   :  { %2347 = vmatprep.subr.bf16.mxu0 %v2346_v6  ;;  %v2398_v6 = vpack.c.bf16 %v329_v1, %v328_v0  ;;  %v36_v0 = vld [vmem:[%s4120_s0 + $0x80] sm:$0xff] }
  0x7f   :  { %2377 = vmatpush3.bf16.msra.mxu1 %v2376_v5  ;;  %v2428_v5 = vpack.c.bf16 %v343_v63, %v342_v61  ;;  %v387_v61 = vld [vmem:[%s4119_s1 + $0xa98] sm:$0xff] }
  0x80   :  { %2379 = vmatprep.subr.bf16.mxu1 %v2378_v10  ;;  %v2430_v10 = vpack.c.bf16 %v361_v3, %v360_v2  ;;  %v419_v63 = vld [vmem:[%s4119_s1 + $0xb98] sm:$0xff]  ;;  %v38_v2 = vld [vmem:[%s4120_s0 + $0x90] sm:$0xff] }
  0x81   :  { %2349 = vmatpush3.bf16.msra.mxu0 %v2348_v16  ;;  %v2400_v16 = vpack.c.bf16 %v313_v8, %v312_v7  ;;  %v402_v7 = vld [vmem:[%s4119_s1 + $0xb10] sm:$0xff] }
  0x82   :  { %2383 = vmatprep.subr.bf16.mxu0 %v2382_v18  ;;  %v2402_v18 = vpack.c.bf16 %v331_v13, %v330_v12  ;;  %v420_v12 = vld [vmem:[%s4119_s1 + $0xba0] sm:$0xff]  ;;  %v421_v13 = vld [vmem:[%s4119_s1 + $0xba8] sm:$0xff] }
  0x83   :  { %2381 = vmatpush3.bf16.msra.mxu1 %v2380_v17  ;;  %v2432_v17 = vpack.c.bf16 %v345_v11, %v344_v9  ;;  %v403_v9 = vld [vmem:[%s4119_s1 + $0xb18] sm:$0xff]  ;;  %v389_v11 = vld [vmem:[%s4119_s1 + $0xaa8] sm:$0xff] }
  0x84   :  { %2415 = vmatprep.subr.bf16.mxu1 %v2414_v22  ;;  %988 = vmatmul.mubr.f32.vlgmr.msra.gmra.mrb[6].mxu0 %v32_v28  ;;  %v2434_v22 = vpack.c.bf16 %v363_v15, %v362_v14  ;;  %v2404_v28 = vpack.c.bf16 %v315_v20, %v314_v19  ;;  %v41_v14 = vld [vmem:[%s4120_s0 + $0xa8] sm:$0xff]  ;;  %v372_v19 = vld [vmem:[%s4119_s1 + $0xa20] sm:$0xff] }
  0x85   :  { %2385 = vmatpush3.bf16.msra.mxu0 %v2384_v29  ;;  %1127 = vmatprep.mubr.f32.mxu0 %v37_v42  ;;  %v2436_v29 = vpack.c.bf16 %v347_v23, %v346_v21  ;;  %v373_v20 = vld [vmem:[%s4119_s1 + $0xa28] sm:$0xff]  ;;  %v404_v21 = vld [vmem:[%s4119_s1 + $0xb20] sm:$0xff] }
  0x86   :  { %1058 = vmatmul.mubr.f32.vlgmr.msra.gmra.mrb[6].mxu1 %v34_v30  ;;  %2387 = vmatprep.subr.bf16.mxu0 %v2386_v32  ;;  %v2406_v30 = vpack.c.bf16 %v333_v25, %v332_v24  ;;  %v317_v32 = vld [vmem:[%s4119_s1 + $0x868] sm:$0xff]  ;;  %v390_v24 = vld [vmem:[%s4119_s1 + $0xab0] sm:$0xff]  ;;  %v391_v25 = vld [vmem:[%s4119_s1 + $0xab8] sm:$0xff] }
  0x87   :  { %2417 = vmatpush3.bf16.msra.mxu1 %v2416_v31  ;;  %1197 = vmatprep.mubr.f32.mxu1 %v39_v44  ;;  %v316_v31 = vld [vmem:[%s4119_s1 + $0x860] sm:$0xff]  ;;  %v319_v44 = vld [vmem:[%s4119_s1 + $0x878] sm:$0xff]  ;;  %v405_v23 = vld [vmem:[%s4119_s1 + $0xb28] sm:$0xff] }
  0x88   :  { %2419 = vmatprep.subr.bf16.mxu1 %v2418_v36  ;;  %v334_v36 = vld [vmem:[%s4119_s1 + $0x8f0] sm:$0xff]  ;;  %v2408_v40 = vpack.c.bf16 %v317_v32, %v316_v31  ;;  %v375_v32 = vld [vmem:[%s4119_s1 + $0xa38] sm:$0xff] }
  0x89   :  { %2389 = vmatpush3.bf16.msra.mxu0 %v2388_v43  ;;  %v2410_v42 = vpack.c.bf16 %v335_v37, %v334_v36  ;;  %v318_v43 = vld [vmem:[%s4119_s1 + $0x870] sm:$0xff]  ;;  %v392_v36 = vld [vmem:[%s4119_s1 + $0xac0] sm:$0xff]  ;;  %v393_v37 = vld [vmem:[%s4119_s1 + $0xac8] sm:$0xff] }
  0x8a   :  { %2391 = vmatprep.subr.bf16.mxu0 %v2390_v46  ;;  %v2442_v46 = vpack.c.bf16 %v367_v39, %v366_v38  ;;  %v2412_v52 = vpack.c.bf16 %v319_v44, %v318_v43  ;;  %v374_v31 = vld [vmem:[%s4119_s1 + $0xa30] sm:$0xff]  ;;  %v424_v38 = vld [vmem:[%s4119_s1 + $0xbc0] sm:$0xff]  ;;  %v425_v39 = vld [vmem:[%s4119_s1 + $0xbc8] sm:$0xff] }
  0x8b   :  { %2421 = vmatpush3.bf16.msra.mxu1 %v2420_v45  ;;  %v350_v45 = vld [vmem:[%s4119_s1 + $0x970] sm:$0xff]  ;;  %v376_v43 = vld [vmem:[%s4119_s1 + $0xa40] sm:$0xff]  ;;  %v377_v44 = vld [vmem:[%s4119_s1 + $0xa48] sm:$0xff] }
  0x8c   :  { %2423 = vmatprep.subr.bf16.mxu1 %v2422_v50  ;;  %v416_v50 = vld [vmem:[%s4119_s1 + $0xb80] sm:$0xff]  ;;  %v2444_v53 = vpack.c.bf16 %v351_v47, %v350_v45  ;;  %v409_v47 = vld [vmem:[%s4119_s1 + $0xb48] sm:$0xff] }
  0x8d   :  { %2393 = vmatpush3.bf16.msra.mxu0 %v2392_v56  ;;  %v369_v56 = vld [vmem:[%s4119_s1 + $0xa08] sm:$0xff]  ;;  %v408_v45 = vld [vmem:[%s4119_s1 + $0xb40] sm:$0xff] }
  0x8e   :  { %2395 = vmatprep.subr.bf16.mxu0 %v2394_v58  ;;  %v2478_v58 = vpack.c.bf16 %v417_v51, %v416_v50  ;;  %v2448_v1 = vpack.c.bf16 %v369_v56, %v368_v55  ;;  %v426_v50 = vld [vmem:[%s4119_s1 + $0xbd0] sm:$0xff]  ;;  %v427_v51 = vld [vmem:[%s4119_s1 + $0xbd8] sm:$0xff] }
  0x8f   :  { %2425 = vmatpush3.bf16.msra.mxu1 %v2424_v57  ;;  %v400_v57 = vld [vmem:[%s4119_s1 + $0xb00] sm:$0xff]  ;;  %v378_v55 = vld [vmem:[%s4119_s1 + $0xa50] sm:$0xff]  ;;  %v379_v56 = vld [vmem:[%s4119_s1 + $0xa58] sm:$0xff] }
  0x90   :  { %2427 = vmatprep.subr.bf16.mxu1 %v2426_v62  ;;  %v418_v62 = vld [vmem:[%s4119_s1 + $0xb90] sm:$0xff]  ;;  %v2480_v3 = vpack.c.bf16 %v401_v59, %v400_v57  ;;  %v411_v59 = vld [vmem:[%s4119_s1 + $0xb58] sm:$0xff] }
  0x91   :  { %2397 = vmatpush3.bf16.msra.mxu0 %v2396_v4  ;;  %v2450_v4 = vpack.c.bf16 %v387_v61, %v386_v60  ;;  %v2482_v8 = vpack.c.bf16 %v419_v63, %v418_v62  ;;  %v410_v57 = vld [vmem:[%s4119_s1 + $0xb50] sm:$0xff]  ;;  %v396_v60 = vld [vmem:[%s4119_s1 + $0xae0] sm:$0xff]  ;;  %v397_v61 = vld [vmem:[%s4119_s1 + $0xae8] sm:$0xff] }
  0x92   :  { %2399 = vmatprep.subr.bf16.mxu0 %v2398_v6  ;;  %v371_v6 = vld [vmem:[%s4119_s1 + $0xa18] sm:$0xff]  ;;  %v428_v62 = vld [vmem:[%s4119_s1 + $0xbe0] sm:$0xff]  ;;  %v429_v63 = vld [vmem:[%s4119_s1 + $0xbe8] sm:$0xff] }
  0x93   :  { %2429 = vmatpush3.bf16.msra.mxu1 %v2428_v5  ;;  %v370_v5 = vld [vmem:[%s4119_s1 + $0xa10] sm:$0xff] }
  0x94   :  { %2431 = vmatprep.subr.bf16.mxu1 %v2430_v10  ;;  %v388_v10 = vld [vmem:[%s4119_s1 + $0xaa0] sm:$0xff]  ;;  %v2452_v15 = vpack.c.bf16 %v371_v6, %v370_v5  ;;  %v2502_v6 = vpack.c.bf16 %v429_v63, %v428_v62  ;;  %v486_v62 = vld [vmem:[%s4119_s1 + $0xdb0] sm:$0xff]  ;;  %v487_v63 = vld [vmem:[%s4119_s1 + $0xdb8] sm:$0xff] }
  0x95   :  { %2401 = vmatpush3.bf16.msra.mxu0 %v2400_v16  ;;  %v43_v16 = vld [vmem:[%s4120_s0 + $0xb8] sm:$0xff]  ;;  %v412_v5 = vld [vmem:[%s4119_s1 + $0xb60] sm:$0xff] }
  0x96   :  { %2403 = vmatprep.subr.bf16.mxu0 %v2402_v18  ;;  %v2454_v18 = vpack.c.bf16 %v389_v11, %v388_v10  ;;  %v430_v10 = vld [vmem:[%s4119_s1 + $0xbf0] sm:$0xff]  ;;  %v431_v11 = vld [vmem:[%s4119_s1 + $0xbf8] sm:$0xff] }
  0x97   :  { %2433 = vmatpush3.bf16.msra.mxu1 %v2432_v17  ;;  %v2484_v17 = vpack.c.bf16 %v403_v9, %v402_v7  ;;  %v413_v7 = vld [vmem:[%s4119_s1 + $0xb68] sm:$0xff]  ;;  %v399_v9 = vld [vmem:[%s4119_s1 + $0xaf8] sm:$0xff] }
  0x98   :  { %2435 = vmatprep.subr.bf16.mxu1 %v2434_v22  ;;  %v2486_v22 = vpack.c.bf16 %v421_v13, %v420_v12  ;;  %v2504_v13 = vpack.c.bf16 %v413_v7, %v412_v5  ;;  %v470_v5 = vld [vmem:[%s4119_s1 + $0xd30] sm:$0xff]  ;;  %v471_v7 = vld [vmem:[%s4119_s1 + $0xd38] sm:$0xff] }
  0x99   :  { %2405 = vmatpush3.bf16.msra.mxu0 %v2404_v28  ;;  %v2456_v28 = vpack.c.bf16 %v373_v20, %v372_v19  ;;  %v415_v19 = vld [vmem:[%s4119_s1 + $0xb78] sm:$0xff]  ;;  %v448_v20 = vld [vmem:[%s4119_s1 + $0xc80] sm:$0xff] }
  0x9a   :  { %2407 = vmatprep.subr.bf16.mxu0 %v2406_v30  ;;  %v2458_v30 = vpack.c.bf16 %v391_v25, %v390_v24 }
  0x9b   :  { %2437 = vmatpush3.bf16.msra.mxu1 %v2436_v29  ;;  %v2488_v29 = vpack.c.bf16 %v405_v23, %v404_v21  ;;  %v449_v21 = vld [vmem:[%s4119_s1 + $0xc88] sm:$0xff] }
  0x9c   :  { %2439 = vmatprep.subr.bf16.mxu1 %v2438_v34  ;;  %v2490_v34 = vpack.c.bf16 %v423_v27, %v422_v26  ;;  %v481_v23 = vld [vmem:[%s4119_s1 + $0xd88] sm:$0xff]  ;;  %v2510_v26 = vpack.c.bf16 %v449_v21, %v448_v20  ;;  %v432_v27 = vld [vmem:[%s4119_s1 + $0xc00] sm:$0xff]  ;;  %v458_v20 = vld [vmem:[%s4119_s1 + $0xcd0] sm:$0xff] }
  0x9d   :  { %2409 = vmatpush3.bf16.msra.mxu0 %v2408_v40  ;;  %v2460_v40 = vpack.c.bf16 %v375_v32, %v374_v31  ;;  %v465_v31 = vld [vmem:[%s4119_s1 + $0xd08] sm:$0xff]  ;;  %v450_v32 = vld [vmem:[%s4119_s1 + $0xc90] sm:$0xff]  ;;  %v459_v21 = vld [vmem:[%s4119_s1 + $0xcd8] sm:$0xff] }
  0x9e   :  { %2411 = vmatprep.subr.bf16.mxu0 %v2410_v42  ;;  %v2462_v42 = vpack.c.bf16 %v393_v37, %v392_v36  ;;  %v40_v36 = vld [vmem:[%s4120_s0 + $0xa0] sm:$0xff] }
  0x9f   :  { %2441 = vmatpush3.bf16.msra.mxu1 %v2440_v41  ;;  %v2492_v41 = vpack.c.bf16 %v407_v35, %v406_v33  ;;  %v451_v33 = vld [vmem:[%s4119_s1 + $0xc98] sm:$0xff] }
  0xa0   :  { %2443 = vmatprep.subr.bf16.mxu1 %v2442_v46  ;;  %v2494_v46 = vpack.c.bf16 %v425_v39, %v424_v38  ;;  %v483_v35 = vld [vmem:[%s4119_s1 + $0xd98] sm:$0xff]  ;;  %v42_v38 = vld [vmem:[%s4120_s0 + $0xb0] sm:$0xff] }
  0xa1   :  { %2413 = vmatpush3.bf16.msra.mxu0 %v2412_v52  ;;  %v2464_v52 = vpack.c.bf16 %v377_v44, %v376_v43  ;;  %v466_v43 = vld [vmem:[%s4119_s1 + $0xd10] sm:$0xff] }
  0xa2   :  { %2447 = vmatprep.subr.bf16.mxu0 %v2446_v54  ;;  %v2466_v54 = vpack.c.bf16 %v395_v49, %v394_v48  ;;  %v484_v48 = vld [vmem:[%s4119_s1 + $0xda0] sm:$0xff]  ;;  %v485_v49 = vld [vmem:[%s4119_s1 + $0xda8] sm:$0xff] }
  0xa3   :  { %2445 = vmatpush3.bf16.msra.mxu1 %v2444_v53  ;;  %v2496_v53 = vpack.c.bf16 %v409_v47, %v408_v45  ;;  %v467_v45 = vld [vmem:[%s4119_s1 + $0xd18] sm:$0xff]  ;;  %v453_v47 = vld [vmem:[%s4119_s1 + $0xca8] sm:$0xff] }
  0xa4   :  { %2479 = vmatprep.subr.bf16.mxu1 %v2478_v58  ;;  %1128 = vmatmul.mubr.f32.vlgmr.msra.gmra.mrb[8].mxu0 %v36_v0  ;;  %v2498_v58 = vpack.c.bf16 %v427_v51, %v426_v50  ;;  %v2468_v0 = vpack.c.bf16 %v379_v56, %v378_v55  ;;  %v45_v50 = vld [vmem:[%s4120_s0 + $0xc8] sm:$0xff]  ;;  %v436_v55 = vld [vmem:[%s4119_s1 + $0xc20] sm:$0xff] }
  0xa5   :  { %2449 = vmatpush3.bf16.msra.mxu0 %v2448_v1  ;;  %1267 = vmatprep.mubr.f32.mxu0 %v41_v14  ;;  %v2500_v1 = vpack.c.bf16 %v411_v59, %v410_v57  ;;  %v437_v56 = vld [vmem:[%s4119_s1 + $0xc28] sm:$0xff]  ;;  %v468_v57 = vld [vmem:[%s4119_s1 + $0xd20] sm:$0xff] }
  0xa6   :  { %1198 = vmatmul.mubr.f32.vlgmr.msra.gmra.mrb[8].mxu1 %v38_v2  ;;  %2451 = vmatprep.subr.bf16.mxu0 %v2450_v4  ;;  %v2470_v2 = vpack.c.bf16 %v397_v61, %v396_v60  ;;  %v381_v4 = vld [vmem:[%s4119_s1 + $0xa68] sm:$0xff]  ;;  %v454_v60 = vld [vmem:[%s4119_s1 + $0xcb0] sm:$0xff]  ;;  %v455_v61 = vld [vmem:[%s4119_s1 + $0xcb8] sm:$0xff] }
  0xa7   :  { %2481 = vmatpush3.bf16.msra.mxu1 %v2480_v3  ;;  %1337 = vmatprep.mubr.f32.mxu1 %v43_v16  ;;  %v380_v3 = vld [vmem:[%s4119_s1 + $0xa60] sm:$0xff]  ;;  %v383_v16 = vld [vmem:[%s4119_s1 + $0xa78] sm:$0xff]  ;;  %v469_v59 = vld [vmem:[%s4119_s1 + $0xd28] sm:$0xff] }
  0xa8   :  { %2483 = vmatprep.subr.bf16.mxu1 %v2482_v8  ;;  %v398_v8 = vld [vmem:[%s4119_s1 + $0xaf0] sm:$0xff]  ;;  %v2472_v12 = vpack.c.bf16 %v381_v4, %v380_v3  ;;  %v439_v4 = vld [vmem:[%s4119_s1 + $0xc38] sm:$0xff] }
  0xa9   :  { %2453 = vmatpush3.bf16.msra.mxu0 %v2452_v15  ;;  %v2474_v14 = vpack.c.bf16 %v399_v9, %v398_v8  ;;  %v382_v15 = vld [vmem:[%s4119_s1 + $0xa70] sm:$0xff]  ;;  %v456_v8 = vld [vmem:[%s4119_s1 + $0xcc0] sm:$0xff]  ;;  %v457_v9 = vld [vmem:[%s4119_s1 + $0xcc8] sm:$0xff] }
  0xaa   :  { %2455 = vmatprep.subr.bf16.mxu0 %v2454_v18  ;;  %v2506_v18 = vpack.c.bf16 %v431_v11, %v430_v10  ;;  %v2476_v24 = vpack.c.bf16 %v383_v16, %v382_v15  ;;  %v438_v3 = vld [vmem:[%s4119_s1 + $0xc30] sm:$0xff]  ;;  %v488_v10 = vld [vmem:[%s4119_s1 + $0xdc0] sm:$0xff]  ;;  %v489_v11 = vld [vmem:[%s4119_s1 + $0xdc8] sm:$0xff] }
  0xab   :  { %2485 = vmatpush3.bf16.msra.mxu1 %v2484_v17  ;;  %v414_v17 = vld [vmem:[%s4119_s1 + $0xb70] sm:$0xff]  ;;  %v440_v15 = vld [vmem:[%s4119_s1 + $0xc40] sm:$0xff]  ;;  %v441_v16 = vld [vmem:[%s4119_s1 + $0xc48] sm:$0xff] }
  0xac   :  { %2487 = vmatprep.subr.bf16.mxu1 %v2486_v22  ;;  %v480_v22 = vld [vmem:[%s4119_s1 + $0xd80] sm:$0xff]  ;;  %v2508_v25 = vpack.c.bf16 %v415_v19, %v414_v17  ;;  %v473_v19 = vld [vmem:[%s4119_s1 + $0xd48] sm:$0xff] }
  0xad   :  { %2457 = vmatpush3.bf16.msra.mxu0 %v2456_v28  ;;  %v433_v28 = vld [vmem:[%s4119_s1 + $0xc08] sm:$0xff]  ;;  %v472_v17 = vld [vmem:[%s4119_s1 + $0xd40] sm:$0xff] }
  0xae   :  { %2459 = vmatprep.subr.bf16.mxu0 %v2458_v30  ;;  %v2542_v30 = vpack.c.bf16 %v481_v23, %v480_v22  ;;  %v2512_v37 = vpack.c.bf16 %v433_v28, %v432_v27  ;;  %v490_v22 = vld [vmem:[%s4119_s1 + $0xdd0] sm:$0xff]  ;;  %v491_v23 = vld [vmem:[%s4119_s1 + $0xdd8] sm:$0xff] }
  0xaf   :  { %2489 = vmatpush3.bf16.msra.mxu1 %v2488_v29  ;;  %v464_v29 = vld [vmem:[%s4119_s1 + $0xd00] sm:$0xff]  ;;  %v442_v27 = vld [vmem:[%s4119_s1 + $0xc50] sm:$0xff]  ;;  %v443_v28 = vld [vmem:[%s4119_s1 + $0xc58] sm:$0xff] }
  0xb0   :  { %2491 = vmatprep.subr.bf16.mxu1 %v2490_v34  ;;  %v482_v34 = vld [vmem:[%s4119_s1 + $0xd90] sm:$0xff]  ;;  %v2544_v39 = vpack.c.bf16 %v465_v31, %v464_v29  ;;  %v475_v31 = vld [vmem:[%s4119_s1 + $0xd58] sm:$0xff] }
  0xb1   :  { %2461 = vmatpush3.bf16.msra.mxu0 %v2460_v40  ;;  %v2514_v40 = vpack.c.bf16 %v451_v33, %v450_v32  ;;  %v2546_v44 = vpack.c.bf16 %v483_v35, %v482_v34  ;;  %v474_v29 = vld [vmem:[%s4119_s1 + $0xd50] sm:$0xff]  ;;  %v460_v32 = vld [vmem:[%s4119_s1 + $0xce0] sm:$0xff]  ;;  %v461_v33 = vld [vmem:[%s4119_s1 + $0xce8] sm:$0xff] }
  0xb2   :  { %2463 = vmatprep.subr.bf16.mxu0 %v2462_v42  ;;  %v435_v42 = vld [vmem:[%s4119_s1 + $0xc18] sm:$0xff]  ;;  %v492_v34 = vld [vmem:[%s4119_s1 + $0xde0] sm:$0xff]  ;;  %v493_v35 = vld [vmem:[%s4119_s1 + $0xde8] sm:$0xff] }
  0xb3   :  { %2493 = vmatpush3.bf16.msra.mxu1 %v2492_v41  ;;  %v434_v41 = vld [vmem:[%s4119_s1 + $0xc10] sm:$0xff] }
  0xb4   :  { %2495 = vmatprep.subr.bf16.mxu1 %v2494_v46  ;;  %v452_v46 = vld [vmem:[%s4119_s1 + $0xca0] sm:$0xff]  ;;  %v2516_v51 = vpack.c.bf16 %v435_v42, %v434_v41  ;;  %v2566_v42 = vpack.c.bf16 %v493_v35, %v492_v34  ;;  %v1497_v34 = vld [vmem:[%s4122_s3 + $0x68] sm:$0xff] }
  0xb5   :  { %2465 = vmatpush3.bf16.msra.mxu0 %v2464_v52  ;;  %v47_v52 = vld [vmem:[%s4120_s0 + $0xd8] sm:$0xff]  ;;  %v476_v41 = vld [vmem:[%s4119_s1 + $0xd60] sm:$0xff] }
  0xb6   :  { %2467 = vmatprep.subr.bf16.mxu0 %v2466_v54  ;;  %v2518_v54 = vpack.c.bf16 %v453_v47, %v452_v46  ;;  %v494_v46 = vld [vmem:[%s4119_s1 + $0xdf0] sm:$0xff]  ;;  %v495_v47 = vld [vmem:[%s4119_s1 + $0xdf8] sm:$0xff] }
  0xb7   :  { %2497 = vmatpush3.bf16.msra.mxu1 %v2496_v53  ;;  %v2548_v53 = vpack.c.bf16 %v467_v45, %v466_v43  ;;  %v477_v43 = vld [vmem:[%s4119_s1 + $0xd68] sm:$0xff]  ;;  %v463_v45 = vld [vmem:[%s4119_s1 + $0xcf8] sm:$0xff] }
  0xb8   :  { %2499 = vmatprep.subr.bf16.mxu1 %v2498_v58  ;;  %v2550_v58 = vpack.c.bf16 %v485_v49, %v484_v48  ;;  %v2568_v49 = vpack.c.bf16 %v477_v43, %v476_v41  ;;  %v1499_v43 = vld [vmem:[%s4122_s3 + $0x78] sm:$0xff] }
  0xb9   :  { %2469 = vmatpush3.bf16.msra.mxu0 %v2468_v0  ;;  %v2520_v0 = vpack.c.bf16 %v437_v56, %v436_v55  ;;  %v479_v55 = vld [vmem:[%s4119_s1 + $0xd78] sm:$0xff] }
  0xba   :  { %2471 = vmatprep.subr.bf16.mxu0 %v2470_v2  ;;  %v2522_v2 = vpack.c.bf16 %v455_v61, %v454_v60  ;;  %v1582_v61 = vld [vmem:[%s4121_s2] ss:$0 sm:$0xff] }
  0xbb   :  { %2501 = vmatpush3.bf16.msra.mxu1 %v2500_v1  ;;  %v2552_v1 = vpack.c.bf16 %v469_v59, %v468_v57  ;;  %v46_v59 = vld [vmem:[%s4120_s0 + $0xd0] sm:$0xff] }
  0xbc   :  { %2503 = vmatprep.subr.bf16.mxu1 %v2502_v6  ;;  %v2554_v6 = vpack.c.bf16 %v487_v63, %v486_v62 }
  0xbd   :  { %2473 = vmatpush3.bf16.msra.mxu0 %v2472_v12  ;;  %v2524_v12 = vpack.c.bf16 %v439_v4, %v438_v3 }
  0xbe   :  { %2475 = vmatprep.subr.bf16.mxu0 %v2474_v14  ;;  %v2526_v14 = vpack.c.bf16 %v457_v9, %v456_v8 }
  0xbf   :  { %2505 = vmatpush3.bf16.msra.mxu1 %v2504_v13  ;;  %v2556_v13 = vpack.c.bf16 %v471_v7, %v470_v5 }
  0xc0   :  { %2507 = vmatprep.subr.bf16.mxu1 %v2506_v18  ;;  %v2558_v18 = vpack.c.bf16 %v489_v11, %v488_v10 }
  0xc1   :  { %2477 = vmatpush3.bf16.msra.mxu0 %v2476_v24  ;;  %v2528_v24 = vpack.c.bf16 %v441_v16, %v440_v15  ;;  %v1485_v15 = vld [vmem:[%s4122_s3 + $0x8] sm:$0xff]  ;;  %v1486_v16 = vld [vmem:[%s4122_s3 + $0x10] sm:$0xff] }
  0xc2   :  { %2511 = vmatprep.subr.bf16.mxu0 %v2510_v26  ;;  %v2530_v26 = vpack.c.bf16 %v459_v21, %v458_v20  ;;  %v1488_v20 = vld [vmem:[%s4122_s3 + $0x20] sm:$0xff]  ;;  %v1489_v21 = vld [vmem:[%s4122_s3 + $0x28] sm:$0xff] }
  0xc3   :  { %2509 = vmatpush3.bf16.msra.mxu1 %v2508_v25  ;;  %v2560_v25 = vpack.c.bf16 %v473_v19, %v472_v17 }
  0xc4   :  { %2543 = vmatprep.subr.bf16.mxu1 %v2542_v30  ;;  %1268 = vmatmul.mubr.f32.vlgmr.msra.gmra.mrb[10].mxu0 %v40_v36  ;;  %v2562_v30 = vpack.c.bf16 %v491_v23, %v490_v22  ;;  %v2532_v36 = vpack.c.bf16 %v443_v28, %v442_v27  ;;  %v2581_v22 = vpack.c.bf16 %v1489_v21, %v1488_v20  ;;  %v1490_v23 = vld [vmem:[%s4122_s3 + $0x30] sm:$0xff]  ;;  %v1493_v27 = vld [vmem:[%s4122_s3 + $0x48] sm:$0xff] }
  0xc5   :  { %2513 = vmatpush3.bf16.msra.mxu0 %v2512_v37  ;;  %1407 = vmatprep.mubr.f32.mxu0 %v45_v50  ;;  %v2564_v37 = vpack.c.bf16 %v475_v31, %v474_v29  ;;  %v1494_v29 = vld [vmem:[%s4122_s3 + $0x50] sm:$0xff] }
  0xc6   :  { %1338 = vmatmul.mubr.f32.vlgmr.msra.gmra.mrb[10].mxu1 %v42_v38  ;;  %2515 = vmatprep.subr.bf16.mxu0 %v2514_v40  ;;  %v2534_v38 = vpack.c.bf16 %v461_v33, %v460_v32  ;;  %v445_v40 = vld [vmem:[%s4119_s1 + $0xc68] sm:$0xff]  ;;  %v1496_v33 = vld [vmem:[%s4122_s3 + $0x60] sm:$0xff] }
  0xc7   :  { %2545 = vmatpush3.bf16.msra.mxu1 %v2544_v39  ;;  %1477 = vmatprep.mubr.f32.mxu1 %v47_v52  ;;  %v444_v39 = vld [vmem:[%s4119_s1 + $0xc60] sm:$0xff]  ;;  %v447_v52 = vld [vmem:[%s4119_s1 + $0xc78] sm:$0xff] }
  0xc8   :  { %2547 = vmatprep.subr.bf16.mxu1 %v2546_v44  ;;  %v462_v44 = vld [vmem:[%s4119_s1 + $0xcf0] sm:$0xff]  ;;  %v2536_v48 = vpack.c.bf16 %v445_v40, %v444_v39 }
  0xc9   :  { %2517 = vmatpush3.bf16.msra.mxu0 %v2516_v51  ;;  %v2538_v50 = vpack.c.bf16 %v463_v45, %v462_v44  ;;  %v446_v51 = vld [vmem:[%s4119_s1 + $0xc70] sm:$0xff] }
  0xca   :  { %2519 = vmatprep.subr.bf16.mxu0 %v2518_v54  ;;  %v478_v54 = vld [vmem:[%s4119_s1 + $0xd70] sm:$0xff]  ;;  %v2540_v56 = vpack.c.bf16 %v447_v52, %v446_v51 }
  0xcb   :  { %2549 = vmatpush3.bf16.msra.mxu1 %v2548_v53  ;;  %v2570_v53 = vpack.c.bf16 %v495_v47, %v494_v46  ;;  %v2572_v57 = vpack.c.bf16 %v479_v55, %v478_v54  ;;  %v2603_v46 = vmov 0.0  }
  0xcc   :  { %2551 = vmatprep.subr.bf16.mxu1 %v2550_v58  ;;  %v44_v58 = vld [vmem:[%s4120_s0 + $0xc0] sm:$0xff] }
  0xcd   :  { %2521 = vmatpush3.bf16.msra.mxu0 %v2520_v0 }
  0xce   :  { %2523 = vmatprep.subr.bf16.mxu0 %v2522_v2 }
  0xcf   :  { %2553 = vmatpush3.bf16.msra.mxu1 %v2552_v1 }
  0xd0   :  { %2555 = vmatprep.subr.bf16.mxu1 %v2554_v6 }
  0xd1   :  { %2525 = vmatpush3.bf16.msra.mxu0 %v2524_v12 }
  0xd2   :  { %2527 = vmatprep.subr.bf16.mxu0 %v2526_v14  ;;  %v1484_v14 = vld [vmem:[%s4122_s3] sm:$0xff] }
  0xd3   :  { %2557 = vmatpush3.bf16.msra.mxu1 %v2556_v13  ;;  %v2601_v13 = vmov 0.0|0.0   ;;  %v2575_v17 = vpack.c.bf16 %v1485_v15, %v1484_v14 }
  0xd4   :  { %2559 = vmatprep.subr.bf16.mxu1 %v2558_v18  ;;  %v1487_v18 = vld [vmem:[%s4122_s3 + $0x18] sm:$0xff] }
  0xd5   :  { %2529 = vmatpush3.bf16.msra.mxu0 %v2528_v24  ;;  %v2578_v19 = vpack.c.bf16 %v1487_v18, %v1486_v16  ;;  %v1491_v24 = vld [vmem:[%s4122_s3 + $0x38] sm:$0xff]  ;;  %v1583_v16 = vld [vmem:[%s4123_s4] ss:$0 sm:$0xff] }
  0xd6   :  { %2531 = vmatprep.subr.bf16.mxu0 %v2530_v26  ;;  %v1492_v26 = vld [vmem:[%s4122_s3 + $0x40] sm:$0xff] }
  0xd7   :  { %2561 = vmatpush3.bf16.msra.mxu1 %v2560_v25  ;;  %v2584_v25 = vpack.c.bf16 %v1491_v24, %v1490_v23  ;;  %v2587_v28 = vpack.c.bf16 %v1493_v27, %v1492_v26 }
  0xd8   :  { %2563 = vmatprep.subr.bf16.mxu1 %v2562_v30  ;;  %v1495_v30 = vld [vmem:[%s4122_s3 + $0x58] sm:$0xff] }
  0xd9   :  { %2533 = vmatpush3.bf16.msra.mxu0 %v2532_v36  ;;  %v2590_v31 = vpack.c.bf16 %v1495_v30, %v1494_v29 }
  0xda   :  { %2535 = vmatprep.subr.bf16.mxu0 %v2534_v38 }
  0xdb   :  { %2565 = vmatpush3.bf16.msra.mxu1 %v2564_v37  ;;  %v2593_v37 = vpack.c.bf16 %v1497_v34, %v1496_v33 }
  0xdc   :  { %2567 = vmatprep.subr.bf16.mxu1 %v2566_v42  ;;  %v1498_v42 = vld [vmem:[%s4122_s3 + $0x70] sm:$0xff] }
  0xdd   :  { %2537 = vmatpush3.bf16.msra.mxu0 %v2536_v48  ;;  %v2596_v44 = vpack.c.bf16 %v1499_v43, %v1498_v42 }
  0xde   :  { %2539 = vmatprep.subr.bf16.mxu0 %v2538_v50 }
  0xdf   :  { %2569 = vmatpush3.bf16.msra.mxu1 %v2568_v49 }
  0xe0   :  { %2571 = vmatprep.subr.bf16.mxu1 %v2570_v53 }
  0xe1   :  { %2541 = vmatpush3.bf16.msra.mxu0 %v2540_v56 }
  0xe2   :  { %2574 = vmatprep.subr.bf16.mxu0 %v2601_v13 }
  0xe3   :  { %2573 = vmatpush3.bf16.msra.mxu1 %v2572_v57 }
  0xe4   :  { %1408 = vmatmul.mubr.f32.vlgmr.msra.gmra.mrb[12].mxu0 %v44_v58 }
  0xe5   :  { %2576 = vmatpush3.bf16.msra.mxu0 %v2575_v17  ;;  %2123 = vmatprep.mubr.msk.f32.mxu0 %vm2602_vm0, %v2603_v46 }
  0xe6   :  { %1478 = vmatmul.mubr.f32.vlgmr.msra.gmra.mrb[12].mxu1 %v46_v59  ;;  %2577 = vmatprep.subr.bf16.mxu0 %v2601_v13 }
  0xe9   :  { %2579 = vmatpush3.bf16.msra.mxu0 %v2578_v19 }
  0xea   :  { %2580 = vmatprep.subr.bf16.mxu0 %v2601_v13 }
  0xed   :  { %2582 = vmatpush3.bf16.msra.mxu0 %v2581_v22 }
  0xee   :  { %2583 = vmatprep.subr.bf16.mxu0 %v2601_v13 }
  0xf1   :  { %2585 = vmatpush3.bf16.msra.mxu0 %v2584_v25 }
  0xf2   :  { %2586 = vmatprep.subr.bf16.mxu0 %v2601_v13 }
  0xf5   :  { %2588 = vmatpush3.bf16.msra.mxu0 %v2587_v28 }
  0xf6   :  { %2589 = vmatprep.subr.bf16.mxu0 %v2601_v13 }
  0xf7   :  { %v1616_v60 = vpop.f32.mrb[0].mxu0 }
  0xf8   :  { %v1617_v62 = vpop.f32.mrb[1].mxu0 }
  0xf9   :  { %v1651_v63 = vpop.f32.mrb[0].mxu1  ;;  %v1618_v0 = vadd.f32 %v1617_v62, %v1616_v60  ;;  %2591 = vmatpush3.bf16.msra.mxu0 %v2590_v31 }
  0xfa   :  { %v1652_v1 = vpop.f32.mrb[1].mxu1  ;;  %2592 = vmatprep.subr.bf16.mxu0 %v2601_v13 }
  0xfb   :  { %v1653_v2 = vadd.f32 %v1652_v1, %v1651_v63  ;;  %v570_v3 = vadd.f32 %v1618_v0, %v1582_v61 }
  0xfd   :  { %v640_v4 = vadd.f32 %v1653_v2, %v570_v3  ;;  %2594 = vmatpush3.bf16.msra.mxu0 %v2593_v37 }
  0xfe   :  { %2595 = vmatprep.subr.bf16.mxu0 %v2601_v13 }
 0x101   :  { %2597 = vmatpush3.bf16.msra.mxu0 %v2596_v44 }
 0x117   :  { %v1686_v5 = vpop.f32.mrb[2].mxu0 }
 0x118   :  { %v1687_v6 = vpop.f32.mrb[3].mxu0 }
 0x119   :  { %v1721_v7 = vpop.f32.mrb[2].mxu1  ;;  %v1688_v8 = vadd.f32 %v1687_v6, %v1686_v5 }
 0x11a   :  { %v1722_v9 = vpop.f32.mrb[3].mxu1 }
 0x11b   :  { %v1723_v10 = vadd.f32 %v1722_v9, %v1721_v7  ;;  %v710_v11 = vadd.f32 %v1688_v8, %v640_v4 }
 0x11d   :  { %v780_v12 = vadd.f32 %v1723_v10, %v710_v11 }
 0x137   :  { %v1756_v32 = vpop.f32.mrb[4].mxu0 }
 0x138   :  { %v1757_v35 = vpop.f32.mrb[5].mxu0 }
 0x139   :  { %v1791_v36 = vpop.f32.mrb[4].mxu1  ;;  %v1758_v38 = vadd.f32 %v1757_v35, %v1756_v32 }
 0x13a   :  { %v1792_v39 = vpop.f32.mrb[5].mxu1 }
 0x13b   :  { %v1793_v40 = vadd.f32 %v1792_v39, %v1791_v36  ;;  %v850_v41 = vadd.f32 %v1758_v38, %v780_v12 }
 0x13d   :  { %v920_v45 = vadd.f32 %v1793_v40, %v850_v41 }
 0x157   :  { %v1826_v47 = vpop.f32.mrb[6].mxu0 }
 0x158   :  { %v1827_v48 = vpop.f32.mrb[7].mxu0 }
 0x159   :  { %v1861_v49 = vpop.f32.mrb[6].mxu1  ;;  %v1828_v50 = vadd.f32 %v1827_v48, %v1826_v47 }
 0x15a   :  { %v1862_v51 = vpop.f32.mrb[7].mxu1 }
 0x15b   :  { %v1863_v52 = vadd.f32 %v1862_v51, %v1861_v49  ;;  %v990_v53 = vadd.f32 %v1828_v50, %v920_v45 }
 0x15d   :  { %v1060_v54 = vadd.f32 %v1863_v52, %v990_v53 }
 0x177   :  { %v1896_v55 = vpop.f32.mrb[8].mxu0 }
 0x178   :  { %v1897_v56 = vpop.f32.mrb[9].mxu0 }
 0x179   :  { %v1931_v57 = vpop.f32.mrb[8].mxu1  ;;  %v1898_v58 = vadd.f32 %v1897_v56, %v1896_v55 }
 0x17a   :  { %v1932_v59 = vpop.f32.mrb[9].mxu1 }
 0x17b   :  { %v1933_v60 = vadd.f32 %v1932_v59, %v1931_v57  ;;  %v1130_v61 = vadd.f32 %v1898_v58, %v1060_v54 }
 0x17d   :  { %v1200_v62 = vadd.f32 %v1933_v60, %v1130_v61 }
 0x197   :  { %v1966_v63 = vpop.f32.mrb[10].mxu0 }
 0x198   :  { %v1967_v0 = vpop.f32.mrb[11].mxu0 }
 0x199   :  { %v2001_v1 = vpop.f32.mrb[10].mxu1  ;;  %v1968_v2 = vadd.f32 %v1967_v0, %v1966_v63 }
 0x19a   :  { %v2002_v3 = vpop.f32.mrb[11].mxu1 }
 0x19b   :  { %v2003_v4 = vadd.f32 %v2002_v3, %v2001_v1  ;;  %v1270_v5 = vadd.f32 %v1968_v2, %v1200_v62 }
 0x19d   :  { %v1340_v6 = vadd.f32 %v2003_v4, %v1270_v5 }
 0x1b7   :  { %v2036_v7 = vpop.f32.mrb[12].mxu0 }
 0x1b8   :  { %v2037_v8 = vpop.f32.mrb[13].mxu0 }
 0x1b9   :  { %v2071_v9 = vpop.f32.mrb[12].mxu1  ;;  %v2038_v10 = vadd.f32 %v2037_v8, %v2036_v7 }
 0x1ba   :  { %v2072_v11 = vpop.f32.mrb[13].mxu1 }
 0x1bb   :  { %v2073_v12 = vadd.f32 %v2072_v11, %v2071_v9  ;;  %v1410_v13 = vadd.f32 %v2038_v10, %v1340_v6 }
 0x1bd   :  { %v1480_v14 = vadd.f32 %v2073_v12, %v1410_v13 }
 0x1bf   :  { %v1483_v15 = vmax.f32 %v1480_v14, 0.0 }
 0x1c1   :  { %2124 = vmatmul.mubr.f32.vlgmr.msra.gmra.mrb[14].mxu0 %v1483_v15 }
 0x294   :  { %v1573_v17 = vpop.f32.mrb[14].mxu0 }
 0x295   :  { %v1574_v18 = vadd.f32 %v1583_v16, %v1573_v17  ;;  %v2125_v19 = vpop.f32.mrb[15].mxu0 }
 0x297   :  { %1577 = vst [vmem:[%s4124_s5] sm:$0xff] %v1574_v18 }

// kernel: mnist_cnn_forward.4
= control target key start
LH: loop header
LB: loop body
LE: loop exit
PB: predicated region body
PF: predicated region fallthrough
CT: control target
= control target key end

     0   :  { %vm110_vm0 = vcmask 261120   ;;  %vm4459_vm1 = vcmask 523264   ;;  %s9543_s1 = inlined_call_operand.vmem [shape: f32[9,32,64], index: 1, kind: input, shape index: {}]   ;;  %s9544_s0 = inlined_call_operand.vmem [shape: f32[2,32,9,32], index: 0, kind: input, shape index: {}]   ;;  %s9545_s2 = inlined_call_operand.vmem [shape: f32[1,64], index: 2, kind: input, shape index: {}]   ;;  %s9546_s3 = inlined_call_operand.vmem [shape: f32[112,64], index: 3, kind: output, shape index: {}]  }
   0x1   :  { %v4667_v0 = vld [vmem:[%s9543_s1 + $0x20] sm:$0xff]  ;;  %v4668_v1 = vld [vmem:[%s9543_s1 + $0x28] sm:$0xff]  ;;  %v4669_v5 = vld [vmem:[%s9543_s1 + $0x30] sm:$0xff] }
   0x2   :  { %v4973_v2 = vld [vmem:[%s9543_s1 + $0x80] sm:$0xff]  ;;  %v6712_v3 = vpack.c.bf16 %v4668_v1, %v4667_v0  ;;  %v4974_v4 = vld [vmem:[%s9543_s1 + $0x88] sm:$0xff]  ;;  %v4670_v6 = vld [vmem:[%s9543_s1 + $0x38] sm:$0xff] }
   0x3   :  { %v7312_v7 = vpack.c.bf16 %v4974_v4, %v4973_v2  ;;  %v6716_v8 = vpack.c.bf16 %v4670_v6, %v4669_v5  ;;  %v4975_v9 = vld [vmem:[%s9543_s1 + $0x90] sm:$0xff]  ;;  %v4976_v10 = vld [vmem:[%s9543_s1 + $0x98] sm:$0xff]  ;;  %v7323_v11 = vld [vmem:[%s9544_s0 + $0x80] sm:$0xff] }
   0x4   :  { %6713 = vmatprep.subr.bf16.mxu1 %v6712_v3  ;;  %v7325_v12 = vpack.c.bf16 %v4976_v10, %v4975_v9  ;;  %5892 = vmatprep.mubr.msk.f32.mxu1 %vm110_vm0, %v7323_v11  ;;  %v7332_v13 = vld [vmem:[%s9544_s0 + $0x180] sm:$0xff]  ;;  %v74_v15 = vld [vmem:[%s9543_s1 + $0x8] sm:$0xff]  ;;  %v7354_v20 = vld [vmem:[%s9544_s0 + $0x90] sm:$0xff] }
   0x5   :  { %v73_v14 = vld [vmem:[%s9543_s1] sm:$0xff]  ;;  %6745 = vmatprep.subr.bf16.mxu0 %v7312_v7  ;;  %6715 = vmatpush3.bf16.msra.mxu1 %v6712_v3  ;;  %v5048_v18 = vld [vmem:[%s9543_s1 + $0xa8] sm:$0xff]  ;;  %v7360_v21 = vld [vmem:[%s9544_s0 + $0x190] sm:$0xff] }
   0x6   :  { %9615 = vst [vmem:[#allocation2_spill] sm:$0xff] %v7325_v12  ;;  %v5047_v16 = vld [vmem:[%s9543_s1 + $0xa0] sm:$0xff]  ;;  %6747 = vmatpush3.bf16.msra.mxu0 %v7312_v7  ;;  %6717 = vmatprep.subr.bf16.mxu1 %v6716_v8  ;;  %v6720_v17 = vpack.c.bf16 %v74_v15, %v73_v14  ;;  %v7379_v24 = vld [vmem:[%s9544_s0 + $0xb0] sm:$0xff]  ;;  %v5050_v29 = vld [vmem:[%s9543_s1 + $0xb8] sm:$0xff] }
   0x7   :  { %6749 = vmatprep.subr.bf16.mxu0 %v7325_v12  ;;  %6260 = vmatprep.mubr.msk.f32.mxu0 %vm110_vm0, %v7332_v13  ;;  %v6752_v19 = vpack.c.bf16 %v5048_v18, %v5047_v16  ;;  %v7365_v22 = vld [vmem:[%s9544_s0 + $0xa0] sm:$0xff]  ;;  %v7386_v25 = vld [vmem:[%s9544_s0 + $0x1b0] sm:$0xff]  ;;  %v76_v40 = vld [vmem:[%s9543_s1 + $0x18] sm:$0xff] }
   0x8   :  { %v7372_v23 = vld [vmem:[%s9544_s0 + $0x1a0] sm:$0xff]  ;;  %v5049_v28 = vld [vmem:[%s9543_s1 + $0xb0] sm:$0xff]  ;;  %v5136_v44 = vld [vmem:[%s9543_s1 + $0xc8] sm:$0xff] }
   0x9   :  { %6719 = vmatpush3.bf16.msra.mxu1 %v6716_v8  ;;  %v7391_v26 = vld [vmem:[%s9544_s0 + $0xc0] sm:$0xff]  ;;  %v7415_v30 = vld [vmem:[%s9544_s0 + $0xd0] sm:$0xff]  ;;  %v6756_v31 = vpack.c.bf16 %v5050_v29, %v5049_v28  ;;  %v4812_v54 = vld [vmem:[%s9543_s1 + $0x48] sm:$0xff] }
   0xa   :  { %6751 = vmatpush3.bf16.msra.mxu0 %v7325_v12  ;;  %6721 = vmatprep.subr.bf16.mxu1 %v6720_v17  ;;  %v7398_v27 = vld [vmem:[%s9544_s0 + $0x1c0] sm:$0xff]  ;;  %v7422_v32 = vld [vmem:[%s9544_s0 + $0x1d0] sm:$0xff]  ;;  %v5210_v12 = vld [vmem:[%s9543_s1 + $0xe8] sm:$0xff] }
   0xb   :  { %6753 = vmatprep.subr.bf16.mxu0 %v6752_v19  ;;  %v7427_v33 = vld [vmem:[%s9544_s0 + $0xe0] sm:$0xff]  ;;  %v7455_v37 = vld [vmem:[%s9544_s0 + $0x290] sm:$0xff] }
   0xc   :  { %5893 = vmatmul.mubr.msk.f32.vlgmr.msra.gmra.mrb[0].mxu1 %vm110_vm0, %v7354_v20  ;;  %v7432_v34 = vld [vmem:[%s9544_s0 + $0x1e0] sm:$0xff]  ;;  %v7460_v38 = vld [vmem:[%s9544_s0 + $0x390] sm:$0xff] }
   0xd   :  { %6261 = vmatmul.mubr.msk.f32.vlgmr.msra.gmra.mrb[0].mxu0 %vm110_vm0, %v7360_v21  ;;  %6723 = vmatpush3.bf16.msra.mxu1 %v6720_v17  ;;  %v7443_v35 = vld [vmem:[%s9544_s0 + $0x280] sm:$0xff]  ;;  %v75_v39 = vld [vmem:[%s9543_s1 + $0x10] sm:$0xff] }
   0xe   :  { %6755 = vmatpush3.bf16.msra.mxu0 %v6752_v19  ;;  %5895 = vmatprep.mubr.msk.f32.mxu1 %vm110_vm0, %v7365_v22  ;;  %v7450_v36 = vld [vmem:[%s9544_s0 + $0x380] sm:$0xff]  ;;  %v6724_v42 = vpack.c.bf16 %v76_v40, %v75_v39  ;;  %v7495_v46 = vld [vmem:[%s9544_s0 + $0x2b0] sm:$0xff] }
   0xf   :  { %6263 = vmatprep.mubr.msk.f32.mxu0 %vm110_vm0, %v7372_v23  ;;  %6757 = vmatprep.subr.bf16.mxu0 %v6756_v31  ;;  %v7477_v41 = vld [vmem:[%s9544_s0 + $0x2a0] sm:$0xff]  ;;  %v7502_v48 = vld [vmem:[%s9544_s0 + $0x3b0] sm:$0xff] }
  0x10   :  { %5896 = vmatmul.mubr.msk.f32.gmra.mrb[2].mxu1 %vm110_vm0, %v7379_v24  ;;  %v5135_v43 = vld [vmem:[%s9543_s1 + $0xc0] sm:$0xff]  ;;  %6725 = vmatprep.subr.bf16.mxu1 %v6724_v42  ;;  %v7526_v51 = vld [vmem:[%s9544_s0 + $0x2d0] sm:$0xff] }
  0x11   :  { %6264 = vmatmul.mubr.msk.f32.gmra.mrb[2].mxu0 %vm110_vm0, %v7386_v25  ;;  %5898 = vmatprep.mubr.msk.f32.mxu1 %vm110_vm0, %v7391_v26  ;;  %v7490_v45 = vld [vmem:[%s9544_s0 + $0x3a0] sm:$0xff]  ;;  %v7497_v47 = vpack.c.bf16 %v5136_v44, %v5135_v43  ;;  %v7531_v52 = vld [vmem:[%s9544_s0 + $0x3d0] sm:$0xff]  ;;  %v5138_v44 = vld [vmem:[%s9543_s1 + $0xd8] sm:$0xff] }
  0x12   :  { %6266 = vmatprep.mubr.msk.f32.mxu0 %vm110_vm0, %v7398_v27  ;;  %6759 = vmatpush3.bf16.msra.mxu0 %v6756_v31  ;;  %v7514_v49 = vld [vmem:[%s9544_s0 + $0x2c0] sm:$0xff]  ;;  %v7579_v60 = vld [vmem:[%s9544_s0 + $0x11] sm:$0xff] }
  0x13   :  { %6761 = vmatprep.subr.bf16.mxu0 %v7497_v47  ;;  %v7521_v50 = vld [vmem:[%s9544_s0 + $0x3c0] sm:$0xff]  ;;  %6727 = vmatpush3.bf16.msra.mxu1 %v6724_v42  ;;  %v7586_v61 = vld [vmem:[%s9544_s0 + $0x111] sm:$0xff] }
  0x14   :  { %5899 = vmatmul.mubr.msk.f32.gmra.mrb[4].mxu1 %vm110_vm0, %v7415_v30  ;;  %v4811_v53 = vld [vmem:[%s9543_s1 + $0x40] sm:$0xff]  ;;  %9617 = vst [vmem:[#allocation4_spill] sm:$0xff] %v7586_v61  ;;  %v7607_v0 = vld [vmem:[%s9544_s0 + $0x31] sm:$0xff] }
  0x15   :  { %6267 = vmatmul.mubr.msk.f32.gmra.mrb[4].mxu0 %vm110_vm0, %v7422_v32  ;;  %5901 = vmatprep.mubr.msk.f32.mxu1 %vm110_vm0, %v7427_v33  ;;  %v7541_v55 = vpack.c.bf16 %v4812_v54, %v4811_v53  ;;  %v7550_v56 = vld [vmem:[%s9544_s0 + $0x2e0] sm:$0xff]  ;;  %v7614_v1 = vld [vmem:[%s9544_s0 + $0x131] sm:$0xff] }
  0x16   :  { %6269 = vmatprep.mubr.msk.f32.mxu0 %vm110_vm0, %v7432_v34  ;;  %v7557_v57 = vld [vmem:[%s9544_s0 + $0x3e0] sm:$0xff]  ;;  %9619 = vst [vmem:[#allocation6_spill] sm:$0xff] %v7614_v1  ;;  %v7635_v4 = vld [vmem:[%s9544_s0 + $0x51] sm:$0xff] }
  0x17   :  { %v7562_v58 = vld [vmem:[%s9544_s0 + $0x1] sm:$0xff]  ;;  %6729 = vmatprep.subr.bf16.mxu1 %v7541_v55  ;;  %v7642_v5 = vld [vmem:[%s9544_s0 + $0x151] sm:$0xff] }
  0x18   :  { %5902 = vmatmul.mubr.msk.f32.gmra.mrb[6].mxu1 %vm110_vm0, %v7443_v35  ;;  %v7568_v59 = vld [vmem:[%s9544_s0 + $0x101] sm:$0xff]  ;;  %9621 = vst [vmem:[#allocation8_spill] sm:$0xff] %v7642_v5  ;;  %v7675_v14 = vld [vmem:[%s9544_s0 + $0x211] sm:$0xff] }
  0x19   :  { %6270 = vmatmul.mubr.msk.f32.gmra.mrb[6].mxu0 %vm110_vm0, %v7450_v36  ;;  %5904 = vmatprep.mubr.msk.f32.mxu1 %vm110_vm0, %v7455_v37  ;;  %9616 = vst [vmem:[#allocation3_spill] sm:$0xff] %v7568_v59  ;;  %v7591_v62 = vld [vmem:[%s9544_s0 + $0x21] sm:$0xff]  ;;  %v7680_v15 = vld [vmem:[%s9544_s0 + $0x311] sm:$0xff] }
  0x1a   :  { %6272 = vmatprep.mubr.msk.f32.mxu0 %vm110_vm0, %v7460_v38  ;;  %v7596_v63 = vld [vmem:[%s9544_s0 + $0x121] sm:$0xff]  ;;  %9624 = vst [vmem:[#allocation11_spill] sm:$0xff] %v7680_v15  ;;  %v7703_v18 = vld [vmem:[%s9544_s0 + $0x231] sm:$0xff] }
  0x1b   :  { %9618 = vst [vmem:[#allocation5_spill] sm:$0xff] %v7596_v63  ;;  %v7619_v2 = vld [vmem:[%s9544_s0 + $0x41] sm:$0xff]  ;;  %v7708_v19 = vld [vmem:[%s9544_s0 + $0x331] sm:$0xff] }
  0x1c   :  { %5905 = vmatmul.mubr.msk.f32.gmra.mrb[8].mxu1 %vm110_vm0, %v7477_v41  ;;  %v7624_v3 = vld [vmem:[%s9544_s0 + $0x141] sm:$0xff]  ;;  %9626 = vst [vmem:[#allocation13_spill] sm:$0xff] %v7708_v19  ;;  %v7731_v31 = vld [vmem:[%s9544_s0 + $0x251] sm:$0xff] }
  0x1d   :  { %6273 = vmatmul.mubr.msk.f32.gmra.mrb[8].mxu0 %vm110_vm0, %v7490_v45  ;;  %5907 = vmatprep.mubr.msk.f32.mxu1 %vm110_vm0, %v7495_v46  ;;  %9620 = vst [vmem:[#allocation7_spill] sm:$0xff] %v7624_v3  ;;  %v7647_v6 = vld [vmem:[%s9544_s0 + $0x61] sm:$0xff]  ;;  %v7736_v39 = vld [vmem:[%s9544_s0 + $0x351] sm:$0xff] }
  0x1e   :  { %6275 = vmatprep.mubr.msk.f32.mxu0 %vm110_vm0, %v7502_v48  ;;  %v7652_v8 = vld [vmem:[%s9544_s0 + $0x161] sm:$0xff]  ;;  %9628 = vst [vmem:[#allocation15_spill] sm:$0xff] %v7736_v39  ;;  %v5137_v43 = vld [vmem:[%s9543_s1 + $0xd0] sm:$0xff] }
  0x1f   :  { %9622 = vst [vmem:[#allocation9_spill] sm:$0xff] %v7652_v8  ;;  %v7663_v9 = vld [vmem:[%s9544_s0 + $0x201] sm:$0xff]  ;;  %v6764_v53 = vpack.c.bf16 %v5138_v44, %v5137_v43 }
  0x20   :  { %5908 = vmatmul.mubr.msk.f32.gmra.mrb[10].mxu1 %vm110_vm0, %v7514_v49  ;;  %v7670_v10 = vld [vmem:[%s9544_s0 + $0x301] sm:$0xff] }
  0x21   :  { %6276 = vmatmul.mubr.msk.f32.gmra.mrb[10].mxu0 %vm110_vm0, %v7521_v50  ;;  %5910 = vmatprep.mubr.msk.f32.mxu1 %vm110_vm0, %v7526_v51  ;;  %9623 = vst [vmem:[#allocation10_spill] sm:$0xff] %v7670_v10  ;;  %v7691_v16 = vld [vmem:[%s9544_s0 + $0x221] sm:$0xff] }
  0x22   :  { %6278 = vmatprep.mubr.msk.f32.mxu0 %vm110_vm0, %v7531_v52  ;;  %v7698_v17 = vld [vmem:[%s9544_s0 + $0x321] sm:$0xff] }
  0x23   :  { %9625 = vst [vmem:[#allocation12_spill] sm:$0xff] %v7698_v17  ;;  %v7719_v28 = vld [vmem:[%s9544_s0 + $0x241] sm:$0xff] }
  0x24   :  { %5911 = vmatmul.mubr.msk.f32.gmra.mrb[12].mxu1 %vm110_vm0, %v7550_v56  ;;  %v7726_v29 = vld [vmem:[%s9544_s0 + $0x341] sm:$0xff] }
  0x25   :  { %6279 = vmatmul.mubr.msk.f32.gmra.mrb[12].mxu0 %vm110_vm0, %v7557_v57  ;;  %5913 = vmatprep.mubr.msk.f32.mxu1 %vm110_vm0, %v7562_v58  ;;  %9627 = vst [vmem:[#allocation14_spill] sm:$0xff] %v7726_v29  ;;  %v7747_v40 = vld [vmem:[%s9544_s0 + $0x261] sm:$0xff] }
  0x26   :  { %6281 = vmatprep.mubr.msk.f32.mxu0 %vm110_vm0, %v7568_v59  ;;  %v7754_v42 = vld [vmem:[%s9544_s0 + $0x361] sm:$0xff] }
  0x27   :  { %9629 = vst [vmem:[#allocation16_spill] sm:$0xff] %v7754_v42  ;;  %v5209_v54 = vld [vmem:[%s9543_s1 + $0xe0] sm:$0xff] }
  0x28   :  { %5914 = vmatmul.mubr.msk.f32.gmra.mrb[14].mxu1 %vm110_vm0, %v7579_v60  ;;  %v7785_v43 = vpack.c.bf16 %v5210_v12, %v5209_v54  ;;  %v7831_v12 = vld [vmem:[%s9544_s0 + $0x181] sm:$0xff] }
  0x29   :  { %6282 = vmatmul.mubr.msk.f32.gmra.mrb[14].mxu0 %vm110_vm0, %v7586_v61  ;;  %5916 = vmatprep.mubr.msk.f32.mxu1 %vm110_vm0, %v7591_v62  ;;  %9630 = vst [vmem:[#allocation17_spill] sm:$0xff] %v7831_v12  ;;  %v7849_v44 = vld [vmem:[%s9544_s0 + $0x1a1] sm:$0xff] }
  0x2a   :  { %6284 = vmatprep.mubr.msk.f32.mxu0 %vm110_vm0, %v7596_v63  ;;  %9632 = vst [vmem:[#allocation19_spill] sm:$0xff] %v7849_v44  ;;  %v7867_v54 = vld [vmem:[%s9544_s0 + $0x1c1] sm:$0xff] }
  0x2b   :  { %9634 = vst [vmem:[#allocation21_spill] sm:$0xff] %v7867_v54 }
  0x2c   :  { %5917 = vmatmul.mubr.msk.f32.gmra.mrb[16].mxu1 %vm110_vm0, %v7607_v0 }
  0x2d   :  { %6285 = vmatmul.mubr.msk.f32.gmra.mrb[16].mxu0 %vm110_vm0, %v7614_v1  ;;  %5919 = vmatprep.mubr.msk.f32.mxu1 %vm110_vm0, %v7619_v2 }
  0x2e   :  { %6287 = vmatprep.mubr.msk.f32.mxu0 %vm110_vm0, %v7624_v3 }
  0x30   :  { %5920 = vmatmul.mubr.msk.f32.gmra.mrb[18].mxu1 %vm110_vm0, %v7635_v4 }
  0x31   :  { %6288 = vmatmul.mubr.msk.f32.gmra.mrb[18].mxu0 %vm110_vm0, %v7642_v5  ;;  %5922 = vmatprep.mubr.msk.f32.mxu1 %vm110_vm0, %v7647_v6 }
  0x32   :  { %6290 = vmatprep.mubr.msk.f32.mxu0 %vm110_vm0, %v7652_v8 }
  0x34   :  { %5923 = vmatmul.mubr.msk.f32.gmra.mrb[20].mxu1 %vm110_vm0, %v7663_v9 }
  0x35   :  { %6291 = vmatmul.mubr.msk.f32.gmra.mrb[20].mxu0 %vm110_vm0, %v7670_v10  ;;  %5925 = vmatprep.mubr.msk.f32.mxu1 %vm110_vm0, %v7675_v14 }
  0x36   :  { %6293 = vmatprep.mubr.msk.f32.mxu0 %vm110_vm0, %v7680_v15 }
  0x38   :  { %5926 = vmatmul.mubr.msk.f32.gmra.mrb[22].mxu1 %vm110_vm0, %v7691_v16 }
  0x39   :  { %6294 = vmatmul.mubr.msk.f32.gmra.mrb[22].mxu0 %vm110_vm0, %v7698_v17  ;;  %5928 = vmatprep.mubr.msk.f32.mxu1 %vm110_vm0, %v7703_v18 }
  0x3a   :  { %6296 = vmatprep.mubr.msk.f32.mxu0 %vm110_vm0, %v7708_v19 }
  0x3c   :  { %5929 = vmatmul.mubr.msk.f32.gmra.mrb[24].mxu1 %vm110_vm0, %v7719_v28 }
  0x3d   :  { %6297 = vmatmul.mubr.msk.f32.gmra.mrb[24].mxu0 %vm110_vm0, %v7726_v29  ;;  %5931 = vmatprep.mubr.msk.f32.mxu1 %vm110_vm0, %v7731_v31 }
  0x3e   :  { %6299 = vmatprep.mubr.msk.f32.mxu0 %vm110_vm0, %v7736_v39 }
  0x40   :  { %5932 = vmatmul.mubr.msk.f32.gmra.mrb[26].mxu1 %vm110_vm0, %v7747_v40 }
  0x41   :  { %6300 = vmatmul.mubr.msk.f32.gmra.mrb[26].mxu0 %vm110_vm0, %v7754_v42  ;;  %5934 = vmatprep.mubr.msk.f32.mxu1 %vm110_vm0, %v7332_v13 }
  0x42   :  { %6352 = vmatprep.mubr.msk.f32.mxu0 %vm110_vm0, %v7568_v59 }
  0x44   :  { %5935 = vmatmul.mubr.msk.f32.gmra.mrb[28].mxu1 %vm110_vm0, %v7360_v21 }
  0x45   :  { %6353 = vmatmul.mubr.msk.f32.vlgmr.msra.gmra.mrb[0].mxu0 %vm110_vm0, %v7586_v61  ;;  %5937 = vmatprep.mubr.msk.f32.mxu1 %vm110_vm0, %v7372_v23 }
  0x46   :  { %6763 = vmatpush3.bf16.msra.mxu0 %v7497_v47  ;;  %6355 = vmatprep.mubr.msk.f32.mxu0 %vm110_vm0, %v7596_v63  ;;  %v7844_v47 = vld [vmem:[%s9544_s0 + $0x191] sm:$0xff] }
  0x47   :  { %6765 = vmatprep.subr.bf16.mxu0 %v6764_v53  ;;  %9631 = vst [vmem:[#allocation18_spill] sm:$0xff] %v7844_v47 }
  0x48   :  { %5938 = vmatmul.mubr.msk.f32.gmra.mrb[30].mxu1 %vm110_vm0, %v7386_v25 }
  0x49   :  { %6356 = vmatmul.mubr.msk.f32.gmra.mrb[2].mxu0 %vm110_vm0, %v7614_v1  ;;  %5940 = vmatprep.mubr.msk.f32.mxu1 %vm110_vm0, %v7398_v27 }
  0x4a   :  { %6358 = vmatprep.mubr.msk.f32.mxu0 %vm110_vm0, %v7624_v3  ;;  %6767 = vmatpush3.bf16.msra.mxu0 %v6764_v53  ;;  %v7862_v53 = vld [vmem:[%s9544_s0 + $0x1b1] sm:$0xff] }
  0x4b   :  { %6769 = vmatprep.subr.bf16.mxu0 %v7785_v43  ;;  %9633 = vst [vmem:[#allocation20_spill] sm:$0xff] %v7862_v53 }
  0x4c   :  { %5941 = vmatmul.mubr.msk.f32.gmra.mrb[32].mxu1 %vm110_vm0, %v7422_v32 }
  0x4d   :  { %6359 = vmatmul.mubr.msk.f32.gmra.mrb[4].mxu0 %vm110_vm0, %v7642_v5  ;;  %5943 = vmatprep.mubr.msk.f32.mxu1 %vm110_vm0, %v7432_v34 }
  0x4e   :  { %6361 = vmatprep.mubr.msk.f32.mxu0 %vm110_vm0, %v7652_v8 }
  0x50   :  { %5944 = vmatmul.mubr.msk.f32.gmra.mrb[34].mxu1 %vm110_vm0, %v7450_v36 }
  0x51   :  { %6362 = vmatmul.mubr.msk.f32.gmra.mrb[6].mxu0 %vm110_vm0, %v7670_v10  ;;  %5946 = vmatprep.mubr.msk.f32.mxu1 %vm110_vm0, %v7460_v38 }
  0x52   :  { %6364 = vmatprep.mubr.msk.f32.mxu0 %vm110_vm0, %v7680_v15 }
  0x54   :  { %5947 = vmatmul.mubr.msk.f32.gmra.mrb[36].mxu1 %vm110_vm0, %v7490_v45 }
  0x55   :  { %6365 = vmatmul.mubr.msk.f32.gmra.mrb[8].mxu0 %vm110_vm0, %v7698_v17  ;;  %5949 = vmatprep.mubr.msk.f32.mxu1 %vm110_vm0, %v7502_v48 }
  0x56   :  { %6367 = vmatprep.mubr.msk.f32.mxu0 %vm110_vm0, %v7708_v19 }
  0x58   :  { %5950 = vmatmul.mubr.msk.f32.gmra.mrb[38].mxu1 %vm110_vm0, %v7521_v50 }
  0x59   :  { %6368 = vmatmul.mubr.msk.f32.gmra.mrb[10].mxu0 %vm110_vm0, %v7726_v29  ;;  %5952 = vmatprep.mubr.msk.f32.mxu1 %vm110_vm0, %v7531_v52 }
  0x5a   :  { %6370 = vmatprep.mubr.msk.f32.mxu0 %vm110_vm0, %v7736_v39 }
  0x5c   :  { %5953 = vmatmul.mubr.msk.f32.gmra.mrb[40].mxu1 %vm110_vm0, %v7557_v57 }
  0x5d   :  { %6371 = vmatmul.mubr.msk.f32.gmra.mrb[12].mxu0 %vm110_vm0, %v7754_v42  ;;  %5955 = vmatprep.mubr.msk.f32.mxu1 %vm110_vm0, %v7568_v59  ;;  %v8170_v59 = vld [vmem:[%s9544_s0 + $0x291] sm:$0xff] }
  0x5e   :  { %6373 = vmatprep.mubr.msk.f32.mxu0 %vm110_vm0, %v7831_v12  ;;  %v7971_v12 = vld [vmem:[%s9544_s0 + $0x10] sm:$0xff]  ;;  %9660 = vst [vmem:[#allocation47_spill] sm:$0xff] %v8170_v59 }
  0x60   :  { %5956 = vmatmul.mubr.msk.f32.gmra.mrb[42].mxu1 %vm110_vm0, %v7586_v61  ;;  %v8157_v61 = vld [vmem:[%s9544_s0 + $0xf1] sm:$0xff] }
  0x61   :  { %6374 = vmatmul.mubr.msk.f32.gmra.mrb[14].mxu0 %vm110_vm0, %v7844_v47  ;;  %5958 = vmatprep.mubr.msk.f32.mxu1 %vm110_vm0, %v7596_v63  ;;  %v7885_v47 = vld [vmem:[%s9544_s0 + $0x1e1] sm:$0xff]  ;;  %9659 = vst [vmem:[#allocation46_spill] sm:$0xff] %v8157_v61 }
  0x62   :  { %6376 = vmatprep.mubr.msk.f32.mxu0 %vm110_vm0, %v7849_v44  ;;  %v7880_v44 = vld [vmem:[%s9544_s0 + $0x1d1] sm:$0xff]  ;;  %9636 = vst [vmem:[#allocation23_spill] sm:$0xff] %v7885_v47  ;;  %v8152_v63 = vld [vmem:[%s9544_s0 + $0xe1] sm:$0xff] }
  0x63   :  { %9635 = vst [vmem:[#allocation22_spill] sm:$0xff] %v7880_v44  ;;  %9658 = vst [vmem:[#allocation45_spill] sm:$0xff] %v8152_v63 }
  0x64   :  { %5959 = vmatmul.mubr.msk.f32.gmra.mrb[44].mxu1 %vm110_vm0, %v7614_v1  ;;  %v8121_v1 = vld [vmem:[%s9544_s0 + $0xb1] sm:$0xff] }
  0x65   :  { %6377 = vmatmul.mubr.msk.f32.gmra.mrb[16].mxu0 %vm110_vm0, %v7862_v53  ;;  %5961 = vmatprep.mubr.msk.f32.mxu1 %vm110_vm0, %v7624_v3  ;;  %v7903_v53 = vld [vmem:[%s9544_s0 + $0x391] sm:$0xff]  ;;  %v8116_v3 = vld [vmem:[%s9544_s0 + $0xa1] sm:$0xff]  ;;  %9655 = vst [vmem:[#allocation42_spill] sm:$0xff] %v8121_v1 }
  0x66   :  { %6379 = vmatprep.mubr.msk.f32.mxu0 %vm110_vm0, %v7867_v54  ;;  %v7898_v54 = vld [vmem:[%s9544_s0 + $0x381] sm:$0xff]  ;;  %9638 = vst [vmem:[#allocation25_spill] sm:$0xff] %v7903_v53 }
  0x67   :  { %9637 = vst [vmem:[#allocation24_spill] sm:$0xff] %v7898_v54 }
  0x68   :  { %5962 = vmatmul.mubr.msk.f32.gmra.mrb[46].mxu1 %vm110_vm0, %v7642_v5  ;;  %v8103_v5 = vld [vmem:[%s9544_s0 + $0x91] sm:$0xff] }
  0x69   :  { %6380 = vmatmul.mubr.msk.f32.gmra.mrb[18].mxu0 %vm110_vm0, %v7880_v44  ;;  %5964 = vmatprep.mubr.msk.f32.mxu1 %vm110_vm0, %v7652_v8  ;;  %v7921_v44 = vld [vmem:[%s9544_s0 + $0x3b1] sm:$0xff] }
  0x6a   :  { %6382 = vmatprep.mubr.msk.f32.mxu0 %vm110_vm0, %v7885_v47  ;;  %v7916_v47 = vld [vmem:[%s9544_s0 + $0x3a1] sm:$0xff]  ;;  %9640 = vst [vmem:[#allocation27_spill] sm:$0xff] %v7921_v44  ;;  %v8098_v8 = vld [vmem:[%s9544_s0 + $0x271] sm:$0xff] }
  0x6b   :  { %9639 = vst [vmem:[#allocation26_spill] sm:$0xff] %v7916_v47  ;;  %9654 = vst [vmem:[#allocation41_spill] sm:$0xff] %v8098_v8 }
  0x6c   :  { %5965 = vmatmul.mubr.msk.f32.gmra.mrb[48].mxu1 %vm110_vm0, %v7670_v10  ;;  %v8091_v10 = vld [vmem:[%s9544_s0 + $0x260] sm:$0xff] }
  0x6d   :  { %6383 = vmatmul.mubr.msk.f32.gmra.mrb[20].mxu0 %vm110_vm0, %v7898_v54  ;;  %5967 = vmatprep.mubr.msk.f32.mxu1 %vm110_vm0, %v7680_v15  ;;  %v7939_v54 = vld [vmem:[%s9544_s0 + $0x3d1] sm:$0xff]  ;;  %9653 = vst [vmem:[#allocation40_spill] sm:$0xff] %v8091_v10 }
  0x6e   :  { %6385 = vmatprep.mubr.msk.f32.mxu0 %vm110_vm0, %v7903_v53  ;;  %v7934_v53 = vld [vmem:[%s9544_s0 + $0x3c1] sm:$0xff]  ;;  %9642 = vst [vmem:[#allocation29_spill] sm:$0xff] %v7939_v54  ;;  %v8080_v15 = vld [vmem:[%s9544_s0 + $0x250] sm:$0xff] }
  0x6f   :  { %9641 = vst [vmem:[#allocation28_spill] sm:$0xff] %v7934_v53  ;;  %9652 = vst [vmem:[#allocation39_spill] sm:$0xff] %v8080_v15 }
  0x70   :  { %5968 = vmatmul.mubr.msk.f32.gmra.mrb[50].mxu1 %vm110_vm0, %v7698_v17  ;;  %v8055_v17 = vld [vmem:[%s9544_s0 + $0x220] sm:$0xff] }
  0x71   :  { %6386 = vmatmul.mubr.msk.f32.gmra.mrb[22].mxu0 %vm110_vm0, %v7916_v47  ;;  %5970 = vmatprep.mubr.msk.f32.mxu1 %vm110_vm0, %v7708_v19  ;;  %v14_v47 = vld [vmem:[%s9544_s0] sm:$0xff]  ;;  %v8045_v19 = vld [vmem:[%s9544_s0 + $0x210] sm:$0xff]  ;;  %9649 = vst [vmem:[#allocation36_spill] sm:$0xff] %v8055_v17 }
  0x72   :  { %6388 = vmatprep.mubr.msk.f32.mxu0 %vm110_vm0, %v7921_v44  ;;  %v7952_v44 = vld [vmem:[%s9544_s0 + $0x3e1] sm:$0xff]  ;;  %9648 = vst [vmem:[#allocation35_spill] sm:$0xff] %v8045_v19 }
  0x73   :  { %9643 = vst [vmem:[#allocation30_spill] sm:$0xff] %v7952_v44 }
  0x74   :  { %5971 = vmatmul.mubr.msk.f32.gmra.mrb[52].mxu1 %vm110_vm0, %v7726_v29 }
  0x75   :  { %6389 = vmatmul.mubr.msk.f32.gmra.mrb[24].mxu0 %vm110_vm0, %v7934_v53  ;;  %5973 = vmatprep.mubr.msk.f32.mxu1 %vm110_vm0, %v7736_v39  ;;  %v4813_v53 = vld [vmem:[%s9543_s1 + $0x50] sm:$0xff] }
  0x76   :  { %6391 = vmatprep.mubr.msk.f32.mxu0 %vm110_vm0, %v7939_v54  ;;  %v4814_v54 = vld [vmem:[%s9543_s1 + $0x58] sm:$0xff] }
  0x77   :  { %v6732_v39 = vpack.c.bf16 %v4814_v54, %v4813_v53  ;;  %v7994_v53 = vld [vmem:[%s9544_s0 + $0x30] sm:$0xff]  ;;  %v8003_v54 = vld [vmem:[%s9544_s0 + $0x40] sm:$0xff] }
  0x78   :  { %5974 = vmatmul.mubr.msk.f32.gmra.mrb[54].mxu1 %vm110_vm0, %v7754_v42  ;;  %v7978_v42 = vld [vmem:[%s9544_s0 + $0x20] sm:$0xff] }
  0x79   :  { %6392 = vmatmul.mubr.msk.f32.gmra.mrb[26].mxu0 %vm110_vm0, %v7952_v44  ;;  %5984 = vmatprep.mubr.msk.f32.mxu1 %vm110_vm0, %v14_v47  ;;  %9644 = vst [vmem:[#allocation31_spill] sm:$0xff] %v7978_v42  ;;  %v4899_v47 = vld [vmem:[%s9543_s1 + $0x60] sm:$0xff]  ;;  %v4900_v44 = vld [vmem:[%s9543_s1 + $0x68] sm:$0xff] }
  0x7a   :  { %6394 = vmatprep.mubr.msk.f32.mxu0 %vm110_vm0, %v7579_v60  ;;  %v8005_v29 = vpack.c.bf16 %v4900_v44, %v4899_v47  ;;  %v8023_v44 = vld [vmem:[%s9544_s0 + $0x60] sm:$0xff]  ;;  %v8028_v47 = vld [vmem:[%s9544_s0 + $0x71] sm:$0xff] }
  0x7b   :  { %9646 = vst [vmem:[#allocation33_spill] sm:$0xff] %v8023_v44  ;;  %9647 = vst [vmem:[#allocation34_spill] sm:$0xff] %v8028_v47 }
  0x7c   :  { %5985 = vmatmul.mubr.msk.f32.vlgmr.msra.gmra.mrb[0].mxu1 %vm110_vm0, %v7971_v12 }
  0x7d   :  { %6395 = vmatmul.mubr.msk.f32.gmra.mrb[28].mxu0 %vm110_vm0, %v7591_v62  ;;  %6731 = vmatpush3.bf16.msra.mxu1 %v7541_v55  ;;  %v8016_v55 = vld [vmem:[%s9544_s0 + $0x50] sm:$0xff] }
  0x7e   :  { %5987 = vmatprep.mubr.msk.f32.mxu1 %vm110_vm0, %v7978_v42  ;;  %6397 = vmatprep.mubr.msk.f32.mxu0 %vm110_vm0, %v7607_v0  ;;  %9645 = vst [vmem:[#allocation32_spill] sm:$0xff] %v8016_v55 }
  0x7f   :  { %6733 = vmatprep.subr.bf16.mxu1 %v6732_v39 }
  0x80   :  { %5988 = vmatmul.mubr.msk.f32.gmra.mrb[2].mxu1 %vm110_vm0, %v7994_v53 }
  0x81   :  { %6398 = vmatmul.mubr.msk.f32.gmra.mrb[30].mxu0 %vm110_vm0, %v7619_v2  ;;  %5990 = vmatprep.mubr.msk.f32.mxu1 %vm110_vm0, %v8003_v54 }
  0x82   :  { %6400 = vmatprep.mubr.msk.f32.mxu0 %vm110_vm0, %v7635_v4  ;;  %6735 = vmatpush3.bf16.msra.mxu1 %v6732_v39  ;;  %v21_v39 = vld [vmem:[%s9544_s0 + $0x200] sm:$0xff] }
  0x83   :  { %6737 = vmatprep.subr.bf16.mxu1 %v8005_v29 }
  0x84   :  { %5991 = vmatmul.mubr.msk.f32.gmra.mrb[4].mxu1 %vm110_vm0, %v8016_v55 }
  0x85   :  { %6401 = vmatmul.mubr.msk.f32.gmra.mrb[32].mxu0 %vm110_vm0, %v7647_v6  ;;  %5993 = vmatprep.mubr.msk.f32.mxu1 %vm110_vm0, %v8023_v44 }
  0x86   :  { %6403 = vmatprep.mubr.msk.f32.mxu0 %vm110_vm0, %v8028_v47  ;;  %v8062_v47 = vld [vmem:[%s9544_s0 + $0x230] sm:$0xff] }
  0x87   :  { %9650 = vst [vmem:[#allocation37_spill] sm:$0xff] %v8062_v47 }
  0x88   :  { %5994 = vmatmul.mubr.msk.f32.gmra.mrb[6].mxu1 %vm110_vm0, %v21_v39  ;;  %v8073_v39 = vld [vmem:[%s9544_s0 + $0x240] sm:$0xff] }
  0x89   :  { %6404 = vmatmul.mubr.msk.f32.gmra.mrb[34].mxu0 %vm110_vm0, %v7675_v14  ;;  %5996 = vmatprep.mubr.msk.f32.mxu1 %vm110_vm0, %v8045_v19  ;;  %9651 = vst [vmem:[#allocation38_spill] sm:$0xff] %v8073_v39 }
  0x8a   :  { %6406 = vmatprep.mubr.msk.f32.mxu0 %vm110_vm0, %v7691_v16 }
  0x8c   :  { %5997 = vmatmul.mubr.msk.f32.gmra.mrb[8].mxu1 %vm110_vm0, %v8055_v17 }
  0x8d   :  { %6407 = vmatmul.mubr.msk.f32.gmra.mrb[36].mxu0 %vm110_vm0, %v7703_v18  ;;  %5999 = vmatprep.mubr.msk.f32.mxu1 %vm110_vm0, %v8062_v47 }
  0x8e   :  { %6409 = vmatprep.mubr.msk.f32.mxu0 %vm110_vm0, %v7719_v28 }
  0x90   :  { %6000 = vmatmul.mubr.msk.f32.gmra.mrb[10].mxu1 %vm110_vm0, %v8073_v39 }
  0x91   :  { %6410 = vmatmul.mubr.msk.f32.gmra.mrb[38].mxu0 %vm110_vm0, %v7731_v31  ;;  %6002 = vmatprep.mubr.msk.f32.mxu1 %vm110_vm0, %v8080_v15 }
  0x92   :  { %6412 = vmatprep.mubr.msk.f32.mxu0 %vm110_vm0, %v7747_v40 }
  0x94   :  { %6003 = vmatmul.mubr.msk.f32.gmra.mrb[12].mxu1 %vm110_vm0, %v8091_v10 }
  0x95   :  { %6413 = vmatmul.mubr.msk.f32.gmra.mrb[40].mxu0 %vm110_vm0, %v8098_v8  ;;  %6005 = vmatprep.mubr.msk.f32.mxu1 %vm110_vm0, %v7323_v11  ;;  %v8134_v11 = vld [vmem:[%s9544_s0 + $0xc1] sm:$0xff]  ;;  %v8139_v8 = vld [vmem:[%s9544_s0 + $0xd1] sm:$0xff] }
  0x96   :  { %6415 = vmatprep.mubr.msk.f32.mxu0 %vm110_vm0, %v8103_v5  ;;  %9656 = vst [vmem:[#allocation43_spill] sm:$0xff] %v8134_v11  ;;  %9657 = vst [vmem:[#allocation44_spill] sm:$0xff] %v8139_v8 }
  0x98   :  { %6006 = vmatmul.mubr.msk.f32.gmra.mrb[14].mxu1 %vm110_vm0, %v7354_v20 }
  0x99   :  { %6416 = vmatmul.mubr.msk.f32.gmra.mrb[42].mxu0 %vm110_vm0, %v8116_v3  ;;  %6008 = vmatprep.mubr.msk.f32.mxu1 %vm110_vm0, %v7365_v22 }
  0x9a   :  { %6418 = vmatprep.mubr.msk.f32.mxu0 %vm110_vm0, %v8121_v1 }
  0x9c   :  { %6009 = vmatmul.mubr.msk.f32.gmra.mrb[16].mxu1 %vm110_vm0, %v7379_v24 }
  0x9d   :  { %6419 = vmatmul.mubr.msk.f32.gmra.mrb[44].mxu0 %vm110_vm0, %v8134_v11  ;;  %6011 = vmatprep.mubr.msk.f32.mxu1 %vm110_vm0, %v7391_v26  ;;  %v8253_v11 = vld [vmem:[%s9544_s0 + $0x120] sm:$0xff] }
  0x9e   :  { %6421 = vmatprep.mubr.msk.f32.mxu0 %vm110_vm0, %v8139_v8  ;;  %v8175_v8 = vld [vmem:[%s9544_s0 + $0x2a1] sm:$0xff] }
  0x9f   :  { %9661 = vst [vmem:[#allocation48_spill] sm:$0xff] %v8175_v8 }
  0xa0   :  { %6012 = vmatmul.mubr.msk.f32.gmra.mrb[18].mxu1 %vm110_vm0, %v7415_v30 }
  0xa1   :  { %6422 = vmatmul.mubr.msk.f32.gmra.mrb[46].mxu0 %vm110_vm0, %v8152_v63  ;;  %6014 = vmatprep.mubr.msk.f32.mxu1 %vm110_vm0, %v7427_v33  ;;  %v8193_v63 = vld [vmem:[%s9544_s0 + $0x2c1] sm:$0xff] }
  0xa2   :  { %6424 = vmatprep.mubr.msk.f32.mxu0 %vm110_vm0, %v8157_v61  ;;  %v8188_v61 = vld [vmem:[%s9544_s0 + $0x2b1] sm:$0xff]  ;;  %9663 = vst [vmem:[#allocation50_spill] sm:$0xff] %v8193_v63 }
  0xa3   :  { %9662 = vst [vmem:[#allocation49_spill] sm:$0xff] %v8188_v61 }
  0xa4   :  { %6015 = vmatmul.mubr.msk.f32.gmra.mrb[20].mxu1 %vm110_vm0, %v7443_v35  ;;  %v8206_v35 = vld [vmem:[%s9544_s0 + $0x2d1] sm:$0xff] }
  0xa5   :  { %6425 = vmatmul.mubr.msk.f32.gmra.mrb[48].mxu0 %vm110_vm0, %v8170_v59  ;;  %6017 = vmatprep.mubr.msk.f32.mxu1 %vm110_vm0, %v7455_v37  ;;  %9664 = vst [vmem:[#allocation51_spill] sm:$0xff] %v8206_v35  ;;  %v8246_v59 = vld [vmem:[%s9544_s0 + $0x110] sm:$0xff] }
  0xa6   :  { %6427 = vmatprep.mubr.msk.f32.mxu0 %vm110_vm0, %v8175_v8  ;;  %v8211_v8 = vld [vmem:[%s9544_s0 + $0x2e1] sm:$0xff] }
  0xa7   :  { %9665 = vst [vmem:[#allocation52_spill] sm:$0xff] %v8211_v8 }
  0xa8   :  { %6018 = vmatmul.mubr.msk.f32.gmra.mrb[22].mxu1 %vm110_vm0, %v7477_v41 }
  0xa9   :  { %6428 = vmatmul.mubr.msk.f32.gmra.mrb[50].mxu0 %vm110_vm0, %v8188_v61  ;;  %6020 = vmatprep.mubr.msk.f32.mxu1 %vm110_vm0, %v7495_v46  ;;  %v8229_v61 = vld [vmem:[%s9544_s0 + $0x100] sm:$0xff] }
  0xaa   :  { %6430 = vmatprep.mubr.msk.f32.mxu0 %vm110_vm0, %v8193_v63  ;;  %v8224_v63 = vld [vmem:[%s9544_s0 + $0x2f1] sm:$0xff]  ;;  %9667 = vst [vmem:[#allocation54_spill] sm:$0xff] %v8229_v61 }
  0xab   :  { %9666 = vst [vmem:[#allocation53_spill] sm:$0xff] %v8224_v63 }
  0xac   :  { %6021 = vmatmul.mubr.msk.f32.gmra.mrb[24].mxu1 %vm110_vm0, %v7514_v49 }
  0xad   :  { %6431 = vmatmul.mubr.msk.f32.gmra.mrb[52].mxu0 %vm110_vm0, %v8206_v35  ;;  %6023 = vmatprep.mubr.msk.f32.mxu1 %vm110_vm0, %v7526_v51  ;;  %v5211_v35 = vld [vmem:[%s9543_s1 + $0xf0] sm:$0xff] }
  0xae   :  { %6433 = vmatprep.mubr.msk.f32.mxu0 %vm110_vm0, %v8211_v8  ;;  %v5212_v8 = vld [vmem:[%s9543_s1 + $0xf8] sm:$0xff] }
  0xaf   :  { %v6772_v1 = vpack.c.bf16 %v5212_v8, %v5211_v35  ;;  %v8270_v8 = vld [vmem:[%s9544_s0 + $0x130] sm:$0xff]  ;;  %v8278_v35 = vld [vmem:[%s9544_s0 + $0x140] sm:$0xff] }
  0xb0   :  { %6024 = vmatmul.mubr.msk.f32.gmra.mrb[26].mxu1 %vm110_vm0, %v7550_v56 }
  0xb1   :  { %6434 = vmatmul.mubr.msk.f32.gmra.mrb[54].mxu0 %vm110_vm0, %v8224_v63  ;;  %6026 = vmatprep.mubr.msk.f32.mxu1 %vm110_vm0, %v8229_v61  ;;  %v5283_v63 = vld [vmem:[%s9543_s1 + $0x100] sm:$0xff]  ;;  %v5284_v61 = vld [vmem:[%s9543_s1 + $0x108] sm:$0xff] }
  0xb2   :  { %6444 = vmatprep.mubr.msk.f32.mxu0 %vm110_vm0, %v7971_v12 }
  0xb4   :  { %6027 = vmatmul.mubr.msk.f32.gmra.mrb[28].mxu1 %vm110_vm0, %v8246_v59 }
  0xb5   :  { %6445 = vmatmul.mubr.msk.f32.vlgmr.msra.gmra.mrb[0].mxu0 %vm110_vm0, %v7978_v42  ;;  %6029 = vmatprep.mubr.msk.f32.mxu1 %vm110_vm0, %v8253_v11  ;;  %v8280_v42 = vpack.c.bf16 %v5284_v61, %v5283_v63  ;;  %v8298_v61 = vld [vmem:[%s9544_s0 + $0x160] sm:$0xff]  ;;  %v8303_v63 = vld [vmem:[%s9544_s0 + $0x70] sm:$0xff] }
  0xb6   :  { %6771 = vmatpush3.bf16.msra.mxu0 %v7785_v43  ;;  %6447 = vmatprep.mubr.msk.f32.mxu0 %vm110_vm0, %v7994_v53  ;;  %v8291_v43 = vld [vmem:[%s9544_s0 + $0x150] sm:$0xff]  ;;  %9668 = vst [vmem:[#allocation55_spill] sm:$0xff] %v8303_v63 }
  0xb7   :  { %6773 = vmatprep.subr.bf16.mxu0 %v6772_v1 }
  0xb8   :  { %6030 = vmatmul.mubr.msk.f32.gmra.mrb[30].mxu1 %vm110_vm0, %v8270_v8 }
  0xb9   :  { %6448 = vmatmul.mubr.msk.f32.gmra.mrb[2].mxu0 %vm110_vm0, %v8003_v54  ;;  %6032 = vmatprep.mubr.msk.f32.mxu1 %vm110_vm0, %v8278_v35 }
  0xba   :  { %6450 = vmatprep.mubr.msk.f32.mxu0 %vm110_vm0, %v8016_v55  ;;  %6775 = vmatpush3.bf16.msra.mxu0 %v6772_v1  ;;  %v8315_v1 = vld [vmem:[%s9544_s0 + $0x300] sm:$0xff]  ;;  %v8322_v55 = vld [vmem:[%s9544_s0 + $0x310] sm:$0xff] }
  0xbb   :  { %6777 = vmatprep.subr.bf16.mxu0 %v8280_v42 }
  0xbc   :  { %6033 = vmatmul.mubr.msk.f32.gmra.mrb[32].mxu1 %vm110_vm0, %v8291_v43 }
  0xbd   :  { %6451 = vmatmul.mubr.msk.f32.gmra.mrb[4].mxu0 %vm110_vm0, %v8023_v44  ;;  %6035 = vmatprep.mubr.msk.f32.mxu1 %vm110_vm0, %v8298_v61  ;;  %v8333_v44 = vld [vmem:[%s9544_s0 + $0x320] sm:$0xff] }
  0xbe   :  { %6453 = vmatprep.mubr.msk.f32.mxu0 %vm110_vm0, %v8303_v63  ;;  %v8340_v63 = vld [vmem:[%s9544_s0 + $0x330] sm:$0xff] }
  0xc0   :  { %6036 = vmatmul.mubr.msk.f32.gmra.mrb[34].mxu1 %vm110_vm0, %v8315_v1 }
  0xc1   :  { %6454 = vmatmul.mubr.msk.f32.gmra.mrb[6].mxu0 %vm110_vm0, %v8045_v19  ;;  %6038 = vmatprep.mubr.msk.f32.mxu1 %vm110_vm0, %v8322_v55  ;;  %v8351_v19 = vld [vmem:[%s9544_s0 + $0x340] sm:$0xff] }
  0xc2   :  { %6456 = vmatprep.mubr.msk.f32.mxu0 %vm110_vm0, %v8055_v17  ;;  %v8358_v17 = vld [vmem:[%s9544_s0 + $0x350] sm:$0xff] }
  0xc4   :  { %6039 = vmatmul.mubr.msk.f32.gmra.mrb[36].mxu1 %vm110_vm0, %v8333_v44 }
  0xc5   :  { %6457 = vmatmul.mubr.msk.f32.gmra.mrb[8].mxu0 %vm110_vm0, %v8062_v47  ;;  %6041 = vmatprep.mubr.msk.f32.mxu1 %vm110_vm0, %v8340_v63  ;;  %v8369_v47 = vld [vmem:[%s9544_s0 + $0x360] sm:$0xff] }
  0xc6   :  { %6459 = vmatprep.mubr.msk.f32.mxu0 %vm110_vm0, %v8073_v39  ;;  %v8376_v39 = vld [vmem:[%s9544_s0 + $0x270] sm:$0xff] }
  0xc7   :  { %9669 = vst [vmem:[#allocation56_spill] sm:$0xff] %v8376_v39 }
  0xc8   :  { %6042 = vmatmul.mubr.msk.f32.gmra.mrb[38].mxu1 %vm110_vm0, %v8351_v19 }
  0xc9   :  { %6460 = vmatmul.mubr.msk.f32.gmra.mrb[10].mxu0 %vm110_vm0, %v8080_v15  ;;  %6044 = vmatprep.mubr.msk.f32.mxu1 %vm110_vm0, %v8358_v17 }
  0xca   :  { %6462 = vmatprep.mubr.msk.f32.mxu0 %vm110_vm0, %v8091_v10  ;;  %v4902_v10 = vld [vmem:[%s9543_s1 + $0x78] sm:$0xff] }
  0xcc   :  { %6045 = vmatmul.mubr.msk.f32.gmra.mrb[40].mxu1 %vm110_vm0, %v8369_v47 }
  0xcd   :  { %6463 = vmatmul.mubr.msk.f32.gmra.mrb[12].mxu0 %vm110_vm0, %v8376_v39  ;;  %6047 = vmatprep.mubr.msk.f32.mxu1 %vm110_vm0, %v7332_v13  ;;  %v8405_v13 = vld [vmem:[%s9544_s0 + $0xf0] sm:$0xff] }
  0xce   :  { %6465 = vmatprep.mubr.msk.f32.mxu0 %vm110_vm0, %v7354_v20  ;;  %v4901_v39 = vld [vmem:[%s9543_s1 + $0x70] sm:$0xff] }
  0xcf   :  { %v6740_v15 = vpack.c.bf16 %v4902_v10, %v4901_v39  ;;  %v4783_v10 = vld [vmem:[%s9544_s0 + $0x81] sm:$0xff] }
  0xd0   :  { %6048 = vmatmul.mubr.msk.f32.gmra.mrb[42].mxu1 %vm110_vm0, %v7360_v21  ;;  %v9674_v39 = vld [vmem:[#allocation47_spill] sm:$0xff] }
  0xd1   :  { %6466 = vmatmul.mubr.msk.f32.gmra.mrb[14].mxu0 %vm110_vm0, %v7365_v22  ;;  %6050 = vmatprep.mubr.msk.f32.mxu1 %vm110_vm0, %v7372_v23 }
  0xd2   :  { %6468 = vmatprep.mubr.msk.f32.mxu0 %vm110_vm0, %v7379_v24 }
  0xd4   :  { %6051 = vmatmul.mubr.msk.f32.gmra.mrb[44].mxu1 %vm110_vm0, %v7386_v25 }
  0xd5   :  { %6469 = vmatmul.mubr.msk.f32.gmra.mrb[16].mxu0 %vm110_vm0, %v7391_v26  ;;  %6053 = vmatprep.mubr.msk.f32.mxu1 %vm110_vm0, %v7398_v27 }
  0xd6   :  { %6471 = vmatprep.mubr.msk.f32.mxu0 %vm110_vm0, %v7415_v30 }
  0xd8   :  { %6054 = vmatmul.mubr.msk.f32.gmra.mrb[46].mxu1 %vm110_vm0, %v7422_v32 }
  0xd9   :  { %6472 = vmatmul.mubr.msk.f32.gmra.mrb[18].mxu0 %vm110_vm0, %v7427_v33  ;;  %6056 = vmatprep.mubr.msk.f32.mxu1 %vm110_vm0, %v7432_v34 }
  0xda   :  { %6474 = vmatprep.mubr.msk.f32.mxu0 %vm110_vm0, %v8405_v13 }
  0xdc   :  { %6057 = vmatmul.mubr.msk.f32.gmra.mrb[48].mxu1 %vm110_vm0, %v7450_v36  ;;  %v8442_v36 = vld [vmem:[%s9544_s0 + $0x2f0] sm:$0xff] }
  0xdd   :  { %6475 = vmatmul.mubr.msk.f32.gmra.mrb[20].mxu0 %vm110_vm0, %v7455_v37  ;;  %6059 = vmatprep.mubr.msk.f32.mxu1 %vm110_vm0, %v7460_v38 }
  0xde   :  { %6477 = vmatprep.mubr.msk.f32.mxu0 %vm110_vm0, %v7477_v41 }
  0xe0   :  { %6060 = vmatmul.mubr.msk.f32.gmra.mrb[50].mxu1 %vm110_vm0, %v7490_v45 }
  0xe1   :  { %6478 = vmatmul.mubr.msk.f32.gmra.mrb[22].mxu0 %vm110_vm0, %v7495_v46  ;;  %6062 = vmatprep.mubr.msk.f32.mxu1 %vm110_vm0, %v7502_v48 }
  0xe2   :  { %6480 = vmatprep.mubr.msk.f32.mxu0 %vm110_vm0, %v7514_v49 }
  0xe4   :  { %6063 = vmatmul.mubr.msk.f32.gmra.mrb[52].mxu1 %vm110_vm0, %v7521_v50 }
  0xe5   :  { %6481 = vmatmul.mubr.msk.f32.gmra.mrb[24].mxu0 %vm110_vm0, %v7526_v51  ;;  %6065 = vmatprep.mubr.msk.f32.mxu1 %vm110_vm0, %v7531_v52 }
  0xe6   :  { %6483 = vmatprep.mubr.msk.f32.mxu0 %vm110_vm0, %v7550_v56 }
  0xe8   :  { %6066 = vmatmul.mubr.msk.f32.gmra.mrb[54].mxu1 %vm110_vm0, %v7557_v57 }
  0xe9   :  { %6484 = vmatmul.mubr.msk.f32.gmra.mrb[26].mxu0 %vm110_vm0, %v8442_v36  ;;  %6076 = vmatprep.mubr.msk.f32.mxu1 %vm110_vm0, %v7562_v58  ;;  %v5113_v58 = vld [vmem:[%s9544_s0 + $0x170] sm:$0xff] }
  0xea   :  { %6486 = vmatprep.mubr.msk.f32.mxu0 %vm110_vm0, %v8246_v59 }
  0xec   :  { %6077 = vmatmul.mubr.msk.f32.vlgmr.msra.gmra.mrb[0].mxu1 %vm110_vm0, %v7579_v60 }
  0xed   :  { %6487 = vmatmul.mubr.msk.f32.gmra.mrb[28].mxu0 %vm110_vm0, %v8253_v11  ;;  %6739 = vmatpush3.bf16.msra.mxu1 %v8005_v29  ;;  %v9671_v29 = vld [vmem:[#allocation43_spill] sm:$0xff] }
  0xee   :  { %6079 = vmatprep.mubr.msk.f32.mxu1 %vm110_vm0, %v7591_v62  ;;  %6489 = vmatprep.mubr.msk.f32.mxu0 %vm110_vm0, %v8270_v8 }
  0xef   :  { %6741 = vmatprep.subr.bf16.mxu1 %v6740_v15 }
  0xf0   :  { %6080 = vmatmul.mubr.msk.f32.gmra.mrb[2].mxu1 %vm110_vm0, %v7607_v0 }
  0xf1   :  { %6490 = vmatmul.mubr.msk.f32.gmra.mrb[30].mxu0 %vm110_vm0, %v8278_v35  ;;  %6082 = vmatprep.mubr.msk.f32.mxu1 %vm110_vm0, %v7619_v2 }
  0xf2   :  { %6492 = vmatprep.mubr.msk.f32.mxu0 %vm110_vm0, %v8291_v43  ;;  %6743 = vmatpush3.bf16.msra.mxu1 %v6740_v15  ;;  %v9670_v15 = vld [vmem:[#allocation42_spill] sm:$0xff] }
  0xf3   :  { %6784 = vmatprep.subr.bf16.mxu1 %v7312_v7 }
  0xf4   :  { %6083 = vmatmul.mubr.msk.f32.gmra.mrb[4].mxu1 %vm110_vm0, %v7635_v4 }
  0xf5   :  { %6493 = vmatmul.mubr.msk.f32.gmra.mrb[32].mxu0 %vm110_vm0, %v8298_v61  ;;  %6085 = vmatprep.mubr.msk.f32.mxu1 %vm110_vm0, %v7647_v6 }
  0xf6   :  { %6495 = vmatprep.mubr.msk.f32.mxu0 %vm110_vm0, %v5113_v58  ;;  %v9675_v58 = vld [vmem:[#allocation48_spill] sm:$0xff] }
  0xf8   :  { %6086 = vmatmul.mubr.msk.f32.gmra.mrb[6].mxu1 %vm110_vm0, %v7663_v9  ;;  %v5120_v9 = vld [vmem:[%s9544_s0 + $0x370] sm:$0xff] }
  0xf9   :  { %6496 = vmatmul.mubr.msk.f32.gmra.mrb[34].mxu0 %vm110_vm0, %v8322_v55  ;;  %6088 = vmatprep.mubr.msk.f32.mxu1 %vm110_vm0, %v7675_v14 }
  0xfa   :  { %6498 = vmatprep.mubr.msk.f32.mxu0 %vm110_vm0, %v8333_v44 }
  0xfc   :  { %6089 = vmatmul.mubr.msk.f32.gmra.mrb[8].mxu1 %vm110_vm0, %v7691_v16 }
  0xfd   :  { %6499 = vmatmul.mubr.msk.f32.gmra.mrb[36].mxu0 %vm110_vm0, %v8340_v63  ;;  %6091 = vmatprep.mubr.msk.f32.mxu1 %vm110_vm0, %v7703_v18 }
  0xfe   :  { %6501 = vmatprep.mubr.msk.f32.mxu0 %vm110_vm0, %v8351_v19 }
 0x100   :  { %6092 = vmatmul.mubr.msk.f32.gmra.mrb[10].mxu1 %vm110_vm0, %v7719_v28 }
 0x101   :  { %6502 = vmatmul.mubr.msk.f32.gmra.mrb[38].mxu0 %vm110_vm0, %v8358_v17  ;;  %6094 = vmatprep.mubr.msk.f32.mxu1 %vm110_vm0, %v7731_v31 }
 0x102   :  { %6504 = vmatprep.mubr.msk.f32.mxu0 %vm110_vm0, %v8369_v47 }
 0x104   :  { %6095 = vmatmul.mubr.msk.f32.gmra.mrb[12].mxu1 %vm110_vm0, %v7747_v40 }
 0x105   :  { %6505 = vmatmul.mubr.msk.f32.gmra.mrb[40].mxu0 %vm110_vm0, %v5120_v9  ;;  %6097 = vmatprep.mubr.msk.f32.mxu1 %vm110_vm0, %v4783_v10  ;;  %v9676_v9 = vld [vmem:[#allocation49_spill] sm:$0xff]  ;;  %v9677_v10 = vld [vmem:[#allocation50_spill] sm:$0xff] }
 0x106   :  { %6507 = vmatprep.mubr.msk.f32.mxu0 %vm110_vm0, %v7360_v21  ;;  %v8541_v21 = vld [vmem:[%s9544_s0 + $0x1f0] sm:$0xff] }
 0x108   :  { %6098 = vmatmul.mubr.msk.f32.gmra.mrb[14].mxu1 %vm110_vm0, %v8103_v5 }
 0x109   :  { %6508 = vmatmul.mubr.msk.f32.gmra.mrb[42].mxu0 %vm110_vm0, %v7372_v23  ;;  %6100 = vmatprep.mubr.msk.f32.mxu1 %vm110_vm0, %v8116_v3  ;;  %v9672_v23 = vld [vmem:[#allocation44_spill] sm:$0xff] }
 0x10a   :  { %6510 = vmatprep.mubr.msk.f32.mxu0 %vm110_vm0, %v7386_v25  ;;  %v9673_v25 = vld [vmem:[#allocation45_spill] sm:$0xff] }
 0x10c   :  { %6101 = vmatmul.mubr.msk.f32.gmra.mrb[16].mxu1 %vm110_vm0, %v9670_v15 }
 0x10d   :  { %6511 = vmatmul.mubr.msk.f32.gmra.mrb[44].mxu0 %vm110_vm0, %v7398_v27  ;;  %6103 = vmatprep.mubr.msk.f32.mxu1 %vm110_vm0, %v9671_v29  ;;  %v4790_v27 = vld [vmem:[%s9544_s0 + $0x281] sm:$0xff] }
 0x10e   :  { %6513 = vmatprep.mubr.msk.f32.mxu0 %vm110_vm0, %v7422_v32 }
 0x110   :  { %6104 = vmatmul.mubr.msk.f32.gmra.mrb[18].mxu1 %vm110_vm0, %v9672_v23  ;;  %v9681_v23 = vld [vmem:[#allocation4_spill] sm:$0xff] }
 0x111   :  { %6514 = vmatmul.mubr.msk.f32.gmra.mrb[46].mxu0 %vm110_vm0, %v7432_v34  ;;  %6106 = vmatprep.mubr.msk.f32.mxu1 %vm110_vm0, %v9673_v25 }
 0x112   :  { %6516 = vmatprep.mubr.msk.f32.mxu0 %vm110_vm0, %v8541_v21 }
 0x114   :  { %6107 = vmatmul.mubr.msk.f32.gmra.mrb[20].mxu1 %vm110_vm0, %v4790_v27  ;;  %v9678_v27 = vld [vmem:[#allocation51_spill] sm:$0xff] }
 0x115   :  { %6517 = vmatmul.mubr.msk.f32.gmra.mrb[48].mxu0 %vm110_vm0, %v7460_v38  ;;  %6109 = vmatprep.mubr.msk.f32.mxu1 %vm110_vm0, %v9674_v39  ;;  %v5286_v39 = vld [vmem:[%s9543_s1 + $0x118] sm:$0xff] }
 0x116   :  { %6519 = vmatprep.mubr.msk.f32.mxu0 %vm110_vm0, %v7490_v45 }
 0x118   :  { %6110 = vmatmul.mubr.msk.f32.gmra.mrb[22].mxu1 %vm110_vm0, %v9675_v58  ;;  %v8580_v58 = vld [vmem:[%s9544_s0 + $0x3f0] sm:$0xff] }
 0x119   :  { %6520 = vmatmul.mubr.msk.f32.gmra.mrb[50].mxu0 %vm110_vm0, %v7502_v48  ;;  %6112 = vmatprep.mubr.msk.f32.mxu1 %vm110_vm0, %v9676_v9  ;;  %v9679_v9 = vld [vmem:[#allocation52_spill] sm:$0xff] }
 0x11a   :  { %6522 = vmatprep.mubr.msk.f32.mxu0 %vm110_vm0, %v7521_v50 }
 0x11c   :  { %6113 = vmatmul.mubr.msk.f32.gmra.mrb[24].mxu1 %vm110_vm0, %v9677_v10  ;;  %v5285_v10 = vld [vmem:[%s9543_s1 + $0x110] sm:$0xff] }
 0x11d   :  { %6523 = vmatmul.mubr.msk.f32.gmra.mrb[52].mxu0 %vm110_vm0, %v7531_v52  ;;  %6115 = vmatprep.mubr.msk.f32.mxu1 %vm110_vm0, %v9678_v27  ;;  %v9680_v27 = vld [vmem:[#allocation3_spill] sm:$0xff]  ;;  %v6780_v25 = vpack.c.bf16 %v5286_v39, %v5285_v10  ;;  %v9702_v39 = vld [vmem:[#allocation24_spill] sm:$0xff] }
 0x11e   :  { %6525 = vmatprep.mubr.msk.f32.mxu0 %vm110_vm0, %v7557_v57  ;;  %v9705_v10 = vld [vmem:[#allocation27_spill] sm:$0xff] }
 0x120   :  { %6116 = vmatmul.mubr.msk.f32.gmra.mrb[26].mxu1 %vm110_vm0, %v9679_v9  ;;  %v9682_v9 = vld [vmem:[#allocation5_spill] sm:$0xff] }
 0x121   :  { %6526 = vmatmul.mubr.msk.f32.gmra.mrb[54].mxu0 %vm110_vm0, %v8580_v58  ;;  %6118 = vmatprep.mubr.msk.f32.mxu1 %vm110_vm0, %v9680_v27  ;;  %v9683_v27 = vld [vmem:[#allocation6_spill] sm:$0xff] }
 0x122   :  { %6536 = vmatprep.mubr.msk.f32.mxu0 %vm110_vm0, %v7354_v20  ;;  %v9684_v20 = vld [vmem:[#allocation7_spill] sm:$0xff] }
 0x124   :  { %6119 = vmatmul.mubr.msk.f32.gmra.mrb[28].mxu1 %vm110_vm0, %v9681_v23  ;;  %v9691_v23 = vld [vmem:[#allocation14_spill] sm:$0xff] }
 0x125   :  { %6537 = vmatmul.mubr.msk.f32.vlgmr.msra.gmra.mrb[0].mxu0 %vm110_vm0, %v7365_v22  ;;  %6121 = vmatprep.mubr.msk.f32.mxu1 %vm110_vm0, %v9682_v9  ;;  %v9685_v22 = vld [vmem:[#allocation8_spill] sm:$0xff]  ;;  %v9704_v9 = vld [vmem:[#allocation26_spill] sm:$0xff] }
 0x126   :  { %6779 = vmatpush3.bf16.msra.mxu0 %v8280_v42  ;;  %6539 = vmatprep.mubr.msk.f32.mxu0 %vm110_vm0, %v7379_v24  ;;  %v9686_v24 = vld [vmem:[#allocation9_spill] sm:$0xff]  ;;  %v9689_v42 = vld [vmem:[#allocation12_spill] sm:$0xff] }
 0x127   :  { %6781 = vmatprep.subr.bf16.mxu0 %v6780_v25 }
 0x128   :  { %6122 = vmatmul.mubr.msk.f32.gmra.mrb[30].mxu1 %vm110_vm0, %v9683_v27  ;;  %v9706_v27 = vld [vmem:[#allocation28_spill] sm:$0xff] }
 0x129   :  { %6540 = vmatmul.mubr.msk.f32.gmra.mrb[2].mxu0 %vm110_vm0, %v7391_v26  ;;  %6124 = vmatprep.mubr.msk.f32.mxu1 %vm110_vm0, %v9684_v20  ;;  %v9687_v26 = vld [vmem:[#allocation10_spill] sm:$0xff]  ;;  %v9707_v20 = vld [vmem:[#allocation29_spill] sm:$0xff] }
 0x12a   :  { %6542 = vmatprep.mubr.msk.f32.mxu0 %vm110_vm0, %v7415_v30  ;;  %6783 = vmatpush3.bf16.msra.mxu0 %v6780_v25  ;;  %v9688_v30 = vld [vmem:[#allocation11_spill] sm:$0xff]  ;;  %v9698_v25 = vld [vmem:[#allocation21_spill] sm:$0xff] }
 0x12c   :  { %6125 = vmatmul.mubr.msk.f32.gmra.mrb[32].mxu1 %vm110_vm0, %v9685_v22  ;;  %v9708_v22 = vld [vmem:[#allocation30_spill] sm:$0xff] }
 0x12d   :  { %6543 = vmatmul.mubr.msk.f32.gmra.mrb[4].mxu0 %vm110_vm0, %v7427_v33  ;;  %6127 = vmatprep.mubr.msk.f32.mxu1 %vm110_vm0, %v9686_v24  ;;  %v9690_v33 = vld [vmem:[#allocation13_spill] sm:$0xff] }
 0x12e   :  { %6545 = vmatprep.mubr.msk.f32.mxu0 %vm110_vm0, %v8405_v13  ;;  %v9709_v24 = vld [vmem:[#allocation41_spill] sm:$0xff] }
 0x130   :  { %6128 = vmatmul.mubr.msk.f32.gmra.mrb[34].mxu1 %vm110_vm0, %v9687_v26  ;;  %v9710_v26 = vld [vmem:[#allocation54_spill] sm:$0xff] }
 0x131   :  { %6546 = vmatmul.mubr.msk.f32.gmra.mrb[6].mxu0 %vm110_vm0, %v7455_v37  ;;  %6130 = vmatprep.mubr.msk.f32.mxu1 %vm110_vm0, %v9688_v30  ;;  %v9692_v37 = vld [vmem:[#allocation15_spill] sm:$0xff]  ;;  %v7236_v30 = vld [vmem:[%s9544_s0 + $0x190] sm:$0xff] }
 0x132   :  { %6548 = vmatprep.mubr.msk.f32.mxu0 %vm110_vm0, %v7477_v41  ;;  %v9693_v41 = vld [vmem:[#allocation16_spill] sm:$0xff] }
 0x134   :  { %6131 = vmatmul.mubr.msk.f32.gmra.mrb[36].mxu1 %vm110_vm0, %v9689_v42  ;;  %v7237_v42 = vld [vmem:[%s9544_s0 + $0x1a0] sm:$0xff] }
 0x135   :  { %6549 = vmatmul.mubr.msk.f32.gmra.mrb[8].mxu0 %vm110_vm0, %v7495_v46  ;;  %6133 = vmatprep.mubr.msk.f32.mxu1 %vm110_vm0, %v9690_v33  ;;  %v9694_v46 = vld [vmem:[#allocation17_spill] sm:$0xff]  ;;  %v7238_v33 = vld [vmem:[%s9544_s0 + $0x1b0] sm:$0xff] }
 0x136   :  { %6551 = vmatprep.mubr.msk.f32.mxu0 %vm110_vm0, %v7514_v49  ;;  %v9695_v49 = vld [vmem:[#allocation18_spill] sm:$0xff] }
 0x138   :  { %6134 = vmatmul.mubr.msk.f32.gmra.mrb[38].mxu1 %vm110_vm0, %v9691_v23  ;;  %v9711_v23 = vld [vmem:[#allocation2_spill] sm:$0xff] }
 0x139   :  { %6552 = vmatmul.mubr.msk.f32.gmra.mrb[10].mxu0 %vm110_vm0, %v7526_v51  ;;  %6136 = vmatprep.mubr.msk.f32.mxu1 %vm110_vm0, %v9692_v37  ;;  %v9696_v51 = vld [vmem:[#allocation19_spill] sm:$0xff]  ;;  %v7249_v37 = vld [vmem:[%s9544_s0 + $0x3e0] sm:$0xff] }
 0x13a   :  { %6554 = vmatprep.mubr.msk.f32.mxu0 %vm110_vm0, %v7550_v56  ;;  %v9697_v56 = vld [vmem:[#allocation20_spill] sm:$0xff] }
 0x13c   :  { %6137 = vmatmul.mubr.msk.f32.gmra.mrb[40].mxu1 %vm110_vm0, %v9693_v41  ;;  %v8919_v41 = vld [vmem:[%s9544_s0 + $0x11] sm:$0xff] }
 0x13d   :  { %6555 = vmatmul.mubr.msk.f32.gmra.mrb[12].mxu0 %vm110_vm0, %v8442_v36  ;;  %6139 = vmatprep.mubr.msk.f32.mxu1 %vm110_vm0, %v9694_v46  ;;  %v9712_v46 = vld [vmem:[#allocation31_spill] sm:$0xff] }
 0x13e   :  { %6557 = vmatprep.mubr.msk.f32.mxu0 %vm110_vm0, %v7579_v60  ;;  %v9699_v60 = vld [vmem:[#allocation22_spill] sm:$0xff] }
 0x140   :  { %6140 = vmatmul.mubr.msk.f32.gmra.mrb[42].mxu1 %vm110_vm0, %v9695_v49  ;;  %v8928_v49 = vld [vmem:[%s9544_s0 + $0x21] sm:$0xff] }
 0x141   :  { %6558 = vmatmul.mubr.msk.f32.gmra.mrb[14].mxu0 %vm110_vm0, %v7591_v62  ;;  %6142 = vmatprep.mubr.msk.f32.mxu1 %vm110_vm0, %v9696_v51  ;;  %v9700_v62 = vld [vmem:[#allocation23_spill] sm:$0xff] }
 0x142   :  { %6560 = vmatprep.mubr.msk.f32.mxu0 %vm110_vm0, %v7607_v0  ;;  %v9701_v0 = vld [vmem:[#allocation34_spill] sm:$0xff] }
 0x143   :  { %v8946_v51 = vld [vmem:[%s9544_s0 + $0x41] sm:$0xff] }
 0x144   :  { %6143 = vmatmul.mubr.msk.f32.gmra.mrb[44].mxu1 %vm110_vm0, %v9697_v56  ;;  %v9714_v56 = vld [vmem:[#allocation33_spill] sm:$0xff] }
 0x145   :  { %6561 = vmatmul.mubr.msk.f32.gmra.mrb[16].mxu0 %vm110_vm0, %v7619_v2  ;;  %6145 = vmatprep.mubr.msk.f32.mxu1 %vm110_vm0, %v9698_v25  ;;  %v9703_v2 = vld [vmem:[#allocation25_spill] sm:$0xff]  ;;  %v9716_v25 = vld [vmem:[#allocation35_spill] sm:$0xff] }
 0x146   :  { %6563 = vmatprep.mubr.msk.f32.mxu0 %vm110_vm0, %v7635_v4 }
 0x148   :  { %6146 = vmatmul.mubr.msk.f32.gmra.mrb[46].mxu1 %vm110_vm0, %v9699_v60  ;;  %v9717_v60 = vld [vmem:[#allocation36_spill] sm:$0xff] }
 0x149   :  { %6564 = vmatmul.mubr.msk.f32.gmra.mrb[18].mxu0 %vm110_vm0, %v7647_v6  ;;  %6148 = vmatprep.mubr.msk.f32.mxu1 %vm110_vm0, %v9700_v62  ;;  %v9720_v62 = vld [vmem:[#allocation39_spill] sm:$0xff] }
 0x14a   :  { %6566 = vmatprep.mubr.msk.f32.mxu0 %vm110_vm0, %v9701_v0 }
 0x14c   :  { %6149 = vmatmul.mubr.msk.f32.gmra.mrb[48].mxu1 %vm110_vm0, %v9702_v39  ;;  %v9724_v39 = vld [vmem:[#allocation45_spill] sm:$0xff] }
 0x14d   :  { %6567 = vmatmul.mubr.msk.f32.gmra.mrb[20].mxu0 %vm110_vm0, %v7675_v14  ;;  %6151 = vmatprep.mubr.msk.f32.mxu1 %vm110_vm0, %v9703_v2  ;;  %v7260_v2 = vld [vmem:[%s9544_s0 + $0x290] sm:$0xff] }
 0x14e   :  { %6569 = vmatprep.mubr.msk.f32.mxu0 %vm110_vm0, %v7691_v16 }
 0x150   :  { %6152 = vmatmul.mubr.msk.f32.gmra.mrb[50].mxu1 %vm110_vm0, %v9704_v9  ;;  %v9726_v9 = vld [vmem:[#allocation47_spill] sm:$0xff] }
 0x151   :  { %6570 = vmatmul.mubr.msk.f32.gmra.mrb[22].mxu0 %vm110_vm0, %v7703_v18  ;;  %6154 = vmatprep.mubr.msk.f32.mxu1 %vm110_vm0, %v9705_v10  ;;  %v7261_v10 = vld [vmem:[%s9544_s0 + $0x2a0] sm:$0xff] }
 0x152   :  { %6572 = vmatprep.mubr.msk.f32.mxu0 %vm110_vm0, %v7719_v28 }
 0x154   :  { %6155 = vmatmul.mubr.msk.f32.gmra.mrb[52].mxu1 %vm110_vm0, %v9706_v27  ;;  %v9727_v27 = vld [vmem:[#allocation48_spill] sm:$0xff] }
 0x155   :  { %6573 = vmatmul.mubr.msk.f32.gmra.mrb[24].mxu0 %vm110_vm0, %v7731_v31  ;;  %6157 = vmatprep.mubr.msk.f32.mxu1 %vm110_vm0, %v9707_v20  ;;  %v7262_v20 = vld [vmem:[%s9544_s0 + $0x2b0] sm:$0xff] }
 0x156   :  { %6575 = vmatprep.mubr.msk.f32.mxu0 %vm110_vm0, %v7747_v40 }
 0x158   :  { %6158 = vmatmul.mubr.msk.f32.gmra.mrb[54].mxu1 %vm110_vm0, %v9708_v22  ;;  %v9728_v22 = vld [vmem:[#allocation49_spill] sm:$0xff] }
 0x159   :  { %6576 = vmatmul.mubr.msk.f32.gmra.mrb[26].mxu0 %vm110_vm0, %v9709_v24  ;;  %6168 = vmatprep.mubr.msk.f32.mxu1 %vm110_vm0, %v9710_v26  ;;  %v7263_v26 = vld [vmem:[%s9544_s0 + $0x2c0] sm:$0xff] }
 0x15a   :  { %6578 = vmatprep.mubr.msk.f32.mxu0 %vm110_vm0, %v7236_v30 }
 0x15c   :  { %6169 = vmatmul.mubr.msk.f32.vlgmr.msra.gmra.mrb[0].mxu1 %vm110_vm0, %v8246_v59  ;;  %v7239_v59 = vld [vmem:[%s9544_s0 + $0x1c0] sm:$0xff] }
 0x15d   :  { %6579 = vmatmul.mubr.msk.f32.gmra.mrb[28].mxu0 %vm110_vm0, %v7237_v42  ;;  %6786 = vmatpush3.bf16.msra.mxu1 %v7312_v7  ;;  %v8771_v7 = vld [vmem:[%s9544_s0 + $0x111] sm:$0xff] }
 0x15e   :  { %6171 = vmatprep.mubr.msk.f32.mxu1 %vm110_vm0, %v8253_v11  ;;  %6581 = vmatprep.mubr.msk.f32.mxu0 %vm110_vm0, %v7238_v33  ;;  %v8862_v11 = vld [vmem:[%s9544_s0 + $0x331] sm:$0xff] }
 0x15f   :  { %6785 = vmatprep.subr.bf16.mxu1 %v9711_v23 }
 0x160   :  { %6172 = vmatmul.mubr.msk.f32.gmra.mrb[2].mxu1 %vm110_vm0, %v8270_v8  ;;  %v8867_v8 = vld [vmem:[%s9544_s0 + $0x341] sm:$0xff] }
 0x161   :  { %6582 = vmatmul.mubr.msk.f32.gmra.mrb[30].mxu0 %vm110_vm0, %v7239_v59  ;;  %6174 = vmatprep.mubr.msk.f32.mxu1 %vm110_vm0, %v8278_v35  ;;  %v7245_v35 = vld [vmem:[%s9544_s0 + $0x3a0] sm:$0xff] }
 0x162   :  { %6584 = vmatprep.mubr.msk.f32.mxu0 %vm110_vm0, %v7422_v32  ;;  %6787 = vmatpush3.bf16.msra.mxu1 %v9711_v23  ;;  %v7240_v32 = vld [vmem:[%s9544_s0 + $0x180] sm:$0xff] }
 0x163   :  { %v7265_v23 = vld [vmem:[%s9544_s0 + $0x2e0] sm:$0xff] }
 0x164   :  { %6175 = vmatmul.mubr.msk.f32.gmra.mrb[4].mxu1 %vm110_vm0, %v8291_v43  ;;  %v7246_v43 = vld [vmem:[%s9544_s0 + $0x3b0] sm:$0xff] }
 0x165   :  { %6585 = vmatmul.mubr.msk.f32.gmra.mrb[32].mxu0 %vm110_vm0, %v7432_v34  ;;  %6177 = vmatprep.mubr.msk.f32.mxu1 %vm110_vm0, %v8298_v61  ;;  %v8786_v34 = vld [vmem:[%s9544_s0 + $0x121] sm:$0xff]  ;;  %v8884_v61 = vld [vmem:[%s9544_s0 + $0x351] sm:$0xff] }
 0x166   :  { %6587 = vmatprep.mubr.msk.f32.mxu0 %vm110_vm0, %v8541_v21  ;;  %v7248_v21 = vld [vmem:[%s9544_s0 + $0x3d0] sm:$0xff] }
 0x168   :  { %6178 = vmatmul.mubr.msk.f32.gmra.mrb[6].mxu1 %vm110_vm0, %v8315_v1  ;;  %v7247_v1 = vld [vmem:[%s9544_s0 + $0x3c0] sm:$0xff] }
 0x169   :  { %6588 = vmatmul.mubr.msk.f32.gmra.mrb[34].mxu0 %vm110_vm0, %v7460_v38  ;;  %6180 = vmatprep.mubr.msk.f32.mxu1 %vm110_vm0, %v8322_v55  ;;  %v8791_v38 = vld [vmem:[%s9544_s0 + $0x131] sm:$0xff]  ;;  %v8845_v55 = vld [vmem:[%s9544_s0 + $0x321] sm:$0xff] }
 0x16a   :  { %6590 = vmatprep.mubr.msk.f32.mxu0 %vm110_vm0, %v7490_v45  ;;  %v8802_v45 = vld [vmem:[%s9544_s0 + $0x141] sm:$0xff] }
 0x16c   :  { %6181 = vmatmul.mubr.msk.f32.gmra.mrb[8].mxu1 %vm110_vm0, %v8333_v44  ;;  %v7243_v44 = vld [vmem:[%s9544_s0 + $0x380] sm:$0xff] }
 0x16d   :  { %6591 = vmatmul.mubr.msk.f32.gmra.mrb[36].mxu0 %vm110_vm0, %v7502_v48  ;;  %6183 = vmatprep.mubr.msk.f32.mxu1 %vm110_vm0, %v8340_v63  ;;  %v8807_v48 = vld [vmem:[%s9544_s0 + $0x151] sm:$0xff]  ;;  %v8889_v63 = vld [vmem:[%s9544_s0 + $0x361] sm:$0xff] }
 0x16e   :  { %6593 = vmatprep.mubr.msk.f32.mxu0 %vm110_vm0, %v7521_v50  ;;  %v8818_v50 = vld [vmem:[%s9544_s0 + $0x161] sm:$0xff] }
 0x170   :  { %6184 = vmatmul.mubr.msk.f32.gmra.mrb[10].mxu1 %vm110_vm0, %v8351_v19  ;;  %v8840_v19 = vld [vmem:[%s9544_s0 + $0x311] sm:$0xff] }
 0x171   :  { %6594 = vmatmul.mubr.msk.f32.gmra.mrb[38].mxu0 %vm110_vm0, %v7531_v52  ;;  %6186 = vmatprep.mubr.msk.f32.mxu1 %vm110_vm0, %v8358_v17  ;;  %v8823_v52 = vld [vmem:[%s9544_s0 + $0x171] sm:$0xff]  ;;  %v7242_v17 = vld [vmem:[%s9544_s0 + $0x1e0] sm:$0xff] }
 0x172   :  { %6596 = vmatprep.mubr.msk.f32.mxu0 %vm110_vm0, %v7557_v57  ;;  %v7241_v57 = vld [vmem:[%s9544_s0 + $0x1d0] sm:$0xff] }
 0x174   :  { %6187 = vmatmul.mubr.msk.f32.gmra.mrb[12].mxu1 %vm110_vm0, %v8369_v47  ;;  %v7244_v47 = vld [vmem:[%s9544_s0 + $0x390] sm:$0xff] }
 0x175   :  { %6597 = vmatmul.mubr.msk.f32.gmra.mrb[40].mxu0 %vm110_vm0, %v8580_v58  ;;  %6189 = vmatprep.mubr.msk.f32.mxu1 %vm110_vm0, %v7240_v32  ;;  %v8906_v58 = vld [vmem:[%s9544_s0 + $0x371] sm:$0xff] }
 0x176   :  { %6599 = vmatprep.mubr.msk.f32.mxu0 %vm110_vm0, %v8771_v7  ;;  %v9732_v32 = vld [vmem:[#allocation53_spill] sm:$0xff] }
 0x178   :  { %6190 = vmatmul.mubr.msk.f32.gmra.mrb[14].mxu1 %vm110_vm0, %v7236_v30  ;;  %v9729_v30 = vld [vmem:[#allocation50_spill] sm:$0xff] }
 0x179   :  { %6600 = vmatmul.mubr.msk.f32.gmra.mrb[42].mxu0 %vm110_vm0, %v8786_v34  ;;  %6192 = vmatprep.mubr.msk.f32.mxu1 %vm110_vm0, %v7237_v42  ;;  %v7264_v42 = vld [vmem:[%s9544_s0 + $0x2d0] sm:$0xff] }
 0x17a   :  { %6602 = vmatprep.mubr.msk.f32.mxu0 %vm110_vm0, %v8791_v38 }
 0x17c   :  { %6193 = vmatmul.mubr.msk.f32.gmra.mrb[16].mxu1 %vm110_vm0, %v7238_v33  ;;  %v9730_v33 = vld [vmem:[#allocation51_spill] sm:$0xff] }
 0x17d   :  { %6603 = vmatmul.mubr.msk.f32.gmra.mrb[44].mxu0 %vm110_vm0, %v8802_v45  ;;  %6195 = vmatprep.mubr.msk.f32.mxu1 %vm110_vm0, %v7239_v59  ;;  %v9731_v59 = vld [vmem:[#allocation52_spill] sm:$0xff] }
 0x17e   :  { %6605 = vmatprep.mubr.msk.f32.mxu0 %vm110_vm0, %v8807_v48 }
 0x180   :  { %6196 = vmatmul.mubr.msk.f32.gmra.mrb[18].mxu1 %vm110_vm0, %v7241_v57  ;;  %v5276_v57 = vld [vmem:[%s9544_s0 + $0x391] sm:$0xff] }
 0x181   :  { %6606 = vmatmul.mubr.msk.f32.gmra.mrb[46].mxu0 %vm110_vm0, %v8818_v50  ;;  %6198 = vmatprep.mubr.msk.f32.mxu1 %vm110_vm0, %v7242_v17  ;;  %v5277_v17 = vld [vmem:[%s9544_s0 + $0x3a1] sm:$0xff] }
 0x182   :  { %6608 = vmatprep.mubr.msk.f32.mxu0 %vm110_vm0, %v8823_v52 }
 0x184   :  { %6199 = vmatmul.mubr.msk.f32.gmra.mrb[20].mxu1 %vm110_vm0, %v7243_v44  ;;  %v5279_v44 = vld [vmem:[%s9544_s0 + $0x3c1] sm:$0xff] }
 0x185   :  { %6609 = vmatmul.mubr.msk.f32.gmra.mrb[48].mxu0 %vm110_vm0, %v8840_v19  ;;  %6201 = vmatprep.mubr.msk.f32.mxu1 %vm110_vm0, %v7244_v47  ;;  %v7270_v47 = vld [vmem:[%s9544_s0 + $0x231] sm:$0xff] }
 0x186   :  { %6611 = vmatprep.mubr.msk.f32.mxu0 %vm110_vm0, %v8845_v55 }
 0x188   :  { %6202 = vmatmul.mubr.msk.f32.gmra.mrb[22].mxu1 %vm110_vm0, %v7245_v35  ;;  %v5281_v35 = vld [vmem:[%s9544_s0 + $0x3e1] sm:$0xff] }
 0x189   :  { %6612 = vmatmul.mubr.msk.f32.gmra.mrb[50].mxu0 %vm110_vm0, %v8862_v11  ;;  %6204 = vmatprep.mubr.msk.f32.mxu1 %vm110_vm0, %v7246_v43  ;;  %v7272_v43 = vld [vmem:[%s9544_s0 + $0x251] sm:$0xff] }
 0x18a   :  { %6614 = vmatprep.mubr.msk.f32.mxu0 %vm110_vm0, %v8867_v8 }
 0x18c   :  { %6205 = vmatmul.mubr.msk.f32.gmra.mrb[24].mxu1 %vm110_vm0, %v7247_v1 }
 0x18d   :  { %6615 = vmatmul.mubr.msk.f32.gmra.mrb[52].mxu0 %vm110_vm0, %v8884_v61  ;;  %6207 = vmatprep.mubr.msk.f32.mxu1 %vm110_vm0, %v7248_v21 }
 0x18e   :  { %6617 = vmatprep.mubr.msk.f32.mxu0 %vm110_vm0, %v8889_v63 }
 0x190   :  { %6208 = vmatmul.mubr.msk.f32.gmra.mrb[26].mxu1 %vm110_vm0, %v7249_v37 }
 0x191   :  { %6618 = vmatmul.mubr.msk.f32.gmra.mrb[54].mxu0 %vm110_vm0, %v8906_v58  ;;  %6210 = vmatprep.mubr.msk.f32.mxu1 %vm110_vm0, %v7971_v12  ;;  %v8937_v12 = vld [vmem:[%s9544_s0 + $0x31] sm:$0xff] }
 0x192   :  { %6628 = vmatprep.mubr.msk.f32.mxu0 %vm110_vm0, %v8919_v41 }
 0x194   :  { %6211 = vmatmul.mubr.msk.f32.gmra.mrb[28].mxu1 %vm110_vm0, %v9712_v46 }
 0x195   :  { %6629 = vmatmul.mubr.msk.f32.vlgmr.msra.gmra.mrb[0].mxu0 %vm110_vm0, %v8928_v49  ;;  %6213 = vmatprep.mubr.msk.f32.mxu1 %vm110_vm0, %v7994_v53  ;;  %v9713_v53 = vld [vmem:[#allocation32_spill] sm:$0xff] }
 0x196   :  { %6631 = vmatprep.mubr.msk.f32.mxu0 %vm110_vm0, %v8937_v12 }
 0x198   :  { %6214 = vmatmul.mubr.msk.f32.gmra.mrb[30].mxu1 %vm110_vm0, %v8003_v54  ;;  %v9715_v54 = vld [vmem:[#allocation55_spill] sm:$0xff] }
 0x199   :  { %6632 = vmatmul.mubr.msk.f32.gmra.mrb[2].mxu0 %vm110_vm0, %v8946_v51  ;;  %6216 = vmatprep.mubr.msk.f32.mxu1 %vm110_vm0, %v9713_v53 }
 0x19a   :  { %6634 = vmatprep.mubr.msk.f32.mxu0 %vm110_vm0, %v7635_v4  ;;  %v9718_v4 = vld [vmem:[#allocation37_spill] sm:$0xff] }
 0x19c   :  { %6217 = vmatmul.mubr.msk.f32.gmra.mrb[32].mxu1 %vm110_vm0, %v9714_v56 }
 0x19d   :  { %6635 = vmatmul.mubr.msk.f32.gmra.mrb[4].mxu0 %vm110_vm0, %v7647_v6  ;;  %6219 = vmatprep.mubr.msk.f32.mxu1 %vm110_vm0, %v9715_v54  ;;  %v9719_v6 = vld [vmem:[#allocation38_spill] sm:$0xff] }
 0x19e   :  { %6637 = vmatprep.mubr.msk.f32.mxu0 %vm110_vm0, %v9701_v0 }
 0x1a0   :  { %6220 = vmatmul.mubr.msk.f32.gmra.mrb[34].mxu1 %vm110_vm0, %v9716_v25 }
 0x1a1   :  { %6638 = vmatmul.mubr.msk.f32.gmra.mrb[6].mxu0 %vm110_vm0, %v7675_v14  ;;  %6222 = vmatprep.mubr.msk.f32.mxu1 %vm110_vm0, %v9717_v60  ;;  %v9721_v14 = vld [vmem:[#allocation40_spill] sm:$0xff] }
 0x1a2   :  { %6640 = vmatprep.mubr.msk.f32.mxu0 %vm110_vm0, %v7691_v16  ;;  %v9722_v16 = vld [vmem:[#allocation56_spill] sm:$0xff] }
 0x1a4   :  { %6223 = vmatmul.mubr.msk.f32.gmra.mrb[36].mxu1 %vm110_vm0, %v9718_v4 }
 0x1a5   :  { %6641 = vmatmul.mubr.msk.f32.gmra.mrb[8].mxu0 %vm110_vm0, %v7703_v18  ;;  %6225 = vmatprep.mubr.msk.f32.mxu1 %vm110_vm0, %v9719_v6  ;;  %v7254_v18 = vld [vmem:[%s9544_s0 + $0x90] sm:$0xff] }
 0x1a6   :  { %6643 = vmatprep.mubr.msk.f32.mxu0 %vm110_vm0, %v7719_v28  ;;  %v7255_v28 = vld [vmem:[%s9544_s0 + $0xa0] sm:$0xff] }
 0x1a8   :  { %6226 = vmatmul.mubr.msk.f32.gmra.mrb[38].mxu1 %vm110_vm0, %v9720_v62 }
 0x1a9   :  { %6644 = vmatmul.mubr.msk.f32.gmra.mrb[10].mxu0 %vm110_vm0, %v7731_v31  ;;  %6228 = vmatprep.mubr.msk.f32.mxu1 %vm110_vm0, %v9721_v14  ;;  %v7256_v31 = vld [vmem:[%s9544_s0 + $0xb0] sm:$0xff] }
 0x1aa   :  { %6646 = vmatprep.mubr.msk.f32.mxu0 %vm110_vm0, %v7747_v40  ;;  %v9723_v40 = vld [vmem:[#allocation44_spill] sm:$0xff] }
 0x1ac   :  { %6229 = vmatmul.mubr.msk.f32.gmra.mrb[40].mxu1 %vm110_vm0, %v9722_v16 }
 0x1ad   :  { %6647 = vmatmul.mubr.msk.f32.gmra.mrb[12].mxu0 %vm110_vm0, %v9709_v24  ;;  %6231 = vmatprep.mubr.msk.f32.mxu1 %vm110_vm0, %v7254_v18 }
 0x1ae   :  { %6649 = vmatprep.mubr.msk.f32.mxu0 %vm110_vm0, %v8103_v5  ;;  %v7257_v5 = vld [vmem:[%s9544_s0 + $0xc0] sm:$0xff] }
 0x1b0   :  { %6232 = vmatmul.mubr.msk.f32.gmra.mrb[42].mxu1 %vm110_vm0, %v7255_v28 }
 0x1b1   :  { %6650 = vmatmul.mubr.msk.f32.gmra.mrb[14].mxu0 %vm110_vm0, %v8116_v3  ;;  %6234 = vmatprep.mubr.msk.f32.mxu1 %vm110_vm0, %v7256_v31  ;;  %v7258_v3 = vld [vmem:[%s9544_s0 + $0xd0] sm:$0xff] }
 0x1b2   :  { %6652 = vmatprep.mubr.msk.f32.mxu0 %vm110_vm0, %v9670_v15  ;;  %v7259_v15 = vld [vmem:[%s9544_s0 + $0xe0] sm:$0xff] }
 0x1b4   :  { %6235 = vmatmul.mubr.msk.f32.gmra.mrb[44].mxu1 %vm110_vm0, %v7257_v5 }
 0x1b5   :  { %6653 = vmatmul.mubr.msk.f32.gmra.mrb[16].mxu0 %vm110_vm0, %v9671_v29  ;;  %6237 = vmatprep.mubr.msk.f32.mxu1 %vm110_vm0, %v7258_v3  ;;  %v9725_v29 = vld [vmem:[#allocation46_spill] sm:$0xff] }
 0x1b6   :  { %6655 = vmatprep.mubr.msk.f32.mxu0 %vm110_vm0, %v9723_v40 }
 0x1b8   :  { %6238 = vmatmul.mubr.msk.f32.gmra.mrb[46].mxu1 %vm110_vm0, %v7259_v15 }
 0x1b9   :  { %6656 = vmatmul.mubr.msk.f32.gmra.mrb[18].mxu0 %vm110_vm0, %v9724_v39  ;;  %6240 = vmatprep.mubr.msk.f32.mxu1 %vm110_vm0, %v8405_v13 }
 0x1ba   :  { %6658 = vmatprep.mubr.msk.f32.mxu0 %vm110_vm0, %v9725_v29 }
 0x1bc   :  { %6241 = vmatmul.mubr.msk.f32.gmra.mrb[48].mxu1 %vm110_vm0, %v7260_v2 }
 0x1bd   :  { %6659 = vmatmul.mubr.msk.f32.gmra.mrb[20].mxu0 %vm110_vm0, %v9726_v9  ;;  %6243 = vmatprep.mubr.msk.f32.mxu1 %vm110_vm0, %v7261_v10 }
 0x1be   :  { %6661 = vmatprep.mubr.msk.f32.mxu0 %vm110_vm0, %v9727_v27 }
 0x1c0   :  { %6244 = vmatmul.mubr.msk.f32.gmra.mrb[50].mxu1 %vm110_vm0, %v7262_v20 }
 0x1c1   :  { %6662 = vmatmul.mubr.msk.f32.gmra.mrb[22].mxu0 %vm110_vm0, %v9728_v22  ;;  %6246 = vmatprep.mubr.msk.f32.mxu1 %vm110_vm0, %v7263_v26 }
 0x1c2   :  { %6664 = vmatprep.mubr.msk.f32.mxu0 %vm110_vm0, %v9729_v30 }
 0x1c4   :  { %6247 = vmatmul.mubr.msk.f32.gmra.mrb[52].mxu1 %vm110_vm0, %v7264_v42 }
 0x1c5   :  { %6665 = vmatmul.mubr.msk.f32.gmra.mrb[24].mxu0 %vm110_vm0, %v9730_v33  ;;  %6249 = vmatprep.mubr.msk.f32.mxu1 %vm110_vm0, %v7265_v23 }
 0x1c6   :  { %6667 = vmatprep.mubr.msk.f32.mxu0 %vm110_vm0, %v9731_v59 }
 0x1c8   :  { %6250 = vmatmul.mubr.msk.f32.gmra.mrb[54].mxu1 %vm110_vm0, %v8442_v36 }
 0x1c9   :  { %6668 = vmatmul.mubr.msk.f32.gmra.mrb[26].mxu0 %vm110_vm0, %v9732_v32  ;;  %6302 = vmatprep.mubr.msk.f32.mxu1 %vm110_vm0, %v7254_v18 }
 0x1ca   :  { %6670 = vmatprep.mubr.msk.f32.mxu0 %vm110_vm0, %v8771_v7  ;;  %v5270_v7 = vld [vmem:[%s9544_s0 + $0x1a1] sm:$0xff] }
 0x1cc   :  { %6303 = vmatmul.mubr.msk.f32.vlgmr.msra.gmra.mrb[28].mxu1 %vm110_vm0, %v7255_v28 }
 0x1cd   :  { %6671 = vmatmul.mubr.msk.f32.gmra.mrb[28].mxu0 %vm110_vm0, %v8786_v34  ;;  %6305 = vmatprep.mubr.msk.f32.mxu1 %vm110_vm0, %v7256_v31  ;;  %v5271_v34 = vld [vmem:[%s9544_s0 + $0x1b1] sm:$0xff] }
 0x1ce   :  { %6673 = vmatprep.mubr.msk.f32.mxu0 %vm110_vm0, %v8791_v38  ;;  %v5273_v38 = vld [vmem:[%s9544_s0 + $0x1d1] sm:$0xff] }
 0x1d0   :  { %6306 = vmatmul.mubr.msk.f32.gmra.mrb[30].mxu1 %vm110_vm0, %v7257_v5 }
 0x1d1   :  { %6674 = vmatmul.mubr.msk.f32.gmra.mrb[30].mxu0 %vm110_vm0, %v8802_v45  ;;  %6308 = vmatprep.mubr.msk.f32.mxu1 %vm110_vm0, %v7258_v3  ;;  %v7266_v45 = vld [vmem:[%s9544_s0 + $0x51] sm:$0xff] }
 0x1d2   :  { %6676 = vmatprep.mubr.msk.f32.mxu0 %vm110_vm0, %v8807_v48  ;;  %v5274_v48 = vld [vmem:[%s9544_s0 + $0x1e1] sm:$0xff] }
 0x1d4   :  { %6309 = vmatmul.mubr.msk.f32.gmra.mrb[32].mxu1 %vm110_vm0, %v7259_v15 }
 0x1d5   :  { %6677 = vmatmul.mubr.msk.f32.gmra.mrb[32].mxu0 %vm110_vm0, %v8818_v50  ;;  %6311 = vmatprep.mubr.msk.f32.mxu1 %vm110_vm0, %v8405_v13  ;;  %v5269_v13 = vld [vmem:[%s9544_s0 + $0x191] sm:$0xff] }
 0x1d6   :  { %6679 = vmatprep.mubr.msk.f32.mxu0 %vm110_vm0, %v8823_v52  ;;  %v5275_v50 = vld [vmem:[%s9544_s0 + $0x1f1] sm:$0xff]  ;;  %v7267_v52 = vld [vmem:[%s9544_s0 + $0x61] sm:$0xff] }
 0x1d8   :  { %6312 = vmatmul.mubr.msk.f32.gmra.mrb[34].mxu1 %vm110_vm0, %v7260_v2 }
 0x1d9   :  { %6680 = vmatmul.mubr.msk.f32.gmra.mrb[34].mxu0 %vm110_vm0, %v8840_v19  ;;  %6314 = vmatprep.mubr.msk.f32.mxu1 %vm110_vm0, %v7261_v10  ;;  %v7268_v19 = vld [vmem:[%s9544_s0 + $0x211] sm:$0xff] }
 0x1da   :  { %6682 = vmatprep.mubr.msk.f32.mxu0 %vm110_vm0, %v8845_v55  ;;  %v5278_v55 = vld [vmem:[%s9544_s0 + $0x3b1] sm:$0xff] }
 0x1dc   :  { %6315 = vmatmul.mubr.msk.f32.gmra.mrb[36].mxu1 %vm110_vm0, %v7262_v20 }
 0x1dd   :  { %6683 = vmatmul.mubr.msk.f32.gmra.mrb[36].mxu0 %vm110_vm0, %v8862_v11  ;;  %6317 = vmatprep.mubr.msk.f32.mxu1 %vm110_vm0, %v7263_v26  ;;  %v7271_v11 = vld [vmem:[%s9544_s0 + $0x241] sm:$0xff] }
 0x1de   :  { %6685 = vmatprep.mubr.msk.f32.mxu0 %vm110_vm0, %v8867_v8  ;;  %v5280_v8 = vld [vmem:[%s9544_s0 + $0x3d1] sm:$0xff] }
 0x1e0   :  { %6318 = vmatmul.mubr.msk.f32.gmra.mrb[38].mxu1 %vm110_vm0, %v7264_v42 }
 0x1e1   :  { %6686 = vmatmul.mubr.msk.f32.gmra.mrb[38].mxu0 %vm110_vm0, %v8884_v61  ;;  %6320 = vmatprep.mubr.msk.f32.mxu1 %vm110_vm0, %v7265_v23  ;;  %v7273_v61 = vld [vmem:[%s9544_s0 + $0x261] sm:$0xff] }
 0x1e2   :  { %6688 = vmatprep.mubr.msk.f32.mxu0 %vm110_vm0, %v8889_v63  ;;  %v5282_v63 = vld [vmem:[%s9544_s0 + $0x3f1] sm:$0xff] }
 0x1e4   :  { %6321 = vmatmul.mubr.msk.f32.gmra.mrb[40].mxu1 %vm110_vm0, %v8442_v36  ;;  %v5272_v36 = vld [vmem:[%s9544_s0 + $0x1c1] sm:$0xff] }
 0x1e5   :  { %6689 = vmatmul.mubr.msk.f32.gmra.mrb[40].mxu0 %vm110_vm0, %v8906_v58  ;;  %6323 = vmatprep.mubr.msk.f32.mxu1 %vm110_vm0, %v8919_v41 }
 0x1e6   :  { %6691 = vmatprep.mubr.msk.f32.mxu0 %vm110_vm0, %v5269_v13 }
 0x1e8   :  { %6324 = vmatmul.mubr.msk.f32.gmra.mrb[42].mxu1 %vm110_vm0, %v8928_v49 }
 0x1e9   :  { %6692 = vmatmul.mubr.msk.f32.gmra.mrb[42].mxu0 %vm110_vm0, %v5270_v7  ;;  %6326 = vmatprep.mubr.msk.f32.mxu1 %vm110_vm0, %v8937_v12 }
 0x1ea   :  { %6694 = vmatprep.mubr.msk.f32.mxu0 %vm110_vm0, %v5271_v34 }
 0x1ec   :  { %6327 = vmatmul.mubr.msk.f32.gmra.mrb[44].mxu1 %vm110_vm0, %v8946_v51 }
 0x1ed   :  { %6695 = vmatmul.mubr.msk.f32.gmra.mrb[44].mxu0 %vm110_vm0, %v5272_v36  ;;  %6329 = vmatprep.mubr.msk.f32.mxu1 %vm110_vm0, %v7266_v45 }
 0x1ee   :  { %6697 = vmatprep.mubr.msk.f32.mxu0 %vm110_vm0, %v5273_v38 }
 0x1f0   :  { %6330 = vmatmul.mubr.msk.f32.gmra.mrb[46].mxu1 %vm110_vm0, %v7267_v52 }
 0x1f1   :  { %6698 = vmatmul.mubr.msk.f32.gmra.mrb[46].mxu0 %vm110_vm0, %v5274_v48  ;;  %6332 = vmatprep.mubr.msk.f32.mxu1 %vm110_vm0, %v9701_v0  ;;  %v7269_v0 = vld [vmem:[%s9544_s0 + $0x221] sm:$0xff] }
 0x1f2   :  { %6700 = vmatprep.mubr.msk.f32.mxu0 %vm110_vm0, %v5275_v50 }
 0x1f4   :  { %6333 = vmatmul.mubr.msk.f32.gmra.mrb[48].mxu1 %vm110_vm0, %v7268_v19 }
 0x1f5   :  { %6701 = vmatmul.mubr.msk.f32.gmra.mrb[48].mxu0 %vm110_vm0, %v5276_v57  ;;  %6335 = vmatprep.mubr.msk.f32.mxu1 %vm110_vm0, %v7269_v0 }
 0x1f6   :  { %6703 = vmatprep.mubr.msk.f32.mxu0 %vm110_vm0, %v5277_v17 }
 0x1f8   :  { %6336 = vmatmul.mubr.msk.f32.gmra.mrb[50].mxu1 %vm110_vm0, %v7270_v47 }
 0x1f9   :  { %6704 = vmatmul.mubr.msk.f32.gmra.mrb[50].mxu0 %vm110_vm0, %v5278_v55  ;;  %6338 = vmatprep.mubr.msk.f32.mxu1 %vm110_vm0, %v7271_v11 }
 0x1fa   :  { %6706 = vmatprep.mubr.msk.f32.mxu0 %vm110_vm0, %v5279_v44 }
 0x1fc   :  { %6339 = vmatmul.mubr.msk.f32.gmra.mrb[52].mxu1 %vm110_vm0, %v7272_v43 }
 0x1fd   :  { %6707 = vmatmul.mubr.msk.f32.gmra.mrb[52].mxu0 %vm110_vm0, %v5280_v8  ;;  %6341 = vmatprep.mubr.msk.f32.mxu1 %vm110_vm0, %v7273_v61 }
 0x1fe   :  { %6709 = vmatprep.mubr.msk.f32.mxu0 %vm110_vm0, %v5281_v35 }
 0x200   :  { %6342 = vmatmul.mubr.msk.f32.gmra.mrb[54].mxu1 %vm110_vm0, %v9709_v24 }
 0x201   :  { %6710 = vmatmul.mubr.msk.f32.gmra.mrb[54].mxu0 %vm110_vm0, %v5282_v63 }
 0x22f   :  { %v6170_v1 = vpop.f32.mrb[0].mxu1 }
 0x230   :  { %v1756_v21 = vpop.f32.mrb[1].mxu1 }
 0x233   :  { %v6173_v58 = vpop.f32.mrb[2].mxu1 }
 0x234   :  { %v1766_v37 = vpop.f32.mrb[3].mxu1 }
 0x237   :  { %v6176_v41 = vpop.f32.mrb[4].mxu1 }
 0x238   :  { %v1776_v46 = vpop.f32.mrb[5].mxu1 }
 0x23b   :  { %v6179_v49 = vpop.f32.mrb[6].mxu1 }
 0x23c   :  { %v1786_v12 = vpop.f32.mrb[7].mxu1 }
 0x23f   :  { %v6182_v51 = vpop.f32.mrb[8].mxu1 }
 0x240   :  { %v1796_v53 = vpop.f32.mrb[9].mxu1 }
 0x243   :  { %v6185_v56 = vpop.f32.mrb[10].mxu1 }
 0x244   :  { %v1806_v54 = vpop.f32.mrb[11].mxu1 }
 0x247   :  { %v6188_v25 = vpop.f32.mrb[12].mxu1 }
 0x248   :  { %v1816_v60 = vpop.f32.mrb[13].mxu1 }
 0x24b   :  { %v6191_v4 = vpop.f32.mrb[14].mxu1 }
 0x24c   :  { %v1826_v6 = vpop.f32.mrb[15].mxu1 }
 0x24f   :  { %v6194_v62 = vpop.f32.mrb[16].mxu1 }
 0x250   :  { %v1836_v24 = vpop.f32.mrb[17].mxu1 }
 0x253   :  { %v6197_v14 = vpop.f32.mrb[18].mxu1 }
 0x254   :  { %v1846_v16 = vpop.f32.mrb[19].mxu1 }
 0x257   :  { %v9214_v18 = vpop.f32.mrb[20].mxu1 }
 0x258   :  { %v9216_v28 = vpop.f32.mrb[21].mxu1 }
 0x25b   :  { %v9218_v31 = vpop.f32.mrb[22].mxu1 }
 0x25c   :  { %v9220_v5 = vpop.f32.mrb[23].mxu1 }
 0x25f   :  { %v9222_v3 = vpop.f32.mrb[24].mxu1 }
 0x260   :  { %v9224_v40 = vpop.f32.mrb[25].mxu1 }
 0x263   :  { %v9226_v15 = vpop.f32.mrb[26].mxu1 }
 0x264   :  { %v9228_v39 = vpop.f32.mrb[27].mxu1 }
 0x268   :  { %v6630_v29 = vpop.f32.mrb[0].mxu0 }
 0x269   :  { %v6788_v2 = vadd.f32 %v6630_v29, %v6170_v1  ;;  %v4124_v9 = vpop.f32.mrb[1].mxu0 }
 0x26a   :  { %v6789_v10 = vadd.f32 %v4124_v9, %v1756_v21 }
 0x26b   :  { %v9235_v35 = vsel %vm4459_vm1, %v6788_v2, -inf }
 0x26c   :  { %v6633_v27 = vpop.f32.mrb[2].mxu0  ;;  %v9241_v61 = vsel %vm4459_vm1, %v6789_v10, -inf }
 0x26d   :  { %v6790_v20 = vadd.f32 %v6633_v27, %v6173_v58  ;;  %v4134_v22 = vpop.f32.mrb[3].mxu0 }
 0x26e   :  { %v6791_v26 = vadd.f32 %v4134_v22, %v1766_v37 }
 0x270   :  { %v6636_v30 = vpop.f32.mrb[4].mxu0 }
 0x271   :  { %v6792_v42 = vadd.f32 %v6636_v30, %v6176_v41  ;;  %v4144_v33 = vpop.f32.mrb[5].mxu0 }
 0x272   :  { %v6793_v23 = vadd.f32 %v4144_v33, %v1776_v46 }
 0x274   :  { %v6639_v59 = vpop.f32.mrb[6].mxu0  ;;  %v9273_v29 = vsel %vm4459_vm1, %v6793_v23, -inf }
 0x275   :  { %v6794_v32 = vadd.f32 %v6639_v59, %v6179_v49  ;;  %v4154_v13 = vpop.f32.mrb[7].mxu0  ;;  %v9251_v49 = vsel %vm4459_vm1, %v6790_v20, -inf }
 0x276   :  { %v6795_v7 = vadd.f32 %v4154_v13, %v1786_v12 }
 0x277   :  { %v9285_v22 = vsel %vm4459_vm1, %v6794_v32, -inf }
 0x278   :  { %v6642_v34 = vpop.f32.mrb[8].mxu0  ;;  %v9291_v30 = vsel %vm4459_vm1, %v6795_v7, -inf }
 0x279   :  { %v6796_v36 = vadd.f32 %v6642_v34, %v6182_v51  ;;  %v4164_v38 = vpop.f32.mrb[9].mxu0  ;;  %v9257_v51 = vsel %vm4459_vm1, %v6791_v26, -inf }
 0x27a   :  { %v6797_v45 = vadd.f32 %v4164_v38, %v1796_v53 }
 0x27b   :  { %v9303_v13 = vsel %vm4459_vm1, %v6796_v36, -inf }
 0x27c   :  { %v6645_v48 = vpop.f32.mrb[10].mxu0  ;;  %v9309_v34 = vsel %vm4459_vm1, %v6797_v45, -inf }
 0x27d   :  { %v6798_v50 = vadd.f32 %v6645_v48, %v6185_v56  ;;  %v4174_v52 = vpop.f32.mrb[11].mxu0 }
 0x27e   :  { %v6799_v57 = vadd.f32 %v4174_v52, %v1806_v54 }
 0x280   :  { %v6648_v17 = vpop.f32.mrb[12].mxu0 }
 0x281   :  { %v9230_v19 = vadd.f32 %v6648_v17, %v6188_v25  ;;  %v4184_v0 = vpop.f32.mrb[13].mxu0 }
 0x282   :  { %v9232_v55 = vadd.f32 %v4184_v0, %v1816_v60  ;;  %v9321_v0 = vsel %vm4459_vm1, %v6798_v50, -inf }
 0x284   :  { %v6651_v44 = vpop.f32.mrb[14].mxu0 }
 0x285   :  { %v6802_v47 = vadd.f32 %v6651_v44, %v6191_v4  ;;  %v4194_v11 = vpop.f32.mrb[15].mxu0  ;;  %v9327_v44 = vsel %vm4459_vm1, %v6799_v57, -inf }
 0x286   :  { %v6803_v8 = vadd.f32 %v4194_v11, %v1826_v6 }
 0x287   :  { %v9238_v43 = vsel %vm4459_vm1, %v6802_v47, -inf }
 0x288   :  { %v4469_v63 = vmax.f32 %v9235_v35, %v9238_v43  ;;  %v9246_v1 = vsel %vm4459_vm1, %v6803_v8, -inf  ;;  %v6654_v21 = vpop.f32.mrb[16].mxu0 }
 0x289   :  { %v4462_v58 = vmax.f32 %v9241_v61, %v9246_v1  ;;  %v6804_v37 = vadd.f32 %v6654_v21, %v6194_v62  ;;  %v4204_v41 = vpop.f32.mrb[17].mxu0  ;;  %v9267_v62 = vsel %vm4459_vm1, %v6792_v42, -inf }
 0x28a   :  { %v6805_v46 = vadd.f32 %v4204_v41, %v1836_v24 }
 0x28b   :  { %v9254_v12 = vsel %vm4459_vm1, %v6804_v37, -inf  ;;  %v9340_v37 = vsel %vm4459_vm1, %v9230_v19, -inf }
 0x28c   :  { %v4483_v53 = vmax.f32 %v9251_v49, %v9254_v12  ;;  %v9262_v56 = vsel %vm4459_vm1, %v6805_v46, -inf  ;;  %v6657_v54 = vpop.f32.mrb[18].mxu0  ;;  %v9347_v46 = vsel %vm4459_vm1, %v9232_v55, -inf }
 0x28d   :  { %v4476_v25 = vmax.f32 %v9257_v51, %v9262_v56  ;;  %v6806_v60 = vadd.f32 %v6657_v54, %v6197_v14  ;;  %v4214_v4 = vpop.f32.mrb[19].mxu0 }
 0x28e   :  { %v6807_v6 = vadd.f32 %v4214_v4, %v1846_v16 }
 0x28f   :  { %v9270_v24 = vsel %vm4459_vm1, %v6806_v60, -inf }
 0x290   :  { %v4497_v2 = vmax.f32 %v9267_v62, %v9270_v24  ;;  %v9278_v9 = vsel %vm4459_vm1, %v6807_v6, -inf  ;;  %v6660_v10 = vpop.f32.mrb[20].mxu0 }
 0x291   :  { %v4490_v14 = vmax.f32 %v9273_v29, %v9278_v9  ;;  %v6808_v16 = vadd.f32 %v6660_v10, %v9214_v18  ;;  %v4224_v27 = vpop.f32.mrb[21].mxu0 }
 0x292   :  { %v6809_v20 = vadd.f32 %v4224_v27, %v9216_v28 }
 0x293   :  { %v9288_v26 = vsel %vm4459_vm1, %v6808_v16, -inf }
 0x294   :  { %v4511_v42 = vmax.f32 %v9285_v22, %v9288_v26  ;;  %v9296_v33 = vsel %vm4459_vm1, %v6809_v20, -inf  ;;  %v6663_v23 = vpop.f32.mrb[22].mxu0 }
 0x295   :  { %v4504_v18 = vmax.f32 %v9291_v30, %v9296_v33  ;;  %v6810_v28 = vadd.f32 %v6663_v23, %v9218_v31  ;;  %v4234_v59 = vpop.f32.mrb[23].mxu0 }
 0x296   :  { %v6811_v32 = vadd.f32 %v4234_v59, %v9220_v5 }
 0x297   :  { %v9306_v7 = vsel %vm4459_vm1, %v6810_v28, -inf }
 0x298   :  { %v4525_v38 = vmax.f32 %v9303_v13, %v9306_v7  ;;  %v9314_v48 = vsel %vm4459_vm1, %v6811_v32, -inf  ;;  %v6666_v52 = vpop.f32.mrb[24].mxu0 }
 0x299   :  { %v4518_v31 = vmax.f32 %v9309_v34, %v9314_v48  ;;  %v6812_v5 = vadd.f32 %v6666_v52, %v9222_v3  ;;  %v4244_v36 = vpop.f32.mrb[25].mxu0 }
 0x29a   :  { %v6813_v17 = vadd.f32 %v4244_v36, %v9224_v40 }
 0x29b   :  { %v9324_v45 = vsel %vm4459_vm1, %v6812_v5, -inf }
 0x29c   :  { %v4539_v47 = vmax.f32 %v9321_v0, %v9324_v45  ;;  %v9332_v11 = vsel %vm4459_vm1, %v6813_v17, -inf  ;;  %v6669_v8 = vpop.f32.mrb[26].mxu0 }
 0x29d   :  { %v4532_v3 = vmax.f32 %v9327_v44, %v9332_v11  ;;  %v6814_v40 = vadd.f32 %v6669_v8, %v9226_v15  ;;  %v4254_v50 = vpop.f32.mrb[27].mxu0 }
 0x29e   :  { %v6815_v21 = vadd.f32 %v4254_v50, %v9228_v39 }
 0x29f   :  { %v9343_v57 = vsel %vm4459_vm1, %v6814_v40, -inf  ;;  %v6304_v41 = vpop.f32.mrb[28].mxu1 }
 0x2a0   :  { %v4553_v54 = vmax.f32 %v9340_v37, %v9343_v57  ;;  %v9352_v15 = vsel %vm4459_vm1, %v6815_v21, -inf  ;;  %v6672_v60 = vpop.f32.mrb[28].mxu0  ;;  %v2358_v39 = vpop.f32.mrb[29].mxu1  ;;  %v9444_v37 = vld [vmem:[%s9545_s2] ss:$0 sm:$0xff] }
 0x2a1   :  { %v4546_v19 = vmax.f32 %v9347_v46, %v9352_v15  ;;  %v6816_v4 = vadd.f32 %v6672_v60, %v6304_v41  ;;  %v4264_v6 = vpop.f32.mrb[29].mxu0 }
 0x2a2   :  { %v6817_v10 = vadd.f32 %v4264_v6, %v2358_v39 }
 0x2a3   :  { %v4470_v16 = vsel %vm4459_vm1, %v6816_v4, -inf  ;;  %v6307_v27 = vpop.f32.mrb[30].mxu1 }
 0x2a4   :  { %v9360_v55 = vmax.f32 %v4469_v63, %v4470_v16  ;;  %v4463_v20 = vsel %vm4459_vm1, %v6817_v10, -inf  ;;  %v6675_v23 = vpop.f32.mrb[30].mxu0  ;;  %v2368_v28 = vpop.f32.mrb[31].mxu1 }
 0x2a5   :  { %v9366_v59 = vmax.f32 %v4462_v58, %v4463_v20  ;;  %v6818_v32 = vadd.f32 %v6675_v23, %v6307_v27  ;;  %v4274_v52 = vpop.f32.mrb[31].mxu0 }
 0x2a6   :  { %v6819_v5 = vadd.f32 %v4274_v52, %v2368_v28 }
 0x2a7   :  { %v4484_v36 = vsel %vm4459_vm1, %v6818_v32, -inf  ;;  %v6310_v17 = vpop.f32.mrb[32].mxu1 }
 0x2a8   :  { %v9372_v35 = vmax.f32 %v4483_v53, %v4484_v36  ;;  %v4477_v43 = vsel %vm4459_vm1, %v6819_v5, -inf  ;;  %v6678_v63 = vpop.f32.mrb[32].mxu0  ;;  %v2378_v8 = vpop.f32.mrb[33].mxu1 }
 0x2a9   :  { %v9378_v61 = vmax.f32 %v4476_v25, %v4477_v43  ;;  %v6820_v1 = vadd.f32 %v6678_v63, %v6310_v17  ;;  %v4284_v58 = vpop.f32.mrb[33].mxu0 }
 0x2aa   :  { %v6821_v40 = vadd.f32 %v4284_v58, %v2378_v8 }
 0x2ab   :  { %v4498_v50 = vsel %vm4459_vm1, %v6820_v1, -inf  ;;  %v6313_v21 = vpop.f32.mrb[34].mxu1 }
 0x2ac   :  { %v9384_v49 = vmax.f32 %v4497_v2, %v4498_v50  ;;  %v4491_v12 = vsel %vm4459_vm1, %v6821_v40, -inf  ;;  %v6681_v53 = vpop.f32.mrb[34].mxu0  ;;  %v2388_v41 = vpop.f32.mrb[35].mxu1 }
 0x2ad   :  { %v9390_v51 = vmax.f32 %v4490_v14, %v4491_v12  ;;  %v6822_v56 = vadd.f32 %v6681_v53, %v6313_v21  ;;  %v4294_v25 = vpop.f32.mrb[35].mxu0 }
 0x2ae   :  { %v6823_v60 = vadd.f32 %v4294_v25, %v2388_v41 }
 0x2af   :  { %v4512_v39 = vsel %vm4459_vm1, %v6822_v56, -inf  ;;  %v6316_v4 = vpop.f32.mrb[36].mxu1 }
 0x2b0   :  { %v9396_v62 = vmax.f32 %v4511_v42, %v4512_v39  ;;  %v4505_v24 = vsel %vm4459_vm1, %v6823_v60, -inf  ;;  %v6684_v2 = vpop.f32.mrb[36].mxu0  ;;  %v2398_v6 = vpop.f32.mrb[37].mxu1 }
 0x2b1   :  { %v9402_v29 = vmax.f32 %v4504_v18, %v4505_v24  ;;  %v6824_v9 = vadd.f32 %v6684_v2, %v6316_v4  ;;  %v4304_v14 = vpop.f32.mrb[37].mxu0 }
 0x2b2   :  { %v6825_v10 = vadd.f32 %v4304_v14, %v2398_v6 }
 0x2b3   :  { %v4526_v16 = vsel %vm4459_vm1, %v6824_v9, -inf  ;;  %v6319_v27 = vpop.f32.mrb[38].mxu1 }
 0x2b4   :  { %v9408_v22 = vmax.f32 %v4525_v38, %v4526_v16  ;;  %v4519_v26 = vsel %vm4459_vm1, %v6825_v10, -inf  ;;  %v6687_v42 = vpop.f32.mrb[38].mxu0  ;;  %v2408_v20 = vpop.f32.mrb[39].mxu1 }
 0x2b5   :  { %v9414_v30 = vmax.f32 %v4518_v31, %v4519_v26  ;;  %v6826_v33 = vadd.f32 %v6687_v42, %v6319_v27  ;;  %v4314_v18 = vpop.f32.mrb[39].mxu0 }
 0x2b6   :  { %v6827_v23 = vadd.f32 %v4314_v18, %v2408_v20 }
 0x2b7   :  { %v4540_v28 = vsel %vm4459_vm1, %v6826_v33, -inf  ;;  %v6322_v32 = vpop.f32.mrb[40].mxu1 }
 0x2b8   :  { %v9420_v13 = vmax.f32 %v4539_v47, %v4540_v28  ;;  %v4533_v7 = vsel %vm4459_vm1, %v6827_v23, -inf  ;;  %v6690_v38 = vpop.f32.mrb[40].mxu0  ;;  %v2418_v52 = vpop.f32.mrb[41].mxu1 }
 0x2b9   :  { %v9426_v34 = vmax.f32 %v4532_v3, %v4533_v7  ;;  %v6828_v48 = vadd.f32 %v6690_v38, %v6322_v32  ;;  %v4324_v31 = vpop.f32.mrb[41].mxu0 }
 0x2ba   :  { %v6829_v5 = vadd.f32 %v4324_v31, %v2418_v52 }
 0x2bb   :  { %v4554_v36 = vsel %vm4459_vm1, %v6828_v48, -inf  ;;  %v6325_v17 = vpop.f32.mrb[42].mxu1 }
 0x2bc   :  { %v9432_v0 = vmax.f32 %v4553_v54, %v4554_v36  ;;  %v4547_v45 = vsel %vm4459_vm1, %v6829_v5, -inf  ;;  %v6693_v47 = vpop.f32.mrb[42].mxu0  ;;  %v2428_v43 = vpop.f32.mrb[43].mxu1 }
 0x2bd   :  { %v9438_v44 = vmax.f32 %v4546_v19, %v4547_v45  ;;  %v6830_v11 = vadd.f32 %v6693_v47, %v6325_v17  ;;  %v4334_v3 = vpop.f32.mrb[43].mxu0 }
 0x2be   :  { %v6831_v63 = vadd.f32 %v4334_v3, %v2428_v43 }
 0x2bf   :  { %v4472_v8 = vsel %vm4459_vm1, %v6830_v11, -inf  ;;  %v6328_v57 = vpop.f32.mrb[44].mxu1 }
 0x2c0   :  { %v4473_v54 = vmax.f32 %v9360_v55, %v4472_v8  ;;  %v4465_v1 = vsel %vm4459_vm1, %v6831_v63, -inf  ;;  %v6696_v58 = vpop.f32.mrb[44].mxu0  ;;  %v2438_v40 = vpop.f32.mrb[45].mxu1 }
 0x2c1   :  { %v4466_v46 = vmax.f32 %v9366_v59, %v4465_v1  ;;  %v6832_v15 = vadd.f32 %v6696_v58, %v6328_v57  ;;  %v4344_v19 = vpop.f32.mrb[45].mxu0 }
 0x2c2   :  { %v4566_v50 = vadd.f32 %v9444_v37, %v4473_v54  ;;  %v6833_v21 = vadd.f32 %v4344_v19, %v2438_v40 }
 0x2c3   :  { %v4565_v12 = vadd.f32 %v9444_v37, %v4466_v46  ;;  %v4486_v53 = vsel %vm4459_vm1, %v6832_v15, -inf  ;;  %v6331_v41 = vpop.f32.mrb[46].mxu1 }
 0x2c4   :  { %v4580_v56 = vmax.f32 %v4566_v50, 0.0  ;;  %v4487_v25 = vmax.f32 %v9372_v35, %v4486_v53  ;;  %v4479_v55 = vsel %vm4459_vm1, %v6833_v21, -inf  ;;  %v6699_v60 = vpop.f32.mrb[46].mxu0  ;;  %v2448_v39 = vpop.f32.mrb[47].mxu1 }
 0x2c5   :  { %v4579_v4 = vmax.f32 %v4565_v12, 0.0  ;;  %v4480_v59 = vmax.f32 %v9378_v61, %v4479_v55  ;;  %v6834_v24 = vadd.f32 %v6699_v60, %v6331_v41  ;;  %v4354_v2 = vpop.f32.mrb[47].mxu0 }
 0x2c6   :  { %4594 = vst.msk [vmem:[%s9546_s3 + $0x8] sm:$0xff] %vm4459_vm1, %v4580_v56  ;;  %v4568_v6 = vadd.f32 %v9444_v37, %v4487_v25  ;;  %v6835_v9 = vadd.f32 %v4354_v2, %v2448_v39 }
 0x2c7   :  { %4593 = vst.msk [vmem:[%s9546_s3] sm:$0xff] %vm4459_vm1, %v4579_v4  ;;  %v4567_v35 = vadd.f32 %v9444_v37, %v4480_v59  ;;  %v4500_v14 = vsel %vm4459_vm1, %v6834_v24, -inf  ;;  %v6334_v61 = vpop.f32.mrb[48].mxu1 }
 0x2c8   :  { %v4582_v10 = vmax.f32 %v4568_v6, 0.0  ;;  %v4501_v16 = vmax.f32 %v9384_v49, %v4500_v14  ;;  %v4493_v27 = vsel %vm4459_vm1, %v6835_v9, -inf  ;;  %v6702_v26 = vpop.f32.mrb[48].mxu0  ;;  %v2458_v42 = vpop.f32.mrb[49].mxu1 }
 0x2c9   :  { %v4581_v20 = vmax.f32 %v4567_v35, 0.0  ;;  %v4494_v33 = vmax.f32 %v9390_v51, %v4493_v27  ;;  %v6836_v18 = vadd.f32 %v6702_v26, %v6334_v61  ;;  %v4364_v23 = vpop.f32.mrb[49].mxu0 }
 0x2ca   :  { %4596 = vst.msk [vmem:[%s9546_s3 + $0x18] sm:$0xff] %vm4459_vm1, %v4582_v10  ;;  %v4570_v28 = vadd.f32 %v9444_v37, %v4501_v16  ;;  %v6837_v32 = vadd.f32 %v4364_v23, %v2458_v42 }
 0x2cb   :  { %4595 = vst.msk [vmem:[%s9546_s3 + $0x10] sm:$0xff] %vm4459_vm1, %v4581_v20  ;;  %v4569_v49 = vadd.f32 %v9444_v37, %v4494_v33  ;;  %v4514_v7 = vsel %vm4459_vm1, %v6836_v18, -inf  ;;  %v6337_v51 = vpop.f32.mrb[50].mxu1 }
 0x2cc   :  { %v4584_v38 = vmax.f32 %v4570_v28, 0.0  ;;  %v4515_v52 = vmax.f32 %v9396_v62, %v4514_v7  ;;  %v4507_v48 = vsel %vm4459_vm1, %v6837_v32, -inf  ;;  %v6705_v31 = vpop.f32.mrb[50].mxu0  ;;  %v2468_v5 = vpop.f32.mrb[51].mxu1 }
 0x2cd   :  { %v4583_v36 = vmax.f32 %v4569_v49, 0.0  ;;  %v4508_v17 = vmax.f32 %v9402_v29, %v4507_v48  ;;  %v6838_v45 = vadd.f32 %v6705_v31, %v6337_v51  ;;  %v4374_v47 = vpop.f32.mrb[51].mxu0 }
 0x2ce   :  { %4598 = vst.msk [vmem:[%s9546_s3 + $0x28] sm:$0xff] %vm4459_vm1, %v4584_v38  ;;  %v4572_v43 = vadd.f32 %v9444_v37, %v4515_v52  ;;  %v6839_v11 = vadd.f32 %v4374_v47, %v2468_v5 }
 0x2cf   :  { %4597 = vst.msk [vmem:[%s9546_s3 + $0x20] sm:$0xff] %vm4459_vm1, %v4583_v36  ;;  %v4571_v62 = vadd.f32 %v9444_v37, %v4508_v17  ;;  %v4528_v3 = vsel %vm4459_vm1, %v6838_v45, -inf  ;;  %v6340_v29 = vpop.f32.mrb[52].mxu1 }
 0x2d0   :  { %v4586_v63 = vmax.f32 %v4572_v43, 0.0  ;;  %v4529_v8 = vmax.f32 %v9408_v22, %v4528_v3  ;;  %v4521_v57 = vsel %vm4459_vm1, %v6839_v11, -inf  ;;  %v6708_v54 = vpop.f32.mrb[52].mxu0  ;;  %v2478_v1 = vpop.f32.mrb[53].mxu1 }
 0x2d1   :  { %v4585_v58 = vmax.f32 %v4571_v62, 0.0  ;;  %v4522_v40 = vmax.f32 %v9414_v30, %v4521_v57  ;;  %v6840_v46 = vadd.f32 %v6708_v54, %v6340_v29  ;;  %v4384_v15 = vpop.f32.mrb[53].mxu0 }
 0x2d2   :  { %4600 = vst.msk [vmem:[%s9546_s3 + $0x38] sm:$0xff] %vm4459_vm1, %v4586_v63  ;;  %v4574_v19 = vadd.f32 %v9444_v37, %v4529_v8  ;;  %v6841_v50 = vadd.f32 %v4384_v15, %v2478_v1 }
 0x2d3   :  { %4599 = vst.msk [vmem:[%s9546_s3 + $0x30] sm:$0xff] %vm4459_vm1, %v4585_v58  ;;  %v4573_v22 = vadd.f32 %v9444_v37, %v4522_v40  ;;  %v4542_v21 = vsel %vm4459_vm1, %v6840_v46, -inf  ;;  %v6343_v30 = vpop.f32.mrb[54].mxu1 }
 0x2d4   :  { %v4588_v12 = vmax.f32 %v4574_v19, 0.0  ;;  %v4543_v53 = vmax.f32 %v9420_v13, %v4542_v21  ;;  %v4535_v41 = vsel %vm4459_vm1, %v6841_v50, -inf  ;;  %v6711_v56 = vpop.f32.mrb[54].mxu0  ;;  %v2488_v25 = vpop.f32.mrb[55].mxu1 }
 0x2d5   :  { %v4587_v55 = vmax.f32 %v4573_v22, 0.0  ;;  %v4536_v60 = vmax.f32 %v9426_v34, %v4535_v41  ;;  %v6842_v39 = vadd.f32 %v6711_v56, %v6343_v30  ;;  %v4394_v4 = vpop.f32.mrb[55].mxu0 }
 0x2d6   :  { %4602 = vst.msk [vmem:[%s9546_s3 + $0x48] sm:$0xff] %vm4459_vm1, %v4588_v12  ;;  %v4576_v59 = vadd.f32 %v9444_v37, %v4543_v53  ;;  %v6843_v24 = vadd.f32 %v4394_v4, %v2488_v25 }
 0x2d7   :  { %4601 = vst.msk [vmem:[%s9546_s3 + $0x40] sm:$0xff] %vm4459_vm1, %v4587_v55  ;;  %v4575_v13 = vadd.f32 %v9444_v37, %v4536_v60  ;;  %v4556_v2 = vsel %vm4459_vm1, %v6842_v39, -inf }
 0x2d8   :  { %v4590_v34 = vmax.f32 %v4576_v59, 0.0  ;;  %v4557_v6 = vmax.f32 %v9432_v0, %v4556_v2  ;;  %v4549_v9 = vsel %vm4459_vm1, %v6843_v24, -inf }
 0x2d9   :  { %v4589_v35 = vmax.f32 %v4575_v13, 0.0  ;;  %v4550_v14 = vmax.f32 %v9438_v44, %v4549_v9 }
 0x2da   :  { %4604 = vst.msk [vmem:[%s9546_s3 + $0x58] sm:$0xff] %vm4459_vm1, %v4590_v34  ;;  %v4578_v61 = vadd.f32 %v9444_v37, %v4557_v6 }
 0x2db   :  { %4603 = vst.msk [vmem:[%s9546_s3 + $0x50] sm:$0xff] %vm4459_vm1, %v4589_v35  ;;  %v4577_v10 = vadd.f32 %v9444_v37, %v4550_v14 }
 0x2dc   :  { %v4592_v0 = vmax.f32 %v4578_v61, 0.0 }
 0x2dd   :  { %v4591_v16 = vmax.f32 %v4577_v10, 0.0 }
 0x2de   :  { %4606 = vst.msk [vmem:[%s9546_s3 + $0x68] sm:$0xff] %vm4459_vm1, %v4592_v0 }
 0x2df   :  { %4605 = vst.msk [vmem:[%s9546_s3 + $0x60] sm:$0xff] %vm4459_vm1, %v4591_v16 }

</bundles_post_ra>
